<compile_context>
chip_gen: v6e
topology: v6e:2x2x1
jax: 0.10.0
libtpu: 0.0.40
codegen_flags: <defaults>
</compile_context>

<pallas_src>
import math
import functools

import jax
import jax.numpy as jnp
from jax.experimental import pallas as pl
from jax.experimental.pallas import tpu as pltpu

ALPHA = 0.01       # LeakyReLU negative slope
BN_EPS = 1e-5      # BatchNorm3d eps (PyTorch default)
LANE = 128


def _triple(v):
    return (v, v, v) if isinstance(v, int) else tuple(v)


def _round_up(x, m):
    return ((x + m - 1) // m) * m


# ----------------------------------------------------------------------------
# Kernel 1: conv matmul (bf16 x bf16 -> f32) fused with BatchNorm statistics.
# The (2, Np) output is an accumulator of (sum, sumsq) across the M grid axis
# and is finalized in-place into (scale, shift) on the last grid step.
# ----------------------------------------------------------------------------

def _conv_mm_bn_kernel(a_ref, w_ref, gb_ref, y_ref, ss_ref, *, inv_m, eps):
    # Full K and full padded Cout per M tile: one MXU matmul, no K pipeline.
    y = jnp.dot(a_ref[...], w_ref[...], preferred_element_type=jnp.float32)
    y_ref[...] = y.astype(y_ref.dtype)

    @pl.when(pl.program_id(0) == 0)
    def _():
        ss_ref[...] = jnp.zeros_like(ss_ref)

    # Per-channel partial sums while y is still in vregs (XLU, hidden under MXU).
    ss_ref[0:1, :] += jnp.sum(y, axis=0, keepdims=True)
    ss_ref[1:2, :] += jnp.sum(y * y, axis=0, keepdims=True)

    @pl.when(pl.program_id(0) == pl.num_programs(0) - 1)
    def _():
        mean = ss_ref[0:1, :] * inv_m
        var = jnp.maximum(ss_ref[1:2, :] * inv_m - mean * mean, 0.0)
        scale = gb_ref[0:1, :] * jax.lax.rsqrt(var + eps)
        shift = gb_ref[1:2, :] - mean * scale
        ss_ref[0:1, :] = scale
        ss_ref[1:2, :] = shift


def conv_mm_bn_pallas(a, w, gb, m_true, tm, y_dtype, eps=BN_EPS):
    """a: (Mp, Kp) bf16, w: (Kp, Np) bf16, gb: (2, Np) f32
       -> (y (Mp, Np) y_dtype, (scale, shift) (2, Np) f32)."""
    Mp, Kp = a.shape
    _, Np = w.shape
    return pl.pallas_call(
        functools.partial(_conv_mm_bn_kernel, inv_m=1.0 / float(m_true), eps=eps),
        out_shape=(jax.ShapeDtypeStruct((Mp, Np), y_dtype),
                   jax.ShapeDtypeStruct((2, Np), jnp.float32)),
        grid_spec=pltpu.PrefetchScalarGridSpec(
            num_scalar_prefetch=0,
            grid=(Mp // tm,),
            in_specs=[pl.BlockSpec((tm, Kp), lambda i: (i, 0)),
                      pl.BlockSpec((Kp, Np), lambda i: (0, 0)),
                      pl.BlockSpec((2, Np), lambda i: (0, 0))],
            out_specs=(pl.BlockSpec((tm, Np), lambda i: (i, 0)),
                       pl.BlockSpec((2, Np), lambda i: (0, 0)))),
        # (scale,shift) output is a resident accumulator across the M axis.
        compiler_params=pltpu.CompilerParams(
            dimension_semantics=("arbitrary",)),
    )(a, w, gb)


# ----------------------------------------------------------------------------
# Kernel 2: BN affine (precomputed scale/shift) + LeakyReLU epilogue
# ----------------------------------------------------------------------------

def _bn_leaky_kernel(y_ref, ss_ref, o_ref, *, alpha):
    z = y_ref[...].astype(jnp.float32) * ss_ref[0:1, :] + ss_ref[1:2, :]
    # LeakyReLU(z) == max(z, alpha*z) for alpha in (0, 1).
    o_ref[...] = jnp.maximum(z, alpha * z).astype(o_ref.dtype)


def bn_leaky_pallas(y, ss, tm, out_dtype, alpha=ALPHA):
    Mp, Np = y.shape
    return pl.pallas_call(
        functools.partial(_bn_leaky_kernel, alpha=alpha),
        out_shape=jax.ShapeDtypeStruct((Mp, Np), out_dtype),
        grid_spec=pltpu.PrefetchScalarGridSpec(
            num_scalar_prefetch=0,
            grid=(Mp // tm,),
            in_specs=[pl.BlockSpec((tm, Np), lambda i: (i, 0)),
                      pl.BlockSpec((2, Np), lambda i: (0, 0))],
            out_specs=pl.BlockSpec((tm, Np), lambda i: (i, 0))),
        compiler_params=pltpu.CompilerParams(
            dimension_semantics=("parallel",)),
    )(y, ss)


# ----------------------------------------------------------------------------
# im2col (plain-JAX glue) — built directly in bf16 to halve expanded HBM traffic
# ----------------------------------------------------------------------------
# TODO(synk): the spatial (1,kh,kw) / temporal (kt,1,1) patch extraction is
# still a plain-JAX im2col (taps-fold expansion in HBM); a halo-load fused
# Pallas conv kernel would remove that traffic.

def im2col_3d(x, ks, st, pad):
    """x: (B,T,H,W,C) -> bf16 (B*To*Ho*Wo, kt*kh*kw*C); column order (kt,kh,kw,C)."""
    kt, kh, kw = ks
    s0, s1, s2 = st
    p0, p1, p2 = pad
    B, T, H, W, C = x.shape
    x = x.astype(jnp.bfloat16)
    xp = jnp.pad(x, ((0, 0), (p0, p0), (p1, p1), (p2, p2), (0, 0)))
    To = (T + 2 * p0 - kt) // s0 + 1
    Ho = (H + 2 * p1 - kh) // s1 + 1
    Wo = (W + 2 * p2 - kw) // s2 + 1
    cols = []
    for a in range(kt):
        for b in range(kh):
            for c in range(kw):
                cols.append(xp[:, a:a + s0 * To:s0,
                               b:b + s1 * Ho:s1,
                               c:c + s2 * Wo:s2, :])
    if len(cols) == 1:
        patches = cols[0][..., None, :]
    else:
        patches = jnp.stack(cols, axis=-2)               # (B,To,Ho,Wo,taps,C)
    return patches.reshape(B * To * Ho * Wo, kt * kh * kw * C), (B, To, Ho, Wo)


def conv_block_fwd(x, p, cfg, out_dtype, alpha=ALPHA):
    """Conv3dBlock: conv(no bias) -> BatchNorm3d (batch stats) -> LeakyReLU."""
    cols, (B, To, Ho, Wo) = im2col_3d(x, cfg['ks'], cfg['st'], cfg['pad'])
    M, K = cols.shape
    Kp, Np = p['w'].shape                                  # padded at init
    if Kp != K:                                            # zero K-columns match zero W-rows
        cols = jnp.pad(cols, ((0, 0), (0, Kp - K)))
    tm = min(1024, _round_up(M, 8))
    Mp = _round_up(M, tm)
    if Mp != M:                                            # zero rows: no effect on BN stats
        cols = jnp.pad(cols, ((0, Mp - M), (0, 0)))
    # Pre-BN activation in bf16 when it only feeds the next bf16 matmul.
    y_dtype = jnp.bfloat16 if out_dtype == jnp.bfloat16 else jnp.float32
    y, ss = conv_mm_bn_pallas(cols, p['w'], p['gb'], m_true=M, tm=tm, y_dtype=y_dtype)
    out = bn_leaky_pallas(y, ss, tm=tm, out_dtype=out_dtype, alpha=alpha)
    if Mp != M:
        out = out[:M]
    return out.reshape(B, To, Ho, Wo, Np)


# ----------------------------------------------------------------------------
# SpatioTemporalConv configuration / parameter init (mirrors PyTorch __init__)
# ----------------------------------------------------------------------------

def st_conv_cfg(in_channels, out_channels, kernel_size=(3, 1, 1), stride=(1, 1, 1),
                padding=(1, 1, 1), is_first=False):
    ks, st, pd = _triple(kernel_size), _triple(stride), _triple(padding)
    if is_first:
        mid = 45
        spatio = dict(cin=in_channels, cin_pad=in_channels, cout=mid,
                      ks=ks, st=(1, st[1], st[2]), pad=pd)
        temporal = dict(cin=mid, cin_pad=_round_up(mid, LANE), cout=out_channels,
                        ks=(3, 1, 1), st=(st[0], 1, 1), pad=(1, 0, 0))
    else:
        mid = int(math.floor(ks[0] * ks[1] * ks[2] * in_channels * out_channels /
                             (ks[1] * ks[2] * in_channels + ks[0] * out_channels)))
        spatio = dict(cin=in_channels, cin_pad=in_channels, cout=mid,
                      ks=(1, ks[1], ks[2]), st=(1, st[1], st[2]),
                      pad=(0, pd[1], pd[2]))
        temporal = dict(cin=mid, cin_pad=_round_up(mid, LANE), cout=out_channels,
                        ks=(ks[0], 1, 1), st=(st[0], 1, 1), pad=(pd[0], 0, 0))
    return dict(spatio=spatio, temporal=temporal, out_channels=out_channels)


def init_conv_block(key, cfg):
    kt, kh, kw = cfg['ks']
    taps = kt * kh * kw
    cin, cin_p, cout = cfg['cin'], cfg['cin_pad'], cfg['cout']
    cout_p = _round_up(cout, LANE)
    fan_in = taps * cin
    bound = 1.0 / math.sqrt(fan_in)   # ~ PyTorch kaiming_uniform_(a=sqrt(5))
    w_real = jax.random.uniform(key, (taps, cin, cout), jnp.float32, -bound, bound)
    w = jnp.zeros((taps, cin_p, cout_p), jnp.float32)
    w = w.at[:, :cin, :cout].set(w_real)
    w = w.reshape(taps * cin_p, cout_p)
    Kp = _round_up(taps * cin_p, LANE)
    if Kp != taps * cin_p:
        w = jnp.pad(w, ((0, Kp - taps * cin_p), (0, 0)))
    # BatchNorm3d affine params (PyTorch init: gamma=1, beta=0); zero on padding
    # so padded output channels stay exactly zero through BN + LeakyReLU.
    gamma = jnp.zeros((cout_p,), jnp.float32).at[:cout].set(1.0)
    beta = jnp.zeros((cout_p,), jnp.float32)
    return dict(w=w.astype(jnp.bfloat16),           # bf16 MXU operand (cast once)
                gb=jnp.stack([gamma, beta], axis=0))


def init_st_conv(key, cfg):
    k1, k2 = jax.random.split(key)
    return dict(spatio=init_conv_block(k1, cfg['spatio']),
                temporal=init_conv_block(k2, cfg['temporal']))


# ----------------------------------------------------------------------------
# Forward pass (matches SpatioTemporalConv.forward)
# ----------------------------------------------------------------------------

def spatio_temporal_conv_forward(x_ncdhw, params, cfg, alpha=ALPHA):
    # PyTorch layout (B, C, T, H, W) -> channels-last (B, T, H, W, C)
    x = jnp.transpose(x_ncdhw, (0, 2, 3, 4, 1)).astype(jnp.float32)
    # Spatio block: intermediate activation kept in bf16 (next matmul operand).
    x = conv_block_fwd(x, params['spatio'], cfg['spatio'],
                       out_dtype=jnp.bfloat16, alpha=alpha)
    # Temporal block: final activation in f32.
    x = conv_block_fwd(x, params['temporal'], cfg['temporal'],
                       out_dtype=jnp.float32, alpha=alpha)
    x = x[..., :cfg['out_channels']]                 # crop channel padding once
    return jnp.transpose(x, (0, 4, 1, 2, 3))         # back to (B, C, T, H, W)


# ----------------------------------------------------------------------------
# Main
# ----------------------------------------------------------------------------

if __name__ == "__main__":
    key = jax.random.PRNGKey(0)
    k_p1, k_p2, k_x1, k_x2 = jax.random.split(key, 4)

    # Config 1: standard residual-block style SpatioTemporalConv.
    cfg1 = st_conv_cfg(4, 32, kernel_size=3, stride=1, padding=1, is_first=False)
    p1 = init_st_conv(k_p1, cfg1)
    x1 = jax.random.normal(k_x1, (2, 4, 8, 16, 16), jnp.float32)   # (B,C,T,H,W)
    fwd1 = jax.jit(functools.partial(spatio_temporal_conv_forward, cfg=cfg1))
    out1 = jax.block_until_ready(fwd1(x1, p1))
    assert out1.shape == (2, 32, 8, 16, 16), out1.shape
    assert bool(jnp.all(jnp.isfinite(out1)))

    # Config 2: "is_first" stem variant (1x7x7 spatial + 3x1x1 temporal).
    cfg2 = st_conv_cfg(3, 32, kernel_size=(1, 7, 7), stride=(1, 2, 2),
                       padding=(0, 3, 3), is_first=True)
    p2 = init_st_conv(k_p2, cfg2)
    x2 = jax.random.normal(k_x2, (2, 3, 8, 16, 16), jnp.float32)
    fwd2 = jax.jit(functools.partial(spatio_temporal_conv_forward, cfg=cfg2))
    out2 = jax.block_until_ready(fwd2(x2, p2))
    assert out2.shape == (2, 32, 8, 8, 8), out2.shape
    assert bool(jnp.all(jnp.isfinite(out2)))

    print("KERNEL_OK")
</pallas_src>

<mosaic_0001>
module attributes {stable_mosaic.version = 11 : i64} {
  func.func @_conv_mm_bn_kernel(%arg0: i32, %arg1: memref<1024x128xbf16, #tpu.memory_space<vmem>>, %arg2: memref<128x128xbf16, #tpu.memory_space<vmem>>, %arg3: memref<2x128xf32, #tpu.memory_space<vmem>>, %arg4: memref<1024x128xbf16, #tpu.memory_space<vmem>>, %arg5: memref<2x128xf32, #tpu.memory_space<vmem>>) attributes {dimension_semantics = [#tpu.dimension_semantics<arbitrary>], iteration_bounds = array<i64: 4>, scalar_prefetch = 0 : i64, scratch_operands = 0 : i64, tpu.core_type = #tpu.core_type<tc>, window_params = [{transform_indices = @transform_0, window_bounds = array<i64: 1024, 128>}, {pipeline_mode = #tpu.pipeline_mode<synchronous>, transform_indices = @transform_1, window_bounds = array<i64: 128, 128>}, {pipeline_mode = #tpu.pipeline_mode<synchronous>, transform_indices = @transform_2, window_bounds = array<i64: 2, 128>}, {transform_indices = @transform_3, window_bounds = array<i64: 1024, 128>}, {pipeline_mode = #tpu.pipeline_mode<synchronous>, transform_indices = @transform_4, window_bounds = array<i64: 2, 128>}]} {
    %c0 = arith.constant 0 : index
    %c0_0 = arith.constant 0 : index
    %0 = vector.load %arg1[%c0, %c0_0] : memref<1024x128xbf16, #tpu.memory_space<vmem>>, vector<1024x128xbf16>
    %c0_1 = arith.constant 0 : index
    %c0_2 = arith.constant 0 : index
    %1 = vector.load %arg2[%c0_1, %c0_2] : memref<128x128xbf16, #tpu.memory_space<vmem>>, vector<128x128xbf16>
    %cst = arith.constant dense<0.000000e+00> : vector<1024x128xf32>
    %2 = tpu.matmul %0, %1, %cst {dimension_numbers = #tpu.dot_dimension_numbers<[1], [0], [0], [1], [0, 0, 1, 1], [], []>} : vector<1024x128xbf16>, vector<128x128xbf16>, vector<1024x128xf32> -> vector<1024x128xf32>
    %3 = arith.truncf %2 : vector<1024x128xf32> to vector<1024x128xbf16>
    %c0_3 = arith.constant 0 : index
    %c0_4 = arith.constant 0 : index
    %4 = vector.load %arg4[%c0_3, %c0_4] : memref<1024x128xbf16, #tpu.memory_space<vmem>>, vector<1024x128xbf16>
    tpu.vector_store %arg4[%c0_3, %c0_4], %3 {strides = array<i32>} : memref<1024x128xbf16, #tpu.memory_space<vmem>>, vector<1024x128xbf16>,
    %c0_i32 = arith.constant 0 : i32
    %5 = arith.cmpi eq, %arg0, %c0_i32 : i32
    %6 = arith.extui %5 : i1 to i32
    %c0_i32_5 = arith.constant 0 : i32
    %7 = arith.cmpi ne, %6, %c0_i32_5 : i32
    scf.if %7 {
      %cst_16 = arith.constant 0.000000e+00 : f32
      %22 = vector.broadcast %cst_16 : f32 to vector<2x128xf32>
      %c0_17 = arith.constant 0 : index
      %c0_18 = arith.constant 0 : index
      %23 = vector.load %arg5[%c0_17, %c0_18] : memref<2x128xf32, #tpu.memory_space<vmem>>, vector<2x128xf32>
      tpu.vector_store %arg5[%c0_17, %c0_18], %22 {strides = array<i32>} : memref<2x128xf32, #tpu.memory_space<vmem>>, vector<2x128xf32>,
    } else {
    }
    %c0_6 = arith.constant 0 : index
    %c0_7 = arith.constant 0 : index
    %8 = vector.load %arg5[%c0_6, %c0_7] : memref<2x128xf32, #tpu.memory_space<vmem>>, vector<1x128xf32>
    %cst_8 = arith.constant dense<0.000000e+00> : vector<128xf32>
    %9 = vector.multi_reduction <add>, %2, %cst_8 [0] : vector<1024x128xf32> to vector<128xf32>
    %10 = vector.shape_cast %9 : vector<128xf32> to vector<1x128xf32>
    %11 = arith.addf %8, %10 : vector<1x128xf32>
    %c0_9 = arith.constant 0 : index
    %c0_10 = arith.constant 0 : index
    %12 = vector.load %arg5[%c0_9, %c0_10] : memref<2x128xf32, #tpu.memory_space<vmem>>, vector<1x128xf32>
    tpu.vector_store %arg5[%c0_9, %c0_10], %11 {strides = array<i32>} : memref<2x128xf32, #tpu.memory_space<vmem>>, vector<1x128xf32>,
    %c1 = arith.constant 1 : index
    %c0_11 = arith.constant 0 : index
    %13 = vector.load %arg5[%c1, %c0_11] : memref<2x128xf32, #tpu.memory_space<vmem>>, vector<1x128xf32>
    %14 = arith.mulf %2, %2 : vector<1024x128xf32>
    %cst_12 = arith.constant dense<0.000000e+00> : vector<128xf32>
    %15 = vector.multi_reduction <add>, %14, %cst_12 [0] : vector<1024x128xf32> to vector<128xf32>
    %16 = vector.shape_cast %15 : vector<128xf32> to vector<1x128xf32>
    %17 = arith.addf %13, %16 : vector<1x128xf32>
    %c1_13 = arith.constant 1 : index
    %c0_14 = arith.constant 0 : index
    %18 = vector.load %arg5[%c1_13, %c0_14] : memref<2x128xf32, #tpu.memory_space<vmem>>, vector<1x128xf32>
    tpu.vector_store %arg5[%c1_13, %c0_14], %17 {strides = array<i32>} : memref<2x128xf32, #tpu.memory_space<vmem>>, vector<1x128xf32>,
    %c3_i32 = arith.constant 3 : i32
    %19 = arith.cmpi eq, %arg0, %c3_i32 : i32
    %20 = arith.extui %19 : i1 to i32
    %c0_i32_15 = arith.constant 0 : i32
    %21 = arith.cmpi ne, %20, %c0_i32_15 : i32
    scf.if %21 {
      %c0_16 = arith.constant 0 : index
      %c0_17 = arith.constant 0 : index
      %22 = vector.load %arg5[%c0_16, %c0_17] : memref<2x128xf32, #tpu.memory_space<vmem>>, vector<1x128xf32>
      %cst_18 = arith.constant 2.44140625E-4 : f32
      %23 = vector.broadcast %cst_18 : f32 to vector<1x128xf32>
      %24 = arith.mulf %22, %23 : vector<1x128xf32>
      %c1_19 = arith.constant 1 : index
      %c0_20 = arith.constant 0 : index
      %25 = vector.load %arg5[%c1_19, %c0_20] : memref<2x128xf32, #tpu.memory_space<vmem>>, vector<1x128xf32>
      %cst_21 = arith.constant 2.44140625E-4 : f32
      %26 = vector.broadcast %cst_21 : f32 to vector<1x128xf32>
      %27 = arith.mulf %25, %26 : vector<1x128xf32>
      %28 = arith.mulf %24, %24 : vector<1x128xf32>
      %29 = arith.subf %27, %28 : vector<1x128xf32>
      %cst_22 = arith.constant 0.000000e+00 : f32
      %30 = vector.broadcast %cst_22 : f32 to vector<1x128xf32>
      %31 = arith.maximumf %29, %30 : vector<1x128xf32>
      %c0_23 = arith.constant 0 : index
      %c0_24 = arith.constant 0 : index
      %32 = vector.load %arg3[%c0_23, %c0_24] : memref<2x128xf32, #tpu.memory_space<vmem>>, vector<1x128xf32>
      %cst_25 = arith.constant 9.99999974E-6 : f32
      %33 = vector.broadcast %cst_25 : f32 to vector<1x128xf32>
      %34 = arith.addf %31, %33 : vector<1x128xf32>
      %35 = math.rsqrt %34 : vector<1x128xf32>
      %36 = arith.mulf %32, %35 : vector<1x128xf32>
      %c1_26 = arith.constant 1 : index
      %c0_27 = arith.constant 0 : index
      %37 = vector.load %arg3[%c1_26, %c0_27] : memref<2x128xf32, #tpu.memory_space<vmem>>, vector<1x128xf32>
      %38 = arith.mulf %24, %36 : vector<1x128xf32>
      %39 = arith.subf %37, %38 : vector<1x128xf32>
      %c0_28 = arith.constant 0 : index
      %c0_29 = arith.constant 0 : index
      %40 = vector.load %arg5[%c0_28, %c0_29] : memref<2x128xf32, #tpu.memory_space<vmem>>, vector<1x128xf32>
      tpu.vector_store %arg5[%c0_28, %c0_29], %36 {strides = array<i32>} : memref<2x128xf32, #tpu.memory_space<vmem>>, vector<1x128xf32>,
      %c1_30 = arith.constant 1 : index
      %c0_31 = arith.constant 0 : index
      %41 = vector.load %arg5[%c1_30, %c0_31] : memref<2x128xf32, #tpu.memory_space<vmem>>, vector<1x128xf32>
      tpu.vector_store %arg5[%c1_30, %c0_31], %39 {strides = array<i32>} : memref<2x128xf32, #tpu.memory_space<vmem>>, vector<1x128xf32>,
    } else {
    }
    return
  }
  func.func @transform_0(%arg0: i32) -> (i32, i32) {
    %c0_i32 = arith.constant 0 : i32
    %c0_i32_0 = arith.constant 0 : i32
    return %arg0, %c0_i32 : i32, i32
  }
  func.func @transform_1(%arg0: i32) -> (i32, i32) {
    %c0_i32 = arith.constant 0 : i32
    %c0_i32_0 = arith.constant 0 : i32
    %c0_i32_1 = arith.constant 0 : i32
    return %c0_i32, %c0_i32_0 : i32, i32
  }
  func.func @transform_2(%arg0: i32) -> (i32, i32) {
    %c0_i32 = arith.constant 0 : i32
    %c0_i32_0 = arith.constant 0 : i32
    %c0_i32_1 = arith.constant 0 : i32
    return %c0_i32, %c0_i32_0 : i32, i32
  }
  func.func @transform_3(%arg0: i32) -> (i32, i32) {
    %c0_i32 = arith.constant 0 : i32
    %c0_i32_0 = arith.constant 0 : i32
    return %arg0, %c0_i32 : i32, i32
  }
  func.func @transform_4(%arg0: i32) -> (i32, i32) {
    %c0_i32 = arith.constant 0 : i32
    %c0_i32_0 = arith.constant 0 : i32
    %c0_i32_1 = arith.constant 0 : i32
    return %c0_i32, %c0_i32_0 : i32, i32
  }
}

module attributes {stable_mosaic.version = 11 : i64} {
  func.func @_bn_leaky_kernel(%arg0: i32, %arg1: memref<1024x128xbf16, #tpu.memory_space<vmem>>, %arg2: memref<2x128xf32, #tpu.memory_space<vmem>>, %arg3: memref<1024x128xbf16, #tpu.memory_space<vmem>>) attributes {dimension_semantics = [#tpu.dimension_semantics<parallel>], iteration_bounds = array<i64: 4>, scalar_prefetch = 0 : i64, scratch_operands = 0 : i64, tpu.core_type = #tpu.core_type<tc>, window_params = [{transform_indices = @transform_0, window_bounds = array<i64: 1024, 128>}, {pipeline_mode = #tpu.pipeline_mode<synchronous>, transform_indices = @transform_1, window_bounds = array<i64: 2, 128>}, {transform_indices = @transform_2, window_bounds = array<i64: 1024, 128>}]} {
    %c0 = arith.constant 0 : index
    %c0_0 = arith.constant 0 : index
    %0 = vector.load %arg1[%c0, %c0_0] : memref<1024x128xbf16, #tpu.memory_space<vmem>>, vector<1024x128xbf16>
    %1 = arith.extf %0 : vector<1024x128xbf16> to vector<1024x128xf32>
    %c0_1 = arith.constant 0 : index
    %c0_2 = arith.constant 0 : index
    %2 = vector.load %arg2[%c0_1, %c0_2] : memref<2x128xf32, #tpu.memory_space<vmem>>, vector<1x128xf32>
    %3 = vector.broadcast %2 : vector<1x128xf32> to vector<1024x128xf32>
    %4 = arith.mulf %1, %3 : vector<1024x128xf32>
    %c1 = arith.constant 1 : index
    %c0_3 = arith.constant 0 : index
    %5 = vector.load %arg2[%c1, %c0_3] : memref<2x128xf32, #tpu.memory_space<vmem>>, vector<1x128xf32>
    %6 = vector.broadcast %5 : vector<1x128xf32> to vector<1024x128xf32>
    %7 = arith.addf %4, %6 : vector<1024x128xf32>
    %cst = arith.constant 0.00999999977 : f32
    %8 = vector.broadcast %cst : f32 to vector<1024x128xf32>
    %9 = arith.mulf %8, %7 : vector<1024x128xf32>
    %10 = arith.maximumf %7, %9 : vector<1024x128xf32>
    %11 = arith.truncf %10 : vector<1024x128xf32> to vector<1024x128xbf16>
    %c0_4 = arith.constant 0 : index
    %c0_5 = arith.constant 0 : index
    %12 = vector.load %arg3[%c0_4, %c0_5] : memref<1024x128xbf16, #tpu.memory_space<vmem>>, vector<1024x128xbf16>
    tpu.vector_store %arg3[%c0_4, %c0_5], %11 {strides = array<i32>} : memref<1024x128xbf16, #tpu.memory_space<vmem>>, vector<1024x128xbf16>,
    return
  }
  func.func @transform_0(%arg0: i32) -> (i32, i32) {
    %c0_i32 = arith.constant 0 : i32
    %c0_i32_0 = arith.constant 0 : i32
    return %arg0, %c0_i32 : i32, i32
  }
  func.func @transform_1(%arg0: i32) -> (i32, i32) {
    %c0_i32 = arith.constant 0 : i32
    %c0_i32_0 = arith.constant 0 : i32
    %c0_i32_1 = arith.constant 0 : i32
    return %c0_i32, %c0_i32_0 : i32, i32
  }
  func.func @transform_2(%arg0: i32) -> (i32, i32) {
    %c0_i32 = arith.constant 0 : i32
    %c0_i32_0 = arith.constant 0 : i32
    return %arg0, %c0_i32 : i32, i32
  }
}

module attributes {stable_mosaic.version = 11 : i64} {
  func.func @_conv_mm_bn_kernel(%arg0: i32, %arg1: memref<1024x384xbf16, #tpu.memory_space<vmem>>, %arg2: memref<384x128xbf16, #tpu.memory_space<vmem>>, %arg3: memref<2x128xf32, #tpu.memory_space<vmem>>, %arg4: memref<1024x128xf32, #tpu.memory_space<vmem>>, %arg5: memref<2x128xf32, #tpu.memory_space<vmem>>) attributes {dimension_semantics = [#tpu.dimension_semantics<arbitrary>], iteration_bounds = array<i64: 4>, scalar_prefetch = 0 : i64, scratch_operands = 0 : i64, tpu.core_type = #tpu.core_type<tc>, window_params = [{transform_indices = @transform_0, window_bounds = array<i64: 1024, 384>}, {pipeline_mode = #tpu.pipeline_mode<synchronous>, transform_indices = @transform_1, window_bounds = array<i64: 384, 128>}, {pipeline_mode = #tpu.pipeline_mode<synchronous>, transform_indices = @transform_2, window_bounds = array<i64: 2, 128>}, {transform_indices = @transform_3, window_bounds = array<i64: 1024, 128>}, {pipeline_mode = #tpu.pipeline_mode<synchronous>, transform_indices = @transform_4, window_bounds = array<i64: 2, 128>}]} {
    %c0 = arith.constant 0 : index
    %c0_0 = arith.constant 0 : index
    %0 = vector.load %arg1[%c0, %c0_0] : memref<1024x384xbf16, #tpu.memory_space<vmem>>, vector<1024x384xbf16>
    %c0_1 = arith.constant 0 : index
    %c0_2 = arith.constant 0 : index
    %1 = vector.load %arg2[%c0_1, %c0_2] : memref<384x128xbf16, #tpu.memory_space<vmem>>, vector<384x128xbf16>
    %cst = arith.constant dense<0.000000e+00> : vector<1024x128xf32>
    %2 = tpu.matmul %0, %1, %cst {dimension_numbers = #tpu.dot_dimension_numbers<[1], [0], [0], [1], [0, 0, 1, 1], [], []>} : vector<1024x384xbf16>, vector<384x128xbf16>, vector<1024x128xf32> -> vector<1024x128xf32>
    %c0_3 = arith.constant 0 : index
    %c0_4 = arith.constant 0 : index
    %3 = vector.load %arg4[%c0_3, %c0_4] : memref<1024x128xf32, #tpu.memory_space<vmem>>, vector<1024x128xf32>
    tpu.vector_store %arg4[%c0_3, %c0_4], %2 {strides = array<i32>} : memref<1024x128xf32, #tpu.memory_space<vmem>>, vector<1024x128xf32>,
    %c0_i32 = arith.constant 0 : i32
    %4 = arith.cmpi eq, %arg0, %c0_i32 : i32
    %5 = arith.extui %4 : i1 to i32
    %c0_i32_5 = arith.constant 0 : i32
    %6 = arith.cmpi ne, %5, %c0_i32_5 : i32
    scf.if %6 {
      %cst_16 = arith.constant 0.000000e+00 : f32
      %21 = vector.broadcast %cst_16 : f32 to vector<2x128xf32>
      %c0_17 = arith.constant 0 : index
      %c0_18 = arith.constant 0 : index
      %22 = vector.load %arg5[%c0_17, %c0_18] : memref<2x128xf32, #tpu.memory_space<vmem>>, vector<2x128xf32>
      tpu.vector_store %arg5[%c0_17, %c0_18], %21 {strides = array<i32>} : memref<2x128xf32, #tpu.memory_space<vmem>>, vector<2x128xf32>,
    } else {
    }
    %c0_6 = arith.constant 0 : index
    %c0_7 = arith.constant 0 : index
    %7 = vector.load %arg5[%c0_6, %c0_7] : memref<2x128xf32, #tpu.memory_space<vmem>>, vector<1x128xf32>
    %cst_8 = arith.constant dense<0.000000e+00> : vector<128xf32>
    %8 = vector.multi_reduction <add>, %2, %cst_8 [0] : vector<1024x128xf32> to vector<128xf32>
    %9 = vector.shape_cast %8 : vector<128xf32> to vector<1x128xf32>
    %10 = arith.addf %7, %9 : vector<1x128xf32>
    %c0_9 = arith.constant 0 : index
    %c0_10 = arith.constant 0 : index
    %11 = vector.load %arg5[%c0_9, %c0_10] : memref<2x128xf32, #tpu.memory_space<vmem>>, vector<1x128xf32>
    tpu.vector_store %arg5[%c0_9, %c0_10], %10 {strides = array<i32>} : memref<2x128xf32, #tpu.memory_space<vmem>>, vector<1x128xf32>,
    %c1 = arith.constant 1 : index
    %c0_11 = arith.constant 0 : index
    %12 = vector.load %arg5[%c1, %c0_11] : memref<2x128xf32, #tpu.memory_space<vmem>>, vector<1x128xf32>
    %13 = arith.mulf %2, %2 : vector<1024x128xf32>
    %cst_12 = arith.constant dense<0.000000e+00> : vector<128xf32>
    %14 = vector.multi_reduction <add>, %13, %cst_12 [0] : vector<1024x128xf32> to vector<128xf32>
    %15 = vector.shape_cast %14 : vector<128xf32> to vector<1x128xf32>
    %16 = arith.addf %12, %15 : vector<1x128xf32>
    %c1_13 = arith.constant 1 : index
    %c0_14 = arith.constant 0 : index
    %17 = vector.load %arg5[%c1_13, %c0_14] : memref<2x128xf32, #tpu.memory_space<vmem>>, vector<1x128xf32>
    tpu.vector_store %arg5[%c1_13, %c0_14], %16 {strides = array<i32>} : memref<2x128xf32, #tpu.memory_space<vmem>>, vector<1x128xf32>,
    %c3_i32 = arith.constant 3 : i32
    %18 = arith.cmpi eq, %arg0, %c3_i32 : i32
    %19 = arith.extui %18 : i1 to i32
    %c0_i32_15 = arith.constant 0 : i32
    %20 = arith.cmpi ne, %19, %c0_i32_15 : i32
    scf.if %20 {
      %c0_16 = arith.constant 0 : index
      %c0_17 = arith.constant 0 : index
      %21 = vector.load %arg5[%c0_16, %c0_17] : memref<2x128xf32, #tpu.memory_space<vmem>>, vector<1x128xf32>
      %cst_18 = arith.constant 2.44140625E-4 : f32
      %22 = vector.broadcast %cst_18 : f32 to vector<1x128xf32>
      %23 = arith.mulf %21, %22 : vector<1x128xf32>
      %c1_19 = arith.constant 1 : index
      %c0_20 = arith.constant 0 : index
      %24 = vector.load %arg5[%c1_19, %c0_20] : memref<2x128xf32, #tpu.memory_space<vmem>>, vector<1x128xf32>
      %cst_21 = arith.constant 2.44140625E-4 : f32
      %25 = vector.broadcast %cst_21 : f32 to vector<1x128xf32>
      %26 = arith.mulf %24, %25 : vector<1x128xf32>
      %27 = arith.mulf %23, %23 : vector<1x128xf32>
      %28 = arith.subf %26, %27 : vector<1x128xf32>
      %cst_22 = arith.constant 0.000000e+00 : f32
      %29 = vector.broadcast %cst_22 : f32 to vector<1x128xf32>
      %30 = arith.maximumf %28, %29 : vector<1x128xf32>
      %c0_23 = arith.constant 0 : index
      %c0_24 = arith.constant 0 : index
      %31 = vector.load %arg3[%c0_23, %c0_24] : memref<2x128xf32, #tpu.memory_space<vmem>>, vector<1x128xf32>
      %cst_25 = arith.constant 9.99999974E-6 : f32
      %32 = vector.broadcast %cst_25 : f32 to vector<1x128xf32>
      %33 = arith.addf %30, %32 : vector<1x128xf32>
      %34 = math.rsqrt %33 : vector<1x128xf32>
      %35 = arith.mulf %31, %34 : vector<1x128xf32>
      %c1_26 = arith.constant 1 : index
      %c0_27 = arith.constant 0 : index
      %36 = vector.load %arg3[%c1_26, %c0_27] : memref<2x128xf32, #tpu.memory_space<vmem>>, vector<1x128xf32>
      %37 = arith.mulf %23, %35 : vector<1x128xf32>
      %38 = arith.subf %36, %37 : vector<1x128xf32>
      %c0_28 = arith.constant 0 : index
      %c0_29 = arith.constant 0 : index
      %39 = vector.load %arg5[%c0_28, %c0_29] : memref<2x128xf32, #tpu.memory_space<vmem>>, vector<1x128xf32>
      tpu.vector_store %arg5[%c0_28, %c0_29], %35 {strides = array<i32>} : memref<2x128xf32, #tpu.memory_space<vmem>>, vector<1x128xf32>,
      %c1_30 = arith.constant 1 : index
      %c0_31 = arith.constant 0 : index
      %40 = vector.load %arg5[%c1_30, %c0_31] : memref<2x128xf32, #tpu.memory_space<vmem>>, vector<1x128xf32>
      tpu.vector_store %arg5[%c1_30, %c0_31], %38 {strides = array<i32>} : memref<2x128xf32, #tpu.memory_space<vmem>>, vector<1x128xf32>,
    } else {
    }
    return
  }
  func.func @transform_0(%arg0: i32) -> (i32, i32) {
    %c0_i32 = arith.constant 0 : i32
    %c0_i32_0 = arith.constant 0 : i32
    return %arg0, %c0_i32 : i32, i32
  }
  func.func @transform_1(%arg0: i32) -> (i32, i32) {
    %c0_i32 = arith.constant 0 : i32
    %c0_i32_0 = arith.constant 0 : i32
    %c0_i32_1 = arith.constant 0 : i32
    return %c0_i32, %c0_i32_0 : i32, i32
  }
  func.func @transform_2(%arg0: i32) -> (i32, i32) {
    %c0_i32 = arith.constant 0 : i32
    %c0_i32_0 = arith.constant 0 : i32
    %c0_i32_1 = arith.constant 0 : i32
    return %c0_i32, %c0_i32_0 : i32, i32
  }
  func.func @transform_3(%arg0: i32) -> (i32, i32) {
    %c0_i32 = arith.constant 0 : i32
    %c0_i32_0 = arith.constant 0 : i32
    return %arg0, %c0_i32 : i32, i32
  }
  func.func @transform_4(%arg0: i32) -> (i32, i32) {
    %c0_i32 = arith.constant 0 : i32
    %c0_i32_0 = arith.constant 0 : i32
    %c0_i32_1 = arith.constant 0 : i32
    return %c0_i32, %c0_i32_0 : i32, i32
  }
}

module attributes {stable_mosaic.version = 11 : i64} {
  func.func @_bn_leaky_kernel(%arg0: i32, %arg1: memref<1024x128xf32, #tpu.memory_space<vmem>>, %arg2: memref<2x128xf32, #tpu.memory_space<vmem>>, %arg3: memref<1024x128xf32, #tpu.memory_space<vmem>>) attributes {dimension_semantics = [#tpu.dimension_semantics<parallel>], iteration_bounds = array<i64: 4>, scalar_prefetch = 0 : i64, scratch_operands = 0 : i64, tpu.core_type = #tpu.core_type<tc>, window_params = [{transform_indices = @transform_0, window_bounds = array<i64: 1024, 128>}, {pipeline_mode = #tpu.pipeline_mode<synchronous>, transform_indices = @transform_1, window_bounds = array<i64: 2, 128>}, {transform_indices = @transform_2, window_bounds = array<i64: 1024, 128>}]} {
    %c0 = arith.constant 0 : index
    %c0_0 = arith.constant 0 : index
    %0 = vector.load %arg1[%c0, %c0_0] : memref<1024x128xf32, #tpu.memory_space<vmem>>, vector<1024x128xf32>
    %c0_1 = arith.constant 0 : index
    %c0_2 = arith.constant 0 : index
    %1 = vector.load %arg2[%c0_1, %c0_2] : memref<2x128xf32, #tpu.memory_space<vmem>>, vector<1x128xf32>
    %2 = vector.broadcast %1 : vector<1x128xf32> to vector<1024x128xf32>
    %3 = arith.mulf %0, %2 : vector<1024x128xf32>
    %c1 = arith.constant 1 : index
    %c0_3 = arith.constant 0 : index
    %4 = vector.load %arg2[%c1, %c0_3] : memref<2x128xf32, #tpu.memory_space<vmem>>, vector<1x128xf32>
    %5 = vector.broadcast %4 : vector<1x128xf32> to vector<1024x128xf32>
    %6 = arith.addf %3, %5 : vector<1024x128xf32>
    %cst = arith.constant 0.00999999977 : f32
    %7 = vector.broadcast %cst : f32 to vector<1024x128xf32>
    %8 = arith.mulf %7, %6 : vector<1024x128xf32>
    %9 = arith.maximumf %6, %8 : vector<1024x128xf32>
    %c0_4 = arith.constant 0 : index
    %c0_5 = arith.constant 0 : index
    %10 = vector.load %arg3[%c0_4, %c0_5] : memref<1024x128xf32, #tpu.memory_space<vmem>>, vector<1024x128xf32>
    tpu.vector_store %arg3[%c0_4, %c0_5], %9 {strides = array<i32>} : memref<1024x128xf32, #tpu.memory_space<vmem>>, vector<1024x128xf32>,
    return
  }
  func.func @transform_0(%arg0: i32) -> (i32, i32) {
    %c0_i32 = arith.constant 0 : i32
    %c0_i32_0 = arith.constant 0 : i32
    return %arg0, %c0_i32 : i32, i32
  }
  func.func @transform_1(%arg0: i32) -> (i32, i32) {
    %c0_i32 = arith.constant 0 : i32
    %c0_i32_0 = arith.constant 0 : i32
    %c0_i32_1 = arith.constant 0 : i32
    return %c0_i32, %c0_i32_0 : i32, i32
  }
  func.func @transform_2(%arg0: i32) -> (i32, i32) {
    %c0_i32 = arith.constant 0 : i32
    %c0_i32_0 = arith.constant 0 : i32
    return %arg0, %c0_i32 : i32, i32
  }
}

</mosaic_0001>

<bundles_post_ra>
// kernel: spatio_temporal_conv_forward.5
= control target key start
LH: loop header
LB: loop body
LE: loop exit
PB: predicated region body
PF: predicated region fallthrough
CT: control target
= control target key end

     0   :  { %s2625_s9 = smov 0   ;;  %s3057_s0 = inlined_call_operand.vmem [shape: bf16[4096,128], index: 0, kind: input, shape index: {}]   ;;  %s3058_s1 = inlined_call_operand.vmem [shape: f32[2,128], index: 1, kind: input, shape index: {}]   ;;  %s3059_s2 = inlined_call_operand.vmem [shape: bf16[4096,128], index: 2, kind: output, shape index: {}]  }
   0x1 LB: > { %s1621_s10 = sadd.s32 4294967295, %s2608_s9   ;;  %p1625_p0 = scmp.ge.s32.totalorder %s2608_s9, 1  ;;  %s2608_s9 = sphi %s2625_s9, %s12_s9  }
   0x2   : > { %p113_p1 = scmp.lt.s32.totalorder %s2608_s9, 5 }
   0x4   : > { %p114_p2 = pnand %p1625_p0, %p113_p1 }
   0x5   : > { %s1626_s11 = sshll.u32 (!%p114_p2), %s1621_s10, 7 }
   0x6   : > { %117 = sbr.rel (%p114_p2) target bundleno = 198 (0xc6), region = 28  ;;  %p136_p3 = scmp.lt.s32.totalorder (!%p114_p2), %s1626_s11, 511 }
   0xb   : > { %s3061_s11 = smov (!%p136_p3, %s1626_s11), 511  ;;  %v2646_v0 = vld [vmem:[%s3058_s1] ss:$0 sm:$0xff]  ;;  %v2655_v9 = vld [vmem:[%s3058_s1 + $0x1] ss:$0 sm:$0xff] }
   0xc   : > { %s1627_s12 = sshll.u32 %s3061_s11, 2 }
   0xd   : > { %s2641_s15 = scalar_lea.vmem %s3057_s0, %s1627_s12  ;;  %s2680_s22 = scalar_lea.vmem %s3059_s2, %s1627_s12 }
   0xe   : > { %v1891_v1 = vld [vmem:[%s2641_s15] sm:$0xff]   ;;  %v2466_v2 = vld [vmem:[%s2641_s15 + $0x8] sm:$0xff]   ;;  %v2467_v3 = vld [vmem:[%s2641_s15 + $0x10] sm:$0xff]  }
   0xf   : > { %v1892_v4 = vunpack.c.l.bf16 %v1891_v1  ;;  %v1893_v5 = vunpack.c.h.bf16 %v1891_v1  ;;  %v1896_v6 = vunpack.c.l.bf16 %v2466_v2  ;;  %v1897_v7 = vunpack.c.h.bf16 %v2466_v2  ;;  %v2468_v8 = vld [vmem:[%s2641_s15 + $0x18] sm:$0xff]   ;;  %v2469_v22 = vld [vmem:[%s2641_s15 + $0x20] sm:$0xff]   ;;  %v2470_v43 = vld [vmem:[%s2641_s15 + $0x28] sm:$0xff]  }
  0x10   : > { %v1900_v10 = vunpack.c.l.bf16 %v2467_v3  ;;  %v1901_v11 = vunpack.c.h.bf16 %v2467_v3  ;;  %v1904_v12 = vunpack.c.l.bf16 %v2468_v8  ;;  %v1905_v13 = vunpack.c.h.bf16 %v2468_v8  ;;  %v2471_v48 = vld [vmem:[%s2641_s15 + $0x30] sm:$0xff]   ;;  %v2472_v53 = vld [vmem:[%s2641_s15 + $0x38] sm:$0xff]  }
  0x11   : > { %v408_v14 = vmul.f32 %v1892_v4, %v2646_v0  ;;  %v409_v15 = vmul.f32 %v1893_v5, %v2646_v0  ;;  %v410_v16 = vmul.f32 %v1896_v6, %v2646_v0  ;;  %v411_v17 = vmul.f32 %v1897_v7, %v2646_v0 }
  0x12   : > { %v412_v18 = vmul.f32 %v1900_v10, %v2646_v0  ;;  %v413_v19 = vmul.f32 %v1901_v11, %v2646_v0  ;;  %v414_v20 = vmul.f32 %v1904_v12, %v2646_v0  ;;  %v415_v21 = vmul.f32 %v1905_v13, %v2646_v0  ;;  %v2473_v12 = vld [vmem:[%s2641_s15 + $0x40] sm:$0xff]  }
  0x13   : > { %v541_v23 = vadd.f32 %v2655_v9, %v408_v14  ;;  %v542_v24 = vadd.f32 %v2655_v9, %v409_v15  ;;  %v543_v25 = vadd.f32 %v2655_v9, %v410_v16  ;;  %v544_v26 = vadd.f32 %v2655_v9, %v411_v17 }
  0x14   : > { %v545_v27 = vadd.f32 %v2655_v9, %v412_v18  ;;  %v546_v28 = vadd.f32 %v2655_v9, %v413_v19  ;;  %v547_v29 = vadd.f32 %v2655_v9, %v414_v20  ;;  %v548_v30 = vadd.f32 %v2655_v9, %v415_v21 }
  0x15   : > { %v669_v31 = vmul.f32 0.01, %v541_v23  ;;  %v670_v32 = vmul.f32 0.01, %v542_v24  ;;  %v671_v33 = vmul.f32 0.01, %v543_v25  ;;  %v1908_v34 = vunpack.c.l.bf16 %v2469_v22 }
  0x16   : > { %v672_v35 = vmul.f32 0.01, %v544_v26  ;;  %v673_v36 = vmul.f32 0.01, %v545_v27  ;;  %v674_v37 = vmul.f32 0.01, %v546_v28  ;;  %v1909_v38 = vunpack.c.h.bf16 %v2469_v22 }
  0x17   : > { %v797_v39 = vmax.f32 %v541_v23, %v669_v31  ;;  %v798_v40 = vmax.f32 %v542_v24, %v670_v32  ;;  %v799_v41 = vmax.f32 %v543_v25, %v671_v33  ;;  %v675_v42 = vmul.f32 0.01, %v547_v29  ;;  %v2474_v25 = vld [vmem:[%s2641_s15 + $0x48] sm:$0xff]  }
  0x18   : > { %v800_v44 = vmax.f32 %v544_v26, %v672_v35  ;;  %v801_v45 = vmax.f32 %v545_v27, %v673_v36  ;;  %v802_v46 = vmax.f32 %v546_v28, %v674_v37  ;;  %v676_v47 = vmul.f32 0.01, %v548_v30 }
  0x19   : > { %v2149_v49 = vpack.c.bf16 %v798_v40, %v797_v39  ;;  %v803_v50 = vmax.f32 %v547_v29, %v675_v42  ;;  %v416_v51 = vmul.f32 %v1908_v34, %v2646_v0  ;;  %v417_v52 = vmul.f32 %v1909_v38, %v2646_v0  ;;  %v2475_v34 = vld [vmem:[%s2641_s15 + $0x50] sm:$0xff]  }
  0x1a   : > { %v2154_v54 = vpack.c.bf16 %v800_v44, %v799_v41  ;;  %v2159_v55 = vpack.c.bf16 %v802_v46, %v801_v45  ;;  %v804_v56 = vmax.f32 %v548_v30, %v676_v47  ;;  %v1912_v57 = vunpack.c.l.bf16 %v2470_v43 }
  0x1b   : > { %2150 = vst [vmem:[%s2680_s22] sm:$0xff] %v2149_v49   ;;  %v549_v58 = vadd.f32 %v2655_v9, %v416_v51  ;;  %v550_v59 = vadd.f32 %v2655_v9, %v417_v52  ;;  %v1913_v60 = vunpack.c.h.bf16 %v2470_v43  ;;  %v1916_v61 = vunpack.c.l.bf16 %v2471_v48  ;;  %v2476_v43 = vld [vmem:[%s2641_s15 + $0x58] sm:$0xff]  }
  0x1c   : > { %2529 = vst [vmem:[%s2680_s22 + $0x8] sm:$0xff] %v2154_v54   ;;  %2530 = vst [vmem:[%s2680_s22 + $0x10] sm:$0xff] %v2159_v55   ;;  %v2164_v62 = vpack.c.bf16 %v804_v56, %v803_v50  ;;  %v418_v63 = vmul.f32 %v1912_v57, %v2646_v0  ;;  %v1917_v1 = vunpack.c.h.bf16 %v2471_v48  ;;  %v1920_v2 = vunpack.c.l.bf16 %v2472_v53  ;;  %v2477_v56 = vld [vmem:[%s2641_s15 + $0x60] sm:$0xff]  }
  0x1d   : > { %v677_v3 = vmul.f32 0.01, %v549_v58  ;;  %v678_v4 = vmul.f32 0.01, %v550_v59  ;;  %v419_v5 = vmul.f32 %v1913_v60, %v2646_v0  ;;  %v420_v6 = vmul.f32 %v1916_v61, %v2646_v0 }
  0x1e   : > { %2531 = vst [vmem:[%s2680_s22 + $0x18] sm:$0xff] %v2164_v62   ;;  %v551_v7 = vadd.f32 %v2655_v9, %v418_v63  ;;  %v421_v8 = vmul.f32 %v1917_v1, %v2646_v0  ;;  %v1921_v10 = vunpack.c.h.bf16 %v2472_v53  ;;  %v422_v11 = vmul.f32 %v1920_v2, %v2646_v0 }
  0x1f   : > { %v805_v13 = vmax.f32 %v549_v58, %v677_v3  ;;  %v806_v14 = vmax.f32 %v550_v59, %v678_v4  ;;  %v552_v15 = vadd.f32 %v2655_v9, %v419_v5  ;;  %v553_v16 = vadd.f32 %v2655_v9, %v420_v6 }
  0x20   : > { %v679_v17 = vmul.f32 0.01, %v551_v7  ;;  %v554_v18 = vadd.f32 %v2655_v9, %v421_v8  ;;  %v423_v19 = vmul.f32 %v1921_v10, %v2646_v0  ;;  %v555_v20 = vadd.f32 %v2655_v9, %v422_v11  ;;  %v2478_v11 = vld [vmem:[%s2641_s15 + $0x68] sm:$0xff]  }
  0x21   : > { %v2169_v21 = vpack.c.bf16 %v806_v14, %v805_v13  ;;  %v680_v22 = vmul.f32 0.01, %v552_v15  ;;  %v681_v23 = vmul.f32 0.01, %v553_v16  ;;  %v1924_v24 = vunpack.c.l.bf16 %v2473_v12 }
  0x22   : > { %v807_v26 = vmax.f32 %v551_v7, %v679_v17  ;;  %v682_v27 = vmul.f32 0.01, %v554_v18  ;;  %v556_v28 = vadd.f32 %v2655_v9, %v423_v19  ;;  %v683_v29 = vmul.f32 0.01, %v555_v20 }
  0x23   : > { %2532 = vst [vmem:[%s2680_s22 + $0x20] sm:$0xff] %v2169_v21   ;;  %v808_v30 = vmax.f32 %v552_v15, %v680_v22  ;;  %v809_v31 = vmax.f32 %v553_v16, %v681_v23  ;;  %v1925_v32 = vunpack.c.h.bf16 %v2473_v12  ;;  %v424_v33 = vmul.f32 %v1924_v24, %v2646_v0 }
  0x24   : > { %v810_v35 = vmax.f32 %v554_v18, %v682_v27  ;;  %v684_v36 = vmul.f32 0.01, %v556_v28  ;;  %v811_v37 = vmax.f32 %v555_v20, %v683_v29  ;;  %v1928_v38 = vunpack.c.l.bf16 %v2474_v25  ;;  %v2479_v20 = vld [vmem:[%s2641_s15 + $0x70] sm:$0xff]   ;;  %v2480_v29 = vld [vmem:[%s2641_s15 + $0x78] sm:$0xff]  }
  0x25   : > { %v2174_v39 = vpack.c.bf16 %v808_v30, %v807_v26  ;;  %v425_v40 = vmul.f32 %v1925_v32, %v2646_v0  ;;  %v557_v41 = vadd.f32 %v2655_v9, %v424_v33  ;;  %v1929_v42 = vunpack.c.h.bf16 %v2474_v25 }
  0x26   : > { %v2179_v44 = vpack.c.bf16 %v810_v35, %v809_v31  ;;  %v812_v45 = vmax.f32 %v556_v28, %v684_v36  ;;  %v426_v46 = vmul.f32 %v1928_v38, %v2646_v0  ;;  %v1932_v47 = vunpack.c.l.bf16 %v2475_v34 }
  0x27   : > { %2533 = vst [vmem:[%s2680_s22 + $0x28] sm:$0xff] %v2174_v39   ;;  %v558_v48 = vadd.f32 %v2655_v9, %v425_v40  ;;  %v685_v49 = vmul.f32 0.01, %v557_v41  ;;  %v427_v50 = vmul.f32 %v1929_v42, %v2646_v0  ;;  %v1933_v51 = vunpack.c.h.bf16 %v2475_v34  ;;  %v2481_v42 = vld [vmem:[%s2641_s15 + $0x80] sm:$0xff]  }
  0x28   : > { %2534 = vst [vmem:[%s2680_s22 + $0x30] sm:$0xff] %v2179_v44   ;;  %v2184_v52 = vpack.c.bf16 %v812_v45, %v811_v37  ;;  %v559_v53 = vadd.f32 %v2655_v9, %v426_v46  ;;  %v428_v54 = vmul.f32 %v1932_v47, %v2646_v0  ;;  %v1936_v55 = vunpack.c.l.bf16 %v2476_v43 }
  0x29   : > { %v686_v57 = vmul.f32 0.01, %v558_v48  ;;  %v813_v58 = vmax.f32 %v557_v41, %v685_v49  ;;  %v560_v59 = vadd.f32 %v2655_v9, %v427_v50  ;;  %v429_v60 = vmul.f32 %v1933_v51, %v2646_v0 }
  0x2a   : > { %2535 = vst [vmem:[%s2680_s22 + $0x38] sm:$0xff] %v2184_v52   ;;  %v687_v61 = vmul.f32 0.01, %v559_v53  ;;  %v561_v62 = vadd.f32 %v2655_v9, %v428_v54  ;;  %v1937_v63 = vunpack.c.h.bf16 %v2476_v43  ;;  %v430_v1 = vmul.f32 %v1936_v55, %v2646_v0  ;;  %v2482_v55 = vld [vmem:[%s2641_s15 + $0x88] sm:$0xff]  }
  0x2b   : > { %v814_v2 = vmax.f32 %v558_v48, %v686_v57  ;;  %v688_v3 = vmul.f32 0.01, %v560_v59  ;;  %v562_v4 = vadd.f32 %v2655_v9, %v429_v60  ;;  %v1940_v5 = vunpack.c.l.bf16 %v2477_v56 }
  0x2c   : > { %v815_v6 = vmax.f32 %v559_v53, %v687_v61  ;;  %v689_v7 = vmul.f32 0.01, %v561_v62  ;;  %v431_v8 = vmul.f32 %v1937_v63, %v2646_v0  ;;  %v563_v10 = vadd.f32 %v2655_v9, %v430_v1 }
  0x2d   : > { %v2189_v12 = vpack.c.bf16 %v814_v2, %v813_v58  ;;  %v816_v13 = vmax.f32 %v560_v59, %v688_v3  ;;  %v690_v14 = vmul.f32 0.01, %v562_v4  ;;  %v1941_v15 = vunpack.c.h.bf16 %v2477_v56 }
  0x2e   : > { %v817_v16 = vmax.f32 %v561_v62, %v689_v7  ;;  %v564_v17 = vadd.f32 %v2655_v9, %v431_v8  ;;  %v691_v18 = vmul.f32 0.01, %v563_v10  ;;  %v432_v19 = vmul.f32 %v1940_v5, %v2646_v0  ;;  %v2483_v5 = vld [vmem:[%s2641_s15 + $0x90] sm:$0xff]  }
  0x2f   : > { %2536 = vst [vmem:[%s2680_s22 + $0x40] sm:$0xff] %v2189_v12   ;;  %v2194_v21 = vpack.c.bf16 %v816_v13, %v815_v6  ;;  %v818_v22 = vmax.f32 %v562_v4, %v690_v14  ;;  %v433_v23 = vmul.f32 %v1941_v15, %v2646_v0  ;;  %v1944_v24 = vunpack.c.l.bf16 %v2478_v11  ;;  %v2484_v15 = vld [vmem:[%s2641_s15 + $0x98] sm:$0xff]  }
  0x30   : > { %v692_v25 = vmul.f32 0.01, %v564_v17  ;;  %v819_v26 = vmax.f32 %v563_v10, %v691_v18  ;;  %v565_v27 = vadd.f32 %v2655_v9, %v432_v19  ;;  %v1945_v28 = vunpack.c.h.bf16 %v2478_v11 }
  0x31   : > { %2537 = vst [vmem:[%s2680_s22 + $0x48] sm:$0xff] %v2194_v21   ;;  %v2199_v30 = vpack.c.bf16 %v818_v22, %v817_v16  ;;  %v566_v31 = vadd.f32 %v2655_v9, %v433_v23  ;;  %v434_v32 = vmul.f32 %v1944_v24, %v2646_v0  ;;  %v1948_v33 = vunpack.c.l.bf16 %v2479_v20 }
  0x32   : > { %v820_v34 = vmax.f32 %v564_v17, %v692_v25  ;;  %v693_v35 = vmul.f32 0.01, %v565_v27  ;;  %v435_v36 = vmul.f32 %v1945_v28, %v2646_v0  ;;  %v1949_v37 = vunpack.c.h.bf16 %v2479_v20  ;;  %v2485_v28 = vld [vmem:[%s2641_s15 + $0xa0] sm:$0xff]  }
  0x33   : > { %2538 = vst [vmem:[%s2680_s22 + $0x50] sm:$0xff] %v2199_v30   ;;  %v694_v38 = vmul.f32 0.01, %v566_v31  ;;  %v567_v39 = vadd.f32 %v2655_v9, %v434_v32  ;;  %v436_v40 = vmul.f32 %v1948_v33, %v2646_v0  ;;  %v1952_v41 = vunpack.c.l.bf16 %v2480_v29 }
  0x34   : > { %v2204_v43 = vpack.c.bf16 %v820_v34, %v819_v26  ;;  %v821_v44 = vmax.f32 %v565_v27, %v693_v35  ;;  %v568_v45 = vadd.f32 %v2655_v9, %v435_v36  ;;  %v437_v46 = vmul.f32 %v1949_v37, %v2646_v0 }
  0x35   : > { %v822_v47 = vmax.f32 %v566_v31, %v694_v38  ;;  %v695_v48 = vmul.f32 0.01, %v567_v39  ;;  %v569_v49 = vadd.f32 %v2655_v9, %v436_v40  ;;  %v1953_v50 = vunpack.c.h.bf16 %v2480_v29 }
  0x36   : > { %2539 = vst [vmem:[%s2680_s22 + $0x58] sm:$0xff] %v2204_v43   ;;  %v696_v51 = vmul.f32 0.01, %v568_v45  ;;  %v570_v52 = vadd.f32 %v2655_v9, %v437_v46  ;;  %v438_v53 = vmul.f32 %v1952_v41, %v2646_v0  ;;  %v1956_v54 = vunpack.c.l.bf16 %v2481_v42  ;;  %v2486_v41 = vld [vmem:[%s2641_s15 + $0xa8] sm:$0xff]  }
  0x37   : > { %v2209_v56 = vpack.c.bf16 %v822_v47, %v821_v44  ;;  %v823_v57 = vmax.f32 %v567_v39, %v695_v48  ;;  %v697_v58 = vmul.f32 0.01, %v569_v49  ;;  %v439_v59 = vmul.f32 %v1953_v50, %v2646_v0 }
  0x38   : > { %v824_v60 = vmax.f32 %v568_v45, %v696_v51  ;;  %v698_v61 = vmul.f32 0.01, %v570_v52  ;;  %v571_v62 = vadd.f32 %v2655_v9, %v438_v53  ;;  %v1957_v63 = vunpack.c.h.bf16 %v2481_v42 }
  0x39   : > { %2540 = vst [vmem:[%s2680_s22 + $0x60] sm:$0xff] %v2209_v56   ;;  %v825_v1 = vmax.f32 %v569_v49, %v697_v58  ;;  %v572_v2 = vadd.f32 %v2655_v9, %v439_v59  ;;  %v440_v3 = vmul.f32 %v1956_v54, %v2646_v0  ;;  %v1960_v4 = vunpack.c.l.bf16 %v2482_v55  ;;  %v2487_v54 = vld [vmem:[%s2641_s15 + $0xb0] sm:$0xff]  }
  0x3a   : > { %v2214_v6 = vpack.c.bf16 %v824_v60, %v823_v57  ;;  %v826_v7 = vmax.f32 %v570_v52, %v698_v61  ;;  %v699_v8 = vmul.f32 0.01, %v571_v62  ;;  %v441_v10 = vmul.f32 %v1957_v63, %v2646_v0 }
  0x3b   : > { %v700_v11 = vmul.f32 0.01, %v572_v2  ;;  %v573_v12 = vadd.f32 %v2655_v9, %v440_v3  ;;  %v1961_v13 = vunpack.c.h.bf16 %v2482_v55  ;;  %v442_v14 = vmul.f32 %v1960_v4, %v2646_v0  ;;  %v2488_v4 = vld [vmem:[%s2641_s15 + $0xb8] sm:$0xff]  }
  0x3c   : > { %2541 = vst [vmem:[%s2680_s22 + $0x68] sm:$0xff] %v2214_v6   ;;  %v2219_v16 = vpack.c.bf16 %v826_v7, %v825_v1  ;;  %v827_v17 = vmax.f32 %v571_v62, %v699_v8  ;;  %v574_v18 = vadd.f32 %v2655_v9, %v441_v10  ;;  %v1964_v19 = vunpack.c.l.bf16 %v2483_v5 }
  0x3d   : > { %v828_v20 = vmax.f32 %v572_v2, %v700_v11  ;;  %v701_v21 = vmul.f32 0.01, %v573_v12  ;;  %v443_v22 = vmul.f32 %v1961_v13, %v2646_v0  ;;  %v575_v23 = vadd.f32 %v2655_v9, %v442_v14  ;;  %v2489_v14 = vld [vmem:[%s2641_s15 + $0xc0] sm:$0xff]  }
  0x3e   : > { %2542 = vst [vmem:[%s2680_s22 + $0x70] sm:$0xff] %v2219_v16   ;;  %v702_v24 = vmul.f32 0.01, %v574_v18  ;;  %v1965_v25 = vunpack.c.h.bf16 %v2483_v5  ;;  %v444_v26 = vmul.f32 %v1964_v19, %v2646_v0  ;;  %v1968_v27 = vunpack.c.l.bf16 %v2484_v15 }
  0x3f   : > { %v2224_v29 = vpack.c.bf16 %v828_v20, %v827_v17  ;;  %v829_v30 = vmax.f32 %v573_v12, %v701_v21  ;;  %v576_v31 = vadd.f32 %v2655_v9, %v443_v22  ;;  %v703_v32 = vmul.f32 0.01, %v575_v23 }
  0x40   : > { %v830_v33 = vmax.f32 %v574_v18, %v702_v24  ;;  %v445_v34 = vmul.f32 %v1965_v25, %v2646_v0  ;;  %v577_v35 = vadd.f32 %v2655_v9, %v444_v26  ;;  %v1969_v36 = vunpack.c.h.bf16 %v2484_v15 }
  0x41   : > { %2543 = vst [vmem:[%s2680_s22 + $0x78] sm:$0xff] %v2224_v29   ;;  %v704_v37 = vmul.f32 0.01, %v576_v31  ;;  %v831_v38 = vmax.f32 %v575_v23, %v703_v32  ;;  %v446_v39 = vmul.f32 %v1968_v27, %v2646_v0  ;;  %v1972_v40 = vunpack.c.l.bf16 %v2485_v28  ;;  %v2490_v27 = vld [vmem:[%s2641_s15 + $0xc8] sm:$0xff]  }
  0x42   : > { %v2229_v42 = vpack.c.bf16 %v830_v33, %v829_v30  ;;  %v578_v43 = vadd.f32 %v2655_v9, %v445_v34  ;;  %v705_v44 = vmul.f32 0.01, %v577_v35  ;;  %v447_v45 = vmul.f32 %v1969_v36, %v2646_v0 }
  0x43   : > { %v832_v46 = vmax.f32 %v576_v31, %v704_v37  ;;  %v579_v47 = vadd.f32 %v2655_v9, %v446_v39  ;;  %v1973_v48 = vunpack.c.h.bf16 %v2485_v28  ;;  %v448_v49 = vmul.f32 %v1972_v40, %v2646_v0  ;;  %v2491_v40 = vld [vmem:[%s2641_s15 + $0xd0] sm:$0xff]  }
  0x44   : > { %2544 = vst [vmem:[%s2680_s22 + $0x80] sm:$0xff] %v2229_v42   ;;  %v706_v50 = vmul.f32 0.01, %v578_v43  ;;  %v833_v51 = vmax.f32 %v577_v35, %v705_v44  ;;  %v580_v52 = vadd.f32 %v2655_v9, %v447_v45  ;;  %v1976_v53 = vunpack.c.l.bf16 %v2486_v41 }
  0x45   : > { %v2234_v55 = vpack.c.bf16 %v832_v46, %v831_v38  ;;  %v707_v56 = vmul.f32 0.01, %v579_v47  ;;  %v449_v57 = vmul.f32 %v1973_v48, %v2646_v0  ;;  %v581_v58 = vadd.f32 %v2655_v9, %v448_v49 }
  0x46   : > { %v834_v59 = vmax.f32 %v578_v43, %v706_v50  ;;  %v708_v60 = vmul.f32 0.01, %v580_v52  ;;  %v1977_v61 = vunpack.c.h.bf16 %v2486_v41  ;;  %v450_v62 = vmul.f32 %v1976_v53, %v2646_v0  ;;  %v2492_v53 = vld [vmem:[%s2641_s15 + $0xd8] sm:$0xff]  }
  0x47   : > { %2545 = vst [vmem:[%s2680_s22 + $0x88] sm:$0xff] %v2234_v55   ;;  %v835_v63 = vmax.f32 %v579_v47, %v707_v56  ;;  %v582_v1 = vadd.f32 %v2655_v9, %v449_v57  ;;  %v709_v2 = vmul.f32 0.01, %v581_v58  ;;  %v1980_v3 = vunpack.c.l.bf16 %v2487_v54 }
  0x48   : > { %v2239_v5 = vpack.c.bf16 %v834_v59, %v833_v51  ;;  %v836_v6 = vmax.f32 %v580_v52, %v708_v60  ;;  %v451_v7 = vmul.f32 %v1977_v61, %v2646_v0  ;;  %v583_v8 = vadd.f32 %v2655_v9, %v450_v62  ;;  %v2493_v62 = vld [vmem:[%s2641_s15 + $0xe0] sm:$0xff]  }
  0x49   : > { %v710_v10 = vmul.f32 0.01, %v582_v1  ;;  %v837_v11 = vmax.f32 %v581_v58, %v709_v2  ;;  %v1981_v12 = vunpack.c.h.bf16 %v2487_v54  ;;  %v452_v13 = vmul.f32 %v1980_v3, %v2646_v0 }
  0x4a   : > { %2546 = vst [vmem:[%s2680_s22 + $0x90] sm:$0xff] %v2239_v5   ;;  %v2244_v15 = vpack.c.bf16 %v836_v6, %v835_v63  ;;  %v584_v16 = vadd.f32 %v2655_v9, %v451_v7  ;;  %v711_v17 = vmul.f32 0.01, %v583_v8  ;;  %v1984_v18 = vunpack.c.l.bf16 %v2488_v4 }
  0x4b   : > { %v838_v19 = vmax.f32 %v582_v1, %v710_v10  ;;  %v453_v20 = vmul.f32 %v1981_v12, %v2646_v0  ;;  %v585_v21 = vadd.f32 %v2655_v9, %v452_v13  ;;  %v1985_v22 = vunpack.c.h.bf16 %v2488_v4  ;;  %v2494_v13 = vld [vmem:[%s2641_s15 + $0xe8] sm:$0xff]  }
  0x4c   : > { %2547 = vst [vmem:[%s2680_s22 + $0x98] sm:$0xff] %v2244_v15   ;;  %v712_v23 = vmul.f32 0.01, %v584_v16  ;;  %v839_v24 = vmax.f32 %v583_v8, %v711_v17  ;;  %v454_v25 = vmul.f32 %v1984_v18, %v2646_v0  ;;  %v1988_v26 = vunpack.c.l.bf16 %v2489_v14 }
  0x4d   : > { %v2249_v28 = vpack.c.bf16 %v838_v19, %v837_v11  ;;  %v586_v29 = vadd.f32 %v2655_v9, %v453_v20  ;;  %v713_v30 = vmul.f32 0.01, %v585_v21  ;;  %v455_v31 = vmul.f32 %v1985_v22, %v2646_v0 }
  0x4e   : > { %v840_v32 = vmax.f32 %v584_v16, %v712_v23  ;;  %v587_v33 = vadd.f32 %v2655_v9, %v454_v25  ;;  %v1989_v34 = vunpack.c.h.bf16 %v2489_v14  ;;  %v456_v35 = vmul.f32 %v1988_v26, %v2646_v0  ;;  %v2495_v26 = vld [vmem:[%s2641_s15 + $0xf0] sm:$0xff]  }
  0x4f   : > { %2548 = vst [vmem:[%s2680_s22 + $0xa0] sm:$0xff] %v2249_v28   ;;  %v714_v36 = vmul.f32 0.01, %v586_v29  ;;  %v841_v37 = vmax.f32 %v585_v21, %v713_v30  ;;  %v588_v38 = vadd.f32 %v2655_v9, %v455_v31  ;;  %v1992_v39 = vunpack.c.l.bf16 %v2490_v27 }
  0x50   : > { %v2254_v41 = vpack.c.bf16 %v840_v32, %v839_v24  ;;  %v715_v42 = vmul.f32 0.01, %v587_v33  ;;  %v457_v43 = vmul.f32 %v1989_v34, %v2646_v0  ;;  %v589_v44 = vadd.f32 %v2655_v9, %v456_v35 }
  0x51   : > { %v842_v45 = vmax.f32 %v586_v29, %v714_v36  ;;  %v716_v46 = vmul.f32 0.01, %v588_v38  ;;  %v1993_v47 = vunpack.c.h.bf16 %v2490_v27  ;;  %v458_v48 = vmul.f32 %v1992_v39, %v2646_v0  ;;  %v2496_v39 = vld [vmem:[%s2641_s15 + $0xf8] sm:$0xff]  }
  0x52   : > { %2549 = vst [vmem:[%s2680_s22 + $0xa8] sm:$0xff] %v2254_v41   ;;  %v843_v49 = vmax.f32 %v587_v33, %v715_v42  ;;  %v590_v50 = vadd.f32 %v2655_v9, %v457_v43  ;;  %v717_v51 = vmul.f32 0.01, %v589_v44  ;;  %v1996_v52 = vunpack.c.l.bf16 %v2491_v40 }
  0x53   : > { %v2259_v54 = vpack.c.bf16 %v842_v45, %v841_v37  ;;  %v844_v55 = vmax.f32 %v588_v38, %v716_v46  ;;  %v459_v56 = vmul.f32 %v1993_v47, %v2646_v0  ;;  %v591_v57 = vadd.f32 %v2655_v9, %v458_v48  ;;  %v2497_v48 = vld [vmem:[%s2641_s15 + $0x100] sm:$0xff]  }
  0x54   : > { %v718_v58 = vmul.f32 0.01, %v590_v50  ;;  %v845_v59 = vmax.f32 %v589_v44, %v717_v51  ;;  %v1997_v60 = vunpack.c.h.bf16 %v2491_v40  ;;  %v460_v61 = vmul.f32 %v1996_v52, %v2646_v0 }
  0x55   : > { %2550 = vst [vmem:[%s2680_s22 + $0xb0] sm:$0xff] %v2259_v54   ;;  %v2264_v63 = vpack.c.bf16 %v844_v55, %v843_v49  ;;  %v592_v1 = vadd.f32 %v2655_v9, %v459_v56  ;;  %v719_v2 = vmul.f32 0.01, %v591_v57  ;;  %v2000_v3 = vunpack.c.l.bf16 %v2492_v53 }
  0x56   : > { %v846_v4 = vmax.f32 %v590_v50, %v718_v58  ;;  %v461_v5 = vmul.f32 %v1997_v60, %v2646_v0  ;;  %v593_v6 = vadd.f32 %v2655_v9, %v460_v61  ;;  %v2001_v7 = vunpack.c.h.bf16 %v2492_v53  ;;  %v2498_v61 = vld [vmem:[%s2641_s15 + $0x108] sm:$0xff]  }
  0x57   : > { %2551 = vst [vmem:[%s2680_s22 + $0xb8] sm:$0xff] %v2264_v63   ;;  %v720_v8 = vmul.f32 0.01, %v592_v1  ;;  %v847_v10 = vmax.f32 %v591_v57, %v719_v2  ;;  %v462_v11 = vmul.f32 %v2000_v3, %v2646_v0  ;;  %v2004_v12 = vunpack.c.l.bf16 %v2493_v62 }
  0x58   : > { %v2269_v14 = vpack.c.bf16 %v846_v4, %v845_v59  ;;  %v594_v15 = vadd.f32 %v2655_v9, %v461_v5  ;;  %v721_v16 = vmul.f32 0.01, %v593_v6  ;;  %v463_v17 = vmul.f32 %v2001_v7, %v2646_v0 }
  0x59   : > { %v848_v18 = vmax.f32 %v592_v1, %v720_v8  ;;  %v595_v19 = vadd.f32 %v2655_v9, %v462_v11  ;;  %v2005_v20 = vunpack.c.h.bf16 %v2493_v62  ;;  %v464_v21 = vmul.f32 %v2004_v12, %v2646_v0  ;;  %v2499_v12 = vld [vmem:[%s2641_s15 + $0x110] sm:$0xff]  }
  0x5a   : > { %2552 = vst [vmem:[%s2680_s22 + $0xc0] sm:$0xff] %v2269_v14   ;;  %v722_v22 = vmul.f32 0.01, %v594_v15  ;;  %v849_v23 = vmax.f32 %v593_v6, %v721_v16  ;;  %v596_v24 = vadd.f32 %v2655_v9, %v463_v17  ;;  %v2008_v25 = vunpack.c.l.bf16 %v2494_v13 }
  0x5b   : > { %v2274_v27 = vpack.c.bf16 %v848_v18, %v847_v10  ;;  %v723_v28 = vmul.f32 0.01, %v595_v19  ;;  %v465_v29 = vmul.f32 %v2005_v20, %v2646_v0  ;;  %v597_v30 = vadd.f32 %v2655_v9, %v464_v21 }
  0x5c   : > { %v850_v31 = vmax.f32 %v594_v15, %v722_v22  ;;  %v724_v32 = vmul.f32 0.01, %v596_v24  ;;  %v2009_v33 = vunpack.c.h.bf16 %v2494_v13  ;;  %v466_v34 = vmul.f32 %v2008_v25, %v2646_v0  ;;  %v2500_v25 = vld [vmem:[%s2641_s15 + $0x118] sm:$0xff]  }
  0x5d   : > { %2553 = vst [vmem:[%s2680_s22 + $0xc8] sm:$0xff] %v2274_v27   ;;  %v851_v35 = vmax.f32 %v595_v19, %v723_v28  ;;  %v598_v36 = vadd.f32 %v2655_v9, %v465_v29  ;;  %v725_v37 = vmul.f32 0.01, %v597_v30  ;;  %v2012_v38 = vunpack.c.l.bf16 %v2495_v26 }
  0x5e   : > { %v2279_v40 = vpack.c.bf16 %v850_v31, %v849_v23  ;;  %v852_v41 = vmax.f32 %v596_v24, %v724_v32  ;;  %v467_v42 = vmul.f32 %v2009_v33, %v2646_v0  ;;  %v599_v43 = vadd.f32 %v2655_v9, %v466_v34  ;;  %v2501_v34 = vld [vmem:[%s2641_s15 + $0x120] sm:$0xff]  }
  0x5f   : > { %v726_v44 = vmul.f32 0.01, %v598_v36  ;;  %v853_v45 = vmax.f32 %v597_v30, %v725_v37  ;;  %v2013_v46 = vunpack.c.h.bf16 %v2495_v26  ;;  %v468_v47 = vmul.f32 %v2012_v38, %v2646_v0 }
  0x60   : > { %2554 = vst [vmem:[%s2680_s22 + $0xd0] sm:$0xff] %v2279_v40   ;;  %v2284_v49 = vpack.c.bf16 %v852_v41, %v851_v35  ;;  %v600_v50 = vadd.f32 %v2655_v9, %v467_v42  ;;  %v727_v51 = vmul.f32 0.01, %v599_v43  ;;  %v2016_v52 = vunpack.c.l.bf16 %v2496_v39 }
  0x61   : > { %v854_v53 = vmax.f32 %v598_v36, %v726_v44  ;;  %v469_v54 = vmul.f32 %v2013_v46, %v2646_v0  ;;  %v601_v55 = vadd.f32 %v2655_v9, %v468_v47  ;;  %v2017_v56 = vunpack.c.h.bf16 %v2496_v39  ;;  %v2502_v47 = vld [vmem:[%s2641_s15 + $0x128] sm:$0xff]  }
  0x62   : > { %2555 = vst [vmem:[%s2680_s22 + $0xd8] sm:$0xff] %v2284_v49   ;;  %v728_v57 = vmul.f32 0.01, %v600_v50  ;;  %v855_v58 = vmax.f32 %v599_v43, %v727_v51  ;;  %v470_v59 = vmul.f32 %v2016_v52, %v2646_v0  ;;  %v2020_v60 = vunpack.c.l.bf16 %v2497_v48 }
  0x63   : > { %v2289_v62 = vpack.c.bf16 %v854_v53, %v853_v45  ;;  %v602_v63 = vadd.f32 %v2655_v9, %v469_v54  ;;  %v729_v1 = vmul.f32 0.01, %v601_v55  ;;  %v471_v2 = vmul.f32 %v2017_v56, %v2646_v0 }
  0x64   : > { %v856_v3 = vmax.f32 %v600_v50, %v728_v57  ;;  %v603_v4 = vadd.f32 %v2655_v9, %v470_v59  ;;  %v2021_v5 = vunpack.c.h.bf16 %v2497_v48  ;;  %v472_v6 = vmul.f32 %v2020_v60, %v2646_v0  ;;  %v2503_v60 = vld [vmem:[%s2641_s15 + $0x130] sm:$0xff]  }
  0x65   : > { %2556 = vst [vmem:[%s2680_s22 + $0xe0] sm:$0xff] %v2289_v62   ;;  %v730_v7 = vmul.f32 0.01, %v602_v63  ;;  %v857_v8 = vmax.f32 %v601_v55, %v729_v1  ;;  %v604_v10 = vadd.f32 %v2655_v9, %v471_v2  ;;  %v2024_v11 = vunpack.c.l.bf16 %v2498_v61 }
  0x66   : > { %v2294_v13 = vpack.c.bf16 %v856_v3, %v855_v58  ;;  %v731_v14 = vmul.f32 0.01, %v603_v4  ;;  %v473_v15 = vmul.f32 %v2021_v5, %v2646_v0  ;;  %v605_v16 = vadd.f32 %v2655_v9, %v472_v6 }
  0x67   : > { %v858_v17 = vmax.f32 %v602_v63, %v730_v7  ;;  %v732_v18 = vmul.f32 0.01, %v604_v10  ;;  %v2025_v19 = vunpack.c.h.bf16 %v2498_v61  ;;  %v474_v20 = vmul.f32 %v2024_v11, %v2646_v0  ;;  %v2504_v11 = vld [vmem:[%s2641_s15 + $0x138] sm:$0xff]  }
  0x68   : > { %2557 = vst [vmem:[%s2680_s22 + $0xe8] sm:$0xff] %v2294_v13   ;;  %v859_v21 = vmax.f32 %v603_v4, %v731_v14  ;;  %v606_v22 = vadd.f32 %v2655_v9, %v473_v15  ;;  %v733_v23 = vmul.f32 0.01, %v605_v16  ;;  %v2028_v24 = vunpack.c.l.bf16 %v2499_v12 }
  0x69   : > { %v2299_v26 = vpack.c.bf16 %v858_v17, %v857_v8  ;;  %v860_v27 = vmax.f32 %v604_v10, %v732_v18  ;;  %v475_v28 = vmul.f32 %v2025_v19, %v2646_v0  ;;  %v607_v29 = vadd.f32 %v2655_v9, %v474_v20  ;;  %v2505_v20 = vld [vmem:[%s2641_s15 + $0x140] sm:$0xff]  }
  0x6a   : > { %v734_v30 = vmul.f32 0.01, %v606_v22  ;;  %v861_v31 = vmax.f32 %v605_v16, %v733_v23  ;;  %v2029_v32 = vunpack.c.h.bf16 %v2499_v12  ;;  %v476_v33 = vmul.f32 %v2028_v24, %v2646_v0 }
  0x6b   : > { %2558 = vst [vmem:[%s2680_s22 + $0xf0] sm:$0xff] %v2299_v26   ;;  %v2304_v35 = vpack.c.bf16 %v860_v27, %v859_v21  ;;  %v608_v36 = vadd.f32 %v2655_v9, %v475_v28  ;;  %v735_v37 = vmul.f32 0.01, %v607_v29  ;;  %v2032_v38 = vunpack.c.l.bf16 %v2500_v25 }
  0x6c   : > { %v862_v39 = vmax.f32 %v606_v22, %v734_v30  ;;  %v477_v40 = vmul.f32 %v2029_v32, %v2646_v0  ;;  %v609_v41 = vadd.f32 %v2655_v9, %v476_v33  ;;  %v2033_v42 = vunpack.c.h.bf16 %v2500_v25  ;;  %v2506_v33 = vld [vmem:[%s2641_s15 + $0x148] sm:$0xff]  }
  0x6d   : > { %2559 = vst [vmem:[%s2680_s22 + $0xf8] sm:$0xff] %v2304_v35   ;;  %v736_v43 = vmul.f32 0.01, %v608_v36  ;;  %v863_v44 = vmax.f32 %v607_v29, %v735_v37  ;;  %v478_v45 = vmul.f32 %v2032_v38, %v2646_v0  ;;  %v2036_v46 = vunpack.c.l.bf16 %v2501_v34 }
  0x6e   : > { %v2309_v48 = vpack.c.bf16 %v862_v39, %v861_v31  ;;  %v610_v49 = vadd.f32 %v2655_v9, %v477_v40  ;;  %v737_v50 = vmul.f32 0.01, %v609_v41  ;;  %v479_v51 = vmul.f32 %v2033_v42, %v2646_v0 }
  0x6f   : > { %v864_v52 = vmax.f32 %v608_v36, %v736_v43  ;;  %v611_v53 = vadd.f32 %v2655_v9, %v478_v45  ;;  %v2037_v54 = vunpack.c.h.bf16 %v2501_v34  ;;  %v480_v55 = vmul.f32 %v2036_v46, %v2646_v0 }
  0x70   : > { %2560 = vst [vmem:[%s2680_s22 + $0x100] sm:$0xff] %v2309_v48   ;;  %v738_v56 = vmul.f32 0.01, %v610_v49  ;;  %v865_v57 = vmax.f32 %v609_v41, %v737_v50  ;;  %v612_v58 = vadd.f32 %v2655_v9, %v479_v51  ;;  %v2040_v59 = vunpack.c.l.bf16 %v2502_v47  ;;  %v2900_v41 = vld [vmem:[%s3058_s1] ss:$0 sm:$0xff] }
  0x71   : > { %v2314_v61 = vpack.c.bf16 %v864_v52, %v863_v44  ;;  %v739_v62 = vmul.f32 0.01, %v611_v53  ;;  %v481_v63 = vmul.f32 %v2037_v54, %v2646_v0  ;;  %v613_v1 = vadd.f32 %v2655_v9, %v480_v55  ;;  %v2910_v50 = vld [vmem:[%s3058_s1 + $0x1] ss:$0 sm:$0xff] }
  0x72   : > { %v866_v2 = vmax.f32 %v610_v49, %v738_v56  ;;  %v740_v3 = vmul.f32 0.01, %v612_v58  ;;  %v2041_v4 = vunpack.c.h.bf16 %v2502_v47  ;;  %v482_v5 = vmul.f32 %v2040_v59, %v2646_v0  ;;  %v2508_v59 = vld [vmem:[%s2641_s15 + $0x158] sm:$0xff]  }
  0x73   : > { %2561 = vst [vmem:[%s2680_s22 + $0x108] sm:$0xff] %v2314_v61   ;;  %v867_v6 = vmax.f32 %v611_v53, %v739_v62  ;;  %v614_v7 = vadd.f32 %v2655_v9, %v481_v63  ;;  %v741_v8 = vmul.f32 0.01, %v613_v1  ;;  %v2044_v10 = vunpack.c.l.bf16 %v2503_v60 }
  0x74   : > { %v2319_v12 = vpack.c.bf16 %v866_v2, %v865_v57  ;;  %v868_v13 = vmax.f32 %v612_v58, %v740_v3  ;;  %v483_v14 = vmul.f32 %v2041_v4, %v2646_v0  ;;  %v615_v15 = vadd.f32 %v2655_v9, %v482_v5  ;;  %v2509_v5 = vld [vmem:[%s2641_s15 + $0x160] sm:$0xff]  }
  0x75   : > { %v742_v16 = vmul.f32 0.01, %v614_v7  ;;  %v869_v17 = vmax.f32 %v613_v1, %v741_v8  ;;  %v2045_v18 = vunpack.c.h.bf16 %v2503_v60  ;;  %v484_v19 = vmul.f32 %v2044_v10, %v2646_v0 }
  0x76   : > { %2562 = vst [vmem:[%s2680_s22 + $0x110] sm:$0xff] %v2319_v12   ;;  %v2324_v21 = vpack.c.bf16 %v868_v13, %v867_v6  ;;  %v616_v22 = vadd.f32 %v2655_v9, %v483_v14  ;;  %v743_v23 = vmul.f32 0.01, %v615_v15  ;;  %v2048_v24 = vunpack.c.l.bf16 %v2504_v11 }
  0x77   : > { %v870_v25 = vmax.f32 %v614_v7, %v742_v16  ;;  %v485_v26 = vmul.f32 %v2045_v18, %v2646_v0  ;;  %v617_v27 = vadd.f32 %v2655_v9, %v484_v19  ;;  %v2049_v28 = vunpack.c.h.bf16 %v2504_v11  ;;  %v2510_v19 = vld [vmem:[%s2641_s15 + $0x168] sm:$0xff]  }
  0x78   : > { %2563 = vst [vmem:[%s2680_s22 + $0x118] sm:$0xff] %v2324_v21   ;;  %v744_v29 = vmul.f32 0.01, %v616_v22  ;;  %v871_v30 = vmax.f32 %v615_v15, %v743_v23  ;;  %v486_v31 = vmul.f32 %v2048_v24, %v2646_v0  ;;  %v2052_v32 = vunpack.c.l.bf16 %v2505_v20 }
  0x79   : > { %v2329_v34 = vpack.c.bf16 %v870_v25, %v869_v17  ;;  %v618_v35 = vadd.f32 %v2655_v9, %v485_v26  ;;  %v745_v36 = vmul.f32 0.01, %v617_v27  ;;  %v487_v37 = vmul.f32 %v2049_v28, %v2646_v0  ;;  %v2507_v0 = vld [vmem:[%s2641_s15 + $0x150] sm:$0xff]  }
  0x7a   : > { %v872_v38 = vmax.f32 %v616_v22, %v744_v29  ;;  %v619_v39 = vadd.f32 %v2655_v9, %v486_v31  ;;  %v2053_v40 = vunpack.c.h.bf16 %v2505_v20  ;;  %v488_v42 = vmul.f32 %v2900_v41, %v2052_v32  ;;  %v2511_v32 = vld [vmem:[%s2641_s15 + $0x170] sm:$0xff]  }
  0x7b   : > { %2564 = vst [vmem:[%s2680_s22 + $0x120] sm:$0xff] %v2329_v34   ;;  %v746_v43 = vmul.f32 0.01, %v618_v35  ;;  %v873_v44 = vmax.f32 %v617_v27, %v745_v36  ;;  %v620_v45 = vadd.f32 %v2655_v9, %v487_v37  ;;  %v2056_v46 = vunpack.c.l.bf16 %v2506_v33 }
  0x7c   : > { %v2334_v47 = vpack.c.bf16 %v872_v38, %v871_v30  ;;  %v747_v48 = vmul.f32 0.01, %v619_v39  ;;  %v489_v49 = vmul.f32 %v2900_v41, %v2053_v40  ;;  %v621_v51 = vadd.f32 %v2910_v50, %v488_v42 }
  0x7d   : > { %v874_v52 = vmax.f32 %v618_v35, %v746_v43  ;;  %v748_v53 = vmul.f32 0.01, %v620_v45  ;;  %v2057_v54 = vunpack.c.h.bf16 %v2506_v33  ;;  %v490_v9 = vmul.f32 %v2900_v41, %v2056_v46  ;;  %v2512_v46 = vld [vmem:[%s2641_s15 + $0x178] sm:$0xff]  }
  0x7e   : > { %2565 = vst [vmem:[%s2680_s22 + $0x128] sm:$0xff] %v2334_v47   ;;  %v875_v55 = vmax.f32 %v619_v39, %v747_v48  ;;  %v622_v56 = vadd.f32 %v2910_v50, %v489_v49  ;;  %v749_v57 = vmul.f32 0.01, %v621_v51  ;;  %v2060_v58 = vunpack.c.l.bf16 %v2507_v0 }
  0x7f   : > { %v2339_v60 = vpack.c.bf16 %v874_v52, %v873_v44  ;;  %v876_v61 = vmax.f32 %v620_v45, %v748_v53  ;;  %v491_v62 = vmul.f32 %v2900_v41, %v2057_v54  ;;  %v623_v63 = vadd.f32 %v2910_v50, %v490_v9  ;;  %v2513_v9 = vld [vmem:[%s2641_s15 + $0x180] sm:$0xff]  }
  0x80   : > { %v750_v1 = vmul.f32 0.01, %v622_v56  ;;  %v877_v2 = vmax.f32 %v621_v51, %v749_v57  ;;  %v2061_v3 = vunpack.c.h.bf16 %v2507_v0  ;;  %v492_v4 = vmul.f32 %v2900_v41, %v2060_v58 }
  0x81   : > { %2566 = vst [vmem:[%s2680_s22 + $0x130] sm:$0xff] %v2339_v60   ;;  %v2344_v6 = vpack.c.bf16 %v876_v61, %v875_v55  ;;  %v624_v7 = vadd.f32 %v2910_v50, %v491_v62  ;;  %v751_v8 = vmul.f32 0.01, %v623_v63  ;;  %v2064_v10 = vunpack.c.l.bf16 %v2508_v59 }
  0x82   : > { %v878_v11 = vmax.f32 %v622_v56, %v750_v1  ;;  %v493_v12 = vmul.f32 %v2900_v41, %v2061_v3  ;;  %v625_v13 = vadd.f32 %v2910_v50, %v492_v4  ;;  %v2065_v14 = vunpack.c.h.bf16 %v2508_v59  ;;  %v2514_v4 = vld [vmem:[%s2641_s15 + $0x188] sm:$0xff]  }
  0x83   : > { %2567 = vst [vmem:[%s2680_s22 + $0x138] sm:$0xff] %v2344_v6   ;;  %v752_v15 = vmul.f32 0.01, %v624_v7  ;;  %v879_v16 = vmax.f32 %v623_v63, %v751_v8  ;;  %v494_v17 = vmul.f32 %v2900_v41, %v2064_v10  ;;  %v2068_v18 = vunpack.c.l.bf16 %v2509_v5 }
  0x84   : > { %v2349_v20 = vpack.c.bf16 %v878_v11, %v877_v2  ;;  %v626_v21 = vadd.f32 %v2910_v50, %v493_v12  ;;  %v753_v22 = vmul.f32 0.01, %v625_v13  ;;  %v495_v23 = vmul.f32 %v2900_v41, %v2065_v14 }
  0x85   : > { %v880_v24 = vmax.f32 %v624_v7, %v752_v15  ;;  %v627_v25 = vadd.f32 %v2910_v50, %v494_v17  ;;  %v2069_v26 = vunpack.c.h.bf16 %v2509_v5  ;;  %v496_v27 = vmul.f32 %v2900_v41, %v2068_v18  ;;  %v2515_v18 = vld [vmem:[%s2641_s15 + $0x190] sm:$0xff]  }
  0x86   : > { %2568 = vst [vmem:[%s2680_s22 + $0x140] sm:$0xff] %v2349_v20   ;;  %v754_v28 = vmul.f32 0.01, %v626_v21  ;;  %v881_v29 = vmax.f32 %v625_v13, %v753_v22  ;;  %v628_v30 = vadd.f32 %v2910_v50, %v495_v23  ;;  %v2072_v31 = vunpack.c.l.bf16 %v2510_v19 }
  0x87   : > { %v2354_v33 = vpack.c.bf16 %v880_v24, %v879_v16  ;;  %v755_v34 = vmul.f32 0.01, %v627_v25  ;;  %v497_v35 = vmul.f32 %v2900_v41, %v2069_v26  ;;  %v629_v36 = vadd.f32 %v2910_v50, %v496_v27 }
  0x88   : > { %v882_v37 = vmax.f32 %v626_v21, %v754_v28  ;;  %v756_v38 = vmul.f32 0.01, %v628_v30  ;;  %v2073_v39 = vunpack.c.h.bf16 %v2510_v19  ;;  %v498_v40 = vmul.f32 %v2900_v41, %v2072_v31  ;;  %v2516_v31 = vld [vmem:[%s2641_s15 + $0x198] sm:$0xff]  }
  0x89   : > { %2569 = vst [vmem:[%s2680_s22 + $0x148] sm:$0xff] %v2354_v33   ;;  %v883_v42 = vmax.f32 %v627_v25, %v755_v34  ;;  %v630_v43 = vadd.f32 %v2910_v50, %v497_v35  ;;  %v757_v44 = vmul.f32 0.01, %v629_v36  ;;  %v2076_v45 = vunpack.c.l.bf16 %v2511_v32 }
  0x8a   : > { %v2359_v0 = vpack.c.bf16 %v882_v37, %v881_v29  ;;  %v884_v47 = vmax.f32 %v628_v30, %v756_v38  ;;  %v499_v48 = vmul.f32 %v2900_v41, %v2073_v39  ;;  %v631_v49 = vadd.f32 %v2910_v50, %v498_v40  ;;  %v2517_v40 = vld [vmem:[%s2641_s15 + $0x1a0] sm:$0xff]  }
  0x8b   : > { %v758_v51 = vmul.f32 0.01, %v630_v43  ;;  %v885_v52 = vmax.f32 %v629_v36, %v757_v44  ;;  %v2077_v53 = vunpack.c.h.bf16 %v2511_v32  ;;  %v500_v54 = vmul.f32 %v2900_v41, %v2076_v45 }
  0x8c   : > { %2570 = vst [vmem:[%s2680_s22 + $0x150] sm:$0xff] %v2359_v0   ;;  %v2364_v55 = vpack.c.bf16 %v884_v47, %v883_v42  ;;  %v632_v56 = vadd.f32 %v2910_v50, %v499_v48  ;;  %v759_v57 = vmul.f32 0.01, %v631_v49  ;;  %v2080_v58 = vunpack.c.l.bf16 %v2512_v46 }
  0x8d   : > { %v886_v59 = vmax.f32 %v630_v43, %v758_v51  ;;  %v501_v60 = vmul.f32 %v2900_v41, %v2077_v53  ;;  %v633_v61 = vadd.f32 %v2910_v50, %v500_v54  ;;  %v2081_v62 = vunpack.c.h.bf16 %v2512_v46  ;;  %v2518_v54 = vld [vmem:[%s2641_s15 + $0x1a8] sm:$0xff]  }
  0x8e   : > { %2571 = vst [vmem:[%s2680_s22 + $0x158] sm:$0xff] %v2364_v55   ;;  %v760_v63 = vmul.f32 0.01, %v632_v56  ;;  %v887_v1 = vmax.f32 %v631_v49, %v759_v57  ;;  %v502_v2 = vmul.f32 %v2900_v41, %v2080_v58  ;;  %v2084_v3 = vunpack.c.l.bf16 %v2513_v9 }
  0x8f   : > { %v2369_v5 = vpack.c.bf16 %v886_v59, %v885_v52  ;;  %v634_v6 = vadd.f32 %v2910_v50, %v501_v60  ;;  %v761_v7 = vmul.f32 0.01, %v633_v61  ;;  %v503_v8 = vmul.f32 %v2900_v41, %v2081_v62 }
  0x90   : > { %v888_v10 = vmax.f32 %v632_v56, %v760_v63  ;;  %v635_v11 = vadd.f32 %v2910_v50, %v502_v2  ;;  %v2085_v12 = vunpack.c.h.bf16 %v2513_v9  ;;  %v504_v13 = vmul.f32 %v2900_v41, %v2084_v3  ;;  %v2519_v3 = vld [vmem:[%s2641_s15 + $0x1b0] sm:$0xff]  }
  0x91   : > { %2572 = vst [vmem:[%s2680_s22 + $0x160] sm:$0xff] %v2369_v5   ;;  %v762_v14 = vmul.f32 0.01, %v634_v6  ;;  %v889_v15 = vmax.f32 %v633_v61, %v761_v7  ;;  %v636_v16 = vadd.f32 %v2910_v50, %v503_v8  ;;  %v2088_v17 = vunpack.c.l.bf16 %v2514_v4 }
  0x92   : > { %v2374_v19 = vpack.c.bf16 %v888_v10, %v887_v1  ;;  %v763_v20 = vmul.f32 0.01, %v635_v11  ;;  %v505_v21 = vmul.f32 %v2900_v41, %v2085_v12  ;;  %v637_v22 = vadd.f32 %v2910_v50, %v504_v13 }
  0x93   : > { %v890_v23 = vmax.f32 %v634_v6, %v762_v14  ;;  %v764_v24 = vmul.f32 0.01, %v636_v16  ;;  %v2089_v25 = vunpack.c.h.bf16 %v2514_v4  ;;  %v506_v26 = vmul.f32 %v2900_v41, %v2088_v17  ;;  %v2520_v17 = vld [vmem:[%s2641_s15 + $0x1b8] sm:$0xff]  }
  0x94   : > { %2573 = vst [vmem:[%s2680_s22 + $0x168] sm:$0xff] %v2374_v19   ;;  %v891_v27 = vmax.f32 %v635_v11, %v763_v20  ;;  %v638_v28 = vadd.f32 %v2910_v50, %v505_v21  ;;  %v765_v29 = vmul.f32 0.01, %v637_v22  ;;  %v2092_v30 = vunpack.c.l.bf16 %v2515_v18 }
  0x95   : > { %v2379_v32 = vpack.c.bf16 %v890_v23, %v889_v15  ;;  %v892_v33 = vmax.f32 %v636_v16, %v764_v24  ;;  %v507_v34 = vmul.f32 %v2900_v41, %v2089_v25  ;;  %v639_v35 = vadd.f32 %v2910_v50, %v506_v26  ;;  %v2521_v26 = vld [vmem:[%s2641_s15 + $0x1c0] sm:$0xff]  }
  0x96   : > { %v766_v36 = vmul.f32 0.01, %v638_v28  ;;  %v893_v37 = vmax.f32 %v637_v22, %v765_v29  ;;  %v2093_v38 = vunpack.c.h.bf16 %v2515_v18  ;;  %v508_v39 = vmul.f32 %v2900_v41, %v2092_v30 }
  0x97   : > { %2574 = vst [vmem:[%s2680_s22 + $0x170] sm:$0xff] %v2379_v32   ;;  %v2384_v42 = vpack.c.bf16 %v892_v33, %v891_v27  ;;  %v640_v43 = vadd.f32 %v2910_v50, %v507_v34  ;;  %v767_v44 = vmul.f32 0.01, %v639_v35  ;;  %v2096_v45 = vunpack.c.l.bf16 %v2516_v31 }
  0x98   : > { %v894_v46 = vmax.f32 %v638_v28, %v766_v36  ;;  %v509_v0 = vmul.f32 %v2900_v41, %v2093_v38  ;;  %v641_v47 = vadd.f32 %v2910_v50, %v508_v39  ;;  %v2097_v48 = vunpack.c.h.bf16 %v2516_v31  ;;  %v2522_v39 = vld [vmem:[%s2641_s15 + $0x1c8] sm:$0xff]  }
  0x99   : > { %2575 = vst [vmem:[%s2680_s22 + $0x178] sm:$0xff] %v2384_v42   ;;  %v768_v49 = vmul.f32 0.01, %v640_v43  ;;  %v895_v51 = vmax.f32 %v639_v35, %v767_v44  ;;  %v510_v52 = vmul.f32 %v2900_v41, %v2096_v45  ;;  %v2100_v53 = vunpack.c.l.bf16 %v2517_v40 }
  0x9a   : > { %v2389_v9 = vpack.c.bf16 %v894_v46, %v893_v37  ;;  %v642_v55 = vadd.f32 %v2910_v50, %v509_v0  ;;  %v769_v56 = vmul.f32 0.01, %v641_v47  ;;  %v511_v57 = vmul.f32 %v2900_v41, %v2097_v48 }
  0x9b   : > { %v896_v58 = vmax.f32 %v640_v43, %v768_v49  ;;  %v643_v59 = vadd.f32 %v2910_v50, %v510_v52  ;;  %v2101_v60 = vunpack.c.h.bf16 %v2517_v40  ;;  %v512_v61 = vmul.f32 %v2900_v41, %v2100_v53  ;;  %v2523_v53 = vld [vmem:[%s2641_s15 + $0x1d0] sm:$0xff]  }
  0x9c   : > { %2576 = vst [vmem:[%s2680_s22 + $0x180] sm:$0xff] %v2389_v9   ;;  %v770_v62 = vmul.f32 0.01, %v642_v55  ;;  %v897_v63 = vmax.f32 %v641_v47, %v769_v56  ;;  %v644_v1 = vadd.f32 %v2910_v50, %v511_v57  ;;  %v2104_v2 = vunpack.c.l.bf16 %v2518_v54 }
  0x9d   : > { %v2394_v4 = vpack.c.bf16 %v896_v58, %v895_v51  ;;  %v771_v5 = vmul.f32 0.01, %v643_v59  ;;  %v513_v6 = vmul.f32 %v2900_v41, %v2101_v60  ;;  %v645_v7 = vadd.f32 %v2910_v50, %v512_v61 }
  0x9e   : > { %v898_v8 = vmax.f32 %v642_v55, %v770_v62  ;;  %v772_v10 = vmul.f32 0.01, %v644_v1  ;;  %v2105_v11 = vunpack.c.h.bf16 %v2518_v54  ;;  %v514_v12 = vmul.f32 %v2900_v41, %v2104_v2  ;;  %v2524_v2 = vld [vmem:[%s2641_s15 + $0x1d8] sm:$0xff]  }
  0x9f   : > { %2577 = vst [vmem:[%s2680_s22 + $0x188] sm:$0xff] %v2394_v4   ;;  %v899_v13 = vmax.f32 %v643_v59, %v771_v5  ;;  %v646_v14 = vadd.f32 %v2910_v50, %v513_v6  ;;  %v773_v15 = vmul.f32 0.01, %v645_v7  ;;  %v2108_v16 = vunpack.c.l.bf16 %v2519_v3 }
  0xa0   : > { %v2399_v18 = vpack.c.bf16 %v898_v8, %v897_v63  ;;  %v900_v19 = vmax.f32 %v644_v1, %v772_v10  ;;  %v515_v20 = vmul.f32 %v2900_v41, %v2105_v11  ;;  %v647_v21 = vadd.f32 %v2910_v50, %v514_v12  ;;  %v2525_v12 = vld [vmem:[%s2641_s15 + $0x1e0] sm:$0xff]  }
  0xa1   : > { %v774_v22 = vmul.f32 0.01, %v646_v14  ;;  %v901_v23 = vmax.f32 %v645_v7, %v773_v15  ;;  %v2109_v24 = vunpack.c.h.bf16 %v2519_v3  ;;  %v516_v25 = vmul.f32 %v2900_v41, %v2108_v16 }
  0xa2   : > { %2578 = vst [vmem:[%s2680_s22 + $0x190] sm:$0xff] %v2399_v18   ;;  %v2404_v27 = vpack.c.bf16 %v900_v19, %v899_v13  ;;  %v648_v28 = vadd.f32 %v2910_v50, %v515_v20  ;;  %v775_v29 = vmul.f32 0.01, %v647_v21  ;;  %v2112_v30 = vunpack.c.l.bf16 %v2520_v17 }
  0xa3   : > { %v902_v31 = vmax.f32 %v646_v14, %v774_v22  ;;  %v517_v32 = vmul.f32 %v2900_v41, %v2109_v24  ;;  %v649_v33 = vadd.f32 %v2910_v50, %v516_v25  ;;  %v2113_v34 = vunpack.c.h.bf16 %v2520_v17  ;;  %v2526_v25 = vld [vmem:[%s2641_s15 + $0x1e8] sm:$0xff]  }
  0xa4   : > { %2579 = vst [vmem:[%s2680_s22 + $0x198] sm:$0xff] %v2404_v27   ;;  %v776_v35 = vmul.f32 0.01, %v648_v28  ;;  %v903_v36 = vmax.f32 %v647_v21, %v775_v29  ;;  %v518_v37 = vmul.f32 %v2900_v41, %v2112_v30  ;;  %v2116_v38 = vunpack.c.l.bf16 %v2521_v26 }
  0xa5   : > { %v2409_v40 = vpack.c.bf16 %v902_v31, %v901_v23  ;;  %v650_v42 = vadd.f32 %v2910_v50, %v517_v32  ;;  %v777_v43 = vmul.f32 0.01, %v649_v33  ;;  %v519_v44 = vmul.f32 %v2900_v41, %v2113_v34 }
  0xa6   : > { %v904_v45 = vmax.f32 %v648_v28, %v776_v35  ;;  %v651_v46 = vadd.f32 %v2910_v50, %v518_v37  ;;  %v2117_v0 = vunpack.c.h.bf16 %v2521_v26  ;;  %v520_v47 = vmul.f32 %v2900_v41, %v2116_v38  ;;  %v2527_v38 = vld [vmem:[%s2641_s15 + $0x1f0] sm:$0xff]  }
  0xa7   : > { %2580 = vst [vmem:[%s2680_s22 + $0x1a0] sm:$0xff] %v2409_v40   ;;  %v778_v48 = vmul.f32 0.01, %v650_v42  ;;  %v905_v49 = vmax.f32 %v649_v33, %v777_v43  ;;  %v652_v51 = vadd.f32 %v2910_v50, %v519_v44  ;;  %v2120_v52 = vunpack.c.l.bf16 %v2522_v39 }
  0xa8   : > { %v2414_v54 = vpack.c.bf16 %v904_v45, %v903_v36  ;;  %v779_v9 = vmul.f32 0.01, %v651_v46  ;;  %v521_v55 = vmul.f32 %v2900_v41, %v2117_v0  ;;  %v653_v56 = vadd.f32 %v2910_v50, %v520_v47 }
  0xa9   : > { %v906_v57 = vmax.f32 %v650_v42, %v778_v48  ;;  %v780_v58 = vmul.f32 0.01, %v652_v51  ;;  %v2121_v59 = vunpack.c.h.bf16 %v2522_v39  ;;  %v522_v60 = vmul.f32 %v2900_v41, %v2120_v52  ;;  %v2528_v52 = vld [vmem:[%s2641_s15 + $0x1f8] sm:$0xff]  }
  0xaa   : > { %2581 = vst [vmem:[%s2680_s22 + $0x1a8] sm:$0xff] %v2414_v54   ;;  %v907_v61 = vmax.f32 %v651_v46, %v779_v9  ;;  %v654_v62 = vadd.f32 %v2910_v50, %v521_v55  ;;  %v781_v63 = vmul.f32 0.01, %v653_v56  ;;  %v2124_v1 = vunpack.c.l.bf16 %v2523_v53 }
  0xab   : > { %v2419_v3 = vpack.c.bf16 %v906_v57, %v905_v49  ;;  %v908_v4 = vmax.f32 %v652_v51, %v780_v58  ;;  %v523_v5 = vmul.f32 %v2900_v41, %v2121_v59  ;;  %v655_v6 = vadd.f32 %v2910_v50, %v522_v60 }
  0xac   : > { %v782_v7 = vmul.f32 0.01, %v654_v62  ;;  %v909_v8 = vmax.f32 %v653_v56, %v781_v63  ;;  %v2125_v10 = vunpack.c.h.bf16 %v2523_v53  ;;  %v524_v11 = vmul.f32 %v2900_v41, %v2124_v1 }
  0xad   : > { %2582 = vst [vmem:[%s2680_s22 + $0x1b0] sm:$0xff] %v2419_v3   ;;  %v2424_v13 = vpack.c.bf16 %v908_v4, %v907_v61  ;;  %v656_v14 = vadd.f32 %v2910_v50, %v523_v5  ;;  %v783_v15 = vmul.f32 0.01, %v655_v6  ;;  %v2128_v16 = vunpack.c.l.bf16 %v2524_v2 }
  0xae   : > { %v910_v17 = vmax.f32 %v654_v62, %v782_v7  ;;  %v525_v18 = vmul.f32 %v2900_v41, %v2125_v10  ;;  %v657_v19 = vadd.f32 %v2910_v50, %v524_v11  ;;  %v2129_v20 = vunpack.c.h.bf16 %v2524_v2 }
  0xaf   : > { %2583 = vst [vmem:[%s2680_s22 + $0x1b8] sm:$0xff] %v2424_v13   ;;  %v784_v21 = vmul.f32 0.01, %v656_v14  ;;  %v911_v22 = vmax.f32 %v655_v6, %v783_v15  ;;  %v526_v23 = vmul.f32 %v2900_v41, %v2128_v16  ;;  %v2132_v24 = vunpack.c.l.bf16 %v2525_v12 }
  0xb0   : > { %v2429_v26 = vpack.c.bf16 %v910_v17, %v909_v8  ;;  %v658_v27 = vadd.f32 %v2910_v50, %v525_v18  ;;  %v785_v28 = vmul.f32 0.01, %v657_v19  ;;  %v527_v29 = vmul.f32 %v2900_v41, %v2129_v20 }
  0xb1   : > { %v912_v30 = vmax.f32 %v656_v14, %v784_v21  ;;  %v659_v31 = vadd.f32 %v2910_v50, %v526_v23  ;;  %v2133_v32 = vunpack.c.h.bf16 %v2525_v12  ;;  %v528_v33 = vmul.f32 %v2900_v41, %v2132_v24 }
  0xb2   : > { %2584 = vst [vmem:[%s2680_s22 + $0x1c0] sm:$0xff] %v2429_v26   ;;  %v786_v34 = vmul.f32 0.01, %v658_v27  ;;  %v913_v35 = vmax.f32 %v657_v19, %v785_v28  ;;  %v660_v36 = vadd.f32 %v2910_v50, %v527_v29  ;;  %v2136_v37 = vunpack.c.l.bf16 %v2526_v25 }
  0xb3   : > { %v2434_v39 = vpack.c.bf16 %v912_v30, %v911_v22  ;;  %v787_v40 = vmul.f32 0.01, %v659_v31  ;;  %v529_v42 = vmul.f32 %v2900_v41, %v2133_v32  ;;  %v661_v43 = vadd.f32 %v2910_v50, %v528_v33 }
  0xb4   : > { %v914_v44 = vmax.f32 %v658_v27, %v786_v34  ;;  %v788_v45 = vmul.f32 0.01, %v660_v36  ;;  %v2137_v46 = vunpack.c.h.bf16 %v2526_v25  ;;  %v530_v0 = vmul.f32 %v2900_v41, %v2136_v37 }
  0xb5   : > { %2585 = vst [vmem:[%s2680_s22 + $0x1c8] sm:$0xff] %v2434_v39   ;;  %v915_v47 = vmax.f32 %v659_v31, %v787_v40  ;;  %v662_v48 = vadd.f32 %v2910_v50, %v529_v42  ;;  %v789_v49 = vmul.f32 0.01, %v661_v43  ;;  %v2140_v51 = vunpack.c.l.bf16 %v2527_v38 }
  0xb6   : > { %v2439_v53 = vpack.c.bf16 %v914_v44, %v913_v35  ;;  %v916_v54 = vmax.f32 %v660_v36, %v788_v45  ;;  %v531_v9 = vmul.f32 %v2900_v41, %v2137_v46  ;;  %v663_v55 = vadd.f32 %v2910_v50, %v530_v0 }
  0xb7   : > { %v790_v56 = vmul.f32 0.01, %v662_v48  ;;  %v917_v57 = vmax.f32 %v661_v43, %v789_v49  ;;  %v2141_v58 = vunpack.c.h.bf16 %v2527_v38  ;;  %v532_v59 = vmul.f32 %v2900_v41, %v2140_v51 }
  0xb8   : > { %2586 = vst [vmem:[%s2680_s22 + $0x1d0] sm:$0xff] %v2439_v53   ;;  %v2444_v60 = vpack.c.bf16 %v916_v54, %v915_v47  ;;  %v664_v61 = vadd.f32 %v2910_v50, %v531_v9  ;;  %v791_v62 = vmul.f32 0.01, %v663_v55  ;;  %v2144_v63 = vunpack.c.l.bf16 %v2528_v52 }
  0xb9   : > { %v918_v1 = vmax.f32 %v662_v48, %v790_v56  ;;  %v533_v2 = vmul.f32 %v2900_v41, %v2141_v58  ;;  %v665_v3 = vadd.f32 %v2910_v50, %v532_v59  ;;  %v2145_v4 = vunpack.c.h.bf16 %v2528_v52 }
  0xba   : > { %2587 = vst [vmem:[%s2680_s22 + $0x1d8] sm:$0xff] %v2444_v60   ;;  %v792_v5 = vmul.f32 0.01, %v664_v61  ;;  %v919_v6 = vmax.f32 %v663_v55, %v791_v62  ;;  %v534_v7 = vmul.f32 %v2900_v41, %v2144_v63 }
  0xbb   : > { %v2449_v8 = vpack.c.bf16 %v918_v1, %v917_v57  ;;  %v666_v10 = vadd.f32 %v2910_v50, %v533_v2  ;;  %v793_v11 = vmul.f32 0.01, %v665_v3  ;;  %v535_v12 = vmul.f32 %v2900_v41, %v2145_v4 }
  0xbc   : > { %v920_v13 = vmax.f32 %v664_v61, %v792_v5  ;;  %v667_v14 = vadd.f32 %v2910_v50, %v534_v7 }
  0xbd   : > { %2588 = vst [vmem:[%s2680_s22 + $0x1e0] sm:$0xff] %v2449_v8   ;;  %v794_v15 = vmul.f32 0.01, %v666_v10  ;;  %v921_v16 = vmax.f32 %v665_v3, %v793_v11  ;;  %v668_v17 = vadd.f32 %v2910_v50, %v535_v12 }
  0xbe   : > { %v2454_v18 = vpack.c.bf16 %v920_v13, %v919_v6  ;;  %v795_v19 = vmul.f32 0.01, %v667_v14 }
  0xbf   : > { %v922_v20 = vmax.f32 %v666_v10, %v794_v15  ;;  %v796_v21 = vmul.f32 0.01, %v668_v17 }
  0xc0   : > { %2589 = vst [vmem:[%s2680_s22 + $0x1e8] sm:$0xff] %v2454_v18   ;;  %v923_v22 = vmax.f32 %v667_v14, %v795_v19 }
  0xc1   : > { %v2459_v23 = vpack.c.bf16 %v922_v20, %v921_v16  ;;  %v924_v24 = vmax.f32 %v668_v17, %v796_v21 }
  0xc3   : > { %2590 = vst [vmem:[%s2680_s22 + $0x1f0] sm:$0xff] %v2459_v23   ;;  %v2464_v25 = vpack.c.bf16 %v924_v24, %v923_v22 }
  0xc5   : > { %2591 = vst [vmem:[%s2680_s22 + $0x1f8] sm:$0xff] %v2464_v25  }
  0xc6 PF: > { %s12_s9 = sadd.s32 1, %s2608_s9  }
  0xc7   : > { %p9_p4 = scmp.ge.s32.totalorder %s12_s9, 6  }
  0xc9   :  { %11 = sbr.rel (!%p9_p4) target bundleno = 1 (0x1), region = 58 }

// kernel: spatio_temporal_conv_forward.4
= control target key start
LH: loop header
LB: loop body
LE: loop exit
PB: predicated region body
PF: predicated region fallthrough
CT: control target
= control target key end

     0   :  { %s3521_s15 = smov 0   ;;  %s4507_s0 = inlined_call_operand.vmem [shape: bf16[4096,128], index: 0, kind: input, shape index: {}]   ;;  %s4508_s1 = inlined_call_operand.vmem [shape: bf16[128,128], index: 1, kind: input, shape index: {}]   ;;  %s4509_s2 = inlined_call_operand.vmem [shape: f32[2,128], index: 2, kind: input, shape index: {}]   ;;  %s4510_s3 = inlined_call_operand.vmem [shape: bf16[4096,128], index: 3, kind: output, shape index: {0}]   ;;  %s4511_s4 = inlined_call_operand.vmem [shape: f32[2,128], index: 4, kind: output, shape index: {1}]  }
   0x1 LB: > { %s3527_s16 = sadd.s32 4294967295, %s3493_s15   ;;  %p2452_p0 = scmp.ge.s32.totalorder %s3493_s15, 1  ;;  %s3493_s15 = sphi %s3521_s15, %s15_s15  }
   0x2   : > { %p161_p1 = scmp.lt.s32.totalorder %s3493_s15, 5 }
   0x4   : > { %p162_p2 = pnand %p2452_p0, %p161_p1 }
   0x6   : > { %165 = sbr.rel (%p162_p2) target bundleno = 687 (0x2af), region = 32 }
   0xb   : > { %v3413_v0 = vld [vmem:[%s4508_s1 + $0x38] sm:$0xff]   ;;  %s2453_s19 = sshll.u32 %s3527_s16, 7  ;;  %v3414_v1 = vld [vmem:[%s4508_s1 + $0x30] sm:$0xff]   ;;  %v3415_v2 = vld [vmem:[%s4508_s1 + $0x28] sm:$0xff]   ;;  %p2657_p4 = scmp.ne.s32.totalorder %s3527_s16, 0 }
   0xc   : > { %p188_p3 = scmp.lt.s32.totalorder %s2453_s19, 511  ;;  %3244 = vmatprep.subr.bf16.mxu0 %v3413_v0  ;;  %3388 = vmatprep.subr.bf16.mxu1 %v3413_v0  ;;  %v3416_v3 = vld [vmem:[%s4508_s1 + $0x20] sm:$0xff]   ;;  %v3417_v6 = vld [vmem:[%s4508_s1 + $0x18] sm:$0xff]   ;;  %v3418_v7 = vld [vmem:[%s4508_s1 + $0x10] sm:$0xff]  }
   0xd   : > { %3245 = vmatpush3.bf16.msra.mxu0 %v3413_v0  ;;  %3396 = vmatpush3.bf16.msra.mxu1 %v3413_v0  ;;  %v3419_v8 = vld [vmem:[%s4508_s1 + $0x8] sm:$0xff]   ;;  %v3420_v9 = vld [vmem:[%s4508_s1] sm:$0xff]  }
   0xe   : > { %s4817_s19 = smov (!%p188_p3, %s2453_s19), 511  ;;  %3246 = vmatprep.subr.bf16.mxu0 %v3414_v1  ;;  %3389 = vmatprep.subr.bf16.mxu1 %v3414_v1 }
   0xf   : > { %s2454_s24 = sshll.u32 %s4817_s19, 2 }
  0x10   : > { %s3549_s27 = scalar_lea.vmem %s4507_s0, %s2454_s24  ;;  %s3643_s14 = scalar_lea.vmem %s4510_s3, %s2454_s24 }
  0x11   : > { %3247 = vmatpush3.bf16.msra.mxu0 %v3414_v1  ;;  %3397 = vmatpush3.bf16.msra.mxu1 %v3414_v1  ;;  %v3421_v4 = vld [vmem:[%s3549_s27] sm:$0xff]   ;;  %v3423_v10 = vld [vmem:[%s3549_s27 + $0x8] sm:$0xff]   ;;  %v3425_v12 = vld [vmem:[%s3549_s27 + $0x10] sm:$0xff]  }
  0x12   : > { %3248 = vmatprep.subr.bf16.mxu0 %v3415_v2  ;;  %3390 = vmatprep.subr.bf16.mxu1 %v3415_v2  ;;  %v3422_v5 = vld [vmem:[%s3549_s27 + $0x100] sm:$0xff]   ;;  %v3424_v11 = vld [vmem:[%s3549_s27 + $0x108] sm:$0xff]   ;;  %v3426_v13 = vld [vmem:[%s3549_s27 + $0x110] sm:$0xff]  }
  0x13   : > { %3260 = vmatprep.mubr.bf16.mxu0 %v3421_v4  ;;  %3324 = vmatprep.mubr.bf16.mxu1 %v3422_v5  ;;  %v3427_v14 = vld [vmem:[%s3549_s27 + $0x18] sm:$0xff]   ;;  %v3429_v16 = vld [vmem:[%s3549_s27 + $0x20] sm:$0xff]   ;;  %v3431_v18 = vld [vmem:[%s3549_s27 + $0x28] sm:$0xff]  }
  0x14   : > { %v3428_v15 = vld [vmem:[%s3549_s27 + $0x118] sm:$0xff]   ;;  %v3430_v17 = vld [vmem:[%s3549_s27 + $0x120] sm:$0xff]   ;;  %v3432_v19 = vld [vmem:[%s3549_s27 + $0x128] sm:$0xff]  }
  0x15   : > { %3249 = vmatpush3.bf16.msra.mxu0 %v3415_v2  ;;  %3398 = vmatpush3.bf16.msra.mxu1 %v3415_v2  ;;  %v3433_v20 = vld [vmem:[%s3549_s27 + $0x30] sm:$0xff]   ;;  %v3435_v22 = vld [vmem:[%s3549_s27 + $0x38] sm:$0xff]   ;;  %v3437_v24 = vld [vmem:[%s3549_s27 + $0x40] sm:$0xff]  }
  0x16   : > { %3250 = vmatprep.subr.bf16.mxu0 %v3416_v3  ;;  %3391 = vmatprep.subr.bf16.mxu1 %v3416_v3  ;;  %v3434_v21 = vld [vmem:[%s3549_s27 + $0x130] sm:$0xff]   ;;  %v3436_v23 = vld [vmem:[%s3549_s27 + $0x138] sm:$0xff]   ;;  %v3438_v25 = vld [vmem:[%s3549_s27 + $0x140] sm:$0xff]  }
  0x17   : > { %v3439_v26 = vld [vmem:[%s3549_s27 + $0x48] sm:$0xff]   ;;  %v3441_v28 = vld [vmem:[%s3549_s27 + $0x50] sm:$0xff]   ;;  %v3443_v30 = vld [vmem:[%s3549_s27 + $0x58] sm:$0xff]  }
  0x18   : > { %v3440_v27 = vld [vmem:[%s3549_s27 + $0x148] sm:$0xff]   ;;  %v3442_v29 = vld [vmem:[%s3549_s27 + $0x150] sm:$0xff]   ;;  %v3444_v31 = vld [vmem:[%s3549_s27 + $0x158] sm:$0xff]  }
  0x19   : > { %3251 = vmatpush3.bf16.msra.mxu0 %v3416_v3  ;;  %3399 = vmatpush3.bf16.msra.mxu1 %v3416_v3  ;;  %v3445_v32 = vld [vmem:[%s3549_s27 + $0x60] sm:$0xff]   ;;  %v3447_v34 = vld [vmem:[%s3549_s27 + $0x68] sm:$0xff]   ;;  %v3449_v36 = vld [vmem:[%s3549_s27 + $0x70] sm:$0xff]  }
  0x1a   : > { %3252 = vmatprep.subr.bf16.mxu0 %v3417_v6  ;;  %3392 = vmatprep.subr.bf16.mxu1 %v3417_v6  ;;  %v3446_v33 = vld [vmem:[%s3549_s27 + $0x160] sm:$0xff]   ;;  %v3448_v35 = vld [vmem:[%s3549_s27 + $0x168] sm:$0xff]   ;;  %v3450_v37 = vld [vmem:[%s3549_s27 + $0x170] sm:$0xff]  }
  0x1b   : > { %v3451_v38 = vld [vmem:[%s3549_s27 + $0x78] sm:$0xff]   ;;  %v3453_v40 = vld [vmem:[%s3549_s27 + $0x80] sm:$0xff]   ;;  %v3455_v42 = vld [vmem:[%s3549_s27 + $0x88] sm:$0xff]  }
  0x1c   : > { %v3452_v39 = vld [vmem:[%s3549_s27 + $0x178] sm:$0xff]   ;;  %v3454_v41 = vld [vmem:[%s3549_s27 + $0x180] sm:$0xff]   ;;  %v3456_v43 = vld [vmem:[%s3549_s27 + $0x188] sm:$0xff]  }
  0x1d   : > { %3253 = vmatpush3.bf16.msra.mxu0 %v3417_v6  ;;  %3400 = vmatpush3.bf16.msra.mxu1 %v3417_v6  ;;  %v3457_v44 = vld [vmem:[%s3549_s27 + $0x90] sm:$0xff]   ;;  %v3459_v46 = vld [vmem:[%s3549_s27 + $0x98] sm:$0xff]   ;;  %v3461_v48 = vld [vmem:[%s3549_s27 + $0xa0] sm:$0xff]  }
  0x1e   : > { %3254 = vmatprep.subr.bf16.mxu0 %v3418_v7  ;;  %3393 = vmatprep.subr.bf16.mxu1 %v3418_v7  ;;  %v3458_v45 = vld [vmem:[%s3549_s27 + $0x190] sm:$0xff]   ;;  %v3460_v47 = vld [vmem:[%s3549_s27 + $0x198] sm:$0xff]   ;;  %v3462_v49 = vld [vmem:[%s3549_s27 + $0x1a0] sm:$0xff]  }
  0x1f   : > { %v3463_v50 = vld [vmem:[%s3549_s27 + $0xa8] sm:$0xff]   ;;  %v3465_v52 = vld [vmem:[%s3549_s27 + $0xb0] sm:$0xff]   ;;  %v3467_v54 = vld [vmem:[%s3549_s27 + $0xb8] sm:$0xff]  }
  0x20   : > { %v3464_v51 = vld [vmem:[%s3549_s27 + $0x1a8] sm:$0xff]   ;;  %v3466_v53 = vld [vmem:[%s3549_s27 + $0x1b0] sm:$0xff]   ;;  %v3468_v55 = vld [vmem:[%s3549_s27 + $0x1b8] sm:$0xff]  }
  0x21   : > { %3255 = vmatpush3.bf16.msra.mxu0 %v3418_v7  ;;  %3401 = vmatpush3.bf16.msra.mxu1 %v3418_v7  ;;  %v3469_v56 = vld [vmem:[%s3549_s27 + $0xc0] sm:$0xff]   ;;  %v3471_v58 = vld [vmem:[%s3549_s27 + $0xc8] sm:$0xff]   ;;  %v3473_v60 = vld [vmem:[%s3549_s27 + $0xd0] sm:$0xff]  }
  0x22   : > { %3256 = vmatprep.subr.bf16.mxu0 %v3419_v8  ;;  %3394 = vmatprep.subr.bf16.mxu1 %v3419_v8  ;;  %v3470_v57 = vld [vmem:[%s3549_s27 + $0x1c0] sm:$0xff]   ;;  %v3472_v59 = vld [vmem:[%s3549_s27 + $0x1c8] sm:$0xff]   ;;  %v3474_v61 = vld [vmem:[%s3549_s27 + $0x1d0] sm:$0xff]  }
  0x23   : > { %v3475_v62 = vld [vmem:[%s3549_s27 + $0xd8] sm:$0xff]   ;;  %v3477_v0 = vld [vmem:[%s3549_s27 + $0xe0] sm:$0xff]   ;;  %v3479_v2 = vld [vmem:[%s3549_s27 + $0xe8] sm:$0xff]  }
  0x24   : > { %v3476_v63 = vld [vmem:[%s3549_s27 + $0x1d8] sm:$0xff]   ;;  %v3478_v1 = vld [vmem:[%s3549_s27 + $0x1e0] sm:$0xff]   ;;  %v3480_v3 = vld [vmem:[%s3549_s27 + $0x1e8] sm:$0xff]  }
  0x25   : > { %3257 = vmatpush3.bf16.msra.mxu0 %v3419_v8  ;;  %3402 = vmatpush3.bf16.msra.mxu1 %v3419_v8  ;;  %v3481_v4 = vld [vmem:[%s3549_s27 + $0xf0] sm:$0xff]   ;;  %v3483_v6 = vld [vmem:[%s3549_s27 + $0xf8] sm:$0xff]  }
  0x26   : > { %3258 = vmatprep.subr.bf16.mxu0 %v3420_v9  ;;  %3395 = vmatprep.subr.bf16.mxu1 %v3420_v9  ;;  %v3482_v5 = vld [vmem:[%s3549_s27 + $0x1f0] sm:$0xff]   ;;  %v3484_v7 = vld [vmem:[%s3549_s27 + $0x1f8] sm:$0xff]  }
  0x29   : > { %3259 = vmatpush3.bf16.msra.mxu0 %v3420_v9  ;;  %3403 = vmatpush3.bf16.msra.mxu1 %v3420_v9 }
  0x2c   : > { %3261 = vmatmul.mubr.bf16.vlgmr.msra.gmra.mxu0 %v3423_v10  ;;  %3325 = vmatmul.mubr.bf16.vlgmr.msra.gmra.mxu1 %v3424_v11 }
  0x2d   : > { %3264 = vmatprep.mubr.bf16.mxu0 %v3425_v12  ;;  %3328 = vmatprep.mubr.bf16.mxu1 %v3426_v13 }
  0x34   : > { %3265 = vmatmul.mubr.bf16.gmra.mxu0 %v3427_v14  ;;  %3329 = vmatmul.mubr.bf16.gmra.mxu1 %v3428_v15 }
  0x35   : > { %3268 = vmatprep.mubr.bf16.mxu0 %v3429_v16  ;;  %3332 = vmatprep.mubr.bf16.mxu1 %v3430_v17 }
  0x3c   : > { %3269 = vmatmul.mubr.bf16.gmra.mxu0 %v3431_v18  ;;  %3333 = vmatmul.mubr.bf16.gmra.mxu1 %v3432_v19 }
  0x3d   : > { %3272 = vmatprep.mubr.bf16.mxu0 %v3433_v20  ;;  %3336 = vmatprep.mubr.bf16.mxu1 %v3434_v21 }
  0x44   : > { %3273 = vmatmul.mubr.bf16.gmra.mxu0 %v3435_v22  ;;  %3337 = vmatmul.mubr.bf16.gmra.mxu1 %v3436_v23 }
  0x45   : > { %3276 = vmatprep.mubr.bf16.mxu0 %v3437_v24  ;;  %3340 = vmatprep.mubr.bf16.mxu1 %v3438_v25 }
  0x4c   : > { %3277 = vmatmul.mubr.bf16.gmra.mxu0 %v3439_v26  ;;  %3341 = vmatmul.mubr.bf16.gmra.mxu1 %v3440_v27 }
  0x4d   : > { %3280 = vmatprep.mubr.bf16.mxu0 %v3441_v28  ;;  %3344 = vmatprep.mubr.bf16.mxu1 %v3442_v29 }
  0x54   : > { %3281 = vmatmul.mubr.bf16.gmra.mxu0 %v3443_v30  ;;  %3345 = vmatmul.mubr.bf16.gmra.mxu1 %v3444_v31 }
  0x55   : > { %3284 = vmatprep.mubr.bf16.mxu0 %v3445_v32  ;;  %3348 = vmatprep.mubr.bf16.mxu1 %v3446_v33 }
  0x5c   : > { %3285 = vmatmul.mubr.bf16.gmra.mxu0 %v3447_v34  ;;  %3349 = vmatmul.mubr.bf16.gmra.mxu1 %v3448_v35 }
  0x5d   : > { %3288 = vmatprep.mubr.bf16.mxu0 %v3449_v36  ;;  %3352 = vmatprep.mubr.bf16.mxu1 %v3450_v37 }
  0x64   : > { %3289 = vmatmul.mubr.bf16.gmra.mxu0 %v3451_v38  ;;  %3353 = vmatmul.mubr.bf16.gmra.mxu1 %v3452_v39 }
  0x65   : > { %3292 = vmatprep.mubr.bf16.mxu0 %v3453_v40  ;;  %3356 = vmatprep.mubr.bf16.mxu1 %v3454_v41 }
  0x6c   : > { %3293 = vmatmul.mubr.bf16.gmra.mxu0 %v3455_v42  ;;  %3357 = vmatmul.mubr.bf16.gmra.mxu1 %v3456_v43 }
  0x6d   : > { %3296 = vmatprep.mubr.bf16.mxu0 %v3457_v44  ;;  %3360 = vmatprep.mubr.bf16.mxu1 %v3458_v45 }
  0x74   : > { %3297 = vmatmul.mubr.bf16.gmra.mxu0 %v3459_v46  ;;  %3361 = vmatmul.mubr.bf16.gmra.mxu1 %v3460_v47 }
  0x75   : > { %3300 = vmatprep.mubr.bf16.mxu0 %v3461_v48  ;;  %3364 = vmatprep.mubr.bf16.mxu1 %v3462_v49 }
  0x7c   : > { %3301 = vmatmul.mubr.bf16.gmra.mxu0 %v3463_v50  ;;  %3365 = vmatmul.mubr.bf16.gmra.mxu1 %v3464_v51 }
  0x7d   : > { %3304 = vmatprep.mubr.bf16.mxu0 %v3465_v52  ;;  %3368 = vmatprep.mubr.bf16.mxu1 %v3466_v53 }
  0x84   : > { %3305 = vmatmul.mubr.bf16.gmra.mxu0 %v3467_v54  ;;  %3369 = vmatmul.mubr.bf16.gmra.mxu1 %v3468_v55 }
  0x85   : > { %3308 = vmatprep.mubr.bf16.mxu0 %v3469_v56  ;;  %3372 = vmatprep.mubr.bf16.mxu1 %v3470_v57 }
  0x8c   : > { %3309 = vmatmul.mubr.bf16.gmra.mxu0 %v3471_v58  ;;  %3373 = vmatmul.mubr.bf16.gmra.mxu1 %v3472_v59 }
  0x8d   : > { %3312 = vmatprep.mubr.bf16.mxu0 %v3473_v60  ;;  %3376 = vmatprep.mubr.bf16.mxu1 %v3474_v61 }
  0x94   : > { %3313 = vmatmul.mubr.bf16.gmra.mxu0 %v3475_v62  ;;  %3377 = vmatmul.mubr.bf16.gmra.mxu1 %v3476_v63 }
  0x95   : > { %3316 = vmatprep.mubr.bf16.mxu0 %v3477_v0  ;;  %3380 = vmatprep.mubr.bf16.mxu1 %v3478_v1 }
  0x9c   : > { %3317 = vmatmul.mubr.bf16.gmra.mxu0 %v3479_v2  ;;  %3381 = vmatmul.mubr.bf16.gmra.mxu1 %v3480_v3 }
  0x9d   : > { %3320 = vmatprep.mubr.bf16.mxu0 %v3481_v4  ;;  %3384 = vmatprep.mubr.bf16.mxu1 %v3482_v5 }
  0xa4   : > { %3321 = vmatmul.mubr.bf16.gmra.mxu0 %v3483_v6  ;;  %3385 = vmatmul.mubr.bf16.gmra.mxu1 %v3484_v7 }
  0xec   : > { %v3630_v8 = vpop.f32.mrf.mxu0  ;;  %v3632_v9 = vpop.f32.mrf.mxu1 }
  0xed   : > { %4664 = vst [vmem:[#allocation2_spill] sm:$0xff] %v3632_v9 }
  0xee   : > { %v3634_v10 = vpop.f32.mrf.mxu0  ;;  %v3636_v11 = vpop.f32.mrf.mxu1 }
  0xef   : > { %4665 = vst [vmem:[#allocation3_spill] sm:$0xff] %v3636_v11 }
  0xf0   : > { %v3645_v12 = vpop.f32.mrf.mxu0  ;;  %v3647_v13 = vpop.f32.mrf.mxu1 }
  0xf1   : > { %4666 = vst [vmem:[#allocation4_spill] sm:$0xff] %v3647_v13  ;;  %v2797_v14 = vpack.c.bf16 %v3645_v12, %v3630_v8  ;;  %v2957_v15 = vpack.c.bf16 %v3647_v13, %v3632_v9 }
  0xf2   : > { %v3653_v16 = vpop.f32.mrf.mxu0  ;;  %v3655_v17 = vpop.f32.mrf.mxu1 }
  0xf3   : > { %4667 = vst [vmem:[#allocation5_spill] sm:$0xff] %v3655_v17  ;;  %3109 = vst [vmem:[%s3643_s14 + $0x8] sm:$0xff] %v2797_v14   ;;  %v2792_v18 = vpack.c.bf16 %v3653_v16, %v3634_v10  ;;  %v2952_v19 = vpack.c.bf16 %v3655_v17, %v3636_v11 }
  0xf4   : > { %3141 = vst [vmem:[%s3643_s14 + $0x108] sm:$0xff] %v2957_v15   ;;  %v3663_v20 = vpop.f32.mrf.mxu0  ;;  %v3665_v21 = vpop.f32.mrf.mxu1 }
  0xf5   : > { %4668 = vst [vmem:[#allocation6_spill] sm:$0xff] %v3665_v21  ;;  %2793 = vst [vmem:[%s3643_s14] sm:$0xff] %v2792_v18  }
  0xf6   : > { %3140 = vst [vmem:[%s3643_s14 + $0x100] sm:$0xff] %v2952_v19   ;;  %v3669_v22 = vpop.f32.mrf.mxu0  ;;  %v3671_v23 = vpop.f32.mrf.mxu1 }
  0xf7   : > { %4669 = vst [vmem:[#allocation7_spill] sm:$0xff] %v3671_v23 }
  0xf8   : > { %v3673_v24 = vpop.f32.mrf.mxu0  ;;  %v3675_v25 = vpop.f32.mrf.mxu1 }
  0xf9   : > { %4670 = vst [vmem:[#allocation8_spill] sm:$0xff] %v3675_v25  ;;  %v2807_v26 = vpack.c.bf16 %v3673_v24, %v3663_v20  ;;  %v2967_v27 = vpack.c.bf16 %v3675_v25, %v3665_v21 }
  0xfa   : > { %v3681_v28 = vpop.f32.mrf.mxu0  ;;  %v3683_v29 = vpop.f32.mrf.mxu1 }
  0xfb   : > { %4671 = vst [vmem:[#allocation9_spill] sm:$0xff] %v3683_v29  ;;  %3111 = vst [vmem:[%s3643_s14 + $0x18] sm:$0xff] %v2807_v26   ;;  %v2802_v30 = vpack.c.bf16 %v3681_v28, %v3669_v22  ;;  %v2962_v31 = vpack.c.bf16 %v3683_v29, %v3671_v23 }
  0xfc   : > { %3143 = vst [vmem:[%s3643_s14 + $0x118] sm:$0xff] %v2967_v27   ;;  %v3691_v32 = vpop.f32.mrf.mxu0  ;;  %v3693_v33 = vpop.f32.mrf.mxu1 }
  0xfd   : > { %4672 = vst [vmem:[#allocation10_spill] sm:$0xff] %v3693_v33  ;;  %3110 = vst [vmem:[%s3643_s14 + $0x10] sm:$0xff] %v2802_v30  }
  0xfe   : > { %3142 = vst [vmem:[%s3643_s14 + $0x110] sm:$0xff] %v2962_v31   ;;  %v3697_v34 = vpop.f32.mrf.mxu0  ;;  %v3699_v35 = vpop.f32.mrf.mxu1 }
  0xff   : > { %4673 = vst [vmem:[#allocation11_spill] sm:$0xff] %v3699_v35 }
 0x100   : > { %v3701_v36 = vpop.f32.mrf.mxu0  ;;  %v3703_v37 = vpop.f32.mrf.mxu1 }
 0x101   : > { %4674 = vst [vmem:[#allocation12_spill] sm:$0xff] %v3703_v37  ;;  %v2817_v38 = vpack.c.bf16 %v3701_v36, %v3691_v32  ;;  %v2977_v39 = vpack.c.bf16 %v3703_v37, %v3693_v33 }
 0x102   : > { %v3709_v40 = vpop.f32.mrf.mxu0  ;;  %v3711_v41 = vpop.f32.mrf.mxu1 }
 0x103   : > { %4675 = vst [vmem:[#allocation13_spill] sm:$0xff] %v3711_v41  ;;  %3113 = vst [vmem:[%s3643_s14 + $0x28] sm:$0xff] %v2817_v38   ;;  %v2812_v42 = vpack.c.bf16 %v3709_v40, %v3697_v34  ;;  %v2972_v43 = vpack.c.bf16 %v3711_v41, %v3699_v35 }
 0x104   : > { %3145 = vst [vmem:[%s3643_s14 + $0x128] sm:$0xff] %v2977_v39   ;;  %v3719_v44 = vpop.f32.mrf.mxu0  ;;  %v3721_v45 = vpop.f32.mrf.mxu1 }
 0x105   : > { %4676 = vst [vmem:[#allocation14_spill] sm:$0xff] %v3721_v45  ;;  %3112 = vst [vmem:[%s3643_s14 + $0x20] sm:$0xff] %v2812_v42  }
 0x106   : > { %3144 = vst [vmem:[%s3643_s14 + $0x120] sm:$0xff] %v2972_v43   ;;  %v3725_v46 = vpop.f32.mrf.mxu0  ;;  %v3727_v47 = vpop.f32.mrf.mxu1 }
 0x107   : > { %4677 = vst [vmem:[#allocation15_spill] sm:$0xff] %v3727_v47 }
 0x108   : > { %v3729_v48 = vpop.f32.mrf.mxu0  ;;  %v3731_v49 = vpop.f32.mrf.mxu1 }
 0x109   : > { %4678 = vst [vmem:[#allocation16_spill] sm:$0xff] %v3731_v49  ;;  %v2827_v50 = vpack.c.bf16 %v3729_v48, %v3719_v44  ;;  %v2987_v51 = vpack.c.bf16 %v3731_v49, %v3721_v45 }
 0x10a   : > { %v3737_v52 = vpop.f32.mrf.mxu0  ;;  %v3739_v53 = vpop.f32.mrf.mxu1 }
 0x10b   : > { %4679 = vst [vmem:[#allocation17_spill] sm:$0xff] %v3739_v53  ;;  %3115 = vst [vmem:[%s3643_s14 + $0x38] sm:$0xff] %v2827_v50   ;;  %v2822_v54 = vpack.c.bf16 %v3737_v52, %v3725_v46  ;;  %v2982_v55 = vpack.c.bf16 %v3739_v53, %v3727_v47 }
 0x10c   : > { %3147 = vst [vmem:[%s3643_s14 + $0x138] sm:$0xff] %v2987_v51   ;;  %v3747_v56 = vpop.f32.mrf.mxu0  ;;  %v3749_v57 = vpop.f32.mrf.mxu1 }
 0x10d   : > { %4680 = vst [vmem:[#allocation18_spill] sm:$0xff] %v3749_v57  ;;  %3114 = vst [vmem:[%s3643_s14 + $0x30] sm:$0xff] %v2822_v54  }
 0x10e   : > { %3146 = vst [vmem:[%s3643_s14 + $0x130] sm:$0xff] %v2982_v55   ;;  %v3753_v58 = vpop.f32.mrf.mxu0  ;;  %v3755_v59 = vpop.f32.mrf.mxu1 }
 0x10f   : > { %4681 = vst [vmem:[#allocation19_spill] sm:$0xff] %v3755_v59 }
 0x110   : > { %v3757_v60 = vpop.f32.mrf.mxu0  ;;  %v3759_v61 = vpop.f32.mrf.mxu1 }
 0x111   : > { %4682 = vst [vmem:[#allocation20_spill] sm:$0xff] %v3759_v61  ;;  %v2837_v62 = vpack.c.bf16 %v3757_v60, %v3747_v56  ;;  %v2997_v63 = vpack.c.bf16 %v3759_v61, %v3749_v57 }
 0x112   : > { %v3765_v0 = vpop.f32.mrf.mxu0  ;;  %v3767_v1 = vpop.f32.mrf.mxu1 }
 0x113   : > { %4683 = vst [vmem:[#allocation21_spill] sm:$0xff] %v3767_v1  ;;  %3117 = vst [vmem:[%s3643_s14 + $0x48] sm:$0xff] %v2837_v62   ;;  %v2832_v2 = vpack.c.bf16 %v3765_v0, %v3753_v58  ;;  %v2992_v3 = vpack.c.bf16 %v3767_v1, %v3755_v59 }
 0x114   : > { %3149 = vst [vmem:[%s3643_s14 + $0x148] sm:$0xff] %v2997_v63   ;;  %v3775_v4 = vpop.f32.mrf.mxu0  ;;  %v3777_v5 = vpop.f32.mrf.mxu1 }
 0x115   : > { %4684 = vst [vmem:[#allocation22_spill] sm:$0xff] %v3777_v5  ;;  %3116 = vst [vmem:[%s3643_s14 + $0x40] sm:$0xff] %v2832_v2  }
 0x116   : > { %3148 = vst [vmem:[%s3643_s14 + $0x140] sm:$0xff] %v2992_v3   ;;  %v3781_v6 = vpop.f32.mrf.mxu0  ;;  %v3783_v7 = vpop.f32.mrf.mxu1 }
 0x117   : > { %4685 = vst [vmem:[#allocation23_spill] sm:$0xff] %v3783_v7 }
 0x118   : > { %v3785_v14 = vpop.f32.mrf.mxu0  ;;  %v3787_v15 = vpop.f32.mrf.mxu1 }
 0x119   : > { %4686 = vst [vmem:[#allocation24_spill] sm:$0xff] %v3787_v15  ;;  %v2847_v18 = vpack.c.bf16 %v3785_v14, %v3775_v4  ;;  %v3007_v19 = vpack.c.bf16 %v3787_v15, %v3777_v5 }
 0x11a   : > { %v3793_v26 = vpop.f32.mrf.mxu0  ;;  %v3795_v27 = vpop.f32.mrf.mxu1 }
 0x11b   : > { %4687 = vst [vmem:[#allocation25_spill] sm:$0xff] %v3795_v27  ;;  %3119 = vst [vmem:[%s3643_s14 + $0x58] sm:$0xff] %v2847_v18   ;;  %v2842_v30 = vpack.c.bf16 %v3793_v26, %v3781_v6  ;;  %v3002_v31 = vpack.c.bf16 %v3795_v27, %v3783_v7 }
 0x11c   : > { %3151 = vst [vmem:[%s3643_s14 + $0x158] sm:$0xff] %v3007_v19   ;;  %v3803_v38 = vpop.f32.mrf.mxu0  ;;  %v3805_v39 = vpop.f32.mrf.mxu1 }
 0x11d   : > { %4688 = vst [vmem:[#allocation26_spill] sm:$0xff] %v3805_v39  ;;  %3118 = vst [vmem:[%s3643_s14 + $0x50] sm:$0xff] %v2842_v30  }
 0x11e   : > { %3150 = vst [vmem:[%s3643_s14 + $0x150] sm:$0xff] %v3002_v31   ;;  %v3809_v42 = vpop.f32.mrf.mxu0  ;;  %v3811_v43 = vpop.f32.mrf.mxu1 }
 0x11f   : > { %4689 = vst [vmem:[#allocation27_spill] sm:$0xff] %v3811_v43 }
 0x120   : > { %v3813_v50 = vpop.f32.mrf.mxu0  ;;  %v3815_v51 = vpop.f32.mrf.mxu1 }
 0x121   : > { %4690 = vst [vmem:[#allocation28_spill] sm:$0xff] %v3815_v51  ;;  %v2857_v54 = vpack.c.bf16 %v3813_v50, %v3803_v38  ;;  %v3017_v55 = vpack.c.bf16 %v3815_v51, %v3805_v39 }
 0x122   : > { %v3821_v62 = vpop.f32.mrf.mxu0  ;;  %v3823_v63 = vpop.f32.mrf.mxu1 }
 0x123   : > { %4691 = vst [vmem:[#allocation29_spill] sm:$0xff] %v3823_v63  ;;  %3121 = vst [vmem:[%s3643_s14 + $0x68] sm:$0xff] %v2857_v54   ;;  %v2852_v2 = vpack.c.bf16 %v3821_v62, %v3809_v42  ;;  %v3012_v3 = vpack.c.bf16 %v3823_v63, %v3811_v43 }
 0x124   : > { %3153 = vst [vmem:[%s3643_s14 + $0x168] sm:$0xff] %v3017_v55   ;;  %v3831_v18 = vpop.f32.mrf.mxu0  ;;  %v3833_v19 = vpop.f32.mrf.mxu1 }
 0x125   : > { %4692 = vst [vmem:[#allocation30_spill] sm:$0xff] %v3833_v19  ;;  %3120 = vst [vmem:[%s3643_s14 + $0x60] sm:$0xff] %v2852_v2  }
 0x126   : > { %3152 = vst [vmem:[%s3643_s14 + $0x160] sm:$0xff] %v3012_v3   ;;  %v3837_v30 = vpop.f32.mrf.mxu0  ;;  %v3839_v31 = vpop.f32.mrf.mxu1 }
 0x127   : > { %4693 = vst [vmem:[#allocation31_spill] sm:$0xff] %v3839_v31 }
 0x128   : > { %v3841_v54 = vpop.f32.mrf.mxu0  ;;  %v3843_v55 = vpop.f32.mrf.mxu1 }
 0x129   : > { %4694 = vst [vmem:[#allocation32_spill] sm:$0xff] %v3843_v55  ;;  %v2867_v51 = vpack.c.bf16 %v3841_v54, %v3831_v18  ;;  %v3027_v39 = vpack.c.bf16 %v3843_v55, %v3833_v19 }
 0x12a   : > { %v3849_v63 = vpop.f32.mrf.mxu0  ;;  %v3851_v2 = vpop.f32.mrf.mxu1 }
 0x12b   : > { %4695 = vst [vmem:[#allocation33_spill] sm:$0xff] %v3851_v2  ;;  %3123 = vst [vmem:[%s3643_s14 + $0x78] sm:$0xff] %v2867_v51   ;;  %v2862_v3 = vpack.c.bf16 %v3849_v63, %v3837_v30  ;;  %v3022_v43 = vpack.c.bf16 %v3851_v2, %v3839_v31 }
 0x12c   : > { %3155 = vst [vmem:[%s3643_s14 + $0x178] sm:$0xff] %v3027_v39   ;;  %v3859_v15 = vpop.f32.mrf.mxu0  ;;  %v3861_v5 = vpop.f32.mrf.mxu1 }
 0x12d   : > { %4696 = vst [vmem:[#allocation34_spill] sm:$0xff] %v3861_v5  ;;  %3122 = vst [vmem:[%s3643_s14 + $0x70] sm:$0xff] %v2862_v3  }
 0x12e   : > { %3154 = vst [vmem:[%s3643_s14 + $0x170] sm:$0xff] %v3022_v43   ;;  %v3865_v55 = vpop.f32.mrf.mxu0  ;;  %v3867_v51 = vpop.f32.mrf.mxu1 }
 0x12f   : > { %4697 = vst [vmem:[#allocation35_spill] sm:$0xff] %v3867_v51 }
 0x130   : > { %v3869_v39 = vpop.f32.mrf.mxu0  ;;  %v3871_v19 = vpop.f32.mrf.mxu1 }
 0x131   : > { %4698 = vst [vmem:[#allocation36_spill] sm:$0xff] %v3871_v19  ;;  %v2877_v27 = vpack.c.bf16 %v3869_v39, %v3859_v15  ;;  %v3037_v2 = vpack.c.bf16 %v3871_v19, %v3861_v5 }
 0x132   : > { %v3877_v31 = vpop.f32.mrf.mxu0  ;;  %v3879_v3 = vpop.f32.mrf.mxu1 }
 0x133   : > { %4699 = vst [vmem:[#allocation37_spill] sm:$0xff] %v3879_v3  ;;  %3125 = vst [vmem:[%s3643_s14 + $0x88] sm:$0xff] %v2877_v27   ;;  %v2872_v43 = vpack.c.bf16 %v3877_v31, %v3865_v55  ;;  %v3032_v7 = vpack.c.bf16 %v3879_v3, %v3867_v51 }
 0x134   : > { %3157 = vst [vmem:[%s3643_s14 + $0x188] sm:$0xff] %v3037_v2   ;;  %v3887_v61 = vpop.f32.mrf.mxu0  ;;  %v3889_v57 = vpop.f32.mrf.mxu1 }
 0x135   : > { %4700 = vst [vmem:[#allocation38_spill] sm:$0xff] %v3889_v57  ;;  %3124 = vst [vmem:[%s3643_s14 + $0x80] sm:$0xff] %v2872_v43  }
 0x136   : > { %3156 = vst [vmem:[%s3643_s14 + $0x180] sm:$0xff] %v3032_v7   ;;  %v3893_v19 = vpop.f32.mrf.mxu0  ;;  %v3895_v27 = vpop.f32.mrf.mxu1 }
 0x137   : > { %4701 = vst [vmem:[#allocation39_spill] sm:$0xff] %v3895_v27 }
 0x138   : > { %v3897_v2 = vpop.f32.mrf.mxu0  ;;  %v3899_v5 = vpop.f32.mrf.mxu1 }
 0x139   : > { %4702 = vst [vmem:[#allocation40_spill] sm:$0xff] %v3899_v5  ;;  %v2887_v1 = vpack.c.bf16 %v3897_v2, %v3887_v61  ;;  %v3047_v3 = vpack.c.bf16 %v3899_v5, %v3889_v57 }
 0x13a   : > { %v3905_v51 = vpop.f32.mrf.mxu0  ;;  %v3907_v43 = vpop.f32.mrf.mxu1 }
 0x13b   : > { %4703 = vst [vmem:[#allocation41_spill] sm:$0xff] %v3907_v43  ;;  %3127 = vst [vmem:[%s3643_s14 + $0x98] sm:$0xff] %v2887_v1   ;;  %v2882_v7 = vpack.c.bf16 %v3905_v51, %v3893_v19  ;;  %v3042_v59 = vpack.c.bf16 %v3907_v43, %v3895_v27 }
 0x13c   : > { %3159 = vst [vmem:[%s3643_s14 + $0x198] sm:$0xff] %v3047_v3   ;;  %v3915_v49 = vpop.f32.mrf.mxu0  ;;  %v3917_v45 = vpop.f32.mrf.mxu1 }
 0x13d   : > { %4704 = vst [vmem:[#allocation42_spill] sm:$0xff] %v3917_v45  ;;  %3126 = vst [vmem:[%s3643_s14 + $0x90] sm:$0xff] %v2882_v7  }
 0x13e   : > { %3158 = vst [vmem:[%s3643_s14 + $0x190] sm:$0xff] %v3042_v59   ;;  %v3921_v5 = vpop.f32.mrf.mxu0  ;;  %v3923_v1 = vpop.f32.mrf.mxu1 }
 0x13f   : > { %4705 = vst [vmem:[#allocation43_spill] sm:$0xff] %v3923_v1 }
 0x140   : > { %v3925_v3 = vpop.f32.mrf.mxu0  ;;  %v3927_v57 = vpop.f32.mrf.mxu1 }
 0x141   : > { %4706 = vst [vmem:[#allocation44_spill] sm:$0xff] %v3927_v57  ;;  %v2897_v53 = vpack.c.bf16 %v3925_v3, %v3915_v49  ;;  %v3057_v43 = vpack.c.bf16 %v3927_v57, %v3917_v45 }
 0x142   : > { %v3933_v27 = vpop.f32.mrf.mxu0  ;;  %v3935_v7 = vpop.f32.mrf.mxu1 }
 0x143   : > { %4707 = vst [vmem:[#allocation45_spill] sm:$0xff] %v3935_v7  ;;  %3129 = vst [vmem:[%s3643_s14 + $0xa8] sm:$0xff] %v2897_v53   ;;  %v2892_v59 = vpack.c.bf16 %v3933_v27, %v3921_v5  ;;  %v3052_v47 = vpack.c.bf16 %v3935_v7, %v3923_v1 }
 0x144   : > { %3161 = vst [vmem:[%s3643_s14 + $0x1a8] sm:$0xff] %v3057_v43   ;;  %v3943_v37 = vpop.f32.mrf.mxu0  ;;  %v3945_v33 = vpop.f32.mrf.mxu1 }
 0x145   : > { %4708 = vst [vmem:[#allocation46_spill] sm:$0xff] %v3945_v33  ;;  %3128 = vst [vmem:[%s3643_s14 + $0xa0] sm:$0xff] %v2892_v59  }
 0x146   : > { %3160 = vst [vmem:[%s3643_s14 + $0x1a0] sm:$0xff] %v3052_v47   ;;  %v3949_v57 = vpop.f32.mrf.mxu0  ;;  %v3951_v53 = vpop.f32.mrf.mxu1 }
 0x147   : > { %4709 = vst [vmem:[#allocation47_spill] sm:$0xff] %v3951_v53 }
 0x148   : > { %v3953_v43 = vpop.f32.mrf.mxu0  ;;  %v3955_v45 = vpop.f32.mrf.mxu1 }
 0x149   : > { %4710 = vst [vmem:[#allocation48_spill] sm:$0xff] %v3955_v45  ;;  %v2907_v41 = vpack.c.bf16 %v3953_v43, %v3943_v37  ;;  %v3067_v7 = vpack.c.bf16 %v3955_v45, %v3945_v33 }
 0x14a   : > { %v3961_v1 = vpop.f32.mrf.mxu0  ;;  %v3963_v59 = vpop.f32.mrf.mxu1 }
 0x14b   : > { %4711 = vst [vmem:[#allocation49_spill] sm:$0xff] %v3963_v59  ;;  %3131 = vst [vmem:[%s3643_s14 + $0xb8] sm:$0xff] %v2907_v41   ;;  %v2902_v47 = vpack.c.bf16 %v3961_v1, %v3949_v57  ;;  %v3062_v35 = vpack.c.bf16 %v3963_v59, %v3951_v53 }
 0x14c   : > { %3163 = vst [vmem:[%s3643_s14 + $0x1b8] sm:$0xff] %v3067_v7   ;;  %v3971_v25 = vpop.f32.mrf.mxu0  ;;  %v3973_v21 = vpop.f32.mrf.mxu1 }
 0x14d   : > { %4712 = vst [vmem:[#allocation50_spill] sm:$0xff] %v3973_v21  ;;  %3130 = vst [vmem:[%s3643_s14 + $0xb0] sm:$0xff] %v2902_v47  }
 0x14e   : > { %3162 = vst [vmem:[%s3643_s14 + $0x1b0] sm:$0xff] %v3062_v35   ;;  %v3977_v45 = vpop.f32.mrf.mxu0  ;;  %v3979_v41 = vpop.f32.mrf.mxu1 }
 0x14f   : > { %4713 = vst [vmem:[#allocation51_spill] sm:$0xff] %v3979_v41 }
 0x150   : > { %v3981_v7 = vpop.f32.mrf.mxu0  ;;  %v3983_v33 = vpop.f32.mrf.mxu1 }
 0x151   : > { %4714 = vst [vmem:[#allocation52_spill] sm:$0xff] %v3981_v7  ;;  %4715 = vst [vmem:[#allocation53_spill] sm:$0xff] %v3983_v33  ;;  %v2917_v29 = vpack.c.bf16 %v3981_v7, %v3971_v25  ;;  %v3077_v59 = vpack.c.bf16 %v3983_v33, %v3973_v21 }
 0x152   : > { %v3989_v53 = vpop.f32.mrf.mxu0  ;;  %v3991_v47 = vpop.f32.mrf.mxu1 }
 0x153   : > { %4716 = vst [vmem:[#allocation54_spill] sm:$0xff] %v3991_v47  ;;  %3133 = vst [vmem:[%s3643_s14 + $0xc8] sm:$0xff] %v2917_v29   ;;  %v2912_v35 = vpack.c.bf16 %v3989_v53, %v3977_v45  ;;  %v3072_v23 = vpack.c.bf16 %v3991_v47, %v3979_v41 }
 0x154   : > { %3165 = vst [vmem:[%s3643_s14 + $0x1c8] sm:$0xff] %v3077_v59   ;;  %v3999_v13 = vpop.f32.mrf.mxu0  ;;  %v4001_v9 = vpop.f32.mrf.mxu1 }
 0x155   : > { %4717 = vst [vmem:[#allocation55_spill] sm:$0xff] %v3999_v13  ;;  %4718 = vst [vmem:[#allocation56_spill] sm:$0xff] %v4001_v9 }
 0x156   : > { %3132 = vst [vmem:[%s3643_s14 + $0xc0] sm:$0xff] %v2912_v35   ;;  %3164 = vst [vmem:[%s3643_s14 + $0x1c0] sm:$0xff] %v3072_v23   ;;  %v4005_v33 = vpop.f32.mrf.mxu0  ;;  %v4007_v29 = vpop.f32.mrf.mxu1 }
 0x157   : > { %4719 = vst [vmem:[#allocation57_spill] sm:$0xff] %v4005_v33  ;;  %4720 = vst [vmem:[#allocation58_spill] sm:$0xff] %v4007_v29 }
 0x158   : > { %v4009_v59 = vpop.f32.mrf.mxu0  ;;  %v4011_v21 = vpop.f32.mrf.mxu1 }
 0x159   : > { %4721 = vst [vmem:[#allocation59_spill] sm:$0xff] %v4009_v59  ;;  %4722 = vst [vmem:[#allocation60_spill] sm:$0xff] %v4011_v21  ;;  %v2927_v17 = vpack.c.bf16 %v4009_v59, %v3999_v13  ;;  %v3087_v47 = vpack.c.bf16 %v4011_v21, %v4001_v9 }
 0x15a   : > { %v4017_v41 = vpop.f32.mrf.mxu0  ;;  %v4019_v35 = vpop.f32.mrf.mxu1 }
 0x15b   : > { %4723 = vst [vmem:[#allocation61_spill] sm:$0xff] %v4017_v41  ;;  %4724 = vst [vmem:[#allocation62_spill] sm:$0xff] %v4019_v35  ;;  %v2922_v23 = vpack.c.bf16 %v4017_v41, %v4005_v33  ;;  %v3082_v11 = vpack.c.bf16 %v4019_v35, %v4007_v29 }
 0x15c   : > { %3135 = vst [vmem:[%s3643_s14 + $0xd8] sm:$0xff] %v2927_v17   ;;  %3167 = vst [vmem:[%s3643_s14 + $0x1d8] sm:$0xff] %v3087_v47   ;;  %v4027_v7 = vpop.f32.mrf.mxu0  ;;  %v4029_v59 = vpop.f32.mrf.mxu1 }
 0x15d   : > { %4725 = vst [vmem:[#allocation63_spill] sm:$0xff] %v4027_v7  ;;  %4726 = vst [vmem:[#allocation64_spill] sm:$0xff] %v4029_v59 }
 0x15e   : > { %3134 = vst [vmem:[%s3643_s14 + $0xd0] sm:$0xff] %v2922_v23   ;;  %3166 = vst [vmem:[%s3643_s14 + $0x1d0] sm:$0xff] %v3082_v11   ;;  %v4033_v21 = vpop.f32.mrf.mxu0  ;;  %v4035_v17 = vpop.f32.mrf.mxu1 }
 0x15f   : > { %4727 = vst [vmem:[#allocation65_spill] sm:$0xff] %v4035_v17 }
 0x160   : > { %v4037_v47 = vpop.f32.mrf.mxu0  ;;  %v4039_v9 = vpop.f32.mrf.mxu1 }
 0x161   : > { %4728 = vst [vmem:[#allocation66_spill] sm:$0xff] %v4037_v47  ;;  %4729 = vst [vmem:[#allocation67_spill] sm:$0xff] %v4039_v9  ;;  %v2937_v13 = vpack.c.bf16 %v4037_v47, %v4027_v7  ;;  %v3097_v35 = vpack.c.bf16 %v4039_v9, %v4029_v59 }
 0x162   : > { %v4045_v29 = vpop.f32.mrf.mxu0  ;;  %v4047_v23 = vpop.f32.mrf.mxu1 }
 0x163   : > { %4730 = vst [vmem:[#allocation68_spill] sm:$0xff] %v4045_v29  ;;  %4731 = vst [vmem:[#allocation69_spill] sm:$0xff] %v4047_v23  ;;  %v2932_v11 = vpack.c.bf16 %v4045_v29, %v4033_v21  ;;  %v3092_v41 = vpack.c.bf16 %v4047_v23, %v4035_v17 }
 0x164   : > { %3137 = vst [vmem:[%s3643_s14 + $0xe8] sm:$0xff] %v2937_v13   ;;  %3169 = vst [vmem:[%s3643_s14 + $0x1e8] sm:$0xff] %v3097_v35   ;;  %v4055_v33 = vpop.f32.mrf.mxu0  ;;  %v4057_v47 = vpop.f32.mrf.mxu1 }
 0x165   : > { %4732 = vst [vmem:[#allocation70_spill] sm:$0xff] %v4055_v33  ;;  %4733 = vst [vmem:[#allocation71_spill] sm:$0xff] %v4057_v47 }
 0x166   : > { %3136 = vst [vmem:[%s3643_s14 + $0xe0] sm:$0xff] %v2932_v11   ;;  %3168 = vst [vmem:[%s3643_s14 + $0x1e0] sm:$0xff] %v3092_v41   ;;  %v4061_v9 = vpop.f32.mrf.mxu0  ;;  %v4063_v13 = vpop.f32.mrf.mxu1 }
 0x167   : > { %4734 = vst [vmem:[#allocation72_spill] sm:$0xff] %v4061_v9  ;;  %4735 = vst [vmem:[#allocation73_spill] sm:$0xff] %v4063_v13 }
 0x168   : > { %v4065_v35 = vpop.f32.mrf.mxu0  ;;  %v4067_v59 = vpop.f32.mrf.mxu1 }
 0x169   : > { %4736 = vst [vmem:[#allocation74_spill] sm:$0xff] %v4065_v35  ;;  %4737 = vst [vmem:[#allocation75_spill] sm:$0xff] %v4067_v59  ;;  %v2947_v7 = vpack.c.bf16 %v4065_v35, %v4055_v33  ;;  %v3107_v23 = vpack.c.bf16 %v4067_v59, %v4057_v47  ;;  %1964 = sbr.rel (%p2657_p4) target bundleno = 368 (0x170), region = 36 }
 0x16a   : > { %v4073_v17 = vpop.f32.mrf.mxu0  ;;  %v4075_v29 = vpop.f32.mrf.mxu1 }
 0x16b   : > { %4738 = vst [vmem:[#allocation76_spill] sm:$0xff] %v4073_v17  ;;  %4739 = vst [vmem:[#allocation77_spill] sm:$0xff] %v4075_v29  ;;  %v2942_v41 = vpack.c.bf16 %v4073_v17, %v4061_v9  ;;  %v3102_v11 = vpack.c.bf16 %v4075_v29, %v4063_v13 }
 0x16c   : > { %3139 = vst [vmem:[%s3643_s14 + $0xf8] sm:$0xff] %v2947_v7   ;;  %3171 = vst [vmem:[%s3643_s14 + $0x1f8] sm:$0xff] %v3107_v23  }
 0x16d   : > { %3138 = vst [vmem:[%s3643_s14 + $0xf0] sm:$0xff] %v2942_v41   ;;  %3170 = vst [vmem:[%s3643_s14 + $0x1f0] sm:$0xff] %v3102_v11  }
 0x16e   : > { %v3495_v35 = vmov 0.0  }
 0x16f   : > { %1965 = vst [vmem:[%s4511_s4] sm:$0x3] %v3495_v35 }
 0x170 PF: > { %v1967_v7 = vadd.f32 %v3653_v16, %v3634_v10  ;;  %v2103_v33 = vmul.f32 %v3634_v10, %v3634_v10  ;;  %p2658_p5 = scmp.ne.s32.totalorder %s3527_s16, 3 }
 0x172   : > { %v1968_v23 = vadd.f32 %v3630_v8, %v1967_v7  ;;  %v2104_v7 = vmul.f32 %v3653_v16, %v3653_v16  ;;  %v2108_v16 = vmul.f32 %v3681_v28, %v3681_v28 }
 0x174   : > { %v1969_v59 = vadd.f32 %v3645_v12, %v1968_v23 }
 0x176   : > { %v1970_v47 = vadd.f32 %v1969_v59, %v3669_v22  ;;  %v2105_v59 = vmul.f32 %v3630_v8, %v3630_v8 }
 0x178   : > { %v1971_v41 = vadd.f32 %v1970_v47, %v3681_v28 }
 0x17a   : > { %v1972_v11 = vadd.f32 %v3663_v20, %v1971_v41  ;;  %v2106_v41 = vmul.f32 %v3645_v12, %v3645_v12 }
 0x17c   : > { %v1973_v29 = vadd.f32 %v3673_v24, %v1972_v11  ;;  %v2231_v11 = vadd.f32 %v2104_v7, %v2103_v33  ;;  %v2110_v33 = vmul.f32 %v3673_v24, %v3673_v24  ;;  %v2114_v24 = vmul.f32 %v3701_v36, %v3701_v36 }
 0x17e   : > { %v1974_v13 = vadd.f32 %v1973_v29, %v3697_v34  ;;  %v2232_v10 = vadd.f32 %v2231_v11, %v2105_v59  ;;  %v2111_v59 = vmul.f32 %v3697_v34, %v3697_v34  ;;  %v2113_v11 = vmul.f32 %v3691_v32, %v3691_v32 }
 0x180   : > { %v1975_v35 = vadd.f32 %v1974_v13, %v3709_v40  ;;  %v2107_v13 = vmul.f32 %v3669_v22, %v3669_v22 }
 0x182   : > { %v1976_v23 = vadd.f32 %v3691_v32, %v1975_v35  ;;  %v2233_v35 = vadd.f32 %v2232_v10, %v2106_v41  ;;  %v2115_v10 = vmul.f32 %v3725_v46, %v3725_v46 }
 0x184   : > { %v1977_v47 = vadd.f32 %v3701_v36, %v1976_v23  ;;  %v2109_v23 = vmul.f32 %v3663_v20, %v3663_v20  ;;  %v2234_v9 = vadd.f32 %v2233_v35, %v2107_v13  ;;  %v2116_v35 = vmul.f32 %v3737_v52, %v3737_v52 }
 0x186   : > { %v1978_v29 = vadd.f32 %v1977_v47, %v3725_v46  ;;  %v2235_v7 = vadd.f32 %v2234_v9, %v2108_v16 }
 0x188   : > { %v1979_v17 = vadd.f32 %v1978_v29, %v3737_v52  ;;  %v2236_v47 = vadd.f32 %v2235_v7, %v2109_v23  ;;  %v2117_v23 = vmul.f32 %v3719_v44, %v3719_v44 }
 0x18a   : > { %v1980_v8 = vadd.f32 %v3719_v44, %v1979_v17  ;;  %v2112_v17 = vmul.f32 %v3709_v40, %v3709_v40  ;;  %v2237_v41 = vadd.f32 %v2236_v47, %v2110_v33  ;;  %v2118_v33 = vmul.f32 %v3729_v48, %v3729_v48 }
 0x18b   : > { %v2120_v47 = vmul.f32 %v3765_v0, %v3765_v0 }
 0x18c   : > { %v1981_v12 = vadd.f32 %v3729_v48, %v1980_v8  ;;  %v2238_v29 = vadd.f32 %v2237_v41, %v2111_v59 }
 0x18e   : > { %v1982_v22 = vadd.f32 %v1981_v12, %v3753_v58  ;;  %v2239_v13 = vadd.f32 %v2238_v29, %v2112_v17  ;;  %v2121_v17 = vmul.f32 %v3747_v56, %v3747_v56  ;;  %v2123_v29 = vmul.f32 %v3781_v6, %v3781_v6 }
 0x190   : > { %v1983_v28 = vadd.f32 %v1982_v22, %v3765_v0  ;;  %v2240_v16 = vadd.f32 %v2239_v13, %v2113_v11  ;;  %v2119_v22 = vmul.f32 %v3753_v58, %v3753_v58 }
 0x192   : > { %v1984_v20 = vadd.f32 %v3747_v56, %v1983_v28  ;;  %v2241_v8 = vadd.f32 %v2240_v16, %v2114_v24  ;;  %v2124_v24 = vmul.f32 %v3793_v26, %v3793_v26  ;;  %v2126_v16 = vmul.f32 %v3785_v14, %v3785_v14 }
 0x194   : > { %v1985_v9 = vadd.f32 %v3757_v60, %v1984_v20  ;;  %v2242_v12 = vadd.f32 %v2241_v8, %v2115_v10  ;;  %v2122_v20 = vmul.f32 %v3757_v60, %v3757_v60 }
 0x196   : > { %v1986_v34 = vadd.f32 %v1985_v9, %v3781_v6  ;;  %v2243_v7 = vadd.f32 %v2242_v12, %v2116_v35  ;;  %v2127_v35 = vmul.f32 %v3809_v42, %v3809_v42  ;;  %v2129_v12 = vmul.f32 %v3803_v38, %v3803_v38 }
 0x198   : > { %v1987_v40 = vadd.f32 %v1986_v34, %v3793_v26  ;;  %v2244_v59 = vadd.f32 %v2243_v7, %v2117_v23  ;;  %v2125_v34 = vmul.f32 %v3775_v4, %v3775_v4 }
 0x19a   : > { %v1988_v32 = vadd.f32 %v3775_v4, %v1987_v40  ;;  %v2245_v28 = vadd.f32 %v2244_v59, %v2118_v33  ;;  %v2130_v33 = vmul.f32 %v3813_v50, %v3813_v50  ;;  %v2132_v59 = vmul.f32 %v3849_v63, %v3849_v63 }
 0x19c   : > { %v1989_v36 = vadd.f32 %v3785_v14, %v1988_v32  ;;  %v2246_v41 = vadd.f32 %v2245_v28, %v2119_v22  ;;  %v2128_v32 = vmul.f32 %v3821_v62, %v3821_v62 }
 0x19e   : > { %v1990_v46 = vadd.f32 %v1989_v36, %v3809_v42  ;;  %v2247_v11 = vadd.f32 %v2246_v41, %v2120_v47  ;;  %v2133_v47 = vmul.f32 %v3831_v18, %v3831_v18  ;;  %v2135_v41 = vmul.f32 %v3865_v55, %v3865_v55 }
 0x1a0   : > { %v1991_v52 = vadd.f32 %v1990_v46, %v3821_v62  ;;  %v2248_v9 = vadd.f32 %v2247_v11, %v2121_v17  ;;  %v2131_v46 = vmul.f32 %v3837_v30, %v3837_v30 }
 0x1a2   : > { %v1992_v44 = vadd.f32 %v3803_v38, %v1991_v52  ;;  %v2249_v13 = vadd.f32 %v2248_v9, %v2122_v20  ;;  %v2136_v20 = vmul.f32 %v3877_v31, %v3877_v31  ;;  %v2138_v9 = vmul.f32 %v3869_v39, %v3869_v39 }
 0x1a4   : > { %v1993_v48 = vadd.f32 %v3813_v50, %v1992_v44  ;;  %v2250_v10 = vadd.f32 %v2249_v13, %v2123_v29  ;;  %v2134_v44 = vmul.f32 %v3841_v54, %v3841_v54 }
 0x1a6   : > { %v1994_v58 = vadd.f32 %v1993_v48, %v3837_v30  ;;  %v2251_v40 = vadd.f32 %v2250_v10, %v2124_v24  ;;  %v2139_v24 = vmul.f32 %v3893_v19, %v3893_v19  ;;  %v2141_v10 = vmul.f32 %v3887_v61, %v3887_v61 }
 0x1a8   : > { %v1995_v0 = vadd.f32 %v1994_v58, %v3849_v63  ;;  %v2252_v8 = vadd.f32 %v2251_v40, %v2125_v34  ;;  %v2137_v58 = vmul.f32 %v3859_v15, %v3859_v15 }
 0x1aa   : > { %v1996_v56 = vadd.f32 %v3831_v18, %v1995_v0  ;;  %v2253_v23 = vadd.f32 %v2252_v8, %v2126_v16  ;;  %v2142_v16 = vmul.f32 %v3897_v2, %v3897_v2  ;;  %v2144_v8 = vmul.f32 %v3933_v27, %v3933_v27 }
 0x1ac   : > { %v1997_v60 = vadd.f32 %v3841_v54, %v1996_v56  ;;  %v2254_v36 = vadd.f32 %v2253_v23, %v2127_v35  ;;  %v2140_v56 = vmul.f32 %v3905_v51, %v3905_v51 }
 0x1ae   : > { %v1998_v6 = vadd.f32 %v1997_v60, %v3865_v55  ;;  %v2255_v7 = vadd.f32 %v2254_v36, %v2128_v32  ;;  %v2145_v32 = vmul.f32 %v3915_v49, %v3915_v49 }
 0x1b0   : > { %v1999_v26 = vadd.f32 %v1998_v6, %v3877_v31  ;;  %v2256_v22 = vadd.f32 %v2255_v7, %v2129_v12  ;;  %v2143_v6 = vmul.f32 %v3921_v5, %v3921_v5  ;;  %v2146_v12 = vmul.f32 %v3925_v3, %v3925_v3 }
 0x1b2   : > { %v2000_v4 = vadd.f32 %v3859_v15, %v1999_v26  ;;  %v2257_v52 = vadd.f32 %v2256_v22, %v2130_v33  ;;  %v2147_v33 = vmul.f32 %v3949_v57, %v3949_v57 }
 0x1b4   : > { %v2001_v14 = vadd.f32 %v3869_v39, %v2000_v4  ;;  %v2258_v28 = vadd.f32 %v2257_v52, %v2131_v46  ;;  %v2148_v46 = vmul.f32 %v3961_v1, %v3961_v1 }
 0x1b6   : > { %v2002_v42 = vadd.f32 %v2001_v14, %v3893_v19  ;;  %v2259_v17 = vadd.f32 %v2258_v28, %v2132_v59  ;;  %v2149_v59 = vmul.f32 %v3943_v37, %v3943_v37 }
 0x1b8   : > { %v2003_v62 = vadd.f32 %v2002_v42, %v3905_v51  ;;  %v2260_v48 = vadd.f32 %v2259_v17, %v2133_v47  ;;  %v2150_v47 = vmul.f32 %v3953_v43, %v3953_v43 }
 0x1ba   : > { %v2004_v38 = vadd.f32 %v3887_v61, %v2003_v62  ;;  %v2261_v11 = vadd.f32 %v2260_v48, %v2134_v44 }
 0x1bc   : > { %v2005_v50 = vadd.f32 %v3897_v2, %v2004_v38  ;;  %v2262_v29 = vadd.f32 %v2261_v11, %v2135_v41  ;;  %v4740_v2 = vld [vmem:[#allocation52_spill] sm:$0xff] }
 0x1be   : > { %v2006_v30 = vadd.f32 %v2005_v50, %v3921_v5  ;;  %v2263_v0 = vadd.f32 %v2262_v29, %v2136_v20  ;;  %v4741_v5 = vld [vmem:[#allocation57_spill] sm:$0xff]  ;;  %v2151_v50 = vmul.f32 %v3977_v45, %v3977_v45 }
 0x1c0   : > { %v2007_v63 = vadd.f32 %v2006_v30, %v3933_v27  ;;  %v2264_v13 = vadd.f32 %v2263_v0, %v2137_v58  ;;  %v4742_v27 = vld [vmem:[#allocation61_spill] sm:$0xff]  ;;  %v2152_v30 = vmul.f32 %v3989_v53, %v3989_v53 }
 0x1c2   : > { %v2008_v18 = vadd.f32 %v3915_v49, %v2007_v63  ;;  %v2265_v34 = vadd.f32 %v2264_v13, %v2138_v9  ;;  %v4743_v49 = vld [vmem:[#allocation55_spill] sm:$0xff]  ;;  %v2153_v63 = vmul.f32 %v3971_v25, %v3971_v25 }
 0x1c4   : > { %v2009_v54 = vadd.f32 %v3925_v3, %v2008_v18  ;;  %v2266_v60 = vadd.f32 %v2265_v34, %v2139_v24  ;;  %v4744_v3 = vld [vmem:[#allocation59_spill] sm:$0xff]  ;;  %v2154_v18 = vmul.f32 %v4740_v2, %v4740_v2  ;;  %v4751_v34 = vld [vmem:[#allocation74_spill] sm:$0xff] }
 0x1c6   : > { %v2010_v55 = vadd.f32 %v2009_v54, %v3949_v57  ;;  %v2267_v40 = vadd.f32 %v2266_v60, %v2140_v56  ;;  %v2155_v54 = vmul.f32 %v4741_v5, %v4741_v5 }
 0x1c8   : > { %v2011_v31 = vadd.f32 %v2010_v55, %v3961_v1  ;;  %v2268_v35 = vadd.f32 %v2267_v40, %v2141_v10  ;;  %v4745_v1 = vld [vmem:[#allocation68_spill] sm:$0xff]  ;;  %v2156_v55 = vmul.f32 %v4742_v27, %v4742_v27  ;;  %v2158_v10 = vmul.f32 %v4744_v3, %v4744_v3 }
 0x1c9   : > { %v2159_v40 = vmul.f32 %v4033_v21, %v4033_v21 }
 0x1ca   : > { %v2012_v15 = vadd.f32 %v3943_v37, %v2011_v31  ;;  %v2269_v26 = vadd.f32 %v2268_v35, %v2142_v16  ;;  %v4746_v37 = vld [vmem:[#allocation63_spill] sm:$0xff]  ;;  %v2157_v31 = vmul.f32 %v4743_v49, %v4743_v49 }
 0x1cc   : > { %v2013_v39 = vadd.f32 %v3953_v43, %v2012_v15  ;;  %v2270_v23 = vadd.f32 %v2269_v26, %v2143_v6  ;;  %v4747_v43 = vld [vmem:[#allocation66_spill] sm:$0xff]  ;;  %v4753_v6 = vld [vmem:[#allocation5_spill] sm:$0xff] }
 0x1cd   : > { %v4754_v26 = vld [vmem:[#allocation2_spill] sm:$0xff] }
 0x1ce   : > { %v2014_v19 = vadd.f32 %v2013_v39, %v3977_v45  ;;  %v2271_v36 = vadd.f32 %v2270_v23, %v2144_v8  ;;  %v4748_v45 = vld [vmem:[#allocation72_spill] sm:$0xff]  ;;  %v4752_v39 = vld [vmem:[#allocation3_spill] sm:$0xff] }
 0x1d0   : > { %v2015_v51 = vadd.f32 %v2014_v19, %v3989_v53  ;;  %v2272_v7 = vadd.f32 %v2271_v36, %v2145_v32  ;;  %v4749_v53 = vld [vmem:[#allocation76_spill] sm:$0xff]  ;;  %v2161_v32 = vmul.f32 %v4746_v37, %v4746_v37 }
 0x1d2   : > { %v2016_v61 = vadd.f32 %v3971_v25, %v2015_v51  ;;  %v2273_v22 = vadd.f32 %v2272_v7, %v2146_v12  ;;  %v4750_v25 = vld [vmem:[#allocation70_spill] sm:$0xff]  ;;  %v2160_v51 = vmul.f32 %v4745_v1, %v4745_v1  ;;  %v2162_v12 = vmul.f32 %v4747_v43, %v4747_v43  ;;  %v4757_v7 = vld [vmem:[#allocation9_spill] sm:$0xff] }
 0x1d4   : > { %v2017_v4 = vadd.f32 %v4740_v2, %v2016_v61  ;;  %v2274_v52 = vadd.f32 %v2273_v22, %v2147_v33  ;;  %v4755_v2 = vld [vmem:[#allocation4_spill] sm:$0xff]  ;;  %v4758_v22 = vld [vmem:[#allocation6_spill] sm:$0xff] }
 0x1d6   : > { %v2018_v14 = vadd.f32 %v2017_v4, %v4741_v5  ;;  %v2275_v28 = vadd.f32 %v2274_v52, %v2148_v46  ;;  %v4759_v52 = vld [vmem:[#allocation8_spill] sm:$0xff] }
 0x1d8   : > { %v2019_v42 = vadd.f32 %v2018_v14, %v4742_v27  ;;  %v2276_v44 = vadd.f32 %v2275_v28, %v2149_v59  ;;  %v2163_v14 = vmul.f32 %v4748_v45, %v4748_v45  ;;  %v4760_v28 = vld [vmem:[#allocation11_spill] sm:$0xff] }
 0x1da   : > { %v2020_v62 = vadd.f32 %v4743_v49, %v2019_v42  ;;  %v2277_v41 = vadd.f32 %v2276_v44, %v2150_v47  ;;  %v2164_v42 = vmul.f32 %v4749_v53, %v4749_v53 }
 0x1dc   : > { %v2021_v38 = vadd.f32 %v4744_v3, %v2020_v62  ;;  %v2278_v20 = vadd.f32 %v2277_v41, %v2151_v50  ;;  %v2165_v62 = vmul.f32 %v4750_v25, %v4750_v25  ;;  %v2167_v50 = vmul.f32 %v4752_v39, %v4752_v39 }
 0x1de   : > { %v2022_v57 = vadd.f32 %v2021_v38, %v4033_v21  ;;  %v2279_v58 = vadd.f32 %v2278_v20, %v2152_v30  ;;  %v4756_v21 = vld [vmem:[#allocation7_spill] sm:$0xff]  ;;  %v2166_v38 = vmul.f32 %v4751_v34, %v4751_v34  ;;  %v2168_v30 = vmul.f32 %v4753_v6, %v4753_v6 }
 0x1e0   : > { %v2023_v17 = vadd.f32 %v2022_v57, %v4745_v1  ;;  %v2280_v9 = vadd.f32 %v2279_v58, %v2153_v63  ;;  %v4761_v1 = vld [vmem:[#allocation13_spill] sm:$0xff]  ;;  %v2169_v63 = vmul.f32 %v4754_v26, %v4754_v26 }
 0x1e2   : > { %v2024_v48 = vadd.f32 %v4746_v37, %v2023_v17  ;;  %v2281_v24 = vadd.f32 %v2280_v9, %v2154_v18  ;;  %v4762_v37 = vld [vmem:[#allocation10_spill] sm:$0xff]  ;;  %v2170_v18 = vmul.f32 %v4755_v2, %v4755_v2 }
 0x1e4   : > { %v2025_v11 = vadd.f32 %v4747_v43, %v2024_v48  ;;  %v2282_v56 = vadd.f32 %v2281_v24, %v2155_v54  ;;  %v4763_v43 = vld [vmem:[#allocation12_spill] sm:$0xff]  ;;  %v2171_v54 = vmul.f32 %v4756_v21, %v4756_v21 }
 0x1e6   : > { %v2026_v29 = vadd.f32 %v2025_v11, %v4748_v45  ;;  %v2283_v60 = vadd.f32 %v2282_v56, %v2156_v55  ;;  %v4764_v45 = vld [vmem:[#allocation15_spill] sm:$0xff]  ;;  %v2172_v55 = vmul.f32 %v4757_v7, %v4757_v7 }
 0x1e8   : > { %v2027_v0 = vadd.f32 %v2026_v29, %v4749_v53  ;;  %v2284_v19 = vadd.f32 %v2283_v60, %v2157_v31  ;;  %v4765_v53 = vld [vmem:[#allocation17_spill] sm:$0xff]  ;;  %v2173_v31 = vmul.f32 %v4758_v22, %v4758_v22 }
 0x1ea   : > { %v2028_v13 = vadd.f32 %v4750_v25, %v2027_v0  ;;  %v2285_v8 = vadd.f32 %v2284_v19, %v2158_v10  ;;  %v4766_v25 = vld [vmem:[#allocation14_spill] sm:$0xff]  ;;  %v2174_v10 = vmul.f32 %v4759_v52, %v4759_v52 }
 0x1ec   : > { %v2029_v15 = vadd.f32 %v4751_v34, %v2028_v13  ;;  %v2286_v23 = vadd.f32 %v2285_v8, %v2159_v40  ;;  %v4767_v34 = vld [vmem:[#allocation16_spill] sm:$0xff]  ;;  %v2175_v40 = vmul.f32 %v4760_v28, %v4760_v28 }
 0x1ee   : > { %v2030_v16 = vadd.f32 %v2029_v15, %v4752_v39  ;;  %v2287_v36 = vadd.f32 %v2286_v23, %v2160_v51  ;;  %v4768_v39 = vld [vmem:[#allocation19_spill] sm:$0xff]  ;;  %v2176_v51 = vmul.f32 %v4761_v1, %v4761_v1 }
 0x1f0   : > { %v2031_v35 = vadd.f32 %v2030_v16, %v4753_v6  ;;  %v2288_v33 = vadd.f32 %v2287_v36, %v2161_v32  ;;  %v4769_v6 = vld [vmem:[#allocation21_spill] sm:$0xff]  ;;  %v2177_v32 = vmul.f32 %v4762_v37, %v4762_v37 }
 0x1f2   : > { %v2032_v61 = vadd.f32 %v4754_v26, %v2031_v35  ;;  %v2289_v46 = vadd.f32 %v2288_v33, %v2162_v12  ;;  %v4770_v26 = vld [vmem:[#allocation18_spill] sm:$0xff]  ;;  %v2178_v12 = vmul.f32 %v4763_v43, %v4763_v43 }
 0x1f4   : > { %v2033_v4 = vadd.f32 %v4755_v2, %v2032_v61  ;;  %v2290_v59 = vadd.f32 %v2289_v46, %v2163_v14  ;;  %v4771_v2 = vld [vmem:[#allocation20_spill] sm:$0xff]  ;;  %v2179_v14 = vmul.f32 %v4764_v45, %v4764_v45 }
 0x1f6   : > { %v2034_v5 = vadd.f32 %v2033_v4, %v4756_v21  ;;  %v2291_v47 = vadd.f32 %v2290_v59, %v2164_v42  ;;  %v4772_v21 = vld [vmem:[#allocation23_spill] sm:$0xff]  ;;  %v2180_v42 = vmul.f32 %v4765_v53, %v4765_v53 }
 0x1f8   : > { %v2035_v27 = vadd.f32 %v2034_v5, %v4757_v7  ;;  %v2292_v44 = vadd.f32 %v2291_v47, %v2165_v62  ;;  %v4773_v7 = vld [vmem:[#allocation25_spill] sm:$0xff]  ;;  %v2181_v62 = vmul.f32 %v4766_v25, %v4766_v25 }
 0x1fa   : > { %v2036_v49 = vadd.f32 %v4758_v22, %v2035_v27  ;;  %v2293_v41 = vadd.f32 %v2292_v44, %v2166_v38  ;;  %v4774_v22 = vld [vmem:[#allocation22_spill] sm:$0xff]  ;;  %v2182_v38 = vmul.f32 %v4767_v34, %v4767_v34 }
 0x1fc   : > { %v2037_v3 = vadd.f32 %v4759_v52, %v2036_v49  ;;  %v2294_v20 = vadd.f32 %v2293_v41, %v2167_v50  ;;  %v4775_v52 = vld [vmem:[#allocation24_spill] sm:$0xff]  ;;  %v2183_v50 = vmul.f32 %v4768_v39, %v4768_v39 }
 0x1fe   : > { %v2038_v57 = vadd.f32 %v2037_v3, %v4760_v28  ;;  %v2295_v58 = vadd.f32 %v2294_v20, %v2168_v30  ;;  %v4776_v28 = vld [vmem:[#allocation27_spill] sm:$0xff]  ;;  %v2184_v30 = vmul.f32 %v4769_v6, %v4769_v6 }
 0x200   : > { %v2039_v17 = vadd.f32 %v2038_v57, %v4761_v1  ;;  %v2296_v9 = vadd.f32 %v2295_v58, %v2169_v63  ;;  %v4777_v1 = vld [vmem:[#allocation29_spill] sm:$0xff]  ;;  %v2185_v63 = vmul.f32 %v4770_v26, %v4770_v26 }
 0x202   : > { %v2040_v48 = vadd.f32 %v4762_v37, %v2039_v17  ;;  %v2297_v24 = vadd.f32 %v2296_v9, %v2170_v18  ;;  %v4778_v37 = vld [vmem:[#allocation26_spill] sm:$0xff]  ;;  %v2186_v18 = vmul.f32 %v4771_v2, %v4771_v2 }
 0x204   : > { %v2041_v11 = vadd.f32 %v4763_v43, %v2040_v48  ;;  %v2298_v56 = vadd.f32 %v2297_v24, %v2171_v54  ;;  %v4779_v43 = vld [vmem:[#allocation28_spill] sm:$0xff]  ;;  %v2187_v54 = vmul.f32 %v4772_v21, %v4772_v21 }
 0x206   : > { %v2042_v29 = vadd.f32 %v2041_v11, %v4764_v45  ;;  %v2299_v60 = vadd.f32 %v2298_v56, %v2172_v55  ;;  %v4780_v45 = vld [vmem:[#allocation31_spill] sm:$0xff]  ;;  %v2188_v55 = vmul.f32 %v4773_v7, %v4773_v7 }
 0x208   : > { %v2043_v0 = vadd.f32 %v2042_v29, %v4765_v53  ;;  %v2300_v19 = vadd.f32 %v2299_v60, %v2173_v31  ;;  %v4781_v53 = vld [vmem:[#allocation33_spill] sm:$0xff]  ;;  %v2189_v31 = vmul.f32 %v4774_v22, %v4774_v22 }
 0x20a   : > { %v2044_v13 = vadd.f32 %v4766_v25, %v2043_v0  ;;  %v2301_v8 = vadd.f32 %v2300_v19, %v2174_v10  ;;  %v4782_v25 = vld [vmem:[#allocation30_spill] sm:$0xff]  ;;  %v2190_v10 = vmul.f32 %v4775_v52, %v4775_v52 }
 0x20c   : > { %v2045_v15 = vadd.f32 %v4767_v34, %v2044_v13  ;;  %v2302_v23 = vadd.f32 %v2301_v8, %v2175_v40  ;;  %v4783_v34 = vld [vmem:[#allocation32_spill] sm:$0xff]  ;;  %v2191_v40 = vmul.f32 %v4776_v28, %v4776_v28 }
 0x20e   : > { %v2046_v16 = vadd.f32 %v2045_v15, %v4768_v39  ;;  %v2303_v36 = vadd.f32 %v2302_v23, %v2176_v51  ;;  %v4784_v39 = vld [vmem:[#allocation35_spill] sm:$0xff]  ;;  %v2192_v51 = vmul.f32 %v4777_v1, %v4777_v1 }
 0x210   : > { %v2047_v35 = vadd.f32 %v2046_v16, %v4769_v6  ;;  %v2304_v33 = vadd.f32 %v2303_v36, %v2177_v32  ;;  %v4785_v6 = vld [vmem:[#allocation37_spill] sm:$0xff]  ;;  %v2193_v32 = vmul.f32 %v4778_v37, %v4778_v37 }
 0x212   : > { %v2048_v61 = vadd.f32 %v4770_v26, %v2047_v35  ;;  %v2305_v46 = vadd.f32 %v2304_v33, %v2178_v12  ;;  %v4786_v26 = vld [vmem:[#allocation34_spill] sm:$0xff]  ;;  %v2194_v12 = vmul.f32 %v4779_v43, %v4779_v43 }
 0x214   : > { %v2049_v4 = vadd.f32 %v4771_v2, %v2048_v61  ;;  %v2306_v59 = vadd.f32 %v2305_v46, %v2179_v14  ;;  %v4787_v2 = vld [vmem:[#allocation36_spill] sm:$0xff]  ;;  %v2195_v14 = vmul.f32 %v4780_v45, %v4780_v45 }
 0x216   : > { %v2050_v5 = vadd.f32 %v2049_v4, %v4772_v21  ;;  %v2307_v47 = vadd.f32 %v2306_v59, %v2180_v42  ;;  %v4788_v21 = vld [vmem:[#allocation39_spill] sm:$0xff]  ;;  %v2196_v42 = vmul.f32 %v4781_v53, %v4781_v53 }
 0x218   : > { %v2051_v27 = vadd.f32 %v2050_v5, %v4773_v7  ;;  %v2308_v44 = vadd.f32 %v2307_v47, %v2181_v62  ;;  %v4789_v7 = vld [vmem:[#allocation41_spill] sm:$0xff]  ;;  %v2197_v62 = vmul.f32 %v4782_v25, %v4782_v25 }
 0x21a   : > { %v2052_v49 = vadd.f32 %v4774_v22, %v2051_v27  ;;  %v2309_v41 = vadd.f32 %v2308_v44, %v2182_v38  ;;  %v4790_v22 = vld [vmem:[#allocation38_spill] sm:$0xff]  ;;  %v2198_v38 = vmul.f32 %v4783_v34, %v4783_v34 }
 0x21c   : > { %v2053_v3 = vadd.f32 %v4775_v52, %v2052_v49  ;;  %v2310_v20 = vadd.f32 %v2309_v41, %v2183_v50  ;;  %v4791_v52 = vld [vmem:[#allocation40_spill] sm:$0xff]  ;;  %v2199_v50 = vmul.f32 %v4784_v39, %v4784_v39 }
 0x21e   : > { %v2054_v57 = vadd.f32 %v2053_v3, %v4776_v28  ;;  %v2311_v58 = vadd.f32 %v2310_v20, %v2184_v30  ;;  %v4792_v28 = vld [vmem:[#allocation43_spill] sm:$0xff]  ;;  %v2200_v30 = vmul.f32 %v4785_v6, %v4785_v6 }
 0x220   : > { %v2055_v17 = vadd.f32 %v2054_v57, %v4777_v1  ;;  %v2312_v9 = vadd.f32 %v2311_v58, %v2185_v63  ;;  %v4793_v1 = vld [vmem:[#allocation45_spill] sm:$0xff]  ;;  %v2201_v63 = vmul.f32 %v4786_v26, %v4786_v26 }
 0x222   : > { %v2056_v48 = vadd.f32 %v4778_v37, %v2055_v17  ;;  %v2313_v24 = vadd.f32 %v2312_v9, %v2186_v18  ;;  %v4794_v37 = vld [vmem:[#allocation42_spill] sm:$0xff]  ;;  %v2202_v18 = vmul.f32 %v4787_v2, %v4787_v2 }
 0x224   : > { %v2057_v11 = vadd.f32 %v4779_v43, %v2056_v48  ;;  %v2314_v56 = vadd.f32 %v2313_v24, %v2187_v54  ;;  %v4795_v43 = vld [vmem:[#allocation44_spill] sm:$0xff]  ;;  %v2203_v54 = vmul.f32 %v4788_v21, %v4788_v21 }
 0x226   : > { %v2058_v29 = vadd.f32 %v2057_v11, %v4780_v45  ;;  %v2315_v60 = vadd.f32 %v2314_v56, %v2188_v55  ;;  %v4796_v45 = vld [vmem:[#allocation47_spill] sm:$0xff]  ;;  %v2204_v55 = vmul.f32 %v4789_v7, %v4789_v7 }
 0x228   : > { %v2059_v0 = vadd.f32 %v2058_v29, %v4781_v53  ;;  %v2316_v19 = vadd.f32 %v2315_v60, %v2189_v31  ;;  %v4797_v53 = vld [vmem:[#allocation49_spill] sm:$0xff]  ;;  %v2205_v31 = vmul.f32 %v4790_v22, %v4790_v22 }
 0x22a   : > { %v2060_v13 = vadd.f32 %v4782_v25, %v2059_v0  ;;  %v2317_v8 = vadd.f32 %v2316_v19, %v2190_v10  ;;  %v4798_v25 = vld [vmem:[#allocation46_spill] sm:$0xff]  ;;  %v2206_v10 = vmul.f32 %v4791_v52, %v4791_v52 }
 0x22c   : > { %v2061_v15 = vadd.f32 %v4783_v34, %v2060_v13  ;;  %v2318_v23 = vadd.f32 %v2317_v8, %v2191_v40  ;;  %v4799_v34 = vld [vmem:[#allocation48_spill] sm:$0xff]  ;;  %v2207_v40 = vmul.f32 %v4792_v28, %v4792_v28 }
 0x22e   : > { %v2062_v16 = vadd.f32 %v2061_v15, %v4784_v39  ;;  %v2319_v36 = vadd.f32 %v2318_v23, %v2192_v51  ;;  %v4800_v39 = vld [vmem:[#allocation51_spill] sm:$0xff]  ;;  %v2208_v51 = vmul.f32 %v4793_v1, %v4793_v1 }
 0x230   : > { %v2063_v35 = vadd.f32 %v2062_v16, %v4785_v6  ;;  %v2320_v33 = vadd.f32 %v2319_v36, %v2193_v32  ;;  %v4801_v6 = vld [vmem:[#allocation54_spill] sm:$0xff]  ;;  %v2209_v32 = vmul.f32 %v4794_v37, %v4794_v37 }
 0x232   : > { %v2064_v61 = vadd.f32 %v4786_v26, %v2063_v35  ;;  %v2321_v46 = vadd.f32 %v2320_v33, %v2194_v12  ;;  %v4802_v26 = vld [vmem:[#allocation50_spill] sm:$0xff]  ;;  %v2210_v12 = vmul.f32 %v4795_v43, %v4795_v43 }
 0x234   : > { %v2065_v4 = vadd.f32 %v4787_v2, %v2064_v61  ;;  %v2322_v59 = vadd.f32 %v2321_v46, %v2195_v14  ;;  %v4803_v2 = vld [vmem:[#allocation53_spill] sm:$0xff]  ;;  %v2211_v14 = vmul.f32 %v4796_v45, %v4796_v45 }
 0x236   : > { %v2066_v5 = vadd.f32 %v2065_v4, %v4788_v21  ;;  %v2323_v47 = vadd.f32 %v2322_v59, %v2196_v42  ;;  %v4804_v21 = vld [vmem:[#allocation58_spill] sm:$0xff]  ;;  %v2212_v42 = vmul.f32 %v4797_v53, %v4797_v53 }
 0x238   : > { %v2067_v27 = vadd.f32 %v2066_v5, %v4789_v7  ;;  %v2324_v44 = vadd.f32 %v2323_v47, %v2197_v62  ;;  %v4805_v7 = vld [vmem:[#allocation62_spill] sm:$0xff]  ;;  %v2213_v62 = vmul.f32 %v4798_v25, %v4798_v25 }
 0x23a   : > { %v2068_v49 = vadd.f32 %v4790_v22, %v2067_v27  ;;  %v2325_v41 = vadd.f32 %v2324_v44, %v2198_v38  ;;  %v4806_v22 = vld [vmem:[#allocation56_spill] sm:$0xff]  ;;  %v2214_v38 = vmul.f32 %v4799_v34, %v4799_v34 }
 0x23c   : > { %v2069_v3 = vadd.f32 %v4791_v52, %v2068_v49  ;;  %v2326_v20 = vadd.f32 %v2325_v41, %v2199_v50  ;;  %v4807_v52 = vld [vmem:[#allocation60_spill] sm:$0xff]  ;;  %v2215_v50 = vmul.f32 %v4800_v39, %v4800_v39 }
 0x23e   : > { %v2070_v57 = vadd.f32 %v2069_v3, %v4792_v28  ;;  %v2327_v58 = vadd.f32 %v2326_v20, %v2200_v30  ;;  %v4808_v28 = vld [vmem:[#allocation65_spill] sm:$0xff]  ;;  %v2216_v30 = vmul.f32 %v4801_v6, %v4801_v6 }
 0x240   : > { %v2071_v17 = vadd.f32 %v2070_v57, %v4793_v1  ;;  %v2328_v9 = vadd.f32 %v2327_v58, %v2201_v63  ;;  %v4809_v1 = vld [vmem:[#allocation69_spill] sm:$0xff]  ;;  %v2217_v63 = vmul.f32 %v4802_v26, %v4802_v26 }
 0x242   : > { %v2072_v48 = vadd.f32 %v4794_v37, %v2071_v17  ;;  %v2329_v24 = vadd.f32 %v2328_v9, %v2202_v18  ;;  %v4810_v37 = vld [vmem:[#allocation64_spill] sm:$0xff]  ;;  %v2218_v18 = vmul.f32 %v4803_v2, %v4803_v2 }
 0x244   : > { %v2073_v11 = vadd.f32 %v4795_v43, %v2072_v48  ;;  %v2330_v56 = vadd.f32 %v2329_v24, %v2203_v54  ;;  %v4811_v43 = vld [vmem:[#allocation67_spill] sm:$0xff]  ;;  %v2219_v54 = vmul.f32 %v4804_v21, %v4804_v21 }
 0x246   : > { %v2074_v29 = vadd.f32 %v2073_v11, %v4796_v45  ;;  %v2331_v60 = vadd.f32 %v2330_v56, %v2204_v55  ;;  %v4812_v45 = vld [vmem:[#allocation73_spill] sm:$0xff]  ;;  %v2220_v55 = vmul.f32 %v4805_v7, %v4805_v7 }
 0x248   : > { %v2075_v0 = vadd.f32 %v2074_v29, %v4797_v53  ;;  %v2332_v19 = vadd.f32 %v2331_v60, %v2205_v31  ;;  %v4813_v53 = vld [vmem:[#allocation77_spill] sm:$0xff]  ;;  %v2221_v31 = vmul.f32 %v4806_v22, %v4806_v22 }
 0x24a   : > { %v2076_v13 = vadd.f32 %v4798_v25, %v2075_v0  ;;  %v2333_v8 = vadd.f32 %v2332_v19, %v2206_v10  ;;  %v4814_v25 = vld [vmem:[#allocation71_spill] sm:$0xff]  ;;  %v2222_v10 = vmul.f32 %v4807_v52, %v4807_v52 }
 0x24c   : > { %v2077_v15 = vadd.f32 %v4799_v34, %v2076_v13  ;;  %v2334_v23 = vadd.f32 %v2333_v8, %v2207_v40  ;;  %v4815_v34 = vld [vmem:[#allocation75_spill] sm:$0xff]  ;;  %v2225_v8 = vmul.f32 %v4810_v37, %v4810_v37 }
 0x24e   : > { %v2078_v16 = vadd.f32 %v2077_v15, %v4800_v39  ;;  %v2335_v36 = vadd.f32 %v2334_v23, %v2208_v51 }
 0x250   : > { %v2079_v35 = vadd.f32 %v2078_v16, %v4801_v6  ;;  %v2336_v33 = vadd.f32 %v2335_v36, %v2209_v32  ;;  %v2223_v16 = vmul.f32 %v4808_v28, %v4808_v28  ;;  %v2224_v6 = vmul.f32 %v4809_v1, %v4809_v1 }
 0x251   : > { %v2226_v32 = vmul.f32 %v4811_v43, %v4811_v43 }
 0x252   : > { %v2080_v61 = vadd.f32 %v4802_v26, %v2079_v35  ;;  %v2337_v46 = vadd.f32 %v2336_v33, %v2210_v12  ;;  %v2227_v12 = vmul.f32 %v4812_v45, %v4812_v45 }
 0x254   : > { %v2081_v4 = vadd.f32 %v4803_v2, %v2080_v61  ;;  %v2338_v59 = vadd.f32 %v2337_v46, %v2211_v14 }
 0x256   : > { %v2082_v5 = vadd.f32 %v2081_v4, %v4804_v21  ;;  %v2339_v47 = vadd.f32 %v2338_v59, %v2212_v42  ;;  %v1966_v4 = vld [vmem:[%s4511_s4] sm:$0x1]  ;;  %v2230_v42 = vmul.f32 %v4815_v34, %v4815_v34 }
 0x258   : > { %v2083_v27 = vadd.f32 %v2082_v5, %v4805_v7  ;;  %v2340_v44 = vadd.f32 %v2339_v47, %v2213_v62  ;;  %v2228_v5 = vmul.f32 %v4813_v53, %v4813_v53  ;;  %v2229_v7 = vmul.f32 %v4814_v25, %v4814_v25  ;;  %v2102_v47 = vld [vmem:[%s4511_s4 + $0x1] sm:$0x1] }
 0x25a   : > { %v2084_v49 = vadd.f32 %v4806_v22, %v2083_v27  ;;  %v2341_v41 = vadd.f32 %v2340_v44, %v2214_v38 }
 0x25c   : > { %v2085_v3 = vadd.f32 %v4807_v52, %v2084_v49  ;;  %v2342_v20 = vadd.f32 %v2341_v41, %v2215_v50 }
 0x25e   : > { %v2086_v57 = vadd.f32 %v2085_v3, %v4808_v28  ;;  %v2343_v58 = vadd.f32 %v2342_v20, %v2216_v30 }
 0x260   : > { %v2087_v17 = vadd.f32 %v2086_v57, %v4809_v1  ;;  %v2344_v9 = vadd.f32 %v2343_v58, %v2217_v63 }
 0x262   : > { %v2088_v48 = vadd.f32 %v4810_v37, %v2087_v17  ;;  %v2345_v24 = vadd.f32 %v2344_v9, %v2218_v18 }
 0x264   : > { %v2089_v11 = vadd.f32 %v4811_v43, %v2088_v48  ;;  %v2346_v56 = vadd.f32 %v2345_v24, %v2219_v54 }
 0x266   : > { %v2090_v29 = vadd.f32 %v2089_v11, %v4812_v45  ;;  %v2347_v60 = vadd.f32 %v2346_v56, %v2220_v55 }
 0x268   : > { %v2091_v0 = vadd.f32 %v2090_v29, %v4813_v53  ;;  %v2348_v40 = vadd.f32 %v2347_v60, %v2221_v31 }
 0x26a   : > { %v2092_v13 = vadd.f32 %v4814_v25, %v2091_v0  ;;  %v2349_v35 = vadd.f32 %v2348_v40, %v2222_v10 }
 0x26c   : > { %v2093_v15 = vadd.f32 %v4815_v34, %v2092_v13  ;;  %v2350_v26 = vadd.f32 %v2349_v35, %v2223_v16 }
 0x26e   : > { %v2094_v39 = vrot.slane %v2093_v15, 4  ;;  %v2351_v23 = vadd.f32 %v2350_v26, %v2224_v6 }
 0x270   : > { %v2095_v19 = vadd.f32 %v2094_v39, %v2093_v15  ;;  %v2352_v36 = vadd.f32 %v2351_v23, %v2225_v8 }
 0x272   : > { %v2096_v51 = vrot.slane %v2095_v19, 2  ;;  %v2353_v14 = vadd.f32 %v2352_v36, %v2226_v32 }
 0x274   : > { %v2097_v61 = vadd.f32 %v2096_v51, %v2095_v19  ;;  %v2354_v27 = vadd.f32 %v2353_v14, %v2227_v12 }
 0x276   : > { %v2098_v2 = vrot.slane %v2097_v61, 1  ;;  %v2355_v46 = vadd.f32 %v2354_v27, %v2228_v5 }
 0x278   : > { %v2099_v21 = vadd.f32 %v2098_v2, %v2097_v61  ;;  %v2356_v22 = vadd.f32 %v2355_v46, %v2229_v7 }
 0x27a   : > { %v2100_v33 = vadd.f32 %v2099_v21, %v1966_v4  ;;  %v2357_v49 = vadd.f32 %v2356_v22, %v2230_v42 }
 0x27c   : > { %2101 = vst [vmem:[%s4511_s4] sm:$0x1] %v2100_v33  ;;  %v2358_v62 = vrot.slane %v2357_v49, 4 }
 0x27e   : > { %v2359_v59 = vadd.f32 %v2358_v62, %v2357_v49 }
 0x280   : > { %v2360_v52 = vrot.slane %v2359_v59, 2 }
 0x282   : > { %v2361_v3 = vadd.f32 %v2360_v52, %v2359_v59 }
 0x284   : > { %v2362_v38 = vrot.slane %v2361_v3, 1 }
 0x286   : > { %v2363_v28 = vadd.f32 %v2362_v38, %v2361_v3  ;;  %2369 = sbr.rel (%p2658_p5) target bundleno = 687 (0x2af), region = 40 }
 0x288   : > { %v2364_v57 = vadd.f32 %v2363_v28, %v2102_v47 }
 0x28a   : > { %2365 = vst [vmem:[%s4511_s4 + $0x1] sm:$0x1] %v2364_v57 }
 0x28b   : > { %v2370_v50 = vld [vmem:[%s4511_s4] sm:$0x1]  ;;  %v2381_v11 = vld [vmem:[%s4509_s2 + $0x1] sm:$0x1] }
 0x28c   : > { %v2371_v1 = vmul.f32 0.00024414063, %v2370_v50  ;;  %v2377_v63 = vld [vmem:[%s4509_s2] sm:$0x1] }
 0x28e   : > { %v2374_v30 = vmul.f32 %v2371_v1, %v2371_v1 }
 0x291   : > { %v2372_v44 = vld [vmem:[%s4511_s4 + $0x1] sm:$0x1] }
 0x292   : > { %v2373_v17 = vmul.f32 0.00024414063, %v2372_v44 }
 0x294   : > { %v2375_v41 = vsub.f32 %v2373_v17, %v2374_v30 }
 0x296   : > { %v2376_v37 = vmax.f32 %v2375_v41, 0.0 }
 0x298   : > { %v2378_v48 = vadd.f32 1e-05, %v2376_v37 }
 0x29a   : > { %3485 = vrsqrt.f32 %v2378_v48 }
 0x2a7   : > { %v3486_v20 = vpop.eup %3485 }
 0x2a8   : > { %v2380_v43 = vmul.f32 %v3486_v20, %v2377_v63 }
 0x2aa   : > { %2384 = vst [vmem:[%s4511_s4] sm:$0x1] %v2380_v43  ;;  %v2382_v18 = vmul.f32 %v2380_v43, %v2371_v1 }
 0x2ac   : > { %v2383_v58 = vsub.f32 %v2381_v11, %v2382_v18 }
 0x2ae   : > { %2385 = vst [vmem:[%s4511_s4 + $0x1] sm:$0x1] %v2383_v58 }
 0x2af PF: > { %s15_s15 = sadd.s32 1, %s3493_s15  }
 0x2b0   : > { %p12_p6 = scmp.ge.s32.totalorder %s15_s15, 6  }
 0x2b2   :  { %14 = sbr.rel (!%p12_p6) target bundleno = 1 (0x1), region = 78 }

// kernel: spatio_temporal_conv_forward.6
= control target key start
LH: loop header
LB: loop body
LE: loop exit
PB: predicated region body
PF: predicated region fallthrough
CT: control target
= control target key end

     0   :  { %s4185_s15 = smov 0   ;;  %s5728_s0 = inlined_call_operand.vmem [shape: bf16[4096,384], index: 0, kind: input, shape index: {}]   ;;  %s5729_s1 = inlined_call_operand.vmem [shape: bf16[384,128], index: 1, kind: input, shape index: {}]   ;;  %s5730_s2 = inlined_call_operand.vmem [shape: f32[2,128], index: 2, kind: input, shape index: {}]   ;;  %s5731_s3 = inlined_call_operand.vmem [shape: f32[4096,128], index: 3, kind: output, shape index: {0}]   ;;  %s5732_s4 = inlined_call_operand.vmem [shape: f32[2,128], index: 4, kind: output, shape index: {1}]  }
   0x1 LB: > { %s4191_s16 = sadd.s32 4294967295, %s4156_s15   ;;  %p3384_p0 = scmp.ge.s32.totalorder %s4156_s15, 1  ;;  %s4156_s15 = sphi %s4185_s15, %s15_s15  }
   0x2   : > { %p162_p1 = scmp.lt.s32.totalorder %s4156_s15, 5 }
   0x4   : > { %p163_p2 = pnand %p3384_p0, %p162_p1 }
   0x6   : > { %166 = sbr.rel (%p163_p2) target bundleno = 975 (0x3cf), region = 32 }
   0xb   : > { %v3868_v0 = vld [vmem:[%s5729_s1 + $0x38] sm:$0xff]   ;;  %v4158_v1 = vmov 0   ;;  %s3385_s19 = sshll.u32 %s4191_s16, 7  ;;  %v3869_v2 = vld [vmem:[%s5729_s1 + $0x30] sm:$0xff]   ;;  %v3870_v3 = vld [vmem:[%s5729_s1 + $0x28] sm:$0xff]   ;;  %p3605_p4 = scmp.ne.s32.totalorder %s4191_s16, 0 }
   0xc   : > { %1675 = vmatprep.subr.bf16.mxu0 %v4158_v1  ;;  %3825 = vmatprep.subr.bf16.mxu1 %v4158_v1  ;;  %p190_p3 = scmp.lt.s32.totalorder %s3385_s19, 511  ;;  %v3871_v4 = vld [vmem:[%s5729_s1 + $0x20] sm:$0xff]   ;;  %v3872_v5 = vld [vmem:[%s5729_s1 + $0x18] sm:$0xff]   ;;  %v3873_v7 = vld [vmem:[%s5729_s1 + $0x10] sm:$0xff]  }
   0xd   : > { %1676 = vmatpush1.bf16.msra.mxu0 %v3868_v0  ;;  %3841 = vmatpush1.bf16.msra.mxu1 %v3868_v0  ;;  %v3874_v9 = vld [vmem:[%s5729_s1 + $0x8] sm:$0xff]   ;;  %v3875_v10 = vld [vmem:[%s5729_s1] sm:$0xff]   ;;  %v3876_v11 = vld [vmem:[%s5729_s1 + $0x78] sm:$0xff]  }
   0xe   : > { %1677 = vmatprep.subr.bf16.mxu0 %v4158_v1  ;;  %3826 = vmatprep.subr.bf16.mxu1 %v4158_v1  ;;  %s6088_s19 = smov (!%p190_p3, %s3385_s19), 511  ;;  %v3877_v12 = vld [vmem:[%s5729_s1 + $0x70] sm:$0xff]   ;;  %v3878_v13 = vld [vmem:[%s5729_s1 + $0x68] sm:$0xff]   ;;  %v3879_v14 = vld [vmem:[%s5729_s1 + $0x60] sm:$0xff]  }
   0xf   : > { %s3857_s26 = smul.u32 12, %s6088_s19  ;;  %v3880_v15 = vld [vmem:[%s5729_s1 + $0x58] sm:$0xff]   ;;  %v3881_v16 = vld [vmem:[%s5729_s1 + $0x50] sm:$0xff]   ;;  %v3882_v17 = vld [vmem:[%s5729_s1 + $0x48] sm:$0xff]   ;;  %s3388_s25 = sshll.u32 %s6088_s19, 3 }
  0x10   : > { %v3883_v18 = vld [vmem:[%s5729_s1 + $0x40] sm:$0xff]   ;;  %v3890_v19 = vld [vmem:[%s5729_s1 + $0xb8] sm:$0xff]   ;;  %v3903_v24 = vld [vmem:[%s5729_s1 + $0xb0] sm:$0xff]   ;;  %s4608_s28 = scalar_lea.vmem %s5731_s3, %s3388_s25 }
  0x11   : > { %1678 = vmatpush1.bf16.msra.mxu0 %v3869_v2  ;;  %3842 = vmatpush1.bf16.msra.mxu1 %v3869_v2  ;;  %s4225_s5 = scalar_lea.vmem %s5728_s0, %s3857_s26  ;;  %v3916_v25 = vld [vmem:[%s5729_s1 + $0xa8] sm:$0xff]   ;;  %v3929_v30 = vld [vmem:[%s5729_s1 + $0xa0] sm:$0xff]   ;;  %v3942_v33 = vld [vmem:[%s5729_s1 + $0x98] sm:$0xff]  }
  0x12   : > { %1679 = vmatprep.subr.bf16.mxu0 %v4158_v1  ;;  %3827 = vmatprep.subr.bf16.mxu1 %v4158_v1  ;;  %v3886_v6 = vld [vmem:[%s4225_s5 + $0x4] ss:$12 sps:$4 sm:$0xff]   ;;  %v3884_v20 = vld [vmem:[%s4225_s5] ss:$12 sps:$4 sm:$0xff]   ;;  %v3891_v22 = vld [vmem:[%s4225_s5 + $0x1c] ss:$12 sps:$4 sm:$0xff]  }
  0x13   : > { %v3889_v8 = vld [vmem:[%s4225_s5 + $0x484] ss:$12 sps:$4 sm:$0xff]   ;;  %1707 = vmatprep.mubr.bf16.mxu0 %v3886_v6  ;;  %v3887_v21 = vld [vmem:[%s4225_s5 + $0x480] ss:$12 sps:$4 sm:$0xff]   ;;  %v3893_v23 = vld [vmem:[%s4225_s5 + $0x49c] ss:$12 sps:$4 sm:$0xff]  }
  0x14   : > { %2091 = vmatprep.mubr.bf16.mxu1 %v3889_v8  ;;  %v3895_v26 = vld [vmem:[%s4225_s5 + $0x18] ss:$12 sps:$4 sm:$0xff]   ;;  %v3897_v28 = vld [vmem:[%s4225_s5 + $0x34] ss:$12 sps:$4 sm:$0xff]   ;;  %v3901_v31 = vld [vmem:[%s4225_s5 + $0x30] ss:$12 sps:$4 sm:$0xff]  }
  0x15   : > { %1680 = vmatpush1.bf16.msra.mxu0 %v3870_v3  ;;  %3843 = vmatpush1.bf16.msra.mxu1 %v3870_v3  ;;  %v3896_v27 = vld [vmem:[%s4225_s5 + $0x498] ss:$12 sps:$4 sm:$0xff]   ;;  %v3899_v29 = vld [vmem:[%s4225_s5 + $0x4b4] ss:$12 sps:$4 sm:$0xff]   ;;  %v3902_v32 = vld [vmem:[%s4225_s5 + $0x4b0] ss:$12 sps:$4 sm:$0xff]  }
  0x16   : > { %1681 = vmatprep.subr.bf16.mxu0 %v4158_v1  ;;  %3828 = vmatprep.subr.bf16.mxu1 %v4158_v1  ;;  %v3904_v34 = vld [vmem:[%s4225_s5 + $0x4c] ss:$12 sps:$4 sm:$0xff]   ;;  %v3955_v36 = vld [vmem:[%s5729_s1 + $0x90] sm:$0xff]   ;;  %v3981_v42 = vld [vmem:[%s5729_s1 + $0x80] sm:$0xff]  }
  0x17   : > { %v3906_v35 = vld [vmem:[%s4225_s5 + $0x4cc] ss:$12 sps:$4 sm:$0xff]   ;;  %v3908_v38 = vld [vmem:[%s4225_s5 + $0x48] ss:$12 sps:$4 sm:$0xff]   ;;  %v3910_v40 = vld [vmem:[%s4225_s5 + $0x64] ss:$12 sps:$4 sm:$0xff]  }
  0x18   : > { %v3968_v37 = vld [vmem:[%s5729_s1 + $0x88] sm:$0xff]   ;;  %v3912_v41 = vld [vmem:[%s4225_s5 + $0x4e4] ss:$12 sps:$4 sm:$0xff]   ;;  %v3923_v49 = vld [vmem:[%s4225_s5 + $0x94] ss:$12 sps:$4 sm:$0xff]  }
  0x19   : > { %1682 = vmatpush1.bf16.msra.mxu0 %v3871_v4  ;;  %3844 = vmatpush1.bf16.msra.mxu1 %v3871_v4  ;;  %v3909_v39 = vld [vmem:[%s4225_s5 + $0x4c8] ss:$12 sps:$4 sm:$0xff]   ;;  %v3914_v43 = vld [vmem:[%s4225_s5 + $0x60] ss:$12 sps:$4 sm:$0xff]   ;;  %v3921_v47 = vld [vmem:[%s4225_s5 + $0x78] ss:$12 sps:$4 sm:$0xff]  }
  0x1a   : > { %1683 = vmatprep.subr.bf16.mxu0 %v4158_v1  ;;  %3829 = vmatprep.subr.bf16.mxu1 %v4158_v1  ;;  %v3915_v44 = vld [vmem:[%s4225_s5 + $0x4e0] ss:$12 sps:$4 sm:$0xff]   ;;  %v3917_v45 = vld [vmem:[%s4225_s5 + $0x7c] ss:$12 sps:$4 sm:$0xff]   ;;  %v3922_v48 = vld [vmem:[%s4225_s5 + $0x4f8] ss:$12 sps:$4 sm:$0xff]  }
  0x1b   : > { %v3919_v46 = vld [vmem:[%s4225_s5 + $0x4fc] ss:$12 sps:$4 sm:$0xff]   ;;  %v3925_v50 = vld [vmem:[%s4225_s5 + $0x514] ss:$12 sps:$4 sm:$0xff]   ;;  %v3930_v53 = vld [vmem:[%s4225_s5 + $0xac] ss:$12 sps:$4 sm:$0xff]  }
  0x1c   : > { %v3927_v51 = vld [vmem:[%s4225_s5 + $0x90] ss:$12 sps:$4 sm:$0xff]   ;;  %v3932_v54 = vld [vmem:[%s4225_s5 + $0x52c] ss:$12 sps:$4 sm:$0xff]   ;;  %v3934_v55 = vld [vmem:[%s4225_s5 + $0xa8] ss:$12 sps:$4 sm:$0xff]  }
  0x1d   : > { %1684 = vmatpush1.bf16.msra.mxu0 %v3872_v5  ;;  %3845 = vmatpush1.bf16.msra.mxu1 %v3872_v5  ;;  %v3928_v52 = vld [vmem:[%s4225_s5 + $0x510] ss:$12 sps:$4 sm:$0xff]   ;;  %v3935_v56 = vld [vmem:[%s4225_s5 + $0x528] ss:$12 sps:$4 sm:$0xff]   ;;  %v3940_v59 = vld [vmem:[%s4225_s5 + $0xc0] ss:$12 sps:$4 sm:$0xff]  }
  0x1e   : > { %1685 = vmatprep.subr.bf16.mxu0 %v4158_v1  ;;  %3830 = vmatprep.subr.bf16.mxu1 %v4158_v1  ;;  %v3936_v57 = vld [vmem:[%s4225_s5 + $0xc4] ss:$12 sps:$4 sm:$0xff]   ;;  %v3941_v60 = vld [vmem:[%s4225_s5 + $0x540] ss:$12 sps:$4 sm:$0xff]   ;;  %v3943_v61 = vld [vmem:[%s4225_s5 + $0xdc] ss:$12 sps:$4 sm:$0xff]  }
  0x1f   : > { %v3938_v58 = vld [vmem:[%s4225_s5 + $0x544] ss:$12 sps:$4 sm:$0xff]   ;;  %v3945_v62 = vld [vmem:[%s4225_s5 + $0x55c] ss:$12 sps:$4 sm:$0xff]   ;;  %v3951_v2 = vld [vmem:[%s4225_s5 + $0x574] ss:$12 sps:$4 sm:$0xff]  }
  0x20   : > { %v3947_v63 = vld [vmem:[%s4225_s5 + $0xd8] ss:$12 sps:$4 sm:$0xff]   ;;  %v3953_v3 = vld [vmem:[%s4225_s5 + $0xf0] ss:$12 sps:$4 sm:$0xff]   ;;  %v3961_v8 = vld [vmem:[%s4225_s5 + $0x588] ss:$12 sps:$4 sm:$0xff]  }
  0x21   : > { %1686 = vmatpush1.bf16.msra.mxu0 %v3873_v7  ;;  %3846 = vmatpush1.bf16.msra.mxu1 %v3873_v7  ;;  %v3948_v0 = vld [vmem:[%s4225_s5 + $0x558] ss:$12 sps:$4 sm:$0xff]   ;;  %v3954_v4 = vld [vmem:[%s4225_s5 + $0x570] ss:$12 sps:$4 sm:$0xff]   ;;  %v3960_v7 = vld [vmem:[%s4225_s5 + $0x108] ss:$12 sps:$4 sm:$0xff]  }
  0x22   : > { %1687 = vmatprep.subr.bf16.mxu0 %v4158_v1  ;;  %3831 = vmatprep.subr.bf16.mxu1 %v4158_v1  ;;  %v3956_v5 = vld [vmem:[%s4225_s5 + $0x10c] ss:$12 sps:$4 sm:$0xff]  }
  0x23   : > { %v3958_v6 = vld [vmem:[%s4225_s5 + $0x58c] ss:$12 sps:$4 sm:$0xff]  }
  0x25   : > { %1688 = vmatpush1.bf16.msra.mxu0 %v3874_v9  ;;  %3847 = vmatpush1.bf16.msra.mxu1 %v3874_v9  ;;  %v3962_v9 = vld [vmem:[%s4225_s5 + $0x124] ss:$12 sps:$4 sm:$0xff]  }
  0x26   : > { %1689 = vmatprep.subr.bf16.mxu0 %v4158_v1  ;;  %3832 = vmatprep.subr.bf16.mxu1 %v4158_v1 }
  0x29   : > { %1690 = vmatpush1.bf16.msra.mxu0 %v3875_v10  ;;  %3848 = vmatpush1.bf16.msra.mxu1 %v3875_v10  ;;  %v3964_v10 = vld [vmem:[%s4225_s5 + $0x5a4] ss:$12 sps:$4 sm:$0xff]  }
  0x2a   : > { %1691 = vmatprep.subr.bf16.mxu0 %v4158_v1  ;;  %3833 = vmatprep.subr.bf16.mxu1 %v4158_v1 }
  0x2d   : > { %1692 = vmatpush2.bf16.msra.mxu0 %v3876_v11  ;;  %3849 = vmatpush2.bf16.msra.mxu1 %v3876_v11  ;;  %v3966_v11 = vld [vmem:[%s4225_s5 + $0x120] ss:$12 sps:$4 sm:$0xff]  }
  0x2e   : > { %1693 = vmatprep.subr.bf16.mxu0 %v4158_v1  ;;  %3834 = vmatprep.subr.bf16.mxu1 %v4158_v1 }
  0x31   : > { %1694 = vmatpush2.bf16.msra.mxu0 %v3877_v12  ;;  %3850 = vmatpush2.bf16.msra.mxu1 %v3877_v12  ;;  %v3967_v12 = vld [vmem:[%s4225_s5 + $0x5a0] ss:$12 sps:$4 sm:$0xff]  }
  0x32   : > { %1695 = vmatprep.subr.bf16.mxu0 %v4158_v1  ;;  %3835 = vmatprep.subr.bf16.mxu1 %v4158_v1 }
  0x35   : > { %1696 = vmatpush2.bf16.msra.mxu0 %v3878_v13  ;;  %3851 = vmatpush2.bf16.msra.mxu1 %v3878_v13  ;;  %v3969_v13 = vld [vmem:[%s4225_s5 + $0x13c] ss:$12 sps:$4 sm:$0xff]  }
  0x36   : > { %1697 = vmatprep.subr.bf16.mxu0 %v4158_v1  ;;  %3836 = vmatprep.subr.bf16.mxu1 %v4158_v1 }
  0x39   : > { %1698 = vmatpush2.bf16.msra.mxu0 %v3879_v14  ;;  %3852 = vmatpush2.bf16.msra.mxu1 %v3879_v14  ;;  %v3971_v14 = vld [vmem:[%s4225_s5 + $0x5bc] ss:$12 sps:$4 sm:$0xff]  }
  0x3a   : > { %1699 = vmatprep.subr.bf16.mxu0 %v4158_v1  ;;  %3837 = vmatprep.subr.bf16.mxu1 %v4158_v1 }
  0x3d   : > { %1700 = vmatpush2.bf16.msra.mxu0 %v3880_v15  ;;  %3853 = vmatpush2.bf16.msra.mxu1 %v3880_v15  ;;  %v3973_v15 = vld [vmem:[%s4225_s5 + $0x138] ss:$12 sps:$4 sm:$0xff]  }
  0x3e   : > { %1701 = vmatprep.subr.bf16.mxu0 %v4158_v1  ;;  %3838 = vmatprep.subr.bf16.mxu1 %v4158_v1 }
  0x41   : > { %1702 = vmatpush2.bf16.msra.mxu0 %v3881_v16  ;;  %3854 = vmatpush2.bf16.msra.mxu1 %v3881_v16  ;;  %v3974_v16 = vld [vmem:[%s4225_s5 + $0x5b8] ss:$12 sps:$4 sm:$0xff]  }
  0x42   : > { %1703 = vmatprep.subr.bf16.mxu0 %v4158_v1  ;;  %3839 = vmatprep.subr.bf16.mxu1 %v4158_v1 }
  0x45   : > { %1704 = vmatpush2.bf16.msra.mxu0 %v3882_v17  ;;  %3855 = vmatpush2.bf16.msra.mxu1 %v3882_v17  ;;  %v3975_v17 = vld [vmem:[%s4225_s5 + $0x154] ss:$12 sps:$4 sm:$0xff]  }
  0x46   : > { %1705 = vmatprep.subr.bf16.mxu0 %v4158_v1  ;;  %3840 = vmatprep.subr.bf16.mxu1 %v4158_v1  ;;  %v3949_v1 = vld [vmem:[%s4225_s5 + $0xf4] ss:$12 sps:$4 sm:$0xff]  }
  0x49   : > { %1706 = vmatpush2.bf16.msra.mxu0 %v3883_v18  ;;  %3856 = vmatpush2.bf16.msra.mxu1 %v3883_v18  ;;  %v3977_v18 = vld [vmem:[%s4225_s5 + $0x5d4] ss:$12 sps:$4 sm:$0xff]  }
  0x4a   : > { %3681 = vmatprep.subr.bf16.mxu1 %v3890_v19 }
  0x4c   : > { %1708 = vmatmul.mubr.bf16.vlgmr.msra.gmra.mxu0 %v3884_v20  ;;  %2092 = vmatmul.mubr.bf16.vlgmr.msra.gmra.mxu1 %v3887_v21  ;;  %v3980_v20 = vld [vmem:[%s4225_s5 + $0x5d0] ss:$12 sps:$4 sm:$0xff]   ;;  %v3982_v21 = vld [vmem:[%s4225_s5 + $0x16c] ss:$12 sps:$4 sm:$0xff]  }
  0x4d   : > { %3682 = vmatpush3.bf16.msra.mxu1 %v3890_v19  ;;  %1715 = vmatprep.mubr.bf16.mxu0 %v3891_v22  ;;  %v3979_v19 = vld [vmem:[%s4225_s5 + $0x150] ss:$12 sps:$4 sm:$0xff]   ;;  %v3984_v22 = vld [vmem:[%s4225_s5 + $0x5ec] ss:$12 sps:$4 sm:$0xff]  }
  0x4e   : > { %2099 = vmatprep.mubr.bf16.mxu1 %v3893_v23  ;;  %3683 = vmatprep.subr.bf16.mxu1 %v3903_v24  ;;  %v3986_v23 = vld [vmem:[%s4225_s5 + $0x168] ss:$12 sps:$4 sm:$0xff]  }
  0x51   : > { %3684 = vmatpush3.bf16.msra.mxu1 %v3903_v24  ;;  %v3987_v24 = vld [vmem:[%s4225_s5 + $0x5e8] ss:$12 sps:$4 sm:$0xff]  }
  0x52   : > { %3685 = vmatprep.subr.bf16.mxu1 %v3916_v25 }
  0x54   : > { %1716 = vmatmul.mubr.bf16.gmra.mxu0 %v3895_v26  ;;  %2100 = vmatmul.mubr.bf16.gmra.mxu1 %v3896_v27  ;;  %v3990_v26 = vld [vmem:[%s4225_s5 + $0x8] ss:$12 sps:$4 sm:$0xff]   ;;  %v3991_v27 = vld [vmem:[%s4225_s5 + $0x180] ss:$12 sps:$4 sm:$0xff]  }
  0x55   : > { %1723 = vmatprep.mubr.bf16.mxu0 %v3897_v28  ;;  %2107 = vmatprep.mubr.bf16.mxu1 %v3899_v29  ;;  %v3992_v28 = vld [vmem:[%s4225_s5 + $0x20] ss:$12 sps:$4 sm:$0xff]   ;;  %v3993_v29 = vld [vmem:[%s4225_s5 + $0x19c] ss:$12 sps:$4 sm:$0xff]  }
  0x56   : > { %3686 = vmatpush3.bf16.msra.mxu1 %v3916_v25  ;;  %v3988_v25 = vld [vmem:[%s4225_s5 + $0x184] ss:$12 sps:$4 sm:$0xff]  }
  0x57   : > { %3687 = vmatprep.subr.bf16.mxu1 %v3929_v30 }
  0x5a   : > { %3688 = vmatpush3.bf16.msra.mxu1 %v3929_v30  ;;  %v3995_v30 = vld [vmem:[%s4225_s5 + $0x38] ss:$12 sps:$4 sm:$0xff]  }
  0x5b   : > { %3689 = vmatprep.subr.bf16.mxu1 %v3942_v33 }
  0x5c   : > { %1724 = vmatmul.mubr.bf16.gmra.mxu0 %v3901_v31  ;;  %2108 = vmatmul.mubr.bf16.gmra.mxu1 %v3902_v32  ;;  %v3996_v31 = vld [vmem:[%s4225_s5 + $0x198] ss:$12 sps:$4 sm:$0xff]   ;;  %v3997_v32 = vld [vmem:[%s4225_s5 + $0x50] ss:$12 sps:$4 sm:$0xff]  }
  0x5d   : > { %1731 = vmatprep.mubr.bf16.mxu0 %v3904_v34  ;;  %2115 = vmatprep.mubr.bf16.mxu1 %v3906_v35  ;;  %v4000_v34 = vld [vmem:[%s4225_s5 + $0x68] ss:$12 sps:$4 sm:$0xff]   ;;  %v4001_v35 = vld [vmem:[%s4225_s5 + $0x1b0] ss:$12 sps:$4 sm:$0xff]  }
  0x5e   : > { %3690 = vmatpush3.bf16.msra.mxu1 %v3942_v33  ;;  %v3998_v33 = vld [vmem:[%s4225_s5 + $0x1b4] ss:$12 sps:$4 sm:$0xff]  }
  0x5f   : > { %3691 = vmatprep.subr.bf16.mxu1 %v3955_v36 }
  0x62   : > { %3692 = vmatpush3.bf16.msra.mxu1 %v3955_v36  ;;  %v4002_v36 = vld [vmem:[%s4225_s5 + $0x80] ss:$12 sps:$4 sm:$0xff]  }
  0x63   : > { %3693 = vmatprep.subr.bf16.mxu1 %v3968_v37 }
  0x64   : > { %1732 = vmatmul.mubr.bf16.gmra.mxu0 %v3908_v38  ;;  %2116 = vmatmul.mubr.bf16.gmra.mxu1 %v3909_v39  ;;  %v4005_v38 = vld [vmem:[%s4225_s5 + $0x98] ss:$12 sps:$4 sm:$0xff]   ;;  %v4006_v39 = vld [vmem:[%s4225_s5 + $0x1c8] ss:$12 sps:$4 sm:$0xff]  }
  0x65   : > { %1739 = vmatprep.mubr.bf16.mxu0 %v3910_v40  ;;  %2123 = vmatprep.mubr.bf16.mxu1 %v3912_v41  ;;  %v4007_v40 = vld [vmem:[%s4225_s5 + $0xb0] ss:$12 sps:$4 sm:$0xff]  }
  0x66   : > { %3694 = vmatpush3.bf16.msra.mxu1 %v3968_v37  ;;  %v4003_v37 = vld [vmem:[%s4225_s5 + $0x1cc] ss:$12 sps:$4 sm:$0xff]   ;;  %v4008_v41 = vld [vmem:[%s4225_s5 + $0x1e4] ss:$12 sps:$4 sm:$0xff]  }
  0x67   : > { %3695 = vmatprep.subr.bf16.mxu1 %v3981_v42 }
  0x6a   : > { %3696 = vmatpush3.bf16.msra.mxu1 %v3981_v42  ;;  %v4010_v42 = vld [vmem:[%s4225_s5 + $0xc8] ss:$12 sps:$4 sm:$0xff]  }
  0x6c   : > { %1740 = vmatmul.mubr.bf16.gmra.mxu0 %v3914_v43  ;;  %2124 = vmatmul.mubr.bf16.gmra.mxu1 %v3915_v44  ;;  %v4011_v43 = vld [vmem:[%s4225_s5 + $0x1e0] ss:$12 sps:$4 sm:$0xff]  }
  0x6d   : > { %1747 = vmatprep.mubr.bf16.mxu0 %v3917_v45  ;;  %2131 = vmatprep.mubr.bf16.mxu1 %v3919_v46  ;;  %v4012_v44 = vld [vmem:[%s4225_s5 + $0xe0] ss:$12 sps:$4 sm:$0xff]   ;;  %v4013_v45 = vld [vmem:[%s4225_s5 + $0x1fc] ss:$12 sps:$4 sm:$0xff]   ;;  %v4015_v46 = vld [vmem:[%s4225_s5 + $0xf8] ss:$12 sps:$4 sm:$0xff]  }
  0x74   : > { %1748 = vmatmul.mubr.bf16.gmra.mxu0 %v3921_v47  ;;  %2132 = vmatmul.mubr.bf16.gmra.mxu1 %v3922_v48  ;;  %v4016_v47 = vld [vmem:[%s4225_s5 + $0x1f8] ss:$12 sps:$4 sm:$0xff]   ;;  %v4017_v48 = vld [vmem:[%s4225_s5 + $0x110] ss:$12 sps:$4 sm:$0xff]  }
  0x75   : > { %1755 = vmatprep.mubr.bf16.mxu0 %v3923_v49  ;;  %2139 = vmatprep.mubr.bf16.mxu1 %v3925_v50  ;;  %v4018_v49 = vld [vmem:[%s4225_s5 + $0x214] ss:$12 sps:$4 sm:$0xff]  }
  0x76   : > { %v4020_v50 = vld [vmem:[%s4225_s5 + $0x128] ss:$12 sps:$4 sm:$0xff]  }
  0x7c   : > { %1756 = vmatmul.mubr.bf16.gmra.mxu0 %v3927_v51  ;;  %2140 = vmatmul.mubr.bf16.gmra.mxu1 %v3928_v52  ;;  %v4021_v51 = vld [vmem:[%s4225_s5 + $0x210] ss:$12 sps:$4 sm:$0xff]   ;;  %v4022_v52 = vld [vmem:[%s4225_s5 + $0x140] ss:$12 sps:$4 sm:$0xff]  }
  0x7d   : > { %1763 = vmatprep.mubr.bf16.mxu0 %v3930_v53  ;;  %2147 = vmatprep.mubr.bf16.mxu1 %v3932_v54  ;;  %v4023_v53 = vld [vmem:[%s4225_s5 + $0x22c] ss:$12 sps:$4 sm:$0xff]  }
  0x7e   : > { %v4025_v54 = vld [vmem:[%s4225_s5 + $0x158] ss:$12 sps:$4 sm:$0xff]  }
  0x84   : > { %1764 = vmatmul.mubr.bf16.gmra.mxu0 %v3934_v55  ;;  %2148 = vmatmul.mubr.bf16.gmra.mxu1 %v3935_v56  ;;  %v4026_v55 = vld [vmem:[%s4225_s5 + $0x228] ss:$12 sps:$4 sm:$0xff]   ;;  %v4027_v56 = vld [vmem:[%s4225_s5 + $0x170] ss:$12 sps:$4 sm:$0xff]  }
  0x85   : > { %1771 = vmatprep.mubr.bf16.mxu0 %v3936_v57  ;;  %2155 = vmatprep.mubr.bf16.mxu1 %v3938_v58  ;;  %v4028_v57 = vld [vmem:[%s4225_s5 + $0x244] ss:$12 sps:$4 sm:$0xff]   ;;  %v4030_v58 = vld [vmem:[%s4225_s5 + $0x188] ss:$12 sps:$4 sm:$0xff]  }
  0x8c   : > { %1772 = vmatmul.mubr.bf16.gmra.mxu0 %v3940_v59  ;;  %2156 = vmatmul.mubr.bf16.gmra.mxu1 %v3941_v60  ;;  %v4031_v59 = vld [vmem:[%s4225_s5 + $0x240] ss:$12 sps:$4 sm:$0xff]  }
  0x8d   : > { %1779 = vmatprep.mubr.bf16.mxu0 %v3943_v61  ;;  %2163 = vmatprep.mubr.bf16.mxu1 %v3945_v62  ;;  %v4032_v60 = vld [vmem:[%s4225_s5 + $0x1a0] ss:$12 sps:$4 sm:$0xff]   ;;  %v4033_v61 = vld [vmem:[%s4225_s5 + $0x25c] ss:$12 sps:$4 sm:$0xff]   ;;  %v4035_v62 = vld [vmem:[%s4225_s5 + $0x1b8] ss:$12 sps:$4 sm:$0xff]  }
  0x94   : > { %1780 = vmatmul.mubr.bf16.gmra.mxu0 %v3947_v63  ;;  %2164 = vmatmul.mubr.bf16.gmra.mxu1 %v3948_v0 }
  0x95   : > { %1787 = vmatprep.mubr.bf16.mxu0 %v3949_v1  ;;  %2171 = vmatprep.mubr.bf16.mxu1 %v3951_v2 }
  0x9c   : > { %1788 = vmatmul.mubr.bf16.gmra.mxu0 %v3953_v3  ;;  %2172 = vmatmul.mubr.bf16.gmra.mxu1 %v3954_v4 }
  0x9d   : > { %1795 = vmatprep.mubr.bf16.mxu0 %v3956_v5  ;;  %2179 = vmatprep.mubr.bf16.mxu1 %v3958_v6  ;;  %v4036_v5 = vld [vmem:[%s4225_s5 + $0x258] ss:$12 sps:$4 sm:$0xff]   ;;  %v4037_v6 = vld [vmem:[%s4225_s5 + $0x1d0] ss:$12 sps:$4 sm:$0xff]  }
  0xa4   : > { %1796 = vmatmul.mubr.bf16.gmra.mxu0 %v3960_v7  ;;  %2180 = vmatmul.mubr.bf16.gmra.mxu1 %v3961_v8  ;;  %v4038_v7 = vld [vmem:[%s4225_s5 + $0x274] ss:$12 sps:$4 sm:$0xff]  }
  0xa5   : > { %1803 = vmatprep.mubr.bf16.mxu0 %v3962_v9  ;;  %2187 = vmatprep.mubr.bf16.mxu1 %v3964_v10  ;;  %v4040_v8 = vld [vmem:[%s4225_s5 + $0x1e8] ss:$12 sps:$4 sm:$0xff]  }
  0xac   : > { %1804 = vmatmul.mubr.bf16.gmra.mxu0 %v3966_v11  ;;  %2188 = vmatmul.mubr.bf16.gmra.mxu1 %v3967_v12 }
  0xad   : > { %1811 = vmatprep.mubr.bf16.mxu0 %v3969_v13  ;;  %2195 = vmatprep.mubr.bf16.mxu1 %v3971_v14 }
  0xb4   : > { %1812 = vmatmul.mubr.bf16.gmra.mxu0 %v3973_v15  ;;  %2196 = vmatmul.mubr.bf16.gmra.mxu1 %v3974_v16 }
  0xb5   : > { %1819 = vmatprep.mubr.bf16.mxu0 %v3975_v17  ;;  %2203 = vmatprep.mubr.bf16.mxu1 %v3977_v18  ;;  %v4041_v17 = vld [vmem:[%s4225_s5 + $0x270] ss:$12 sps:$4 sm:$0xff]   ;;  %v4042_v18 = vld [vmem:[%s4225_s5 + $0x200] ss:$12 sps:$4 sm:$0xff]  }
  0xbc   : > { %1820 = vmatmul.mubr.bf16.gmra.mxu0 %v3979_v19  ;;  %2204 = vmatmul.mubr.bf16.gmra.mxu1 %v3980_v20  ;;  %v4043_v19 = vld [vmem:[%s4225_s5 + $0x28c] ss:$12 sps:$4 sm:$0xff]  }
  0xbd   : > { %1827 = vmatprep.mubr.bf16.mxu0 %v3982_v21  ;;  %2211 = vmatprep.mubr.bf16.mxu1 %v3984_v22  ;;  %v4045_v20 = vld [vmem:[%s4225_s5 + $0x218] ss:$12 sps:$4 sm:$0xff]  }
  0xc4   : > { %1828 = vmatmul.mubr.bf16.gmra.mxu0 %v3986_v23  ;;  %2212 = vmatmul.mubr.bf16.gmra.mxu1 %v3987_v24 }
  0xc5   : > { %1835 = vmatprep.mubr.bf16.mxu0 %v3988_v25  ;;  %3697 = vmatprep.mubr.bf16.mxu1 %v3990_v26 }
  0xcc   : > { %1836 = vmatmul.mubr.bf16.gmra.mxu0 %v3991_v27  ;;  %3698 = vmatmul.mubr.bf16.vlgmr.msra.gmra.mxu1 %v3992_v28 }
  0xcd   : > { %1843 = vmatprep.mubr.bf16.mxu0 %v3993_v29  ;;  %3701 = vmatprep.mubr.bf16.mxu1 %v3995_v30  ;;  %v4046_v29 = vld [vmem:[%s4225_s5 + $0x288] ss:$12 sps:$4 sm:$0xff]   ;;  %v4047_v30 = vld [vmem:[%s4225_s5 + $0x230] ss:$12 sps:$4 sm:$0xff]  }
  0xd4   : > { %1844 = vmatmul.mubr.bf16.gmra.mxu0 %v3996_v31  ;;  %3702 = vmatmul.mubr.bf16.gmra.mxu1 %v3997_v32  ;;  %v4050_v31 = vld [vmem:[%s4225_s5 + $0x2a4] ss:$12 sps:$4 sm:$0xff]   ;;  %v4051_v32 = vld [vmem:[%s4225_s5 + $0x248] ss:$12 sps:$4 sm:$0xff]  }
  0xd5   : > { %1851 = vmatprep.mubr.bf16.mxu0 %v3998_v33  ;;  %3705 = vmatprep.mubr.bf16.mxu1 %v4000_v34 }
  0xdc   : > { %1852 = vmatmul.mubr.bf16.gmra.mxu0 %v4001_v35  ;;  %3706 = vmatmul.mubr.bf16.gmra.mxu1 %v4002_v36 }
  0xdd   : > { %1859 = vmatprep.mubr.bf16.mxu0 %v4003_v37  ;;  %3709 = vmatprep.mubr.bf16.mxu1 %v4005_v38 }
  0xe4   : > { %1860 = vmatmul.mubr.bf16.gmra.mxu0 %v4006_v39  ;;  %3710 = vmatmul.mubr.bf16.gmra.mxu1 %v4007_v40 }
  0xe5   : > { %1867 = vmatprep.mubr.bf16.mxu0 %v4008_v41  ;;  %3713 = vmatprep.mubr.bf16.mxu1 %v4010_v42  ;;  %v4048_v41 = vld [vmem:[%s4225_s5 + $0x2a0] ss:$12 sps:$4 sm:$0xff]  }
  0xe6   : > { %v4052_v42 = vld [vmem:[%s4225_s5 + $0x260] ss:$12 sps:$4 sm:$0xff]  }
  0xec   : > { %1868 = vmatmul.mubr.bf16.gmra.mxu0 %v4011_v43  ;;  %3714 = vmatmul.mubr.bf16.gmra.mxu1 %v4012_v44  ;;  %v4055_v43 = vld [vmem:[%s4225_s5 + $0x2bc] ss:$12 sps:$4 sm:$0xff]   ;;  %v4056_v44 = vld [vmem:[%s4225_s5 + $0x278] ss:$12 sps:$4 sm:$0xff]  }
  0xed   : > { %1875 = vmatprep.mubr.bf16.mxu0 %v4013_v45  ;;  %3717 = vmatprep.mubr.bf16.mxu1 %v4015_v46 }
  0xf4   : > { %1876 = vmatmul.mubr.bf16.gmra.mxu0 %v4016_v47  ;;  %3718 = vmatmul.mubr.bf16.gmra.mxu1 %v4017_v48 }
  0xf5   : > { %1883 = vmatprep.mubr.bf16.mxu0 %v4018_v49  ;;  %3721 = vmatprep.mubr.bf16.mxu1 %v4020_v50 }
  0xfc   : > { %1884 = vmatmul.mubr.bf16.gmra.mxu0 %v4021_v51  ;;  %3722 = vmatmul.mubr.bf16.gmra.mxu1 %v4022_v52 }
  0xfd   : > { %1891 = vmatprep.mubr.bf16.mxu0 %v4023_v53  ;;  %3725 = vmatprep.mubr.bf16.mxu1 %v4025_v54  ;;  %v4053_v53 = vld [vmem:[%s4225_s5 + $0x2b8] ss:$12 sps:$4 sm:$0xff]   ;;  %v4057_v54 = vld [vmem:[%s4225_s5 + $0x290] ss:$12 sps:$4 sm:$0xff]  }
 0x104   : > { %1892 = vmatmul.mubr.bf16.gmra.mxu0 %v4026_v55  ;;  %3726 = vmatmul.mubr.bf16.gmra.mxu1 %v4027_v56  ;;  %v4060_v55 = vld [vmem:[%s4225_s5 + $0x2d4] ss:$12 sps:$4 sm:$0xff]  }
 0x105   : > { %1899 = vmatprep.mubr.bf16.mxu0 %v4028_v57  ;;  %3729 = vmatprep.mubr.bf16.mxu1 %v4030_v58  ;;  %v4061_v56 = vld [vmem:[%s4225_s5 + $0x2a8] ss:$12 sps:$4 sm:$0xff]  }
 0x10c   : > { %v4410_v63 = vpop.f32.mrf.mxu0  ;;  %1900 = vmatmul.mubr.bf16.gmra.mxu0 %v4031_v59  ;;  %v4412_v0 = vpop.f32.mrf.mxu1  ;;  %3730 = vmatmul.mubr.bf16.gmra.mxu1 %v4032_v60 }
 0x10d   : > { %1907 = vmatprep.mubr.bf16.mxu0 %v4033_v61  ;;  %3733 = vmatprep.mubr.bf16.mxu1 %v4035_v62 }
 0x10e   : > { %v1711_v1 = vpop.f32.mrf.mxu0  ;;  %v2095_v2 = vpop.f32.mrf.mxu1 }
 0x110   : > { %v4414_v3 = vpop.f32.mrf.mxu0  ;;  %v4416_v4 = vpop.f32.mrf.mxu1 }
 0x112   : > { %v1714_v9 = vpop.f32.mrf.mxu0  ;;  %v2098_v10 = vpop.f32.mrf.mxu1 }
 0x114   : > { %v4422_v11 = vpop.f32.mrf.mxu0  ;;  %1908 = vmatmul.mubr.bf16.gmra.mxu0 %v4036_v5  ;;  %v4424_v12 = vpop.f32.mrf.mxu1  ;;  %3734 = vmatmul.mubr.bf16.gmra.mxu1 %v4037_v6  ;;  %v4058_v5 = vld [vmem:[%s4225_s5 + $0x2d0] ss:$12 sps:$4 sm:$0xff]   ;;  %v4062_v6 = vld [vmem:[%s4225_s5 + $0x2c0] ss:$12 sps:$4 sm:$0xff]  }
 0x115   : > { %1915 = vmatprep.mubr.bf16.mxu0 %v4038_v7  ;;  %3737 = vmatprep.mubr.bf16.mxu1 %v4040_v8  ;;  %v4065_v7 = vld [vmem:[%s4225_s5 + $0x2ec] ss:$12 sps:$4 sm:$0xff]  }
 0x116   : > { %v1719_v13 = vpop.f32.mrf.mxu0  ;;  %v2103_v14 = vpop.f32.mrf.mxu1  ;;  %v4066_v8 = vld [vmem:[%s4225_s5 + $0x2d8] ss:$12 sps:$4 sm:$0xff]  }
 0x118   : > { %v4426_v15 = vpop.f32.mrf.mxu0  ;;  %v4428_v16 = vpop.f32.mrf.mxu1 }
 0x11a   : > { %v1722_v21 = vpop.f32.mrf.mxu0  ;;  %v2106_v22 = vpop.f32.mrf.mxu1 }
 0x11b   : > { %v4063_v21 = vld [vmem:[%s4225_s5 + $0x2e8] ss:$12 sps:$4 sm:$0xff]   ;;  %v4067_v22 = vld [vmem:[%s4225_s5 + $0x2f0] ss:$12 sps:$4 sm:$0xff]  }
 0x11c   : > { %v4434_v23 = vpop.f32.mrf.mxu0  ;;  %1916 = vmatmul.mubr.bf16.gmra.mxu0 %v4041_v17  ;;  %v4436_v24 = vpop.f32.mrf.mxu1  ;;  %3738 = vmatmul.mubr.bf16.gmra.mxu1 %v4042_v18 }
 0x11d   : > { %1923 = vmatprep.mubr.bf16.mxu0 %v4043_v19  ;;  %3741 = vmatprep.mubr.bf16.mxu1 %v4045_v20 }
 0x11e   : > { %v1727_v25 = vpop.f32.mrf.mxu0  ;;  %v2111_v26 = vpop.f32.mrf.mxu1 }
 0x11f   : > { %v4070_v25 = vld [vmem:[%s4225_s5 + $0x304] ss:$12 sps:$4 sm:$0xff]   ;;  %v4071_v26 = vld [vmem:[%s4225_s5 + $0x308] ss:$12 sps:$4 sm:$0xff]  }
 0x120   : > { %v4438_v27 = vpop.f32.mrf.mxu0  ;;  %v4440_v28 = vpop.f32.mrf.mxu1 }
 0x122   : > { %v1730_v33 = vpop.f32.mrf.mxu0  ;;  %v2114_v34 = vpop.f32.mrf.mxu1 }
 0x124   : > { %v4446_v35 = vpop.f32.mrf.mxu0  ;;  %1924 = vmatmul.mubr.bf16.gmra.mxu0 %v4046_v29  ;;  %v4448_v36 = vpop.f32.mrf.mxu1  ;;  %3742 = vmatmul.mubr.bf16.gmra.mxu1 %v4047_v30 }
 0x125   : > { %1931 = vmatprep.mubr.bf16.mxu0 %v4050_v31  ;;  %3745 = vmatprep.mubr.bf16.mxu1 %v4051_v32 }
 0x126   : > { %v1735_v37 = vpop.f32.mrf.mxu0  ;;  %v2119_v38 = vpop.f32.mrf.mxu1 }
 0x128   : > { %v4450_v39 = vpop.f32.mrf.mxu0  ;;  %v4452_v40 = vpop.f32.mrf.mxu1 }
 0x12a   : > { %v1738_v45 = vpop.f32.mrf.mxu0  ;;  %v2122_v46 = vpop.f32.mrf.mxu1 }
 0x12c   : > { %v4458_v47 = vpop.f32.mrf.mxu0  ;;  %1932 = vmatmul.mubr.bf16.gmra.mxu0 %v4048_v41  ;;  %v4460_v48 = vpop.f32.mrf.mxu1  ;;  %3746 = vmatmul.mubr.bf16.gmra.mxu1 %v4052_v42  ;;  %v4068_v41 = vld [vmem:[%s4225_s5 + $0x300] ss:$12 sps:$4 sm:$0xff]  }
 0x12d   : > { %1939 = vmatprep.mubr.bf16.mxu0 %v4055_v43  ;;  %3749 = vmatprep.mubr.bf16.mxu1 %v4056_v44  ;;  %v4072_v42 = vld [vmem:[%s4225_s5 + $0x320] ss:$12 sps:$4 sm:$0xff]   ;;  %v4075_v43 = vld [vmem:[%s4225_s5 + $0x31c] ss:$12 sps:$4 sm:$0xff]   ;;  %v4076_v44 = vld [vmem:[%s4225_s5 + $0x338] ss:$12 sps:$4 sm:$0xff]  }
 0x12e   : > { %v1743_v49 = vpop.f32.mrf.mxu0  ;;  %v2127_v50 = vpop.f32.mrf.mxu1 }
 0x130   : > { %v4462_v51 = vpop.f32.mrf.mxu0  ;;  %v4464_v52 = vpop.f32.mrf.mxu1 }
 0x132   : > { %v1746_v57 = vpop.f32.mrf.mxu0  ;;  %v2130_v58 = vpop.f32.mrf.mxu1 }
 0x133   : > { %v4073_v57 = vld [vmem:[%s4225_s5 + $0x318] ss:$12 sps:$4 sm:$0xff]   ;;  %v4077_v58 = vld [vmem:[%s4225_s5 + $0x350] ss:$12 sps:$4 sm:$0xff]  }
 0x134   : > { %v4470_v59 = vpop.f32.mrf.mxu0  ;;  %1940 = vmatmul.mubr.bf16.gmra.mxu0 %v4053_v53  ;;  %v4472_v60 = vpop.f32.mrf.mxu1  ;;  %3750 = vmatmul.mubr.bf16.gmra.mxu1 %v4057_v54 }
 0x135   : > { %1947 = vmatprep.mubr.bf16.mxu0 %v4060_v55  ;;  %3753 = vmatprep.mubr.bf16.mxu1 %v4061_v56 }
 0x136   : > { %v1751_v61 = vpop.f32.mrf.mxu0  ;;  %v2135_v62 = vpop.f32.mrf.mxu1 }
 0x137   : > { %v4080_v61 = vld [vmem:[%s4225_s5 + $0x334] ss:$12 sps:$4 sm:$0xff]  }
 0x138   : > { %v4474_v1 = vpop.f32.mrf.mxu0  ;;  %v4476_v2 = vpop.f32.mrf.mxu1  ;;  %v4081_v62 = vld [vmem:[%s4225_s5 + $0x368] ss:$12 sps:$4 sm:$0xff]  }
 0x13a   : > { %v1754_v9 = vpop.f32.mrf.mxu0  ;;  %v2138_v10 = vpop.f32.mrf.mxu1 }
 0x13c   : > { %v4482_v13 = vpop.f32.mrf.mxu0  ;;  %1948 = vmatmul.mubr.bf16.gmra.mxu0 %v4058_v5  ;;  %v4484_v14 = vpop.f32.mrf.mxu1  ;;  %3754 = vmatmul.mubr.bf16.gmra.mxu1 %v4062_v6 }
 0x13d   : > { %1955 = vmatprep.mubr.bf16.mxu0 %v4065_v7  ;;  %3757 = vmatprep.mubr.bf16.mxu1 %v4066_v8 }
 0x13e   : > { %v1759_v17 = vpop.f32.mrf.mxu0  ;;  %v2143_v18 = vpop.f32.mrf.mxu1 }
 0x140   : > { %v4486_v19 = vpop.f32.mrf.mxu0  ;;  %v4488_v20 = vpop.f32.mrf.mxu1 }
 0x142   : > { %v1762_v29 = vpop.f32.mrf.mxu0  ;;  %v2146_v30 = vpop.f32.mrf.mxu1 }
 0x144   : > { %v4494_v31 = vpop.f32.mrf.mxu0  ;;  %1956 = vmatmul.mubr.bf16.gmra.mxu0 %v4063_v21  ;;  %v4496_v32 = vpop.f32.mrf.mxu1  ;;  %3758 = vmatmul.mubr.bf16.gmra.mxu1 %v4067_v22  ;;  %v4078_v21 = vld [vmem:[%s4225_s5 + $0x330] ss:$12 sps:$4 sm:$0xff]   ;;  %v4082_v22 = vld [vmem:[%s4225_s5 + $0x380] ss:$12 sps:$4 sm:$0xff]  }
 0x145   : > { %1963 = vmatprep.mubr.bf16.mxu0 %v4070_v25  ;;  %3761 = vmatprep.mubr.bf16.mxu1 %v4071_v26  ;;  %v4085_v25 = vld [vmem:[%s4225_s5 + $0x34c] ss:$12 sps:$4 sm:$0xff]  }
 0x146   : > { %v1767_v33 = vpop.f32.mrf.mxu0  ;;  %v2151_v34 = vpop.f32.mrf.mxu1  ;;  %v4086_v26 = vld [vmem:[%s4225_s5 + $0x398] ss:$12 sps:$4 sm:$0xff]  }
 0x148   : > { %v4498_v37 = vpop.f32.mrf.mxu0  ;;  %v4500_v38 = vpop.f32.mrf.mxu1 }
 0x14a   : > { %v1770_v45 = vpop.f32.mrf.mxu0  ;;  %v2154_v46 = vpop.f32.mrf.mxu1 }
 0x14b   : > { %v4083_v45 = vld [vmem:[%s4225_s5 + $0x348] ss:$12 sps:$4 sm:$0xff]   ;;  %v4087_v46 = vld [vmem:[%s4225_s5 + $0x3b0] ss:$12 sps:$4 sm:$0xff]  }
 0x14c   : > { %v4506_v49 = vpop.f32.mrf.mxu0  ;;  %1964 = vmatmul.mubr.bf16.gmra.mxu0 %v4068_v41  ;;  %v4508_v50 = vpop.f32.mrf.mxu1  ;;  %3762 = vmatmul.mubr.bf16.gmra.mxu1 %v4072_v42 }
 0x14d   : > { %1971 = vmatprep.mubr.bf16.mxu0 %v4075_v43  ;;  %3765 = vmatprep.mubr.bf16.mxu1 %v4076_v44 }
 0x14e   : > { %v1775_v53 = vpop.f32.mrf.mxu0  ;;  %v2159_v54 = vpop.f32.mrf.mxu1 }
 0x14f   : > { %v4090_v53 = vld [vmem:[%s4225_s5 + $0x364] ss:$12 sps:$4 sm:$0xff]   ;;  %v4091_v54 = vld [vmem:[%s4225_s5 + $0x3c8] ss:$12 sps:$4 sm:$0xff]  }
 0x150   : > { %v4510_v55 = vpop.f32.mrf.mxu0  ;;  %v4512_v56 = vpop.f32.mrf.mxu1 }
 0x151   : > { %5897 = vst [vmem:[#allocation2_spill] sm:$0xff] %v4512_v56  ;;  %v4116_v56 = vld [vmem:[%s4225_s5 + $0x4b8] ss:$12 sps:$4 sm:$0xff]  }
 0x152   : > { %v1778_v5 = vpop.f32.mrf.mxu0  ;;  %v2162_v6 = vpop.f32.mrf.mxu1 }
 0x154   : > { %v4518_v7 = vpop.f32.mrf.mxu0  ;;  %1972 = vmatmul.mubr.bf16.gmra.mxu0 %v4073_v57  ;;  %v4520_v8 = vpop.f32.mrf.mxu1  ;;  %3766 = vmatmul.mubr.bf16.gmra.mxu1 %v4077_v58 }
 0x155   : > { %1979 = vmatprep.mubr.bf16.mxu0 %v4080_v61  ;;  %3769 = vmatprep.mubr.bf16.mxu1 %v4081_v62 }
 0x156   : > { %v1783_v9 = vpop.f32.mrf.mxu0  ;;  %v2167_v10 = vpop.f32.mrf.mxu1 }
 0x158   : > { %v4522_v17 = vpop.f32.mrf.mxu0  ;;  %v4524_v18 = vpop.f32.mrf.mxu1 }
 0x159   : > { %5898 = vst [vmem:[#allocation3_spill] sm:$0xff] %v4524_v18 }
 0x15a   : > { %v1786_v29 = vpop.f32.mrf.mxu0  ;;  %v2170_v30 = vpop.f32.mrf.mxu1 }
 0x15c   : > { %v4530_v33 = vpop.f32.mrf.mxu0  ;;  %1980 = vmatmul.mubr.bf16.gmra.mxu0 %v4078_v21  ;;  %v4532_v34 = vpop.f32.mrf.mxu1  ;;  %3770 = vmatmul.mubr.bf16.gmra.mxu1 %v4082_v22  ;;  %v4088_v21 = vld [vmem:[%s4225_s5 + $0x360] ss:$12 sps:$4 sm:$0xff]  }
 0x15d   : > { %5899 = vst [vmem:[#allocation4_spill] sm:$0xff] %v4532_v34  ;;  %1987 = vmatprep.mubr.bf16.mxu0 %v4085_v25  ;;  %3773 = vmatprep.mubr.bf16.mxu1 %v4086_v26  ;;  %v4092_v22 = vld [vmem:[%s4225_s5 + $0x3e0] ss:$12 sps:$4 sm:$0xff]   ;;  %v4095_v25 = vld [vmem:[%s4225_s5 + $0x37c] ss:$12 sps:$4 sm:$0xff]  }
 0x15e   : > { %v1791_v41 = vpop.f32.mrf.mxu0  ;;  %v2175_v42 = vpop.f32.mrf.mxu1  ;;  %v4096_v26 = vld [vmem:[%s4225_s5 + $0x3f8] ss:$12 sps:$4 sm:$0xff]   ;;  %v4108_v34 = vld [vmem:[%s4225_s5 + $0x3c0] ss:$12 sps:$4 sm:$0xff]  }
 0x160   : > { %v4534_v43 = vpop.f32.mrf.mxu0  ;;  %v4536_v44 = vpop.f32.mrf.mxu1 }
 0x161   : > { %5900 = vst [vmem:[#allocation5_spill] sm:$0xff] %v4536_v44 }
 0x162   : > { %v1794_v57 = vpop.f32.mrf.mxu0  ;;  %v2178_v58 = vpop.f32.mrf.mxu1 }
 0x163   : > { %v4093_v57 = vld [vmem:[%s4225_s5 + $0x378] ss:$12 sps:$4 sm:$0xff]   ;;  %v4097_v58 = vld [vmem:[%s4225_s5 + $0x410] ss:$12 sps:$4 sm:$0xff]  }
 0x164   : > { %v4542_v61 = vpop.f32.mrf.mxu0  ;;  %1988 = vmatmul.mubr.bf16.gmra.mxu0 %v4083_v45  ;;  %v4544_v62 = vpop.f32.mrf.mxu1  ;;  %3774 = vmatmul.mubr.bf16.gmra.mxu1 %v4087_v46 }
 0x165   : > { %5901 = vst [vmem:[#allocation6_spill] sm:$0xff] %v4544_v62  ;;  %1995 = vmatprep.mubr.bf16.mxu0 %v4090_v53  ;;  %3777 = vmatprep.mubr.bf16.mxu1 %v4091_v54  ;;  %v4112_v62 = vld [vmem:[%s4225_s5 + $0x4a0] ss:$12 sps:$4 sm:$0xff]  }
 0x166   : > { %v1799_v5 = vpop.f32.mrf.mxu0  ;;  %v2183_v6 = vpop.f32.mrf.mxu1 }
 0x167   : > { %v4100_v5 = vld [vmem:[%s4225_s5 + $0x394] ss:$12 sps:$4 sm:$0xff]  }
 0x168   : > { %v4546_v9 = vpop.f32.mrf.mxu0  ;;  %v4548_v10 = vpop.f32.mrf.mxu1  ;;  %v4101_v6 = vld [vmem:[%s4225_s5 + $0x428] ss:$12 sps:$4 sm:$0xff]  }
 0x169   : > { %5902 = vst [vmem:[#allocation7_spill] sm:$0xff] %v4548_v10  ;;  %v4107_v10 = vld [vmem:[%s4225_s5 + $0x470] ss:$12 sps:$4 sm:$0xff]  }
 0x16a   : > { %v1802_v29 = vpop.f32.mrf.mxu0  ;;  %v2186_v30 = vpop.f32.mrf.mxu1 }
 0x16c   : > { %v4554_v41 = vpop.f32.mrf.mxu0  ;;  %1996 = vmatmul.mubr.bf16.gmra.mxu0 %v4088_v21  ;;  %v4556_v42 = vpop.f32.mrf.mxu1  ;;  %3778 = vmatmul.mubr.bf16.gmra.mxu1 %v4092_v22 }
 0x16d   : > { %5903 = vst [vmem:[#allocation8_spill] sm:$0xff] %v4556_v42  ;;  %2003 = vmatprep.mubr.bf16.mxu0 %v4095_v25  ;;  %3781 = vmatprep.mubr.bf16.mxu1 %v4096_v26  ;;  %v4102_v42 = vld [vmem:[%s4225_s5 + $0x440] ss:$12 sps:$4 sm:$0xff]  }
 0x16e   : > { %v1807_v45 = vpop.f32.mrf.mxu0  ;;  %v2191_v46 = vpop.f32.mrf.mxu1 }
 0x170   : > { %v4558_v53 = vpop.f32.mrf.mxu0  ;;  %v4560_v54 = vpop.f32.mrf.mxu1 }
 0x171   : > { %5904 = vst [vmem:[#allocation9_spill] sm:$0xff] %v4560_v54  ;;  %v4098_v54 = vld [vmem:[%s4225_s5 + $0x390] ss:$12 sps:$4 sm:$0xff]  }
 0x172   : > { %v1810_v21 = vpop.f32.mrf.mxu0  ;;  %v2194_v29 = vpop.f32.mrf.mxu1 }
 0x173   : > { %v4105_v21 = vld [vmem:[%s4225_s5 + $0x3ac] ss:$12 sps:$4 sm:$0xff]  }
 0x174   : > { %v4566_v30 = vpop.f32.mrf.mxu0  ;;  %2004 = vmatmul.mubr.bf16.gmra.mxu0 %v4093_v57  ;;  %v4568_v22 = vpop.f32.mrf.mxu1  ;;  %3782 = vmatmul.mubr.bf16.gmra.mxu1 %v4097_v58  ;;  %v4106_v29 = vld [vmem:[%s4225_s5 + $0x458] ss:$12 sps:$4 sm:$0xff]  }
 0x175   : > { %5905 = vst [vmem:[#allocation10_spill] sm:$0xff] %v4568_v22  ;;  %2011 = vmatprep.mubr.bf16.mxu0 %v4100_v5  ;;  %3785 = vmatprep.mubr.bf16.mxu1 %v4101_v6 }
 0x176   : > { %v1815_v25 = vpop.f32.mrf.mxu0  ;;  %v2199_v26 = vpop.f32.mrf.mxu1 }
 0x178   : > { %v4570_v45 = vpop.f32.mrf.mxu0  ;;  %v4572_v46 = vpop.f32.mrf.mxu1 }
 0x179   : > { %5906 = vst [vmem:[#allocation11_spill] sm:$0xff] %v4572_v46  ;;  %v4103_v46 = vld [vmem:[%s4225_s5 + $0x3a8] ss:$12 sps:$4 sm:$0xff]  }
 0x17a   : > { %v1818_v57 = vpop.f32.mrf.mxu0  ;;  %v2202_v44 = vpop.f32.mrf.mxu1 }
 0x17b   : > { %v4110_v57 = vld [vmem:[%s4225_s5 + $0x3c4] ss:$12 sps:$4 sm:$0xff]   ;;  %v4111_v44 = vld [vmem:[%s4225_s5 + $0x488] ss:$12 sps:$4 sm:$0xff]  }
 0x17c   : > { %v4578_v22 = vpop.f32.mrf.mxu0  ;;  %2012 = vmatmul.mubr.bf16.gmra.mxu0 %v4098_v54  ;;  %v4580_v58 = vpop.f32.mrf.mxu1  ;;  %3786 = vmatmul.mubr.bf16.gmra.mxu1 %v4102_v42 }
 0x17d   : > { %5907 = vst [vmem:[#allocation12_spill] sm:$0xff] %v4580_v58  ;;  %2019 = vmatprep.mubr.bf16.mxu0 %v4105_v21  ;;  %3789 = vmatprep.mubr.bf16.mxu1 %v4106_v29 }
 0x17e   : > { %v1823_v5 = vpop.f32.mrf.mxu0  ;;  %v2207_v6 = vpop.f32.mrf.mxu1 }
 0x180   : > { %v4582_v25 = vpop.f32.mrf.mxu0  ;;  %v4584_v26 = vpop.f32.mrf.mxu1 }
 0x181   : > { %5908 = vst [vmem:[#allocation13_spill] sm:$0xff] %v4584_v26 }
 0x182   : > { %v1826_v54 = vpop.f32.mrf.mxu0  ;;  %v2210_v58 = vpop.f32.mrf.mxu1 }
 0x183   : > { %v4115_v54 = vld [vmem:[%s4225_s5 + $0x3dc] ss:$12 sps:$4 sm:$0xff]  }
 0x184   : > { %v4590_v42 = vpop.f32.mrf.mxu0  ;;  %2020 = vmatmul.mubr.bf16.gmra.mxu0 %v4103_v46  ;;  %v4592_v21 = vpop.f32.mrf.mxu1  ;;  %3790 = vmatmul.mubr.bf16.gmra.mxu1 %v4107_v10 }
 0x185   : > { %2027 = vmatprep.mubr.bf16.mxu0 %v4110_v57  ;;  %3793 = vmatprep.mubr.bf16.mxu1 %v4111_v44 }
 0x186   : > { %v1831_v29 = vpop.f32.mrf.mxu0  ;;  %v2215_v5 = vpop.f32.mrf.mxu1 }
 0x188   : > { %v4594_v6 = vpop.f32.mrf.mxu0  ;;  %v4596_v26 = vpop.f32.mrf.mxu1 }
 0x189   : > { %5909 = vst [vmem:[#allocation14_spill] sm:$0xff] %v4596_v26  ;;  %v4117_v26 = vld [vmem:[%s4225_s5 + $0x4d0] ss:$12 sps:$4 sm:$0xff]  }
 0x18a   : > { %v1834_v58 = vpop.f32.mrf.mxu0  ;;  %v2218_v18 = vpop.f32.mrf.mxu1 }
 0x18b   : > { %v4113_v58 = vld [vmem:[%s4225_s5 + $0x3d8] ss:$12 sps:$4 sm:$0xff]  }
 0x18c   : > { %v4603_v46 = vpop.f32.mrf.mxu0  ;;  %2028 = vmatmul.mubr.bf16.gmra.mxu0 %v4108_v34  ;;  %v3699_v10 = vpop.f32.mrf.mxu1  ;;  %3794 = vmatmul.mubr.bf16.gmra.mxu1 %v4112_v62  ;;  %v4120_v62 = vld [vmem:[%s4225_s5 + $0x3f4] ss:$12 sps:$4 sm:$0xff]  }
 0x18d   : > { %v4611_v57 = vadd.f32 %v3699_v10, %v4422_v11  ;;  %2035 = vmatprep.mubr.bf16.mxu0 %v4115_v54  ;;  %3797 = vmatprep.mubr.bf16.mxu1 %v4116_v56  ;;  %v4121_v56 = vld [vmem:[%s4225_s5 + $0x4e8] ss:$12 sps:$4 sm:$0xff]  }
 0x18e   : > { %v1839_v18 = vpop.f32.mrf.mxu0  ;;  %v2254_v44 = vpop.f32.mrf.mxu1 }
 0x18f   : > { %2767 = vst [vmem:[%s4608_s28 + $0x10] sm:$0xff] %v4611_v57  ;;  %v4616_v34 = vadd.f32 %v2254_v44, %v4410_v63 }
 0x190   : > { %v4618_v29 = vpop.f32.mrf.mxu0  ;;  %v3700_v5 = vpop.f32.mrf.mxu1 }
 0x191   : > { %2765 = vst [vmem:[%s4608_s28] sm:$0xff] %v4616_v34  ;;  %v4625_v11 = vadd.f32 %v3700_v5, %v4426_v15 }
 0x192   : > { %v1842_v54 = vpop.f32.mrf.mxu0  ;;  %v2257_v10 = vpop.f32.mrf.mxu1 }
 0x193   : > { %5910 = vst [vmem:[#allocation15_spill] sm:$0xff] %v4625_v11  ;;  %2768 = vst [vmem:[%s4608_s28 + $0x18] sm:$0xff] %v4625_v11  ;;  %v4632_v63 = vadd.f32 %v2257_v10, %v4414_v3  ;;  %v4118_v10 = vld [vmem:[%s4225_s5 + $0x3f0] ss:$12 sps:$4 sm:$0xff]   ;;  %v4122_v11 = vld [vmem:[%s4225_s5 + $0x500] ss:$12 sps:$4 sm:$0xff]  }
 0x194   : > { %v4634_v18 = vpop.f32.mrf.mxu0  ;;  %2036 = vmatmul.mubr.bf16.gmra.mxu0 %v4113_v58  ;;  %v3703_v44 = vpop.f32.mrf.mxu1  ;;  %3798 = vmatmul.mubr.bf16.gmra.mxu1 %v4117_v26 }
 0x195   : > { %2766 = vst [vmem:[%s4608_s28 + $0x8] sm:$0xff] %v4632_v63  ;;  %v4639_v15 = vadd.f32 %v3703_v44, %v4446_v35  ;;  %2043 = vmatprep.mubr.bf16.mxu0 %v4120_v62  ;;  %3801 = vmatprep.mubr.bf16.mxu1 %v4121_v56  ;;  %v4125_v62 = vld [vmem:[%s4225_s5 + $0x40c] ss:$12 sps:$4 sm:$0xff]  }
 0x196   : > { %v1847_v5 = vpop.f32.mrf.mxu0  ;;  %v2270_v3 = vpop.f32.mrf.mxu1  ;;  %v4126_v56 = vld [vmem:[%s4225_s5 + $0x518] ss:$12 sps:$4 sm:$0xff]  }
 0x197   : > { %5911 = vst [vmem:[#allocation16_spill] sm:$0xff] %v4639_v15  ;;  %2771 = vst [vmem:[%s4608_s28 + $0x30] sm:$0xff] %v4639_v15  ;;  %v4644_v54 = vadd.f32 %v2270_v3, %v4434_v23 }
 0x198   : > { %v4646_v58 = vpop.f32.mrf.mxu0  ;;  %v3704_v26 = vpop.f32.mrf.mxu1 }
 0x199   : > { %2769 = vst [vmem:[%s4608_s28 + $0x20] sm:$0xff] %v4644_v54  ;;  %v4653_v35 = vadd.f32 %v3704_v26, %v4450_v39 }
 0x19a   : > { %v1850_v44 = vpop.f32.mrf.mxu0  ;;  %v2273_v5 = vpop.f32.mrf.mxu1 }
 0x19b   : > { %5912 = vst [vmem:[#allocation17_spill] sm:$0xff] %v4653_v35  ;;  %2772 = vst [vmem:[%s4608_s28 + $0x38] sm:$0xff] %v4653_v35  ;;  %v4660_v23 = vadd.f32 %v2273_v5, %v4438_v27  ;;  %v4123_v5 = vld [vmem:[%s4225_s5 + $0x408] ss:$12 sps:$4 sm:$0xff]   ;;  %v4127_v35 = vld [vmem:[%s4225_s5 + $0x530] ss:$12 sps:$4 sm:$0xff]  }
 0x19c   : > { %v4662_v3 = vpop.f32.mrf.mxu0  ;;  %2044 = vmatmul.mubr.bf16.gmra.mxu0 %v4118_v10  ;;  %v3707_v15 = vpop.f32.mrf.mxu1  ;;  %3802 = vmatmul.mubr.bf16.gmra.mxu1 %v4122_v11 }
 0x19d   : > { %2770 = vst [vmem:[%s4608_s28 + $0x28] sm:$0xff] %v4660_v23  ;;  %v4667_v39 = vadd.f32 %v3707_v15, %v4470_v59  ;;  %2051 = vmatprep.mubr.bf16.mxu0 %v4125_v62  ;;  %3805 = vmatprep.mubr.bf16.mxu1 %v4126_v56  ;;  %v4130_v15 = vld [vmem:[%s4225_s5 + $0x424] ss:$12 sps:$4 sm:$0xff]   ;;  %v4131_v62 = vld [vmem:[%s4225_s5 + $0x548] ss:$12 sps:$4 sm:$0xff]  }
 0x19e   : > { %v1855_v26 = vpop.f32.mrf.mxu0  ;;  %v2286_v27 = vpop.f32.mrf.mxu1 }
 0x19f   : > { %5913 = vst [vmem:[#allocation18_spill] sm:$0xff] %v4667_v39  ;;  %2775 = vst [vmem:[%s4608_s28 + $0x50] sm:$0xff] %v4667_v39  ;;  %v4672_v44 = vadd.f32 %v2286_v27, %v4458_v47 }
 0x1a0   : > { %v4674_v10 = vpop.f32.mrf.mxu0  ;;  %v3708_v11 = vpop.f32.mrf.mxu1 }
 0x1a1   : > { %2773 = vst [vmem:[%s4608_s28 + $0x40] sm:$0xff] %v4672_v44  ;;  %v4681_v59 = vadd.f32 %v3708_v11, %v4474_v1 }
 0x1a2   : > { %v1858_v56 = vpop.f32.mrf.mxu0  ;;  %v2289_v26 = vpop.f32.mrf.mxu1 }
 0x1a3   : > { %5914 = vst [vmem:[#allocation19_spill] sm:$0xff] %v4681_v59  ;;  %2776 = vst [vmem:[%s4608_s28 + $0x58] sm:$0xff] %v4681_v59  ;;  %v4688_v47 = vadd.f32 %v2289_v26, %v4462_v51  ;;  %v4128_v26 = vld [vmem:[%s4225_s5 + $0x420] ss:$12 sps:$4 sm:$0xff]  }
 0x1a4   : > { %v4690_v27 = vpop.f32.mrf.mxu0  ;;  %2052 = vmatmul.mubr.bf16.gmra.mxu0 %v4123_v5  ;;  %v3711_v39 = vpop.f32.mrf.mxu1  ;;  %3806 = vmatmul.mubr.bf16.gmra.mxu1 %v4127_v35  ;;  %v4132_v59 = vld [vmem:[%s4225_s5 + $0x560] ss:$12 sps:$4 sm:$0xff]  }
 0x1a5   : > { %2774 = vst [vmem:[%s4608_s28 + $0x48] sm:$0xff] %v4688_v47  ;;  %v4695_v1 = vadd.f32 %v3711_v39, %v4494_v31  ;;  %2059 = vmatprep.mubr.bf16.mxu0 %v4130_v15  ;;  %3809 = vmatprep.mubr.bf16.mxu1 %v4131_v62  ;;  %v4135_v39 = vld [vmem:[%s4225_s5 + $0x43c] ss:$12 sps:$4 sm:$0xff]   ;;  %v4136_v15 = vld [vmem:[%s4225_s5 + $0x578] ss:$12 sps:$4 sm:$0xff]  }
 0x1a6   : > { %v1863_v11 = vpop.f32.mrf.mxu0  ;;  %v2302_v51 = vpop.f32.mrf.mxu1 }
 0x1a7   : > { %5915 = vst [vmem:[#allocation20_spill] sm:$0xff] %v4695_v1  ;;  %2779 = vst [vmem:[%s4608_s28 + $0x70] sm:$0xff] %v4695_v1  ;;  %v4700_v56 = vadd.f32 %v2302_v51, %v4482_v13 }
 0x1a8   : > { %v4702_v5 = vpop.f32.mrf.mxu0  ;;  %v3712_v35 = vpop.f32.mrf.mxu1 }
 0x1a9   : > { %2777 = vst [vmem:[%s4608_s28 + $0x60] sm:$0xff] %v4700_v56  ;;  %v4709_v31 = vadd.f32 %v3712_v35, %v4498_v37 }
 0x1aa   : > { %v1866_v62 = vpop.f32.mrf.mxu0  ;;  %v2305_v11 = vpop.f32.mrf.mxu1 }
 0x1ab   : > { %5916 = vst [vmem:[#allocation21_spill] sm:$0xff] %v4709_v31  ;;  %2780 = vst [vmem:[%s4608_s28 + $0x78] sm:$0xff] %v4709_v31  ;;  %v4716_v13 = vadd.f32 %v2305_v11, %v4486_v19  ;;  %v4133_v11 = vld [vmem:[%s4225_s5 + $0x438] ss:$12 sps:$4 sm:$0xff]   ;;  %v4137_v31 = vld [vmem:[%s4225_s5 + $0x590] ss:$12 sps:$4 sm:$0xff]  }
 0x1ac   : > { %v4718_v51 = vpop.f32.mrf.mxu0  ;;  %2060 = vmatmul.mubr.bf16.gmra.mxu0 %v4128_v26  ;;  %v3715_v1 = vpop.f32.mrf.mxu1  ;;  %3810 = vmatmul.mubr.bf16.gmra.mxu1 %v4132_v59 }
 0x1ad   : > { %2778 = vst [vmem:[%s4608_s28 + $0x68] sm:$0xff] %v4716_v13  ;;  %v4723_v37 = vadd.f32 %v3715_v1, %v4518_v7  ;;  %2067 = vmatprep.mubr.bf16.mxu0 %v4135_v39  ;;  %3813 = vmatprep.mubr.bf16.mxu1 %v4136_v15  ;;  %v4140_v1 = vld [vmem:[%s4225_s5 + $0x454] ss:$12 sps:$4 sm:$0xff]  }
 0x1ae   : > { %v1871_v35 = vpop.f32.mrf.mxu0  ;;  %v2318_v19 = vpop.f32.mrf.mxu1  ;;  %v4141_v39 = vld [vmem:[%s4225_s5 + $0x5a8] ss:$12 sps:$4 sm:$0xff]  }
 0x1af   : > { %5917 = vst [vmem:[#allocation22_spill] sm:$0xff] %v4723_v37  ;;  %2783 = vst [vmem:[%s4608_s28 + $0x90] sm:$0xff] %v4723_v37  ;;  %v4728_v62 = vadd.f32 %v2318_v19, %v4506_v49 }
 0x1b0   : > { %v4730_v26 = vpop.f32.mrf.mxu0  ;;  %v3716_v59 = vpop.f32.mrf.mxu1 }
 0x1b1   : > { %2781 = vst [vmem:[%s4608_s28 + $0x80] sm:$0xff] %v4728_v62  ;;  %v4737_v7 = vadd.f32 %v3716_v59, %v4522_v17 }
 0x1b2   : > { %v1874_v15 = vpop.f32.mrf.mxu0  ;;  %v2321_v35 = vpop.f32.mrf.mxu1 }
 0x1b3   : > { %5918 = vst [vmem:[#allocation23_spill] sm:$0xff] %v4737_v7  ;;  %2784 = vst [vmem:[%s4608_s28 + $0x98] sm:$0xff] %v4737_v7  ;;  %v4744_v49 = vadd.f32 %v2321_v35, %v4510_v55  ;;  %v4138_v35 = vld [vmem:[%s4225_s5 + $0x450] ss:$12 sps:$4 sm:$0xff]   ;;  %v4142_v7 = vld [vmem:[%s4225_s5 + $0x5c0] ss:$12 sps:$4 sm:$0xff]  }
 0x1b4   : > { %v4746_v19 = vpop.f32.mrf.mxu0  ;;  %2068 = vmatmul.mubr.bf16.gmra.mxu0 %v4133_v11  ;;  %v3719_v37 = vpop.f32.mrf.mxu1  ;;  %3814 = vmatmul.mubr.bf16.gmra.mxu1 %v4137_v31 }
 0x1b5   : > { %2782 = vst [vmem:[%s4608_s28 + $0x88] sm:$0xff] %v4744_v49  ;;  %v4751_v17 = vadd.f32 %v3719_v37, %v4542_v61  ;;  %2075 = vmatprep.mubr.bf16.mxu0 %v4140_v1  ;;  %3817 = vmatprep.mubr.bf16.mxu1 %v4141_v39  ;;  %v4145_v37 = vld [vmem:[%s4225_s5 + $0x46c] ss:$12 sps:$4 sm:$0xff]  }
 0x1b6   : > { %v1879_v59 = vpop.f32.mrf.mxu0  ;;  %v2334_v55 = vpop.f32.mrf.mxu1  ;;  %v4146_v1 = vld [vmem:[%s4225_s5 + $0x5d8] ss:$12 sps:$4 sm:$0xff]  }
 0x1b7   : > { %5919 = vst [vmem:[#allocation24_spill] sm:$0xff] %v4751_v17  ;;  %2787 = vst [vmem:[%s4608_s28 + $0xb0] sm:$0xff] %v4751_v17  ;;  %v4756_v15 = vadd.f32 %v2334_v55, %v4530_v33 }
 0x1b8   : > { %v4758_v11 = vpop.f32.mrf.mxu0  ;;  %v3720_v31 = vpop.f32.mrf.mxu1 }
 0x1b9   : > { %2785 = vst [vmem:[%s4608_s28 + $0xa0] sm:$0xff] %v4756_v15  ;;  %v4765_v61 = vadd.f32 %v3720_v31, %v4546_v9 }
 0x1ba   : > { %v1882_v39 = vpop.f32.mrf.mxu0  ;;  %v2337_v59 = vpop.f32.mrf.mxu1 }
 0x1bb   : > { %5920 = vst [vmem:[#allocation25_spill] sm:$0xff] %v4765_v61  ;;  %2788 = vst [vmem:[%s4608_s28 + $0xb8] sm:$0xff] %v4765_v61  ;;  %v4772_v33 = vadd.f32 %v2337_v59, %v4534_v43  ;;  %v4147_v61 = vld [vmem:[%s4225_s5 + $0x5f0] ss:$12 sps:$4 sm:$0xff]  }
 0x1bc   : > { %v4774_v55 = vpop.f32.mrf.mxu0  ;;  %2076 = vmatmul.mubr.bf16.gmra.mxu0 %v4138_v35  ;;  %v3723_v17 = vpop.f32.mrf.mxu1  ;;  %3818 = vmatmul.mubr.bf16.gmra.mxu1 %v4142_v7  ;;  %v4143_v7 = vld [vmem:[%s4225_s5 + $0x468] ss:$12 sps:$4 sm:$0xff]  }
 0x1bd   : > { %2786 = vst [vmem:[%s4608_s28 + $0xa8] sm:$0xff] %v4772_v33  ;;  %v4779_v9 = vadd.f32 %v3723_v17, %v4566_v30  ;;  %2083 = vmatprep.mubr.bf16.mxu0 %v4145_v37  ;;  %3821 = vmatprep.mubr.bf16.mxu1 %v4146_v1 }
 0x1be   : > { %v1887_v31 = vpop.f32.mrf.mxu0  ;;  %v2350_v39 = vpop.f32.mrf.mxu1 }
 0x1bf   : > { %2791 = vst [vmem:[%s4608_s28 + $0xd0] sm:$0xff] %v4779_v9  ;;  %v4784_v43 = vadd.f32 %v2350_v39, %v4554_v41 }
 0x1c0   : > { %v4786_v59 = vpop.f32.mrf.mxu0  ;;  %v3724_v35 = vpop.f32.mrf.mxu1 }
 0x1c1   : > { %2789 = vst [vmem:[%s4608_s28 + $0xc0] sm:$0xff] %v4784_v43  ;;  %v4793_v30 = vadd.f32 %v3724_v35, %v4570_v45 }
 0x1c2   : > { %v1890_v17 = vpop.f32.mrf.mxu0  ;;  %v2353_v37 = vpop.f32.mrf.mxu1 }
 0x1c3   : > { %2792 = vst [vmem:[%s4608_s28 + $0xd8] sm:$0xff] %v4793_v30  ;;  %v4798_v1 = vadd.f32 %v2353_v37, %v4558_v53 }
 0x1c4   : > { %v4800_v41 = vpop.f32.mrf.mxu0  ;;  %2084 = vmatmul.mubr.bf16.gmra.mxu0 %v4143_v7  ;;  %v3727_v31 = vpop.f32.mrf.mxu1  ;;  %3822 = vmatmul.mubr.bf16.gmra.mxu1 %v4147_v61 }
 0x1c5   : > { %2790 = vst [vmem:[%s4608_s28 + $0xc8] sm:$0xff] %v4798_v1  ;;  %v4805_v45 = vadd.f32 %v3727_v31, %v4590_v42 }
 0x1c6   : > { %v1895_v39 = vpop.f32.mrf.mxu0  ;;  %v2366_v35 = vpop.f32.mrf.mxu1 }
 0x1c7   : > { %5921 = vst [vmem:[#allocation26_spill] sm:$0xff] %v4805_v45  ;;  %2795 = vst [vmem:[%s4608_s28 + $0xf0] sm:$0xff] %v4805_v45  ;;  %v4810_v53 = vadd.f32 %v2366_v35, %v4578_v22 }
 0x1c8   : > { %v4812_v17 = vpop.f32.mrf.mxu0  ;;  %v3728_v37 = vpop.f32.mrf.mxu1 }
 0x1c9   : > { %2793 = vst [vmem:[%s4608_s28 + $0xe0] sm:$0xff] %v4810_v53  ;;  %v4817_v61 = vadd.f32 %v3728_v37, %v4594_v6 }
 0x1ca   : > { %v1898_v7 = vpop.f32.mrf.mxu0  ;;  %v2369_v42 = vpop.f32.mrf.mxu1 }
 0x1cb   : > { %5922 = vst [vmem:[#allocation27_spill] sm:$0xff] %v4817_v61  ;;  %2796 = vst [vmem:[%s4608_s28 + $0xf8] sm:$0xff] %v4817_v61  ;;  %v4822_v31 = vadd.f32 %v2369_v42, %v4582_v25 }
 0x1cc   : > { %v4824_v39 = vpop.f32.mrf.mxu0  ;;  %v3731_v22 = vpop.f32.mrf.mxu1 }
 0x1cd   : > { %2794 = vst [vmem:[%s4608_s28 + $0xe8] sm:$0xff] %v4822_v31  ;;  %v4829_v35 = vadd.f32 %v3731_v22, %v4634_v18 }
 0x1ce   : > { %v1903_v45 = vpop.f32.mrf.mxu0  ;;  %v2382_v6 = vpop.f32.mrf.mxu1 }
 0x1cf   : > { %5923 = vst [vmem:[#allocation28_spill] sm:$0xff] %v4829_v35  ;;  %2799 = vst [vmem:[%s4608_s28 + $0x110] sm:$0xff] %v4829_v35  ;;  %v4834_v37 = vadd.f32 %v2382_v6, %v4603_v46 }
 0x1d0   : > { %v4836_v7 = vpop.f32.mrf.mxu0  ;;  %v3732_v25 = vpop.f32.mrf.mxu1 }
 0x1d1   : > { %5924 = vst [vmem:[#allocation29_spill] sm:$0xff] %v4834_v37  ;;  %2797 = vst [vmem:[%s4608_s28 + $0x100] sm:$0xff] %v4834_v37  ;;  %v4841_v42 = vadd.f32 %v3732_v25, %v4646_v58 }
 0x1d2   : > { %v1906_v61 = vpop.f32.mrf.mxu0  ;;  %v2385_v18 = vpop.f32.mrf.mxu1 }
 0x1d3   : > { %5925 = vst [vmem:[#allocation30_spill] sm:$0xff] %v4841_v42  ;;  %2800 = vst [vmem:[%s4608_s28 + $0x118] sm:$0xff] %v4841_v42  ;;  %v4846_v45 = vadd.f32 %v2385_v18, %v4618_v29 }
 0x1d4   : > { %v1909_v22 = vpop.f32.mrf.mxu0  ;;  %v3735_v46 = vpop.f32.mrf.mxu1 }
 0x1d5   : > { %5926 = vst [vmem:[#allocation31_spill] sm:$0xff] %v4846_v45  ;;  %2798 = vst [vmem:[%s4608_s28 + $0x108] sm:$0xff] %v4846_v45  ;;  %v4851_v6 = vadd.f32 %v3735_v46, %v4690_v27 }
 0x1d6   : > { %v1911_v35 = vpop.f32.mrf.mxu0  ;;  %v2398_v37 = vpop.f32.mrf.mxu1 }
 0x1d7   : > { %5927 = vst [vmem:[#allocation32_spill] sm:$0xff] %v4851_v6  ;;  %2803 = vst [vmem:[%s4608_s28 + $0x130] sm:$0xff] %v4851_v6  ;;  %v4856_v58 = vadd.f32 %v2398_v37, %v4662_v3 }
 0x1d8   : > { %v1912_v61 = vpop.f32.mrf.mxu0  ;;  %v3736_v25 = vpop.f32.mrf.mxu1 }
 0x1d9   : > { %5928 = vst [vmem:[#allocation33_spill] sm:$0xff] %v4856_v58  ;;  %2801 = vst [vmem:[%s4608_s28 + $0x120] sm:$0xff] %v4856_v58  ;;  %v4861_v29 = vadd.f32 %v3736_v25, %v4702_v5 }
 0x1da   : > { %v1914_v18 = vpop.f32.mrf.mxu0  ;;  %v2401_v42 = vpop.f32.mrf.mxu1 }
 0x1db   : > { %5929 = vst [vmem:[#allocation34_spill] sm:$0xff] %v4861_v29  ;;  %2804 = vst [vmem:[%s4608_s28 + $0x138] sm:$0xff] %v4861_v29  ;;  %v4866_v27 = vadd.f32 %v2401_v42, %v4674_v10 }
 0x1dc   : > { %v1917_v35 = vpop.f32.mrf.mxu0  ;;  %v3739_v46 = vpop.f32.mrf.mxu1 }
 0x1dd   : > { %5930 = vst [vmem:[#allocation35_spill] sm:$0xff] %v4866_v27  ;;  %2802 = vst [vmem:[%s4608_s28 + $0x128] sm:$0xff] %v4866_v27  ;;  %v4871_v3 = vadd.f32 %v3739_v46, %v4746_v19 }
 0x1de   : > { %v1919_v37 = vpop.f32.mrf.mxu0  ;;  %v2414_v6 = vpop.f32.mrf.mxu1 }
 0x1df   : > { %5931 = vst [vmem:[#allocation36_spill] sm:$0xff] %v4871_v3  ;;  %2807 = vst [vmem:[%s4608_s28 + $0x150] sm:$0xff] %v4871_v3  ;;  %v4876_v5 = vadd.f32 %v2414_v6, %v4718_v51 }
 0x1e0   : > { %v1920_v25 = vpop.f32.mrf.mxu0  ;;  %v3740_v18 = vpop.f32.mrf.mxu1 }
 0x1e1   : > { %5932 = vst [vmem:[#allocation37_spill] sm:$0xff] %v4876_v5  ;;  %2805 = vst [vmem:[%s4608_s28 + $0x140] sm:$0xff] %v4876_v5  ;;  %v4881_v10 = vadd.f32 %v3740_v18, %v4758_v11 }
 0x1e2   : > { %v1922_v42 = vpop.f32.mrf.mxu0  ;;  %v2417_v29 = vpop.f32.mrf.mxu1 }
 0x1e3   : > { %5933 = vst [vmem:[#allocation38_spill] sm:$0xff] %v4881_v10  ;;  %2808 = vst [vmem:[%s4608_s28 + $0x158] sm:$0xff] %v4881_v10  ;;  %v4886_v19 = vadd.f32 %v2417_v29, %v4730_v26 }
 0x1e4   : > { %v1925_v46 = vpop.f32.mrf.mxu0  ;;  %v3743_v37 = vpop.f32.mrf.mxu1 }
 0x1e5   : > { %5934 = vst [vmem:[#allocation39_spill] sm:$0xff] %v4886_v19  ;;  %2806 = vst [vmem:[%s4608_s28 + $0x148] sm:$0xff] %v4886_v19  ;;  %v4891_v51 = vadd.f32 %v3743_v37, %v4800_v41 }
 0x1e6   : > { %v1927_v6 = vpop.f32.mrf.mxu0  ;;  %v2430_v3 = vpop.f32.mrf.mxu1 }
 0x1e7   : > { %5935 = vst [vmem:[#allocation40_spill] sm:$0xff] %v4891_v51  ;;  %2811 = vst [vmem:[%s4608_s28 + $0x170] sm:$0xff] %v4891_v51  ;;  %v4896_v11 = vadd.f32 %v2430_v3, %v4774_v55 }
 0x1e8   : > { %v1928_v18 = vpop.f32.mrf.mxu0  ;;  %v3744_v42 = vpop.f32.mrf.mxu1 }
 0x1e9   : > { %5936 = vst [vmem:[#allocation41_spill] sm:$0xff] %v4896_v11  ;;  %2809 = vst [vmem:[%s4608_s28 + $0x160] sm:$0xff] %v4896_v11  ;;  %v4901_v26 = vadd.f32 %v3744_v42, %v4812_v17 }
 0x1ea   : > { %v1930_v29 = vpop.f32.mrf.mxu0  ;;  %v2433_v10 = vpop.f32.mrf.mxu1 }
 0x1eb   : > { %5937 = vst [vmem:[#allocation42_spill] sm:$0xff] %v4901_v26  ;;  %2812 = vst [vmem:[%s4608_s28 + $0x178] sm:$0xff] %v4901_v26  ;;  %v4906_v41 = vadd.f32 %v2433_v10, %v4786_v59 }
 0x1ec   : > { %v1933_v37 = vpop.f32.mrf.mxu0  ;;  %v3747_v6 = vpop.f32.mrf.mxu1 }
 0x1ed   : > { %5938 = vst [vmem:[#allocation43_spill] sm:$0xff] %v4906_v41  ;;  %2810 = vst [vmem:[%s4608_s28 + $0x168] sm:$0xff] %v4906_v41  ;;  %v4910_v55 = vadd.f32 %v3747_v6, %v1909_v22 }
 0x1ee   : > { %v1935_v3 = vpop.f32.mrf.mxu0  ;;  %v2446_v51 = vpop.f32.mrf.mxu1 }
 0x1ef   : > { %5939 = vst [vmem:[#allocation44_spill] sm:$0xff] %v4910_v55  ;;  %2815 = vst [vmem:[%s4608_s28 + $0x190] sm:$0xff] %v4910_v55  ;;  %v4915_v17 = vadd.f32 %v2446_v51, %v4824_v39 }
 0x1f0   : > { %v1936_v42 = vpop.f32.mrf.mxu0  ;;  %v3748_v29 = vpop.f32.mrf.mxu1 }
 0x1f1   : > { %5940 = vst [vmem:[#allocation45_spill] sm:$0xff] %v4915_v17  ;;  %2813 = vst [vmem:[%s4608_s28 + $0x180] sm:$0xff] %v4915_v17  ;;  %v4919_v59 = vadd.f32 %v3748_v29, %v1912_v61 }
 0x1f2   : > { %v1938_v10 = vpop.f32.mrf.mxu0  ;;  %v2449_v26 = vpop.f32.mrf.mxu1 }
 0x1f3   : > { %5941 = vst [vmem:[#allocation46_spill] sm:$0xff] %v4919_v59  ;;  %2816 = vst [vmem:[%s4608_s28 + $0x198] sm:$0xff] %v4919_v59  ;;  %v4924_v22 = vadd.f32 %v2449_v26, %v4836_v7 }
 0x1f4   : > { %v1941_v6 = vpop.f32.mrf.mxu0  ;;  %v3751_v3 = vpop.f32.mrf.mxu1 }
 0x1f5   : > { %5942 = vst [vmem:[#allocation47_spill] sm:$0xff] %v4924_v22  ;;  %2814 = vst [vmem:[%s4608_s28 + $0x188] sm:$0xff] %v4924_v22  ;;  %v4928_v39 = vadd.f32 %v3751_v3, %v1925_v46 }
 0x1f6   : > { %v1943_v51 = vpop.f32.mrf.mxu0  ;;  %v2462_v55 = vpop.f32.mrf.mxu1 }
 0x1f7   : > { %5943 = vst [vmem:[#allocation48_spill] sm:$0xff] %v4928_v39  ;;  %2819 = vst [vmem:[%s4608_s28 + $0x1b0] sm:$0xff] %v4928_v39  ;;  %v4932_v61 = vadd.f32 %v2462_v55, %v1917_v35 }
 0x1f8   : > { %v1944_v29 = vpop.f32.mrf.mxu0  ;;  %v3752_v10 = vpop.f32.mrf.mxu1 }
 0x1f9   : > { %5944 = vst [vmem:[#allocation49_spill] sm:$0xff] %v4932_v61  ;;  %2817 = vst [vmem:[%s4608_s28 + $0x1a0] sm:$0xff] %v4932_v61  ;;  %v4936_v7 = vadd.f32 %v3752_v10, %v1928_v18 }
 0x1fa   : > { %v1946_v26 = vpop.f32.mrf.mxu0  ;;  %v2465_v59 = vpop.f32.mrf.mxu1 }
 0x1fb   : > { %5945 = vst [vmem:[#allocation50_spill] sm:$0xff] %v4936_v7  ;;  %2820 = vst [vmem:[%s4608_s28 + $0x1b8] sm:$0xff] %v4936_v7  ;;  %v4940_v46 = vadd.f32 %v2465_v59, %v1920_v25 }
 0x1fc   : > { %v1949_v3 = vpop.f32.mrf.mxu0  ;;  %v3755_v51 = vpop.f32.mrf.mxu1 }
 0x1fd   : > { %5946 = vst [vmem:[#allocation51_spill] sm:$0xff] %v4940_v46  ;;  %2818 = vst [vmem:[%s4608_s28 + $0x1a8] sm:$0xff] %v4940_v46  ;;  %v4944_v35 = vadd.f32 %v3755_v51, %v1941_v6 }
 0x1fe   : > { %v1951_v55 = vpop.f32.mrf.mxu0  ;;  %v2478_v39 = vpop.f32.mrf.mxu1 }
 0x1ff   : > { %5947 = vst [vmem:[#allocation52_spill] sm:$0xff] %v4944_v35  ;;  %2823 = vst [vmem:[%s4608_s28 + $0x1d0] sm:$0xff] %v4944_v35  ;;  %v4948_v18 = vadd.f32 %v2478_v39, %v1933_v37 }
 0x200   : > { %v1952_v10 = vpop.f32.mrf.mxu0  ;;  %v3756_v26 = vpop.f32.mrf.mxu1 }
 0x201   : > { %5948 = vst [vmem:[#allocation53_spill] sm:$0xff] %v4948_v18  ;;  %2821 = vst [vmem:[%s4608_s28 + $0x1c0] sm:$0xff] %v4948_v18  ;;  %v4952_v25 = vadd.f32 %v3756_v26, %v1944_v29 }
 0x202   : > { %v1954_v59 = vpop.f32.mrf.mxu0  ;;  %v2481_v7 = vpop.f32.mrf.mxu1 }
 0x203   : > { %5949 = vst [vmem:[#allocation54_spill] sm:$0xff] %v4952_v25  ;;  %2824 = vst [vmem:[%s4608_s28 + $0x1d8] sm:$0xff] %v4952_v25  ;;  %v4956_v6 = vadd.f32 %v2481_v7, %v1936_v42 }
 0x204   : > { %v1957_v51 = vpop.f32.mrf.mxu0  ;;  %v3759_v55 = vpop.f32.mrf.mxu1 }
 0x205   : > { %5950 = vst [vmem:[#allocation55_spill] sm:$0xff] %v4956_v6  ;;  %2822 = vst [vmem:[%s4608_s28 + $0x1c8] sm:$0xff] %v4956_v6  ;;  %v4960_v37 = vadd.f32 %v3759_v55, %v1957_v51 }
 0x206   : > { %v1959_v39 = vpop.f32.mrf.mxu0  ;;  %v2494_v35 = vpop.f32.mrf.mxu1 }
 0x207   : > { %5951 = vst [vmem:[#allocation56_spill] sm:$0xff] %v4960_v37  ;;  %2827 = vst [vmem:[%s4608_s28 + $0x1f0] sm:$0xff] %v4960_v37  ;;  %v4964_v29 = vadd.f32 %v2494_v35, %v1949_v3 }
 0x208   : > { %v1960_v26 = vpop.f32.mrf.mxu0  ;;  %v3760_v59 = vpop.f32.mrf.mxu1 }
 0x209   : > { %5952 = vst [vmem:[#allocation57_spill] sm:$0xff] %v4964_v29  ;;  %2825 = vst [vmem:[%s4608_s28 + $0x1e0] sm:$0xff] %v4964_v29  ;;  %v4968_v42 = vadd.f32 %v3760_v59, %v1960_v26 }
 0x20a   : > { %v1962_v7 = vpop.f32.mrf.mxu0  ;;  %v2497_v25 = vpop.f32.mrf.mxu1 }
 0x20b   : > { %5953 = vst [vmem:[#allocation58_spill] sm:$0xff] %v4968_v42  ;;  %2828 = vst [vmem:[%s4608_s28 + $0x1f8] sm:$0xff] %v4968_v42  ;;  %v4972_v51 = vadd.f32 %v2497_v25, %v1952_v10 }
 0x20c   : > { %v1965_v55 = vpop.f32.mrf.mxu0  ;;  %v3763_v39 = vpop.f32.mrf.mxu1 }
 0x20d   : > { %5954 = vst [vmem:[#allocation59_spill] sm:$0xff] %v4972_v51  ;;  %2826 = vst [vmem:[%s4608_s28 + $0x1e8] sm:$0xff] %v4972_v51 }
 0x20e   : > { %v1967_v3 = vpop.f32.mrf.mxu0  ;;  %v2510_v35 = vpop.f32.mrf.mxu1 }
 0x20f   : > { %v4976_v37 = vadd.f32 %v2510_v35, %v1965_v55 }
 0x210   : > { %v1968_v6 = vpop.f32.mrf.mxu0  ;;  %v3764_v29 = vpop.f32.mrf.mxu1 }
 0x211   : > { %5955 = vst [vmem:[#allocation60_spill] sm:$0xff] %v4976_v37  ;;  %2829 = vst [vmem:[%s4608_s28 + $0x200] sm:$0xff] %v4976_v37 }
 0x212   : > { %v1970_v26 = vpop.f32.mrf.mxu0  ;;  %v2513_v59 = vpop.f32.mrf.mxu1 }
 0x213   : > { %v4980_v7 = vadd.f32 %v2513_v59, %v1968_v6 }
 0x214   : > { %v1973_v10 = vpop.f32.mrf.mxu0  ;;  %v3767_v25 = vpop.f32.mrf.mxu1 }
 0x215   : > { %5956 = vst [vmem:[#allocation61_spill] sm:$0xff] %v4980_v7  ;;  %2830 = vst [vmem:[%s4608_s28 + $0x208] sm:$0xff] %v4980_v7  ;;  %v4984_v42 = vadd.f32 %v3763_v39, %v1973_v10 }
 0x216   : > { %v1975_v3 = vpop.f32.mrf.mxu0  ;;  %v2526_v51 = vpop.f32.mrf.mxu1 }
 0x217   : > { %5957 = vst [vmem:[#allocation62_spill] sm:$0xff] %v4984_v42  ;;  %2831 = vst [vmem:[%s4608_s28 + $0x210] sm:$0xff] %v4984_v42 }
 0x218   : > { %v1976_v55 = vpop.f32.mrf.mxu0  ;;  %v3768_v35 = vpop.f32.mrf.mxu1 }
 0x219   : > { %v4988_v37 = vadd.f32 %v3764_v29, %v1976_v55 }
 0x21a   : > { %v1978_v26 = vpop.f32.mrf.mxu0  ;;  %v2529_v18 = vpop.f32.mrf.mxu1 }
 0x21b   : > { %5958 = vst [vmem:[#allocation63_spill] sm:$0xff] %v4988_v37  ;;  %2832 = vst [vmem:[%s4608_s28 + $0x218] sm:$0xff] %v4988_v37 }
 0x21c   : > { %v1981_v6 = vpop.f32.mrf.mxu0  ;;  %v3771_v59 = vpop.f32.mrf.mxu1 }
 0x21d   : > { %v4992_v7 = vadd.f32 %v2526_v51, %v1981_v6 }
 0x21e   : > { %v1983_v39 = vpop.f32.mrf.mxu0  ;;  %v2542_v10 = vpop.f32.mrf.mxu1 }
 0x21f   : > { %5959 = vst [vmem:[#allocation64_spill] sm:$0xff] %v4992_v7  ;;  %2833 = vst [vmem:[%s4608_s28 + $0x220] sm:$0xff] %v4992_v7 }
 0x220   : > { %v1984_v3 = vpop.f32.mrf.mxu0  ;;  %v3772_v42 = vpop.f32.mrf.mxu1 }
 0x221   : > { %v4996_v46 = vadd.f32 %v2529_v18, %v1984_v3 }
 0x222   : > { %v1986_v29 = vpop.f32.mrf.mxu0  ;;  %v2545_v55 = vpop.f32.mrf.mxu1 }
 0x223   : > { %5960 = vst [vmem:[#allocation65_spill] sm:$0xff] %v4996_v46  ;;  %2834 = vst [vmem:[%s4608_s28 + $0x228] sm:$0xff] %v4996_v46 }
 0x224   : > { %v1989_v26 = vpop.f32.mrf.mxu0  ;;  %v3775_v37 = vpop.f32.mrf.mxu1 }
 0x225   : > { %v5000_v61 = vadd.f32 %v3767_v25, %v1989_v26 }
 0x226   : > { %v1991_v51 = vpop.f32.mrf.mxu0  ;;  %v2558_v6 = vpop.f32.mrf.mxu1 }
 0x227   : > { %5961 = vst [vmem:[#allocation66_spill] sm:$0xff] %v5000_v61  ;;  %2835 = vst [vmem:[%s4608_s28 + $0x230] sm:$0xff] %v5000_v61 }
 0x228   : > { %v1992_v39 = vpop.f32.mrf.mxu0  ;;  %v3776_v7 = vpop.f32.mrf.mxu1 }
 0x229   : > { %v5004_v22 = vadd.f32 %v3768_v35, %v1992_v39 }
 0x22a   : > { %v1994_v18 = vpop.f32.mrf.mxu0  ;;  %v2561_v3 = vpop.f32.mrf.mxu1 }
 0x22b   : > { %5962 = vst [vmem:[#allocation67_spill] sm:$0xff] %v5004_v22  ;;  %2836 = vst [vmem:[%s4608_s28 + $0x238] sm:$0xff] %v5004_v22 }
 0x22c   : > { %v1997_v29 = vpop.f32.mrf.mxu0  ;;  %v5008_v46 = vpop.f32.mrf.mxu1 }
 0x22d   : > { %v5010_v17 = vadd.f32 %v2542_v10, %v1997_v29 }
 0x22e   : > { %v1999_v25 = vpop.f32.mrf.mxu0  ;;  %v2574_v26 = vpop.f32.mrf.mxu1 }
 0x22f   : > { %5963 = vst [vmem:[#allocation68_spill] sm:$0xff] %v5010_v17  ;;  %2837 = vst [vmem:[%s4608_s28 + $0x240] sm:$0xff] %v5010_v17 }
 0x230   : > { %v2000_v51 = vpop.f32.mrf.mxu0  ;;  %v5014_v61 = vpop.f32.mrf.mxu1 }
 0x231   : > { %v5016_v35 = vadd.f32 %v2545_v55, %v2000_v51 }
 0x232   : > { %v2002_v39 = vpop.f32.mrf.mxu0  ;;  %v2577_v18 = vpop.f32.mrf.mxu1 }
 0x233   : > { %5964 = vst [vmem:[#allocation69_spill] sm:$0xff] %v5016_v35  ;;  %2838 = vst [vmem:[%s4608_s28 + $0x248] sm:$0xff] %v5016_v35 }
 0x234   : > { %v2005_v22 = vpop.f32.mrf.mxu0  ;;  %v5020_v41 = vpop.f32.mrf.mxu1 }
 0x235   : > { %v5022_v10 = vadd.f32 %v3771_v59, %v2005_v22 }
 0x236   : > { %v2007_v29 = vpop.f32.mrf.mxu0  ;;  %v5024_v25 = vpop.f32.mrf.mxu1 }
 0x237   : > { %5965 = vst [vmem:[#allocation70_spill] sm:$0xff] %v5022_v10  ;;  %2839 = vst [vmem:[%s4608_s28 + $0x250] sm:$0xff] %v5022_v10 }
 0x238   : > { %v2008_v17 = vpop.f32.mrf.mxu0  ;;  %v5028_v11 = vpop.f32.mrf.mxu1 }
 0x239   : > { %v5030_v55 = vadd.f32 %v3772_v42, %v2008_v17 }
 0x23a   : > { %v2010_v51 = vpop.f32.mrf.mxu0  ;;  %v5032_v39 = vpop.f32.mrf.mxu1 }
 0x23b   : > { %5966 = vst [vmem:[#allocation71_spill] sm:$0xff] %v5030_v55  ;;  %2840 = vst [vmem:[%s4608_s28 + $0x258] sm:$0xff] %v5030_v55 }
 0x23c   : > { %v2013_v35 = vpop.f32.mrf.mxu0  ;;  %v5036_v19 = vpop.f32.mrf.mxu1 }
 0x23d   : > { %v5038_v22 = vadd.f32 %v2558_v6, %v2013_v35 }
 0x23e   : > { %v2015_v59 = vpop.f32.mrf.mxu0  ;;  %v5040_v29 = vpop.f32.mrf.mxu1 }
 0x23f   : > { %5967 = vst [vmem:[#allocation72_spill] sm:$0xff] %v5038_v22  ;;  %2841 = vst [vmem:[%s4608_s28 + $0x260] sm:$0xff] %v5038_v22 }
 0x240   : > { %v2016_v10 = vpop.f32.mrf.mxu0  ;;  %v5044_v5 = vpop.f32.mrf.mxu1 }
 0x241   : > { %v5046_v17 = vadd.f32 %v2561_v3, %v2016_v10 }
 0x242   : > { %v2018_v42 = vpop.f32.mrf.mxu0  ;;  %v5048_v51 = vpop.f32.mrf.mxu1 }
 0x243   : > { %5968 = vst [vmem:[#allocation73_spill] sm:$0xff] %v5046_v17  ;;  %2842 = vst [vmem:[%s4608_s28 + $0x268] sm:$0xff] %v5046_v17 }
 0x244   : > { %v2021_v55 = vpop.f32.mrf.mxu0  ;;  %v5052_v27 = vpop.f32.mrf.mxu1 }
 0x245   : > { %v5054_v6 = vadd.f32 %v3775_v37, %v2021_v55 }
 0x246   : > { %v2023_v35 = vpop.f32.mrf.mxu0  ;;  %v5056_v59 = vpop.f32.mrf.mxu1 }
 0x247   : > { %5969 = vst [vmem:[#allocation74_spill] sm:$0xff] %v5054_v6  ;;  %2843 = vst [vmem:[%s4608_s28 + $0x270] sm:$0xff] %v5054_v6 }
 0x248   : > { %v2024_v22 = vpop.f32.mrf.mxu0  ;;  %v5060_v3 = vpop.f32.mrf.mxu1 }
 0x249   : > { %v5062_v10 = vadd.f32 %v3776_v7, %v2024_v22 }
 0x24a   : > { %v2026_v42 = vpop.f32.mrf.mxu0  ;;  %v5064_v17 = vpop.f32.mrf.mxu1 }
 0x24b   : > { %2844 = vst [vmem:[%s4608_s28 + $0x278] sm:$0xff] %v5062_v10 }
 0x24c   : > { %v2029_v37 = vpop.f32.mrf.mxu0  ;;  %v3795_v55 = vpop.f32.mrf.mxu1 }
 0x24d   : > { %v5068_v35 = vadd.f32 %v2574_v26, %v2029_v37  ;;  %v5071_v58 = vadd.f32 %v3795_v55, %v4424_v12 }
 0x24e   : > { %v2031_v6 = vpop.f32.mrf.mxu0  ;;  %v2638_v45 = vpop.f32.mrf.mxu1 }
 0x24f   : > { %2845 = vst [vmem:[%s4608_s28 + $0x280] sm:$0xff] %v5068_v35  ;;  %2863 = vst [vmem:[%s4608_s28 + $0x310] sm:$0xff] %v5071_v58  ;;  %v5078_v7 = vadd.f32 %v2638_v45, %v4412_v0 }
 0x250   : > { %v2032_v22 = vpop.f32.mrf.mxu0  ;;  %v3796_v42 = vpop.f32.mrf.mxu1 }
 0x251   : > { %2861 = vst [vmem:[%s4608_s28 + $0x300] sm:$0xff] %v5078_v7  ;;  %v5082_v26 = vadd.f32 %v2577_v18, %v2032_v22  ;;  %v5085_v12 = vadd.f32 %v3796_v42, %v4428_v16 }
 0x252   : > { %v2034_v6 = vpop.f32.mrf.mxu0  ;;  %v2641_v37 = vpop.f32.mrf.mxu1 }
 0x253   : > { %2846 = vst [vmem:[%s4608_s28 + $0x288] sm:$0xff] %v5082_v26  ;;  %2864 = vst [vmem:[%s4608_s28 + $0x318] sm:$0xff] %v5085_v12  ;;  %v5092_v0 = vadd.f32 %v2641_v37, %v4416_v4 }
 0x254   : > { %v2037_v45 = vpop.f32.mrf.mxu0  ;;  %v3799_v55 = vpop.f32.mrf.mxu1 }
 0x255   : > { %2862 = vst [vmem:[%s4608_s28 + $0x308] sm:$0xff] %v5092_v0  ;;  %v5097_v18 = vadd.f32 %v5008_v46, %v2037_v45  ;;  %v5100_v16 = vadd.f32 %v3799_v55, %v4448_v36 }
 0x256   : > { %v2039_v22 = vpop.f32.mrf.mxu0  ;;  %v2654_v42 = vpop.f32.mrf.mxu1 }
 0x257   : > { %2847 = vst [vmem:[%s4608_s28 + $0x290] sm:$0xff] %v5097_v18  ;;  %2867 = vst [vmem:[%s4608_s28 + $0x330] sm:$0xff] %v5100_v16  ;;  %v5107_v4 = vadd.f32 %v2654_v42, %v4436_v24 }
 0x258   : > { %v2040_v6 = vpop.f32.mrf.mxu0  ;;  %v3800_v37 = vpop.f32.mrf.mxu1 }
 0x259   : > { %2865 = vst [vmem:[%s4608_s28 + $0x320] sm:$0xff] %v5107_v4  ;;  %v5112_v46 = vadd.f32 %v5014_v61, %v2040_v6  ;;  %v5115_v36 = vadd.f32 %v3800_v37, %v4452_v40 }
 0x25a   : > { %v2042_v45 = vpop.f32.mrf.mxu0  ;;  %v2657_v55 = vpop.f32.mrf.mxu1 }
 0x25b   : > { %2848 = vst [vmem:[%s4608_s28 + $0x298] sm:$0xff] %v5112_v46  ;;  %2868 = vst [vmem:[%s4608_s28 + $0x338] sm:$0xff] %v5115_v36  ;;  %v5122_v24 = vadd.f32 %v2657_v55, %v4440_v28 }
 0x25c   : > { %v2045_v22 = vpop.f32.mrf.mxu0  ;;  %v3803_v42 = vpop.f32.mrf.mxu1 }
 0x25d   : > { %2866 = vst [vmem:[%s4608_s28 + $0x328] sm:$0xff] %v5122_v24  ;;  %v5127_v61 = vadd.f32 %v5024_v25, %v2045_v22  ;;  %v5130_v40 = vadd.f32 %v3803_v42, %v4472_v60 }
 0x25e   : > { %v2047_v6 = vpop.f32.mrf.mxu0  ;;  %v2670_v37 = vpop.f32.mrf.mxu1 }
 0x25f   : > { %5970 = vst [vmem:[#allocation75_spill] sm:$0xff] %v5130_v40  ;;  %2849 = vst [vmem:[%s4608_s28 + $0x2a0] sm:$0xff] %v5127_v61  ;;  %v5137_v28 = vadd.f32 %v2670_v37, %v4460_v48 }
 0x260   : > { %2871 = vst [vmem:[%s4608_s28 + $0x350] sm:$0xff] %v5130_v40  ;;  %v2048_v45 = vpop.f32.mrf.mxu0  ;;  %v3804_v55 = vpop.f32.mrf.mxu1 }
 0x261   : > { %2869 = vst [vmem:[%s4608_s28 + $0x340] sm:$0xff] %v5137_v28  ;;  %v5142_v25 = vadd.f32 %v5032_v39, %v2048_v45  ;;  %v5145_v60 = vadd.f32 %v3804_v55, %v4476_v2 }
 0x262   : > { %v2050_v22 = vpop.f32.mrf.mxu0  ;;  %v2673_v42 = vpop.f32.mrf.mxu1 }
 0x263   : > { %5971 = vst [vmem:[#allocation76_spill] sm:$0xff] %v5145_v60  ;;  %2850 = vst [vmem:[%s4608_s28 + $0x2a8] sm:$0xff] %v5142_v25  ;;  %v5152_v48 = vadd.f32 %v2673_v42, %v4464_v52 }
 0x264   : > { %2872 = vst [vmem:[%s4608_s28 + $0x358] sm:$0xff] %v5145_v60  ;;  %v2053_v6 = vpop.f32.mrf.mxu0  ;;  %v3807_v37 = vpop.f32.mrf.mxu1 }
 0x265   : > { %2870 = vst [vmem:[%s4608_s28 + $0x348] sm:$0xff] %v5152_v48  ;;  %v5157_v39 = vadd.f32 %v5020_v41, %v2053_v6  ;;  %v5160_v2 = vadd.f32 %v3807_v37, %v4496_v32 }
 0x266   : > { %v2055_v45 = vpop.f32.mrf.mxu0  ;;  %v2686_v55 = vpop.f32.mrf.mxu1 }
 0x267   : > { %5972 = vst [vmem:[#allocation77_spill] sm:$0xff] %v5160_v2  ;;  %2851 = vst [vmem:[%s4608_s28 + $0x2b0] sm:$0xff] %v5157_v39  ;;  %v5167_v52 = vadd.f32 %v2686_v55, %v4484_v14 }
 0x268   : > { %2875 = vst [vmem:[%s4608_s28 + $0x370] sm:$0xff] %v5160_v2  ;;  %v2056_v22 = vpop.f32.mrf.mxu0  ;;  %v3808_v42 = vpop.f32.mrf.mxu1 }
 0x269   : > { %5973 = vst [vmem:[#allocation78_spill] sm:$0xff] %v5167_v52  ;;  %2873 = vst [vmem:[%s4608_s28 + $0x360] sm:$0xff] %v5167_v52  ;;  %v5172_v41 = vadd.f32 %v5028_v11, %v2056_v22  ;;  %v5175_v32 = vadd.f32 %v3808_v42, %v4500_v38 }
 0x26a   : > { %v2058_v6 = vpop.f32.mrf.mxu0  ;;  %v2689_v37 = vpop.f32.mrf.mxu1 }
 0x26b   : > { %5974 = vst [vmem:[#allocation79_spill] sm:$0xff] %v5175_v32  ;;  %2852 = vst [vmem:[%s4608_s28 + $0x2b8] sm:$0xff] %v5172_v41  ;;  %v5182_v14 = vadd.f32 %v2689_v37, %v4488_v20 }
 0x26c   : > { %2876 = vst [vmem:[%s4608_s28 + $0x378] sm:$0xff] %v5175_v32  ;;  %v2061_v45 = vpop.f32.mrf.mxu0  ;;  %v3811_v55 = vpop.f32.mrf.mxu1 }
 0x26d   : > { %5975 = vst [vmem:[#allocation80_spill] sm:$0xff] %v5182_v14  ;;  %2874 = vst [vmem:[%s4608_s28 + $0x368] sm:$0xff] %v5182_v14  ;;  %v5187_v11 = vadd.f32 %v5040_v29, %v2061_v45  ;;  %v5190_v38 = vadd.f32 %v3811_v55, %v4520_v8  ;;  %v5978_v8 = vld [vmem:[#allocation3_spill] sm:$0xff] }
 0x26e   : > { %v2063_v22 = vpop.f32.mrf.mxu0  ;;  %v2702_v42 = vpop.f32.mrf.mxu1 }
 0x26f   : > { %5976 = vst [vmem:[#allocation81_spill] sm:$0xff] %v5190_v38  ;;  %2853 = vst [vmem:[%s4608_s28 + $0x2c0] sm:$0xff] %v5187_v11  ;;  %v5197_v20 = vadd.f32 %v2702_v42, %v4508_v50  ;;  %v5980_v50 = vld [vmem:[#allocation2_spill] sm:$0xff] }
 0x270   : > { %2879 = vst [vmem:[%s4608_s28 + $0x390] sm:$0xff] %v5190_v38  ;;  %v2064_v6 = vpop.f32.mrf.mxu0  ;;  %v3812_v37 = vpop.f32.mrf.mxu1 }
 0x271   : > { %5977 = vst [vmem:[#allocation82_spill] sm:$0xff] %v5197_v20  ;;  %2877 = vst [vmem:[%s4608_s28 + $0x380] sm:$0xff] %v5197_v20  ;;  %v5202_v29 = vadd.f32 %v5048_v51, %v2064_v6  ;;  %v5205_v45 = vadd.f32 %v3812_v37, %v5978_v8  ;;  %v5982_v6 = vld [vmem:[#allocation6_spill] sm:$0xff] }
 0x272   : > { %v2066_v55 = vpop.f32.mrf.mxu0  ;;  %v2705_v22 = vpop.f32.mrf.mxu1 }
 0x273   : > { %5979 = vst [vmem:[#allocation3_spill] sm:$0xff] %v5205_v45  ;;  %2854 = vst [vmem:[%s4608_s28 + $0x2c8] sm:$0xff] %v5202_v29  ;;  %v5212_v42 = vadd.f32 %v2705_v22, %v5980_v50  ;;  %v5984_v22 = vld [vmem:[#allocation4_spill] sm:$0xff] }
 0x274   : > { %2880 = vst [vmem:[%s4608_s28 + $0x398] sm:$0xff] %v5205_v45  ;;  %v2069_v38 = vpop.f32.mrf.mxu0  ;;  %v3815_v32 = vpop.f32.mrf.mxu1 }
 0x275   : > { %5981 = vst [vmem:[#allocation2_spill] sm:$0xff] %v5212_v42  ;;  %2878 = vst [vmem:[%s4608_s28 + $0x388] sm:$0xff] %v5212_v42  ;;  %v5217_v51 = vadd.f32 %v5036_v19, %v2069_v38  ;;  %v5220_v37 = vadd.f32 %v3815_v32, %v5982_v6  ;;  %v5986_v32 = vld [vmem:[#allocation7_spill] sm:$0xff] }
 0x276   : > { %v2071_v8 = vpop.f32.mrf.mxu0  ;;  %v2718_v55 = vpop.f32.mrf.mxu1 }
 0x277   : > { %5983 = vst [vmem:[#allocation6_spill] sm:$0xff] %v5220_v37  ;;  %2855 = vst [vmem:[%s4608_s28 + $0x2d0] sm:$0xff] %v5217_v51  ;;  %v5227_v50 = vadd.f32 %v2718_v55, %v5984_v22  ;;  %v5988_v55 = vld [vmem:[#allocation5_spill] sm:$0xff] }
 0x278   : > { %2883 = vst [vmem:[%s4608_s28 + $0x3b0] sm:$0xff] %v5220_v37  ;;  %v2072_v45 = vpop.f32.mrf.mxu0  ;;  %v3816_v20 = vpop.f32.mrf.mxu1 }
 0x279   : > { %5985 = vst [vmem:[#allocation4_spill] sm:$0xff] %v5227_v50  ;;  %2881 = vst [vmem:[%s4608_s28 + $0x3a0] sm:$0xff] %v5227_v50  ;;  %v5232_v19 = vadd.f32 %v5044_v5, %v2072_v45  ;;  %v5235_v38 = vadd.f32 %v3816_v20, %v5986_v32  ;;  %v5990_v20 = vld [vmem:[#allocation10_spill] sm:$0xff] }
 0x27a   : > { %v2074_v6 = vpop.f32.mrf.mxu0  ;;  %v2721_v8 = vpop.f32.mrf.mxu1 }
 0x27b   : > { %5987 = vst [vmem:[#allocation7_spill] sm:$0xff] %v5235_v38  ;;  %2856 = vst [vmem:[%s4608_s28 + $0x2d8] sm:$0xff] %v5232_v19  ;;  %v5242_v22 = vadd.f32 %v2721_v8, %v5988_v55  ;;  %v5992_v8 = vld [vmem:[#allocation8_spill] sm:$0xff] }
 0x27c   : > { %2884 = vst [vmem:[%s4608_s28 + $0x3b8] sm:$0xff] %v5235_v38  ;;  %v2077_v37 = vpop.f32.mrf.mxu0  ;;  %v3819_v42 = vpop.f32.mrf.mxu1 }
 0x27d   : > { %5989 = vst [vmem:[#allocation5_spill] sm:$0xff] %v5242_v22  ;;  %2882 = vst [vmem:[%s4608_s28 + $0x3a8] sm:$0xff] %v5242_v22  ;;  %v5247_v5 = vadd.f32 %v5056_v59, %v2077_v37  ;;  %v5250_v45 = vadd.f32 %v3819_v42, %v5990_v20  ;;  %v5994_v42 = vld [vmem:[#allocation11_spill] sm:$0xff] }
 0x27e   : > { %v2079_v32 = vpop.f32.mrf.mxu0  ;;  %v2734_v6 = vpop.f32.mrf.mxu1 }
 0x27f   : > { %5991 = vst [vmem:[#allocation10_spill] sm:$0xff] %v5250_v45  ;;  %2857 = vst [vmem:[%s4608_s28 + $0x2e0] sm:$0xff] %v5247_v5  ;;  %v5257_v55 = vadd.f32 %v2734_v6, %v5992_v8  ;;  %v5996_v6 = vld [vmem:[#allocation9_spill] sm:$0xff] }
 0x280   : > { %2887 = vst [vmem:[%s4608_s28 + $0x3d0] sm:$0xff] %v5250_v45  ;;  %v2080_v38 = vpop.f32.mrf.mxu0  ;;  %v3820_v50 = vpop.f32.mrf.mxu1 }
 0x281   : > { %5993 = vst [vmem:[#allocation8_spill] sm:$0xff] %v5257_v55  ;;  %2885 = vst [vmem:[%s4608_s28 + $0x3c0] sm:$0xff] %v5257_v55  ;;  %v5262_v59 = vadd.f32 %v5064_v17, %v2080_v38  ;;  %v5265_v37 = vadd.f32 %v3820_v50, %v5994_v42 }
 0x282   : > { %v2082_v20 = vpop.f32.mrf.mxu0  ;;  %v2737_v32 = vpop.f32.mrf.mxu1 }
 0x283   : > { %5995 = vst [vmem:[#allocation11_spill] sm:$0xff] %v5265_v37  ;;  %2858 = vst [vmem:[%s4608_s28 + $0x2e8] sm:$0xff] %v5262_v59  ;;  %v5272_v8 = vadd.f32 %v2737_v32, %v5996_v6  ;;  %v5999_v20 = vld [vmem:[#allocation12_spill] sm:$0xff] }
 0x284   : > { %2888 = vst [vmem:[%s4608_s28 + $0x3d8] sm:$0xff] %v5265_v37  ;;  %v2085_v45 = vpop.f32.mrf.mxu0  ;;  %v3823_v22 = vpop.f32.mrf.mxu1 }
 0x285   : > { %5997 = vst [vmem:[#allocation9_spill] sm:$0xff] %v5272_v8  ;;  %2886 = vst [vmem:[%s4608_s28 + $0x3c8] sm:$0xff] %v5272_v8  ;;  %v5277_v17 = vadd.f32 %v5052_v27, %v2085_v45  ;;  %v5280_v50 = vadd.f32 %v3823_v22, %v4592_v21  ;;  %v6001_v45 = vld [vmem:[#allocation14_spill] sm:$0xff] }
 0x286   : > { %v2087_v38 = vpop.f32.mrf.mxu0  ;;  %v2750_v42 = vpop.f32.mrf.mxu1 }
 0x287   : > { %5998 = vst [vmem:[#allocation83_spill] sm:$0xff] %v5280_v50  ;;  %2859 = vst [vmem:[%s4608_s28 + $0x2f0] sm:$0xff] %v5277_v17  ;;  %v5287_v32 = vadd.f32 %v2750_v42, %v5999_v20 }
 0x288   : > { %2891 = vst [vmem:[%s4608_s28 + $0x3f0] sm:$0xff] %v5280_v50  ;;  %v2088_v6 = vpop.f32.mrf.mxu0  ;;  %v3824_v37 = vpop.f32.mrf.mxu1  ;;  %v6003_v50 = vld [vmem:[#allocation13_spill] sm:$0xff] }
 0x289   : > { %6000 = vst [vmem:[#allocation12_spill] sm:$0xff] %v5287_v32  ;;  %2889 = vst [vmem:[%s4608_s28 + $0x3e0] sm:$0xff] %v5287_v32  ;;  %v5292_v27 = vadd.f32 %v5060_v3, %v2088_v6  ;;  %v5295_v21 = vadd.f32 %v3824_v37, %v6001_v45  ;;  %2896 = sbr.rel (%p3605_p4) target bundleno = 656 (0x290), region = 36 }
 0x28a   : > { %v2090_v22 = vpop.f32.mrf.mxu0  ;;  %v2753_v38 = vpop.f32.mrf.mxu1 }
 0x28b   : > { %6002 = vst [vmem:[#allocation14_spill] sm:$0xff] %v5295_v21  ;;  %2860 = vst [vmem:[%s4608_s28 + $0x2f8] sm:$0xff] %v5292_v27  ;;  %v5302_v8 = vadd.f32 %v2753_v38, %v6003_v50 }
 0x28c   : > { %2892 = vst [vmem:[%s4608_s28 + $0x3f8] sm:$0xff] %v5295_v21 }
 0x28d   : > { %6004 = vst [vmem:[#allocation13_spill] sm:$0xff] %v5302_v8  ;;  %2890 = vst [vmem:[%s4608_s28 + $0x3e8] sm:$0xff] %v5302_v8 }
 0x28e   : > { %v4159_v42 = vmov 0.0  }
 0x28f   : > { %2897 = vst [vmem:[%s5732_s4] sm:$0x3] %v4159_v42 }
 0x290 PF: > { %v2899_v3 = vadd.f32 %v4632_v63, %v4616_v34  ;;  %v6005_v20 = vld [vmem:[#allocation15_spill] sm:$0xff]  ;;  %v6006_v22 = vld [vmem:[#allocation16_spill] sm:$0xff]  ;;  %v6007_v21 = vld [vmem:[#allocation17_spill] sm:$0xff]  ;;  %v3035_v55 = vmul.f32 %v4616_v34, %v4616_v34  ;;  %p3606_p5 = scmp.ne.s32.totalorder %s4191_s16, 3 }
 0x291   : > { %v6008_v2 = vld [vmem:[#allocation18_spill] sm:$0xff]  ;;  %v6010_v60 = vld [vmem:[#allocation20_spill] sm:$0xff] }
 0x292   : > { %v2900_v37 = vadd.f32 %v2899_v3, %v4611_v57  ;;  %v3036_v3 = vmul.f32 %v4632_v63, %v4632_v63  ;;  %v3040_v63 = vmul.f32 %v4660_v23, %v4660_v23 }
 0x294   : > { %v2901_v6 = vadd.f32 %v2900_v37, %v6005_v20 }
 0x296   : > { %v2902_v50 = vadd.f32 %v2901_v6, %v4644_v54  ;;  %v3037_v6 = vmul.f32 %v4611_v57, %v4611_v57 }
 0x298   : > { %v2903_v45 = vadd.f32 %v2902_v50, %v4660_v23  ;;  %v6009_v50 = vld [vmem:[#allocation19_spill] sm:$0xff] }
 0x29a   : > { %v2904_v38 = vadd.f32 %v2903_v45, %v6006_v22  ;;  %v3038_v45 = vmul.f32 %v6005_v20, %v6005_v20  ;;  %v6011_v20 = vld [vmem:[#allocation21_spill] sm:$0xff] }
 0x29c   : > { %v2905_v8 = vadd.f32 %v2904_v38, %v6007_v21  ;;  %v3163_v38 = vadd.f32 %v3036_v3, %v3035_v55 }
 0x29e   : > { %v2906_v32 = vadd.f32 %v2905_v8, %v4672_v44  ;;  %v3164_v34 = vadd.f32 %v3163_v38, %v3037_v6  ;;  %v3043_v6 = vmul.f32 %v4672_v44, %v4672_v44 }
 0x2a0   : > { %v2907_v42 = vadd.f32 %v2906_v32, %v4688_v47  ;;  %v3039_v32 = vmul.f32 %v4644_v54, %v4644_v54 }
 0x2a2   : > { %v2908_v37 = vadd.f32 %v2907_v42, %v6008_v2  ;;  %v3165_v42 = vadd.f32 %v3164_v34, %v3038_v45 }
 0x2a4   : > { %v2909_v14 = vadd.f32 %v2908_v37, %v6009_v50  ;;  %v3041_v37 = vmul.f32 %v6006_v22, %v6006_v22  ;;  %v3166_v40 = vadd.f32 %v3165_v42, %v3039_v32  ;;  %v6012_v22 = vld [vmem:[#allocation22_spill] sm:$0xff]  ;;  %v3045_v32 = vmul.f32 %v6008_v2, %v6008_v2  ;;  %v6014_v2 = vld [vmem:[#allocation24_spill] sm:$0xff] }
 0x2a6   : > { %v2910_v8 = vadd.f32 %v2909_v14, %v4700_v56  ;;  %v3042_v14 = vmul.f32 %v6007_v21, %v6007_v21  ;;  %v3167_v3 = vadd.f32 %v3166_v40, %v3040_v63  ;;  %v6013_v21 = vld [vmem:[#allocation23_spill] sm:$0xff]  ;;  %v3046_v63 = vmul.f32 %v6009_v50, %v6009_v50  ;;  %v6015_v50 = vld [vmem:[#allocation25_spill] sm:$0xff] }
 0x2a8   : > { %v2911_v52 = vadd.f32 %v2910_v8, %v4716_v13  ;;  %v3168_v38 = vadd.f32 %v3167_v3, %v3041_v37 }
 0x2aa   : > { %v2912_v57 = vadd.f32 %v2911_v52, %v6010_v60  ;;  %v3044_v52 = vmul.f32 %v4688_v47, %v4688_v47  ;;  %v3169_v45 = vadd.f32 %v3168_v38, %v3042_v14 }
 0x2ac   : > { %v2913_v55 = vadd.f32 %v2912_v57, %v6011_v20  ;;  %v3170_v34 = vadd.f32 %v3169_v45, %v3043_v6  ;;  %v3047_v57 = vmul.f32 %v4700_v56, %v4700_v56  ;;  %v3051_v45 = vmul.f32 %v4728_v62, %v4728_v62 }
 0x2ae   : > { %v2914_v54 = vadd.f32 %v2913_v55, %v4728_v62  ;;  %v3171_v42 = vadd.f32 %v3170_v34, %v3044_v52  ;;  %v3048_v55 = vmul.f32 %v4716_v13, %v4716_v13 }
 0x2b0   : > { %v2915_v23 = vadd.f32 %v2914_v54, %v4744_v49  ;;  %v3172_v37 = vadd.f32 %v3171_v42, %v3045_v32  ;;  %v3049_v54 = vmul.f32 %v6010_v60, %v6010_v60  ;;  %v3052_v32 = vmul.f32 %v4744_v49, %v4744_v49 }
 0x2b1   : > { %v3054_v42 = vmul.f32 %v6013_v21, %v6013_v21 }
 0x2b2   : > { %v2916_v8 = vadd.f32 %v2915_v23, %v6012_v22  ;;  %v3173_v14 = vadd.f32 %v3172_v37, %v3046_v63  ;;  %v3050_v23 = vmul.f32 %v6011_v20, %v6011_v20 }
 0x2b4   : > { %v2917_v40 = vadd.f32 %v2916_v8, %v6013_v21  ;;  %v3174_v6 = vadd.f32 %v3173_v14, %v3047_v57  ;;  %v3055_v57 = vmul.f32 %v4756_v15, %v4756_v15  ;;  %v6017_v21 = vld [vmem:[#allocation27_spill] sm:$0xff] }
 0x2b6   : > { %v2918_v44 = vadd.f32 %v2917_v40, %v4756_v15  ;;  %v3175_v52 = vadd.f32 %v3174_v6, %v3048_v55  ;;  %v3053_v40 = vmul.f32 %v6012_v22, %v6012_v22  ;;  %v6016_v22 = vld [vmem:[#allocation26_spill] sm:$0xff]  ;;  %v6018_v15 = vld [vmem:[#allocation29_spill] sm:$0xff] }
 0x2b8   : > { %v2919_v47 = vadd.f32 %v2918_v44, %v4772_v33  ;;  %v3176_v8 = vadd.f32 %v3175_v52, %v3049_v54 }
 0x2ba   : > { %v2920_v3 = vadd.f32 %v2919_v47, %v6014_v2  ;;  %v3177_v34 = vadd.f32 %v3176_v8, %v3050_v23  ;;  %v3056_v47 = vmul.f32 %v4772_v33, %v4772_v33  ;;  %v6019_v33 = vld [vmem:[#allocation31_spill] sm:$0xff] }
 0x2bc   : > { %v2921_v38 = vadd.f32 %v2920_v3, %v6015_v50  ;;  %v3178_v63 = vadd.f32 %v3177_v34, %v3051_v45  ;;  %v3057_v3 = vmul.f32 %v6014_v2, %v6014_v2  ;;  %v6020_v2 = vld [vmem:[#allocation28_spill] sm:$0xff] }
 0x2be   : > { %v2922_v56 = vadd.f32 %v2921_v38, %v4784_v43  ;;  %v3179_v44 = vadd.f32 %v3178_v63, %v3052_v32  ;;  %v3058_v38 = vmul.f32 %v6015_v50, %v6015_v50  ;;  %v6021_v50 = vld [vmem:[#allocation30_spill] sm:$0xff] }
 0x2c0   : > { %v2923_v13 = vadd.f32 %v2922_v56, %v4798_v1  ;;  %v3180_v37 = vadd.f32 %v3179_v44, %v3053_v40  ;;  %v3059_v56 = vmul.f32 %v4784_v43, %v4784_v43  ;;  %v6022_v43 = vld [vmem:[#allocation33_spill] sm:$0xff] }
 0x2c2   : > { %v2924_v60 = vadd.f32 %v2923_v13, %v4779_v9  ;;  %v3181_v55 = vadd.f32 %v3180_v37, %v3054_v42  ;;  %v3060_v13 = vmul.f32 %v4798_v1, %v4798_v1  ;;  %v6023_v1 = vld [vmem:[#allocation35_spill] sm:$0xff] }
 0x2c4   : > { %v2925_v20 = vadd.f32 %v2924_v60, %v4793_v30  ;;  %v3182_v54 = vadd.f32 %v3181_v55, %v3055_v57  ;;  %v3061_v60 = vmul.f32 %v4779_v9, %v4779_v9  ;;  %v6024_v9 = vld [vmem:[#allocation32_spill] sm:$0xff] }
 0x2c6   : > { %v2926_v62 = vadd.f32 %v2925_v20, %v4810_v53  ;;  %v3183_v23 = vadd.f32 %v3182_v54, %v3056_v47  ;;  %v3062_v20 = vmul.f32 %v4793_v30, %v4793_v30  ;;  %v6025_v30 = vld [vmem:[#allocation34_spill] sm:$0xff] }
 0x2c8   : > { %v2927_v49 = vadd.f32 %v2926_v62, %v4822_v31  ;;  %v3184_v45 = vadd.f32 %v3183_v23, %v3057_v3  ;;  %v3063_v62 = vmul.f32 %v4810_v53, %v4810_v53  ;;  %v6026_v53 = vld [vmem:[#allocation37_spill] sm:$0xff] }
 0x2ca   : > { %v2928_v14 = vadd.f32 %v2927_v49, %v6016_v22  ;;  %v3185_v32 = vadd.f32 %v3184_v45, %v3058_v38  ;;  %v3064_v49 = vmul.f32 %v4822_v31, %v4822_v31  ;;  %v6027_v31 = vld [vmem:[#allocation39_spill] sm:$0xff] }
 0x2cc   : > { %v2929_v6 = vadd.f32 %v2928_v14, %v6017_v21  ;;  %v3186_v40 = vadd.f32 %v3185_v32, %v3059_v56  ;;  %v3065_v14 = vmul.f32 %v6016_v22, %v6016_v22  ;;  %v6028_v22 = vld [vmem:[#allocation36_spill] sm:$0xff] }
 0x2ce   : > { %v2930_v52 = vadd.f32 %v2929_v6, %v6018_v15  ;;  %v3187_v42 = vadd.f32 %v3186_v40, %v3060_v13  ;;  %v3066_v6 = vmul.f32 %v6017_v21, %v6017_v21  ;;  %v6029_v21 = vld [vmem:[#allocation38_spill] sm:$0xff] }
 0x2d0   : > { %v2931_v8 = vadd.f32 %v2930_v52, %v6019_v33  ;;  %v3188_v57 = vadd.f32 %v3187_v42, %v3061_v60  ;;  %v3067_v52 = vmul.f32 %v6018_v15, %v6018_v15  ;;  %v6030_v15 = vld [vmem:[#allocation41_spill] sm:$0xff] }
 0x2d2   : > { %v2932_v34 = vadd.f32 %v2931_v8, %v6020_v2  ;;  %v3189_v47 = vadd.f32 %v3188_v57, %v3062_v20  ;;  %v3068_v8 = vmul.f32 %v6019_v33, %v6019_v33  ;;  %v6031_v33 = vld [vmem:[#allocation43_spill] sm:$0xff] }
 0x2d4   : > { %v2933_v63 = vadd.f32 %v2932_v34, %v6021_v50  ;;  %v3190_v3 = vadd.f32 %v3189_v47, %v3063_v62  ;;  %v3069_v34 = vmul.f32 %v6020_v2, %v6020_v2  ;;  %v6032_v2 = vld [vmem:[#allocation40_spill] sm:$0xff] }
 0x2d6   : > { %v2934_v44 = vadd.f32 %v2933_v63, %v6022_v43  ;;  %v3191_v38 = vadd.f32 %v3190_v3, %v3064_v49  ;;  %v3070_v63 = vmul.f32 %v6021_v50, %v6021_v50  ;;  %v6033_v50 = vld [vmem:[#allocation42_spill] sm:$0xff] }
 0x2d8   : > { %v2935_v37 = vadd.f32 %v2934_v44, %v6023_v1  ;;  %v3192_v56 = vadd.f32 %v3191_v38, %v3065_v14  ;;  %v3071_v44 = vmul.f32 %v6022_v43, %v6022_v43  ;;  %v6034_v43 = vld [vmem:[#allocation45_spill] sm:$0xff] }
 0x2da   : > { %v2936_v55 = vadd.f32 %v2935_v37, %v6024_v9  ;;  %v3193_v13 = vadd.f32 %v3192_v56, %v3066_v6  ;;  %v3072_v37 = vmul.f32 %v6023_v1, %v6023_v1  ;;  %v6035_v1 = vld [vmem:[#allocation47_spill] sm:$0xff] }
 0x2dc   : > { %v2937_v54 = vadd.f32 %v2936_v55, %v6025_v30  ;;  %v3194_v60 = vadd.f32 %v3193_v13, %v3067_v52  ;;  %v3073_v55 = vmul.f32 %v6024_v9, %v6024_v9  ;;  %v6036_v9 = vld [vmem:[#allocation44_spill] sm:$0xff] }
 0x2de   : > { %v2938_v23 = vadd.f32 %v2937_v54, %v6026_v53  ;;  %v3195_v20 = vadd.f32 %v3194_v60, %v3068_v8  ;;  %v3074_v54 = vmul.f32 %v6025_v30, %v6025_v30  ;;  %v6037_v30 = vld [vmem:[#allocation46_spill] sm:$0xff] }
 0x2e0   : > { %v2939_v45 = vadd.f32 %v2938_v23, %v6027_v31  ;;  %v3196_v62 = vadd.f32 %v3195_v20, %v3069_v34  ;;  %v3075_v23 = vmul.f32 %v6026_v53, %v6026_v53  ;;  %v6038_v53 = vld [vmem:[#allocation49_spill] sm:$0xff] }
 0x2e2   : > { %v2940_v32 = vadd.f32 %v2939_v45, %v6028_v22  ;;  %v3197_v49 = vadd.f32 %v3196_v62, %v3070_v63  ;;  %v3076_v45 = vmul.f32 %v6027_v31, %v6027_v31  ;;  %v6039_v31 = vld [vmem:[#allocation51_spill] sm:$0xff] }
 0x2e4   : > { %v2941_v40 = vadd.f32 %v2940_v32, %v6029_v21  ;;  %v3198_v14 = vadd.f32 %v3197_v49, %v3071_v44  ;;  %v3077_v32 = vmul.f32 %v6028_v22, %v6028_v22  ;;  %v6040_v22 = vld [vmem:[#allocation48_spill] sm:$0xff] }
 0x2e6   : > { %v2942_v42 = vadd.f32 %v2941_v40, %v6030_v15  ;;  %v3199_v6 = vadd.f32 %v3198_v14, %v3072_v37  ;;  %v3078_v40 = vmul.f32 %v6029_v21, %v6029_v21  ;;  %v6041_v21 = vld [vmem:[#allocation50_spill] sm:$0xff] }
 0x2e8   : > { %v2943_v57 = vadd.f32 %v2942_v42, %v6031_v33  ;;  %v3200_v52 = vadd.f32 %v3199_v6, %v3073_v55  ;;  %v3079_v42 = vmul.f32 %v6030_v15, %v6030_v15  ;;  %v6042_v15 = vld [vmem:[#allocation53_spill] sm:$0xff] }
 0x2ea   : > { %v2944_v47 = vadd.f32 %v2943_v57, %v6032_v2  ;;  %v3201_v8 = vadd.f32 %v3200_v52, %v3074_v54  ;;  %v3080_v57 = vmul.f32 %v6031_v33, %v6031_v33  ;;  %v6043_v33 = vld [vmem:[#allocation55_spill] sm:$0xff] }
 0x2ec   : > { %v2945_v3 = vadd.f32 %v2944_v47, %v6033_v50  ;;  %v3202_v34 = vadd.f32 %v3201_v8, %v3075_v23  ;;  %v3081_v47 = vmul.f32 %v6032_v2, %v6032_v2  ;;  %v6044_v2 = vld [vmem:[#allocation52_spill] sm:$0xff] }
 0x2ee   : > { %v2946_v38 = vadd.f32 %v2945_v3, %v6034_v43  ;;  %v3203_v63 = vadd.f32 %v3202_v34, %v3076_v45  ;;  %v3082_v3 = vmul.f32 %v6033_v50, %v6033_v50  ;;  %v6045_v50 = vld [vmem:[#allocation54_spill] sm:$0xff] }
 0x2f0   : > { %v2947_v56 = vadd.f32 %v2946_v38, %v6035_v1  ;;  %v3204_v44 = vadd.f32 %v3203_v63, %v3077_v32  ;;  %v3083_v38 = vmul.f32 %v6034_v43, %v6034_v43  ;;  %v6046_v43 = vld [vmem:[#allocation57_spill] sm:$0xff] }
 0x2f2   : > { %v2948_v13 = vadd.f32 %v2947_v56, %v6036_v9  ;;  %v3205_v37 = vadd.f32 %v3204_v44, %v3078_v40  ;;  %v3084_v56 = vmul.f32 %v6035_v1, %v6035_v1  ;;  %v6047_v1 = vld [vmem:[#allocation59_spill] sm:$0xff] }
 0x2f4   : > { %v2949_v60 = vadd.f32 %v2948_v13, %v6037_v30  ;;  %v3206_v55 = vadd.f32 %v3205_v37, %v3079_v42  ;;  %v3085_v13 = vmul.f32 %v6036_v9, %v6036_v9  ;;  %v6048_v9 = vld [vmem:[#allocation56_spill] sm:$0xff] }
 0x2f6   : > { %v2950_v20 = vadd.f32 %v2949_v60, %v6038_v53  ;;  %v3207_v54 = vadd.f32 %v3206_v55, %v3080_v57  ;;  %v3086_v60 = vmul.f32 %v6037_v30, %v6037_v30  ;;  %v6049_v30 = vld [vmem:[#allocation58_spill] sm:$0xff] }
 0x2f8   : > { %v2951_v62 = vadd.f32 %v2950_v20, %v6039_v31  ;;  %v3208_v23 = vadd.f32 %v3207_v54, %v3081_v47  ;;  %v3087_v20 = vmul.f32 %v6038_v53, %v6038_v53  ;;  %v6050_v53 = vld [vmem:[#allocation60_spill] sm:$0xff] }
 0x2fa   : > { %v2952_v49 = vadd.f32 %v2951_v62, %v6040_v22  ;;  %v3209_v45 = vadd.f32 %v3208_v23, %v3082_v3  ;;  %v3088_v62 = vmul.f32 %v6039_v31, %v6039_v31  ;;  %v6051_v31 = vld [vmem:[#allocation61_spill] sm:$0xff] }
 0x2fc   : > { %v2953_v14 = vadd.f32 %v2952_v49, %v6041_v21  ;;  %v3210_v32 = vadd.f32 %v3209_v45, %v3083_v38  ;;  %v3089_v49 = vmul.f32 %v6040_v22, %v6040_v22  ;;  %v6052_v22 = vld [vmem:[#allocation62_spill] sm:$0xff] }
 0x2fe   : > { %v2954_v6 = vadd.f32 %v2953_v14, %v6042_v15  ;;  %v3211_v40 = vadd.f32 %v3210_v32, %v3084_v56  ;;  %v3090_v14 = vmul.f32 %v6041_v21, %v6041_v21  ;;  %v6053_v21 = vld [vmem:[#allocation63_spill] sm:$0xff] }
 0x300   : > { %v2955_v52 = vadd.f32 %v2954_v6, %v6043_v33  ;;  %v3212_v42 = vadd.f32 %v3211_v40, %v3085_v13  ;;  %v3091_v6 = vmul.f32 %v6042_v15, %v6042_v15  ;;  %v6054_v15 = vld [vmem:[#allocation64_spill] sm:$0xff] }
 0x302   : > { %v2956_v8 = vadd.f32 %v2955_v52, %v6044_v2  ;;  %v3213_v57 = vadd.f32 %v3212_v42, %v3086_v60  ;;  %v3092_v52 = vmul.f32 %v6043_v33, %v6043_v33  ;;  %v6055_v33 = vld [vmem:[#allocation65_spill] sm:$0xff] }
 0x304   : > { %v2957_v34 = vadd.f32 %v2956_v8, %v6045_v50  ;;  %v3214_v47 = vadd.f32 %v3213_v57, %v3087_v20  ;;  %v3093_v8 = vmul.f32 %v6044_v2, %v6044_v2  ;;  %v6056_v2 = vld [vmem:[#allocation66_spill] sm:$0xff] }
 0x306   : > { %v2958_v63 = vadd.f32 %v2957_v34, %v6046_v43  ;;  %v3215_v3 = vadd.f32 %v3214_v47, %v3088_v62  ;;  %v3094_v34 = vmul.f32 %v6045_v50, %v6045_v50  ;;  %v6057_v50 = vld [vmem:[#allocation67_spill] sm:$0xff] }
 0x308   : > { %v2959_v44 = vadd.f32 %v2958_v63, %v6047_v1  ;;  %v3216_v38 = vadd.f32 %v3215_v3, %v3089_v49  ;;  %v3095_v63 = vmul.f32 %v6046_v43, %v6046_v43  ;;  %v6058_v43 = vld [vmem:[#allocation68_spill] sm:$0xff] }
 0x30a   : > { %v2960_v37 = vadd.f32 %v2959_v44, %v6048_v9  ;;  %v3217_v56 = vadd.f32 %v3216_v38, %v3090_v14  ;;  %v3096_v44 = vmul.f32 %v6047_v1, %v6047_v1  ;;  %v6059_v1 = vld [vmem:[#allocation69_spill] sm:$0xff] }
 0x30c   : > { %v2961_v55 = vadd.f32 %v2960_v37, %v6049_v30  ;;  %v3218_v13 = vadd.f32 %v3217_v56, %v3091_v6  ;;  %v3097_v37 = vmul.f32 %v6048_v9, %v6048_v9  ;;  %v6060_v9 = vld [vmem:[#allocation70_spill] sm:$0xff] }
 0x30e   : > { %v2962_v54 = vadd.f32 %v2961_v55, %v6050_v53  ;;  %v3219_v60 = vadd.f32 %v3218_v13, %v3092_v52  ;;  %v3098_v55 = vmul.f32 %v6049_v30, %v6049_v30  ;;  %v6061_v30 = vld [vmem:[#allocation71_spill] sm:$0xff] }
 0x310   : > { %v2963_v23 = vadd.f32 %v2962_v54, %v6051_v31  ;;  %v3220_v20 = vadd.f32 %v3219_v60, %v3093_v8  ;;  %v3099_v54 = vmul.f32 %v6050_v53, %v6050_v53  ;;  %v6062_v53 = vld [vmem:[#allocation72_spill] sm:$0xff] }
 0x312   : > { %v2964_v45 = vadd.f32 %v2963_v23, %v6052_v22  ;;  %v3221_v62 = vadd.f32 %v3220_v20, %v3094_v34  ;;  %v3100_v23 = vmul.f32 %v6051_v31, %v6051_v31  ;;  %v6063_v31 = vld [vmem:[#allocation73_spill] sm:$0xff] }
 0x314   : > { %v2965_v32 = vadd.f32 %v2964_v45, %v6053_v21  ;;  %v3222_v49 = vadd.f32 %v3221_v62, %v3095_v63  ;;  %v3101_v45 = vmul.f32 %v6052_v22, %v6052_v22  ;;  %v6064_v22 = vld [vmem:[#allocation74_spill] sm:$0xff] }
 0x316   : > { %v2966_v40 = vadd.f32 %v2965_v32, %v6054_v15  ;;  %v3223_v14 = vadd.f32 %v3222_v49, %v3096_v44  ;;  %v3102_v32 = vmul.f32 %v6053_v21, %v6053_v21  ;;  %v3106_v49 = vmul.f32 %v6057_v50, %v6057_v50 }
 0x318   : > { %v2967_v42 = vadd.f32 %v2966_v40, %v6055_v33  ;;  %v3224_v6 = vadd.f32 %v3223_v14, %v3097_v37  ;;  %v3103_v40 = vmul.f32 %v6054_v15, %v6054_v15 }
 0x31a   : > { %v2968_v57 = vadd.f32 %v2967_v42, %v6056_v2  ;;  %v3225_v52 = vadd.f32 %v3224_v6, %v3098_v55  ;;  %v3104_v42 = vmul.f32 %v6055_v33, %v6055_v33  ;;  %v3107_v55 = vmul.f32 %v6058_v43, %v6058_v43 }
 0x31b   : > { %v3109_v6 = vmul.f32 %v6060_v9, %v6060_v9 }
 0x31c   : > { %v2969_v47 = vadd.f32 %v2968_v57, %v6057_v50  ;;  %v3226_v8 = vadd.f32 %v3225_v52, %v3099_v54  ;;  %v3105_v57 = vmul.f32 %v6056_v2, %v6056_v2 }
 0x31e   : > { %v2970_v3 = vadd.f32 %v2969_v47, %v6058_v43  ;;  %v3227_v34 = vadd.f32 %v3226_v8, %v3100_v23  ;;  %v3110_v23 = vmul.f32 %v6061_v30, %v6061_v30  ;;  %v3112_v8 = vmul.f32 %v6063_v31, %v6063_v31 }
 0x320   : > { %v2971_v38 = vadd.f32 %v2970_v3, %v6059_v1  ;;  %v3228_v63 = vadd.f32 %v3227_v34, %v3101_v45  ;;  %v3108_v3 = vmul.f32 %v6059_v1, %v6059_v1 }
 0x322   : > { %v2972_v56 = vadd.f32 %v2971_v38, %v6060_v9  ;;  %v3229_v44 = vadd.f32 %v3228_v63, %v3102_v32  ;;  %v3113_v32 = vmul.f32 %v6064_v22, %v6064_v22  ;;  %v3115_v63 = vmul.f32 %v5068_v35, %v5068_v35 }
 0x324   : > { %v2973_v13 = vadd.f32 %v2972_v56, %v6061_v30  ;;  %v3230_v37 = vadd.f32 %v3229_v44, %v3103_v40  ;;  %v3111_v56 = vmul.f32 %v6062_v53, %v6062_v53 }
 0x326   : > { %v2974_v60 = vadd.f32 %v2973_v13, %v6062_v53  ;;  %v3231_v47 = vadd.f32 %v3230_v37, %v3104_v42  ;;  %v3116_v42 = vmul.f32 %v5082_v26, %v5082_v26  ;;  %v3118_v37 = vmul.f32 %v5112_v46, %v5112_v46 }
 0x328   : > { %v2975_v20 = vadd.f32 %v2974_v60, %v6063_v31  ;;  %v3232_v14 = vadd.f32 %v3231_v47, %v3105_v57  ;;  %v3114_v60 = vmul.f32 %v5062_v10, %v5062_v10 }
 0x32a   : > { %v2976_v62 = vadd.f32 %v2975_v20, %v6064_v22  ;;  %v3233_v54 = vadd.f32 %v3232_v14, %v3106_v49  ;;  %v3119_v49 = vmul.f32 %v5127_v61, %v5127_v61  ;;  %v3121_v14 = vmul.f32 %v5157_v39, %v5157_v39 }
 0x32c   : > { %v2977_v21 = vadd.f32 %v2976_v62, %v5062_v10  ;;  %v3234_v38 = vadd.f32 %v3233_v54, %v3107_v55  ;;  %v3117_v62 = vmul.f32 %v5097_v18, %v5097_v18 }
 0x32e   : > { %v2978_v15 = vadd.f32 %v2977_v21, %v5068_v35  ;;  %v3235_v52 = vadd.f32 %v3234_v38, %v3108_v3  ;;  %v3122_v3 = vmul.f32 %v5172_v41, %v5172_v41  ;;  %v3124_v38 = vmul.f32 %v5202_v29, %v5202_v29 }
 0x330   : > { %v2979_v33 = vadd.f32 %v2978_v15, %v5082_v26  ;;  %v3236_v45 = vadd.f32 %v3235_v52, %v3109_v6  ;;  %v3120_v15 = vmul.f32 %v5142_v25, %v5142_v25 }
 0x332   : > { %v2980_v2 = vadd.f32 %v2979_v33, %v5097_v18  ;;  %v3237_v13 = vadd.f32 %v3236_v45, %v3110_v23  ;;  %v3125_v23 = vmul.f32 %v5217_v51, %v5217_v51  ;;  %v3127_v45 = vmul.f32 %v5247_v5, %v5247_v5 }
 0x334   : > { %v2981_v50 = vadd.f32 %v2980_v2, %v5112_v46  ;;  %v3238_v34 = vadd.f32 %v3237_v13, %v3111_v56  ;;  %v3123_v2 = vmul.f32 %v5187_v11, %v5187_v11 }
 0x336   : > { %v2982_v43 = vadd.f32 %v2981_v50, %v5127_v61  ;;  %v3239_v40 = vadd.f32 %v3238_v34, %v3112_v8  ;;  %v3128_v8 = vmul.f32 %v5262_v59, %v5262_v59  ;;  %v3130_v34 = vmul.f32 %v5292_v27, %v5292_v27 }
 0x338   : > { %v2983_v1 = vadd.f32 %v2982_v43, %v5142_v25  ;;  %v3240_v20 = vadd.f32 %v3239_v40, %v3113_v32  ;;  %v3126_v43 = vmul.f32 %v5232_v19, %v5232_v19 }
 0x33a   : > { %v2984_v9 = vadd.f32 %v2983_v1, %v5157_v39  ;;  %v3241_v44 = vadd.f32 %v3240_v20, %v3114_v60  ;;  %v3131_v60 = vmul.f32 %v5078_v7, %v5078_v7 }
 0x33c   : > { %v2985_v30 = vadd.f32 %v2984_v9, %v5172_v41  ;;  %v3242_v57 = vadd.f32 %v3241_v44, %v3115_v63  ;;  %v3129_v9 = vmul.f32 %v5277_v17, %v5277_v17 }
 0x33e   : > { %v2986_v53 = vadd.f32 %v2985_v30, %v5187_v11  ;;  %v3243_v21 = vadd.f32 %v3242_v57, %v3116_v42 }
 0x340   : > { %v2987_v31 = vadd.f32 %v2986_v53, %v5202_v29  ;;  %v3244_v47 = vadd.f32 %v3243_v21, %v3117_v62  ;;  %v3132_v53 = vmul.f32 %v5092_v0, %v5092_v0 }
 0x342   : > { %v2988_v22 = vadd.f32 %v2987_v31, %v5217_v51  ;;  %v3245_v55 = vadd.f32 %v3244_v47, %v3118_v37  ;;  %v3133_v31 = vmul.f32 %v5071_v58, %v5071_v58 }
 0x344   : > { %v2989_v10 = vadd.f32 %v2988_v22, %v5232_v19  ;;  %v3246_v33 = vadd.f32 %v3245_v55, %v3119_v49  ;;  %v3134_v22 = vmul.f32 %v5085_v12, %v5085_v12 }
 0x346   : > { %v2990_v35 = vadd.f32 %v2989_v10, %v5247_v5  ;;  %v3247_v54 = vadd.f32 %v3246_v33, %v3120_v15  ;;  %v3135_v10 = vmul.f32 %v5107_v4, %v5107_v4 }
 0x348   : > { %v2991_v26 = vadd.f32 %v2990_v35, %v5262_v59  ;;  %v3248_v6 = vadd.f32 %v3247_v54, %v3121_v14  ;;  %v3136_v35 = vmul.f32 %v5122_v24, %v5122_v24 }
 0x34a   : > { %v2992_v18 = vadd.f32 %v2991_v26, %v5277_v17  ;;  %v3249_v50 = vadd.f32 %v3248_v6, %v3122_v3  ;;  %v6065_v17 = vld [vmem:[#allocation75_spill] sm:$0xff]  ;;  %v3137_v26 = vmul.f32 %v5100_v16, %v5100_v16 }
 0x34c   : > { %v2993_v46 = vadd.f32 %v2992_v18, %v5292_v27  ;;  %v3250_v52 = vadd.f32 %v3249_v50, %v3123_v2  ;;  %v6066_v27 = vld [vmem:[#allocation76_spill] sm:$0xff]  ;;  %v3138_v18 = vmul.f32 %v5115_v36, %v5115_v36 }
 0x34e   : > { %v2994_v61 = vadd.f32 %v2993_v46, %v5078_v7  ;;  %v3251_v56 = vadd.f32 %v3250_v52, %v3124_v38  ;;  %v6067_v7 = vld [vmem:[#allocation78_spill] sm:$0xff]  ;;  %v3139_v46 = vmul.f32 %v5137_v28, %v5137_v28 }
 0x350   : > { %v2995_v25 = vadd.f32 %v2994_v61, %v5092_v0  ;;  %v3252_v1 = vadd.f32 %v3251_v56, %v3125_v23  ;;  %v6068_v0 = vld [vmem:[#allocation80_spill] sm:$0xff]  ;;  %v3140_v61 = vmul.f32 %v5152_v48, %v5152_v48 }
 0x352   : > { %v2996_v39 = vadd.f32 %v2995_v25, %v5071_v58  ;;  %v3253_v13 = vadd.f32 %v3252_v1, %v3126_v43  ;;  %v6069_v58 = vld [vmem:[#allocation77_spill] sm:$0xff]  ;;  %v3141_v25 = vmul.f32 %v6065_v17, %v6065_v17  ;;  %v6077_v1 = vld [vmem:[#allocation6_spill] sm:$0xff] }
 0x354   : > { %v2997_v41 = vadd.f32 %v2996_v39, %v5085_v12  ;;  %v3254_v32 = vadd.f32 %v3253_v13, %v3127_v45  ;;  %v6070_v12 = vld [vmem:[#allocation79_spill] sm:$0xff]  ;;  %v3142_v39 = vmul.f32 %v6066_v27, %v6066_v27 }
 0x356   : > { %v2998_v11 = vadd.f32 %v2997_v41, %v5107_v4  ;;  %v3255_v30 = vadd.f32 %v3254_v32, %v3128_v8  ;;  %v6071_v4 = vld [vmem:[#allocation82_spill] sm:$0xff]  ;;  %v3143_v41 = vmul.f32 %v6067_v7, %v6067_v7  ;;  %v3145_v8 = vmul.f32 %v6069_v58, %v6069_v58 }
 0x357   : > { %v3146_v32 = vmul.f32 %v6070_v12, %v6070_v12 }
 0x358   : > { %v2999_v29 = vadd.f32 %v2998_v11, %v5122_v24  ;;  %v3256_v40 = vadd.f32 %v3255_v30, %v3129_v9  ;;  %v6072_v24 = vld [vmem:[#allocation2_spill] sm:$0xff]  ;;  %v3144_v11 = vmul.f32 %v6068_v0, %v6068_v0 }
 0x35a   : > { %v3000_v51 = vadd.f32 %v2999_v29, %v5100_v16  ;;  %v3257_v63 = vadd.f32 %v3256_v40, %v3130_v34  ;;  %v6073_v16 = vld [vmem:[#allocation81_spill] sm:$0xff]  ;;  %v6079_v34 = vld [vmem:[#allocation8_spill] sm:$0xff] }
 0x35b   : > { %v6080_v40 = vld [vmem:[#allocation9_spill] sm:$0xff] }
 0x35c   : > { %v3001_v19 = vadd.f32 %v3000_v51, %v5115_v36  ;;  %v3258_v42 = vadd.f32 %v3257_v63, %v3131_v60  ;;  %v6074_v36 = vld [vmem:[#allocation3_spill] sm:$0xff] }
 0x35d   : > { %v6078_v51 = vld [vmem:[#allocation7_spill] sm:$0xff] }
 0x35e   : > { %v3002_v5 = vadd.f32 %v3001_v19, %v5137_v28  ;;  %v3259_v62 = vadd.f32 %v3258_v42, %v3132_v53  ;;  %v6075_v28 = vld [vmem:[#allocation4_spill] sm:$0xff]  ;;  %v3148_v53 = vmul.f32 %v6072_v24, %v6072_v24 }
 0x360   : > { %v3003_v59 = vadd.f32 %v3002_v5, %v5152_v48  ;;  %v3260_v37 = vadd.f32 %v3259_v62, %v3133_v31  ;;  %v6076_v48 = vld [vmem:[#allocation5_spill] sm:$0xff]  ;;  %v3147_v5 = vmul.f32 %v6071_v4, %v6071_v4  ;;  %v3149_v31 = vmul.f32 %v6073_v16, %v6073_v16 }
 0x362   : > { %v3004_v20 = vadd.f32 %v3003_v59, %v6065_v17  ;;  %v3261_v49 = vadd.f32 %v3260_v37, %v3134_v22  ;;  %v6081_v17 = vld [vmem:[#allocation10_spill] sm:$0xff]  ;;  %v3150_v22 = vmul.f32 %v6074_v36, %v6074_v36 }
 0x364   : > { %v3005_v44 = vadd.f32 %v3004_v20, %v6066_v27  ;;  %v3262_v15 = vadd.f32 %v3261_v49, %v3135_v10  ;;  %v6082_v27 = vld [vmem:[#allocation11_spill] sm:$0xff]  ;;  %v3151_v10 = vmul.f32 %v6075_v28, %v6075_v28 }
 0x366   : > { %v3006_v57 = vadd.f32 %v3005_v44, %v6067_v7  ;;  %v3263_v14 = vadd.f32 %v3262_v15, %v3136_v35  ;;  %v6083_v7 = vld [vmem:[#allocation12_spill] sm:$0xff]  ;;  %v3152_v35 = vmul.f32 %v6076_v48, %v6076_v48 }
 0x368   : > { %v3007_v21 = vadd.f32 %v3006_v57, %v6068_v0  ;;  %v3264_v3 = vadd.f32 %v3263_v14, %v3137_v26  ;;  %v6084_v0 = vld [vmem:[#allocation13_spill] sm:$0xff]  ;;  %v3153_v26 = vmul.f32 %v6077_v1, %v6077_v1 }
 0x36a   : > { %v3008_v47 = vadd.f32 %v3007_v21, %v6069_v58  ;;  %v3265_v2 = vadd.f32 %v3264_v3, %v3138_v18  ;;  %v6085_v58 = vld [vmem:[#allocation83_spill] sm:$0xff]  ;;  %v3154_v18 = vmul.f32 %v6078_v51, %v6078_v51 }
 0x36c   : > { %v3009_v55 = vadd.f32 %v3008_v47, %v6070_v12  ;;  %v3266_v38 = vadd.f32 %v3265_v2, %v3139_v46  ;;  %v6086_v12 = vld [vmem:[#allocation14_spill] sm:$0xff]  ;;  %v3157_v2 = vmul.f32 %v6081_v17, %v6081_v17 }
 0x36e   : > { %v3010_v33 = vadd.f32 %v3009_v55, %v6071_v4  ;;  %v3267_v23 = vadd.f32 %v3266_v38, %v3140_v61 }
 0x370   : > { %v3011_v54 = vadd.f32 %v3010_v33, %v6072_v24  ;;  %v3268_v43 = vadd.f32 %v3267_v23, %v3141_v25  ;;  %v3155_v33 = vmul.f32 %v6079_v34, %v6079_v34  ;;  %v3156_v24 = vmul.f32 %v6080_v40, %v6080_v40 }
 0x371   : > { %v3158_v25 = vmul.f32 %v6082_v27, %v6082_v27 }
 0x372   : > { %v3012_v6 = vadd.f32 %v3011_v54, %v6073_v16  ;;  %v3269_v45 = vadd.f32 %v3268_v43, %v3142_v39  ;;  %v3159_v39 = vmul.f32 %v6083_v7, %v6083_v7 }
 0x374   : > { %v3013_v50 = vadd.f32 %v3012_v6, %v6074_v36  ;;  %v3270_v13 = vadd.f32 %v3269_v45, %v3143_v41 }
 0x376   : > { %v3014_v52 = vadd.f32 %v3013_v50, %v6075_v28  ;;  %v3271_v19 = vadd.f32 %v3270_v13, %v3144_v11  ;;  %v2898_v50 = vld [vmem:[%s5732_s4] sm:$0x1]  ;;  %v3162_v11 = vmul.f32 %v6086_v12, %v6086_v12 }
 0x378   : > { %v3015_v56 = vadd.f32 %v3014_v52, %v6076_v48  ;;  %v3272_v60 = vadd.f32 %v3271_v19, %v3145_v8  ;;  %v3160_v52 = vmul.f32 %v6084_v0, %v6084_v0  ;;  %v3161_v48 = vmul.f32 %v6085_v58, %v6085_v58  ;;  %v3034_v19 = vld [vmem:[%s5732_s4 + $0x1] sm:$0x1] }
 0x37a   : > { %v3016_v29 = vadd.f32 %v3015_v56, %v6077_v1  ;;  %v3273_v63 = vadd.f32 %v3272_v60, %v3146_v32 }
 0x37c   : > { %v3017_v9 = vadd.f32 %v3016_v29, %v6078_v51  ;;  %v3274_v42 = vadd.f32 %v3273_v63, %v3147_v5 }
 0x37e   : > { %v3018_v30 = vadd.f32 %v3017_v9, %v6079_v34  ;;  %v3275_v62 = vadd.f32 %v3274_v42, %v3148_v53 }
 0x380   : > { %v3019_v59 = vadd.f32 %v3018_v30, %v6080_v40  ;;  %v3276_v37 = vadd.f32 %v3275_v62, %v3149_v31 }
 0x382   : > { %v3020_v20 = vadd.f32 %v3019_v59, %v6081_v17  ;;  %v3277_v49 = vadd.f32 %v3276_v37, %v3150_v22 }
 0x384   : > { %v3021_v44 = vadd.f32 %v3020_v20, %v6082_v27  ;;  %v3278_v15 = vadd.f32 %v3277_v49, %v3151_v10 }
 0x386   : > { %v3022_v57 = vadd.f32 %v3021_v44, %v6083_v7  ;;  %v3279_v14 = vadd.f32 %v3278_v15, %v3152_v35 }
 0x388   : > { %v3023_v21 = vadd.f32 %v3022_v57, %v6084_v0  ;;  %v3280_v46 = vadd.f32 %v3279_v14, %v3153_v26 }
 0x38a   : > { %v3024_v47 = vadd.f32 %v3023_v21, %v6085_v58  ;;  %v3281_v54 = vadd.f32 %v3280_v46, %v3154_v18 }
 0x38c   : > { %v3025_v55 = vadd.f32 %v3024_v47, %v6086_v12  ;;  %v3282_v16 = vadd.f32 %v3281_v54, %v3155_v33 }
 0x38e   : > { %v3026_v4 = vrot.slane %v3025_v55, 4  ;;  %v3283_v38 = vadd.f32 %v3282_v16, %v3156_v24 }
 0x390   : > { %v3027_v3 = vadd.f32 %v3026_v4, %v3025_v55  ;;  %v3284_v23 = vadd.f32 %v3283_v38, %v3157_v2 }
 0x392   : > { %v3028_v61 = vrot.slane %v3027_v3, 2  ;;  %v3285_v41 = vadd.f32 %v3284_v23, %v3158_v25 }
 0x394   : > { %v3029_v6 = vadd.f32 %v3028_v61, %v3027_v3  ;;  %v3286_v56 = vadd.f32 %v3285_v41, %v3159_v39 }
 0x396   : > { %v3030_v36 = vrot.slane %v3029_v6, 1  ;;  %v3287_v45 = vadd.f32 %v3286_v56, %v3160_v52 }
 0x398   : > { %v3031_v28 = vadd.f32 %v3030_v36, %v3029_v6  ;;  %v3288_v1 = vadd.f32 %v3287_v45, %v3161_v48 }
 0x39a   : > { %v3032_v43 = vadd.f32 %v3031_v28, %v2898_v50  ;;  %v3289_v29 = vadd.f32 %v3288_v1, %v3162_v11 }
 0x39c   : > { %3033 = vst [vmem:[%s5732_s4] sm:$0x1] %v3032_v43  ;;  %v3290_v8 = vrot.slane %v3289_v29, 4 }
 0x39e   : > { %v3291_v13 = vadd.f32 %v3290_v8, %v3289_v29 }
 0x3a0   : > { %v3292_v51 = vrot.slane %v3291_v13, 2 }
 0x3a2   : > { %v3293_v9 = vadd.f32 %v3292_v51, %v3291_v13 }
 0x3a4   : > { %v3294_v32 = vrot.slane %v3293_v9, 1 }
 0x3a6   : > { %v3295_v34 = vadd.f32 %v3294_v32, %v3293_v9  ;;  %3301 = sbr.rel (%p3606_p5) target bundleno = 975 (0x3cf), region = 40 }
 0x3a8   : > { %v3296_v30 = vadd.f32 %v3295_v34, %v3034_v19 }
 0x3aa   : > { %3297 = vst [vmem:[%s5732_s4 + $0x1] sm:$0x1] %v3296_v30 }
 0x3ab   : > { %v3302_v5 = vld [vmem:[%s5732_s4] sm:$0x1]  ;;  %v3313_v44 = vld [vmem:[%s5730_s2 + $0x1] sm:$0x1] }
 0x3ac   : > { %v3303_v40 = vmul.f32 0.00024414063, %v3302_v5  ;;  %v3309_v31 = vld [vmem:[%s5730_s2] sm:$0x1] }
 0x3ae   : > { %v3306_v53 = vmul.f32 %v3303_v40, %v3303_v40 }
 0x3b1   : > { %v3304_v60 = vld [vmem:[%s5732_s4 + $0x1] sm:$0x1] }
 0x3b2   : > { %v3305_v59 = vmul.f32 0.00024414063, %v3304_v60 }
 0x3b4   : > { %v3307_v63 = vsub.f32 %v3305_v59, %v3306_v53 }
 0x3b6   : > { %v3308_v17 = vmax.f32 %v3307_v63, 0.0 }
 0x3b8   : > { %v3310_v20 = vadd.f32 1e-05, %v3308_v17 }
 0x3ba   : > { %4148 = vrsqrt.f32 %v3310_v20 }
 0x3c7   : > { %v4149_v42 = vpop.eup %4148 }
 0x3c8   : > { %v3312_v27 = vmul.f32 %v4149_v42, %v3309_v31 }
 0x3ca   : > { %3316 = vst [vmem:[%s5732_s4] sm:$0x1] %v3312_v27  ;;  %v3314_v22 = vmul.f32 %v3312_v27, %v3303_v40 }
 0x3cc   : > { %v3315_v62 = vsub.f32 %v3313_v44, %v3314_v22 }
 0x3ce   : > { %3317 = vst [vmem:[%s5732_s4 + $0x1] sm:$0x1] %v3315_v62 }
 0x3cf PF: > { %s15_s15 = sadd.s32 1, %s4156_s15  }
 0x3d0   : > { %p12_p6 = scmp.ge.s32.totalorder %s15_s15, 6  }
 0x3d2   :  { %14 = sbr.rel (!%p12_p6) target bundleno = 1 (0x1), region = 78 }

// kernel: spatio_temporal_conv_forward.7
= control target key start
LH: loop header
LB: loop body
LE: loop exit
PB: predicated region body
PF: predicated region fallthrough
CT: control target
= control target key end

     0   :  { %s1027_s9 = smov 0   ;;  %s1587_s0 = inlined_call_operand.vmem [shape: f32[4096,128], index: 0, kind: input, shape index: {}]   ;;  %s1588_s1 = inlined_call_operand.vmem [shape: f32[2,128], index: 1, kind: input, shape index: {}]   ;;  %s1589_s2 = inlined_call_operand.vmem [shape: f32[4096,128], index: 2, kind: output, shape index: {}]  }
   0x1 LB: > { %s981_s10 = sadd.s32 4294967295, %s1010_s9   ;;  %p985_p0 = scmp.ge.s32.totalorder %s1010_s9, 1  ;;  %s1010_s9 = sphi %s1027_s9, %s12_s9  }
   0x2   : > { %p113_p1 = scmp.lt.s32.totalorder %s1010_s9, 5 }
   0x4   : > { %p114_p2 = pnand %p985_p0, %p113_p1 }
   0x5   : > { %s986_s11 = sshll.u32 (!%p114_p2), %s981_s10, 7 }
   0x6   : > { %117 = sbr.rel (%p114_p2) target bundleno = 162 (0xa2), region = 28  ;;  %p136_p3 = scmp.lt.s32.totalorder (!%p114_p2), %s986_s11, 511 }
   0xb   : > { %s1591_s11 = smov (!%p136_p3, %s986_s11), 511  ;;  %v1041_v0 = vld [vmem:[%s1588_s1] ss:$0 sm:$0xff]  ;;  %v1053_v1 = vld [vmem:[%s1588_s1 + $0x1] ss:$0 sm:$0xff] }
   0xc   : > { %s987_s12 = sshll.u32 %s1591_s11, 3 }
   0xd   : > { %s1048_s17 = scalar_lea.vmem %s1587_s0, %s987_s12  ;;  %s1086_s22 = scalar_lea.vmem %s1589_s2, %s987_s12 }
   0xe   : > { %v147_v2 = vld [vmem:[%s1048_s17] sm:$0xff]  ;;  %v148_v3 = vld [vmem:[%s1048_s17 + $0x8] sm:$0xff]  ;;  %v149_v4 = vld [vmem:[%s1048_s17 + $0x10] sm:$0xff] }
   0xf   : > { %v280_v5 = vmul.f32 %v1041_v0, %v147_v2  ;;  %v281_v6 = vmul.f32 %v1041_v0, %v148_v3  ;;  %v282_v7 = vmul.f32 %v1041_v0, %v149_v4  ;;  %v150_v8 = vld [vmem:[%s1048_s17 + $0x18] sm:$0xff]  ;;  %v151_v9 = vld [vmem:[%s1048_s17 + $0x20] sm:$0xff]  ;;  %v152_v10 = vld [vmem:[%s1048_s17 + $0x28] sm:$0xff] }
  0x10   : > { %v283_v11 = vmul.f32 %v1041_v0, %v150_v8  ;;  %v284_v12 = vmul.f32 %v1041_v0, %v151_v9  ;;  %v285_v13 = vmul.f32 %v1041_v0, %v152_v10  ;;  %v153_v14 = vld [vmem:[%s1048_s17 + $0x30] sm:$0xff]  ;;  %v154_v15 = vld [vmem:[%s1048_s17 + $0x38] sm:$0xff]  ;;  %v155_v24 = vld [vmem:[%s1048_s17 + $0x40] sm:$0xff] }
  0x11   : > { %v413_v16 = vadd.f32 %v1053_v1, %v280_v5  ;;  %v414_v17 = vadd.f32 %v1053_v1, %v281_v6  ;;  %v415_v18 = vadd.f32 %v1053_v1, %v282_v7  ;;  %v286_v19 = vmul.f32 %v1041_v0, %v153_v14  ;;  %v156_v25 = vld [vmem:[%s1048_s17 + $0x48] sm:$0xff]  ;;  %v157_v26 = vld [vmem:[%s1048_s17 + $0x50] sm:$0xff]  ;;  %v158_v39 = vld [vmem:[%s1048_s17 + $0x58] sm:$0xff] }
  0x12   : > { %v416_v20 = vadd.f32 %v1053_v1, %v283_v11  ;;  %v417_v21 = vadd.f32 %v1053_v1, %v284_v12  ;;  %v418_v22 = vadd.f32 %v1053_v1, %v285_v13  ;;  %v287_v23 = vmul.f32 %v1041_v0, %v154_v15  ;;  %v159_v40 = vld [vmem:[%s1048_s17 + $0x60] sm:$0xff]  ;;  %v160_v41 = vld [vmem:[%s1048_s17 + $0x68] sm:$0xff]  ;;  %v161_v46 = vld [vmem:[%s1048_s17 + $0x70] sm:$0xff] }
  0x13   : > { %v541_v27 = vmul.f32 0.01, %v413_v16  ;;  %v542_v28 = vmul.f32 0.01, %v414_v17  ;;  %v543_v29 = vmul.f32 0.01, %v415_v18  ;;  %v419_v30 = vadd.f32 %v1053_v1, %v286_v19 }
  0x14   : > { %v544_v31 = vmul.f32 0.01, %v416_v20  ;;  %v545_v32 = vmul.f32 0.01, %v417_v21  ;;  %v546_v33 = vmul.f32 0.01, %v418_v22  ;;  %v420_v34 = vadd.f32 %v1053_v1, %v287_v23 }
  0x15   : > { %v669_v35 = vmax.f32 %v413_v16, %v541_v27  ;;  %v670_v36 = vmax.f32 %v414_v17, %v542_v28  ;;  %v671_v37 = vmax.f32 %v415_v18, %v543_v29  ;;  %v547_v38 = vmul.f32 0.01, %v419_v30  ;;  %v162_v51 = vld [vmem:[%s1048_s17 + $0x78] sm:$0xff]  ;;  %v163_v2 = vld [vmem:[%s1048_s17 + $0x80] sm:$0xff]  ;;  %v164_v3 = vld [vmem:[%s1048_s17 + $0x88] sm:$0xff] }
  0x16   : > { %v672_v42 = vmax.f32 %v416_v20, %v544_v31  ;;  %v673_v43 = vmax.f32 %v417_v21, %v545_v32  ;;  %v674_v44 = vmax.f32 %v418_v22, %v546_v33  ;;  %v548_v45 = vmul.f32 0.01, %v420_v34  ;;  %v165_v4 = vld [vmem:[%s1048_s17 + $0x90] sm:$0xff]  ;;  %v166_v17 = vld [vmem:[%s1048_s17 + $0x98] sm:$0xff]  ;;  %v167_v18 = vld [vmem:[%s1048_s17 + $0xa0] sm:$0xff] }
  0x17   : > { %797 = vst [vmem:[%s1086_s22] sm:$0xff] %v669_v35  ;;  %798 = vst [vmem:[%s1086_s22 + $0x8] sm:$0xff] %v670_v36  ;;  %v675_v47 = vmax.f32 %v419_v30, %v547_v38  ;;  %v288_v48 = vmul.f32 %v1041_v0, %v155_v24  ;;  %v289_v49 = vmul.f32 %v1041_v0, %v156_v25  ;;  %v168_v19 = vld [vmem:[%s1048_s17 + $0xa8] sm:$0xff]  ;;  %v169_v24 = vld [vmem:[%s1048_s17 + $0xb0] sm:$0xff] }
  0x18   : > { %799 = vst [vmem:[%s1086_s22 + $0x10] sm:$0xff] %v671_v37  ;;  %v290_v50 = vmul.f32 %v1041_v0, %v157_v26  ;;  %800 = vst [vmem:[%s1086_s22 + $0x18] sm:$0xff] %v672_v42  ;;  %v676_v52 = vmax.f32 %v420_v34, %v548_v45  ;;  %v291_v53 = vmul.f32 %v1041_v0, %v158_v39  ;;  %v170_v29 = vld [vmem:[%s1048_s17 + $0xb8] sm:$0xff]  ;;  %v171_v42 = vld [vmem:[%s1048_s17 + $0xc0] sm:$0xff] }
  0x19   : > { %801 = vst [vmem:[%s1086_s22 + $0x20] sm:$0xff] %v673_v43  ;;  %802 = vst [vmem:[%s1086_s22 + $0x28] sm:$0xff] %v674_v44  ;;  %v292_v54 = vmul.f32 %v1041_v0, %v159_v40  ;;  %v293_v55 = vmul.f32 %v1041_v0, %v160_v41  ;;  %v421_v56 = vadd.f32 %v1053_v1, %v288_v48  ;;  %v172_v43 = vld [vmem:[%s1048_s17 + $0xc8] sm:$0xff]  ;;  %v173_v44 = vld [vmem:[%s1048_s17 + $0xd0] sm:$0xff] }
  0x1a   : > { %803 = vst [vmem:[%s1086_s22 + $0x30] sm:$0xff] %v675_v47  ;;  %v422_v57 = vadd.f32 %v1053_v1, %v289_v49  ;;  %v423_v58 = vadd.f32 %v1053_v1, %v290_v50  ;;  %v294_v59 = vmul.f32 %v1041_v0, %v161_v46  ;;  %804 = vst [vmem:[%s1086_s22 + $0x38] sm:$0xff] %v676_v52 }
  0x1b   : > { %v424_v60 = vadd.f32 %v1053_v1, %v291_v53  ;;  %v425_v61 = vadd.f32 %v1053_v1, %v292_v54  ;;  %v426_v62 = vadd.f32 %v1053_v1, %v293_v55  ;;  %v295_v63 = vmul.f32 %v1041_v0, %v162_v51 }
  0x1c   : > { %v549_v5 = vmul.f32 0.01, %v421_v56  ;;  %v550_v6 = vmul.f32 0.01, %v422_v57  ;;  %v551_v7 = vmul.f32 0.01, %v423_v58  ;;  %v427_v8 = vadd.f32 %v1053_v1, %v294_v59 }
  0x1d   : > { %v552_v9 = vmul.f32 0.01, %v424_v60  ;;  %v553_v10 = vmul.f32 0.01, %v425_v61  ;;  %v554_v11 = vmul.f32 0.01, %v426_v62  ;;  %v428_v12 = vadd.f32 %v1053_v1, %v295_v63 }
  0x1e   : > { %v677_v13 = vmax.f32 %v421_v56, %v549_v5  ;;  %v678_v14 = vmax.f32 %v422_v57, %v550_v6  ;;  %v679_v15 = vmax.f32 %v423_v58, %v551_v7  ;;  %v555_v16 = vmul.f32 0.01, %v427_v8  ;;  %v174_v57 = vld [vmem:[%s1048_s17 + $0xd8] sm:$0xff]  ;;  %v175_v58 = vld [vmem:[%s1048_s17 + $0xe0] sm:$0xff]  ;;  %v176_v59 = vld [vmem:[%s1048_s17 + $0xe8] sm:$0xff] }
  0x1f   : > { %v680_v20 = vmax.f32 %v424_v60, %v552_v9  ;;  %v681_v21 = vmax.f32 %v425_v61, %v553_v10  ;;  %v682_v22 = vmax.f32 %v426_v62, %v554_v11  ;;  %v556_v23 = vmul.f32 0.01, %v428_v12  ;;  %v178_v7 = vld [vmem:[%s1048_s17 + $0xf8] sm:$0xff] }
  0x20   : > { %805 = vst [vmem:[%s1086_s22 + $0x40] sm:$0xff] %v677_v13  ;;  %806 = vst [vmem:[%s1086_s22 + $0x48] sm:$0xff] %v678_v14  ;;  %v683_v25 = vmax.f32 %v427_v8, %v555_v16  ;;  %v296_v26 = vmul.f32 %v1041_v0, %v163_v2  ;;  %v297_v27 = vmul.f32 %v1041_v0, %v164_v3  ;;  %v177_v2 = vld [vmem:[%s1048_s17 + $0xf0] sm:$0xff] }
  0x21   : > { %807 = vst [vmem:[%s1086_s22 + $0x50] sm:$0xff] %v679_v15  ;;  %v298_v28 = vmul.f32 %v1041_v0, %v165_v4  ;;  %808 = vst [vmem:[%s1086_s22 + $0x58] sm:$0xff] %v680_v20  ;;  %v684_v30 = vmax.f32 %v428_v12, %v556_v23  ;;  %v299_v31 = vmul.f32 %v1041_v0, %v166_v17  ;;  %v179_v20 = vld [vmem:[%s1048_s17 + $0x100] sm:$0xff] }
  0x22   : > { %809 = vst [vmem:[%s1086_s22 + $0x60] sm:$0xff] %v681_v21  ;;  %810 = vst [vmem:[%s1086_s22 + $0x68] sm:$0xff] %v682_v22  ;;  %v300_v32 = vmul.f32 %v1041_v0, %v167_v18  ;;  %v301_v33 = vmul.f32 %v1041_v0, %v168_v19  ;;  %v429_v34 = vadd.f32 %v1053_v1, %v296_v26  ;;  %v180_v21 = vld [vmem:[%s1048_s17 + $0x108] sm:$0xff]  ;;  %v181_v22 = vld [vmem:[%s1048_s17 + $0x110] sm:$0xff] }
  0x23   : > { %811 = vst [vmem:[%s1086_s22 + $0x70] sm:$0xff] %v683_v25  ;;  %v430_v35 = vadd.f32 %v1053_v1, %v297_v27  ;;  %v431_v36 = vadd.f32 %v1053_v1, %v298_v28  ;;  %v302_v37 = vmul.f32 %v1041_v0, %v169_v24  ;;  %812 = vst [vmem:[%s1086_s22 + $0x78] sm:$0xff] %v684_v30 }
  0x24   : > { %v432_v38 = vadd.f32 %v1053_v1, %v299_v31  ;;  %v433_v39 = vadd.f32 %v1053_v1, %v300_v32  ;;  %v434_v40 = vadd.f32 %v1053_v1, %v301_v33  ;;  %v303_v41 = vmul.f32 %v1041_v0, %v170_v29 }
  0x25   : > { %v557_v45 = vmul.f32 0.01, %v429_v34  ;;  %v558_v46 = vmul.f32 0.01, %v430_v35  ;;  %v559_v47 = vmul.f32 0.01, %v431_v36  ;;  %v435_v48 = vadd.f32 %v1053_v1, %v302_v37 }
  0x26   : > { %v560_v49 = vmul.f32 0.01, %v432_v38  ;;  %v561_v50 = vmul.f32 0.01, %v433_v39  ;;  %v562_v51 = vmul.f32 0.01, %v434_v40  ;;  %v436_v52 = vadd.f32 %v1053_v1, %v303_v41 }
  0x27   : > { %v685_v53 = vmax.f32 %v429_v34, %v557_v45  ;;  %v686_v54 = vmax.f32 %v430_v35, %v558_v46  ;;  %v687_v55 = vmax.f32 %v431_v36, %v559_v47  ;;  %v563_v56 = vmul.f32 0.01, %v435_v48  ;;  %v182_v35 = vld [vmem:[%s1048_s17 + $0x118] sm:$0xff]  ;;  %v183_v36 = vld [vmem:[%s1048_s17 + $0x120] sm:$0xff]  ;;  %v184_v37 = vld [vmem:[%s1048_s17 + $0x128] sm:$0xff] }
  0x28   : > { %v688_v60 = vmax.f32 %v432_v38, %v560_v49  ;;  %v689_v61 = vmax.f32 %v433_v39, %v561_v50  ;;  %v690_v62 = vmax.f32 %v434_v40, %v562_v51  ;;  %v564_v63 = vmul.f32 0.01, %v436_v52  ;;  %v186_v47 = vld [vmem:[%s1048_s17 + $0x138] sm:$0xff] }
  0x29   : > { %813 = vst [vmem:[%s1086_s22 + $0x80] sm:$0xff] %v685_v53  ;;  %814 = vst [vmem:[%s1086_s22 + $0x88] sm:$0xff] %v686_v54  ;;  %v691_v3 = vmax.f32 %v435_v48, %v563_v56  ;;  %v304_v4 = vmul.f32 %v1041_v0, %v171_v42  ;;  %v305_v5 = vmul.f32 %v1041_v0, %v172_v43  ;;  %v185_v42 = vld [vmem:[%s1048_s17 + $0x130] sm:$0xff] }
  0x2a   : > { %815 = vst [vmem:[%s1086_s22 + $0x90] sm:$0xff] %v687_v55  ;;  %v306_v6 = vmul.f32 %v1041_v0, %v173_v44  ;;  %816 = vst [vmem:[%s1086_s22 + $0x98] sm:$0xff] %v688_v60  ;;  %v692_v8 = vmax.f32 %v436_v52, %v564_v63  ;;  %v307_v9 = vmul.f32 %v1041_v0, %v174_v57  ;;  %v187_v60 = vld [vmem:[%s1048_s17 + $0x140] sm:$0xff] }
  0x2b   : > { %817 = vst [vmem:[%s1086_s22 + $0xa0] sm:$0xff] %v689_v61  ;;  %818 = vst [vmem:[%s1086_s22 + $0xa8] sm:$0xff] %v690_v62  ;;  %v308_v10 = vmul.f32 %v1041_v0, %v175_v58  ;;  %v309_v11 = vmul.f32 %v1041_v0, %v176_v59  ;;  %v437_v12 = vadd.f32 %v1053_v1, %v304_v4  ;;  %v188_v61 = vld [vmem:[%s1048_s17 + $0x148] sm:$0xff]  ;;  %v189_v62 = vld [vmem:[%s1048_s17 + $0x150] sm:$0xff] }
  0x2c   : > { %819 = vst [vmem:[%s1086_s22 + $0xb0] sm:$0xff] %v691_v3  ;;  %v438_v13 = vadd.f32 %v1053_v1, %v305_v5  ;;  %v439_v14 = vadd.f32 %v1053_v1, %v306_v6  ;;  %v310_v15 = vmul.f32 %v1041_v0, %v177_v2  ;;  %820 = vst [vmem:[%s1086_s22 + $0xb8] sm:$0xff] %v692_v8 }
  0x2d   : > { %v440_v16 = vadd.f32 %v1053_v1, %v307_v9  ;;  %v441_v17 = vadd.f32 %v1053_v1, %v308_v10  ;;  %v442_v18 = vadd.f32 %v1053_v1, %v309_v11  ;;  %v311_v19 = vmul.f32 %v1041_v0, %v178_v7 }
  0x2e   : > { %v565_v23 = vmul.f32 0.01, %v437_v12  ;;  %v566_v24 = vmul.f32 0.01, %v438_v13  ;;  %v567_v25 = vmul.f32 0.01, %v439_v14  ;;  %v443_v26 = vadd.f32 %v1053_v1, %v310_v15 }
  0x2f   : > { %v568_v27 = vmul.f32 0.01, %v440_v16  ;;  %v569_v28 = vmul.f32 0.01, %v441_v17  ;;  %v570_v29 = vmul.f32 0.01, %v442_v18  ;;  %v444_v30 = vadd.f32 %v1053_v1, %v311_v19 }
  0x30   : > { %v693_v31 = vmax.f32 %v437_v12, %v565_v23  ;;  %v694_v32 = vmax.f32 %v438_v13, %v566_v24  ;;  %v695_v33 = vmax.f32 %v439_v14, %v567_v25  ;;  %v571_v34 = vmul.f32 0.01, %v443_v26  ;;  %v190_v13 = vld [vmem:[%s1048_s17 + $0x158] sm:$0xff]  ;;  %v191_v14 = vld [vmem:[%s1048_s17 + $0x160] sm:$0xff]  ;;  %v192_v15 = vld [vmem:[%s1048_s17 + $0x168] sm:$0xff] }
  0x31   : > { %v696_v38 = vmax.f32 %v440_v16, %v568_v27  ;;  %v697_v39 = vmax.f32 %v441_v17, %v569_v28  ;;  %v698_v40 = vmax.f32 %v442_v18, %v570_v29  ;;  %v572_v41 = vmul.f32 0.01, %v444_v30  ;;  %v194_v25 = vld [vmem:[%s1048_s17 + $0x178] sm:$0xff] }
  0x32   : > { %821 = vst [vmem:[%s1086_s22 + $0xc0] sm:$0xff] %v693_v31  ;;  %822 = vst [vmem:[%s1086_s22 + $0xc8] sm:$0xff] %v694_v32  ;;  %v699_v43 = vmax.f32 %v443_v26, %v571_v34  ;;  %v312_v44 = vmul.f32 %v1041_v0, %v179_v20  ;;  %v313_v45 = vmul.f32 %v1041_v0, %v180_v21  ;;  %v193_v20 = vld [vmem:[%s1048_s17 + $0x170] sm:$0xff] }
  0x33   : > { %823 = vst [vmem:[%s1086_s22 + $0xd0] sm:$0xff] %v695_v33  ;;  %v314_v46 = vmul.f32 %v1041_v0, %v181_v22  ;;  %824 = vst [vmem:[%s1086_s22 + $0xd8] sm:$0xff] %v696_v38  ;;  %v700_v48 = vmax.f32 %v444_v30, %v572_v41  ;;  %v315_v49 = vmul.f32 %v1041_v0, %v182_v35  ;;  %v195_v38 = vld [vmem:[%s1048_s17 + $0x180] sm:$0xff] }
  0x34   : > { %825 = vst [vmem:[%s1086_s22 + $0xe0] sm:$0xff] %v697_v39  ;;  %826 = vst [vmem:[%s1086_s22 + $0xe8] sm:$0xff] %v698_v40  ;;  %v316_v50 = vmul.f32 %v1041_v0, %v183_v36  ;;  %v317_v51 = vmul.f32 %v1041_v0, %v184_v37  ;;  %v445_v52 = vadd.f32 %v1053_v1, %v312_v44  ;;  %v196_v39 = vld [vmem:[%s1048_s17 + $0x188] sm:$0xff]  ;;  %v197_v40 = vld [vmem:[%s1048_s17 + $0x190] sm:$0xff] }
  0x35   : > { %827 = vst [vmem:[%s1086_s22 + $0xf0] sm:$0xff] %v699_v43  ;;  %v446_v53 = vadd.f32 %v1053_v1, %v313_v45  ;;  %v447_v54 = vadd.f32 %v1053_v1, %v314_v46  ;;  %v318_v55 = vmul.f32 %v1041_v0, %v185_v42  ;;  %828 = vst [vmem:[%s1086_s22 + $0xf8] sm:$0xff] %v700_v48 }
  0x36   : > { %v448_v56 = vadd.f32 %v1053_v1, %v315_v49  ;;  %v449_v57 = vadd.f32 %v1053_v1, %v316_v50  ;;  %v450_v58 = vadd.f32 %v1053_v1, %v317_v51  ;;  %v319_v59 = vmul.f32 %v1041_v0, %v186_v47 }
  0x37   : > { %v573_v63 = vmul.f32 0.01, %v445_v52  ;;  %v574_v2 = vmul.f32 0.01, %v446_v53  ;;  %v575_v3 = vmul.f32 0.01, %v447_v54  ;;  %v451_v4 = vadd.f32 %v1053_v1, %v318_v55 }
  0x38   : > { %v576_v5 = vmul.f32 0.01, %v448_v56  ;;  %v577_v6 = vmul.f32 0.01, %v449_v57  ;;  %v578_v7 = vmul.f32 0.01, %v450_v58  ;;  %v452_v8 = vadd.f32 %v1053_v1, %v319_v59 }
  0x39   : > { %v701_v9 = vmax.f32 %v445_v52, %v573_v63  ;;  %v702_v10 = vmax.f32 %v446_v53, %v574_v2  ;;  %v703_v11 = vmax.f32 %v447_v54, %v575_v3  ;;  %v579_v12 = vmul.f32 0.01, %v451_v4  ;;  %v198_v53 = vld [vmem:[%s1048_s17 + $0x198] sm:$0xff]  ;;  %v199_v54 = vld [vmem:[%s1048_s17 + $0x1a0] sm:$0xff]  ;;  %v200_v55 = vld [vmem:[%s1048_s17 + $0x1a8] sm:$0xff] }
  0x3a   : > { %v704_v16 = vmax.f32 %v448_v56, %v576_v5  ;;  %v705_v17 = vmax.f32 %v449_v57, %v577_v6  ;;  %v706_v18 = vmax.f32 %v450_v58, %v578_v7  ;;  %v580_v19 = vmul.f32 0.01, %v452_v8  ;;  %v202_v3 = vld [vmem:[%s1048_s17 + $0x1b8] sm:$0xff] }
  0x3b   : > { %829 = vst [vmem:[%s1086_s22 + $0x100] sm:$0xff] %v701_v9  ;;  %830 = vst [vmem:[%s1086_s22 + $0x108] sm:$0xff] %v702_v10  ;;  %v707_v21 = vmax.f32 %v451_v4, %v579_v12  ;;  %v320_v22 = vmul.f32 %v1041_v0, %v187_v60  ;;  %v321_v23 = vmul.f32 %v1041_v0, %v188_v61  ;;  %v201_v60 = vld [vmem:[%s1048_s17 + $0x1b0] sm:$0xff] }
  0x3c   : > { %831 = vst [vmem:[%s1086_s22 + $0x110] sm:$0xff] %v703_v11  ;;  %v322_v24 = vmul.f32 %v1041_v0, %v189_v62  ;;  %832 = vst [vmem:[%s1086_s22 + $0x118] sm:$0xff] %v704_v16  ;;  %v708_v26 = vmax.f32 %v452_v8, %v580_v19  ;;  %v323_v27 = vmul.f32 %v1041_v0, %v190_v13  ;;  %v203_v16 = vld [vmem:[%s1048_s17 + $0x1c0] sm:$0xff] }
  0x3d   : > { %833 = vst [vmem:[%s1086_s22 + $0x120] sm:$0xff] %v705_v17  ;;  %834 = vst [vmem:[%s1086_s22 + $0x128] sm:$0xff] %v706_v18  ;;  %v324_v28 = vmul.f32 %v1041_v0, %v191_v14  ;;  %v325_v29 = vmul.f32 %v1041_v0, %v192_v15  ;;  %v453_v30 = vadd.f32 %v1053_v1, %v320_v22  ;;  %v204_v17 = vld [vmem:[%s1048_s17 + $0x1c8] sm:$0xff]  ;;  %v205_v18 = vld [vmem:[%s1048_s17 + $0x1d0] sm:$0xff] }
  0x3e   : > { %835 = vst [vmem:[%s1086_s22 + $0x130] sm:$0xff] %v707_v21  ;;  %v454_v31 = vadd.f32 %v1053_v1, %v321_v23  ;;  %v455_v32 = vadd.f32 %v1053_v1, %v322_v24  ;;  %v326_v33 = vmul.f32 %v1041_v0, %v193_v20  ;;  %836 = vst [vmem:[%s1086_s22 + $0x138] sm:$0xff] %v708_v26 }
  0x3f   : > { %v456_v34 = vadd.f32 %v1053_v1, %v323_v27  ;;  %v457_v35 = vadd.f32 %v1053_v1, %v324_v28  ;;  %v458_v36 = vadd.f32 %v1053_v1, %v325_v29  ;;  %v327_v37 = vmul.f32 %v1041_v0, %v194_v25 }
  0x40   : > { %v581_v41 = vmul.f32 0.01, %v453_v30  ;;  %v582_v42 = vmul.f32 0.01, %v454_v31  ;;  %v583_v43 = vmul.f32 0.01, %v455_v32  ;;  %v459_v44 = vadd.f32 %v1053_v1, %v326_v33 }
  0x41   : > { %v584_v45 = vmul.f32 0.01, %v456_v34  ;;  %v585_v46 = vmul.f32 0.01, %v457_v35  ;;  %v586_v47 = vmul.f32 0.01, %v458_v36  ;;  %v460_v48 = vadd.f32 %v1053_v1, %v327_v37 }
  0x42   : > { %v709_v49 = vmax.f32 %v453_v30, %v581_v41  ;;  %v710_v50 = vmax.f32 %v454_v31, %v582_v42  ;;  %v711_v51 = vmax.f32 %v455_v32, %v583_v43  ;;  %v587_v52 = vmul.f32 0.01, %v459_v44  ;;  %v206_v31 = vld [vmem:[%s1048_s17 + $0x1d8] sm:$0xff]  ;;  %v207_v32 = vld [vmem:[%s1048_s17 + $0x1e0] sm:$0xff]  ;;  %v208_v33 = vld [vmem:[%s1048_s17 + $0x1e8] sm:$0xff] }
  0x43   : > { %v712_v56 = vmax.f32 %v456_v34, %v584_v45  ;;  %v713_v57 = vmax.f32 %v457_v35, %v585_v46  ;;  %v714_v58 = vmax.f32 %v458_v36, %v586_v47  ;;  %v588_v59 = vmul.f32 0.01, %v460_v48  ;;  %v210_v43 = vld [vmem:[%s1048_s17 + $0x1f8] sm:$0xff] }
  0x44   : > { %837 = vst [vmem:[%s1086_s22 + $0x140] sm:$0xff] %v709_v49  ;;  %838 = vst [vmem:[%s1086_s22 + $0x148] sm:$0xff] %v710_v50  ;;  %v715_v61 = vmax.f32 %v459_v44, %v587_v52  ;;  %v328_v62 = vmul.f32 %v1041_v0, %v195_v38  ;;  %v329_v63 = vmul.f32 %v1041_v0, %v196_v39  ;;  %v209_v38 = vld [vmem:[%s1048_s17 + $0x1f0] sm:$0xff] }
  0x45   : > { %839 = vst [vmem:[%s1086_s22 + $0x150] sm:$0xff] %v711_v51  ;;  %v330_v2 = vmul.f32 %v1041_v0, %v197_v40  ;;  %840 = vst [vmem:[%s1086_s22 + $0x158] sm:$0xff] %v712_v56  ;;  %v716_v4 = vmax.f32 %v460_v48, %v588_v59  ;;  %v331_v5 = vmul.f32 %v1041_v0, %v198_v53  ;;  %v211_v56 = vld [vmem:[%s1048_s17 + $0x200] sm:$0xff] }
  0x46   : > { %841 = vst [vmem:[%s1086_s22 + $0x160] sm:$0xff] %v713_v57  ;;  %842 = vst [vmem:[%s1086_s22 + $0x168] sm:$0xff] %v714_v58  ;;  %v332_v6 = vmul.f32 %v1041_v0, %v199_v54  ;;  %v333_v7 = vmul.f32 %v1041_v0, %v200_v55  ;;  %v461_v8 = vadd.f32 %v1053_v1, %v328_v62  ;;  %v212_v57 = vld [vmem:[%s1048_s17 + $0x208] sm:$0xff]  ;;  %v213_v58 = vld [vmem:[%s1048_s17 + $0x210] sm:$0xff] }
  0x47   : > { %843 = vst [vmem:[%s1086_s22 + $0x170] sm:$0xff] %v715_v61  ;;  %v462_v9 = vadd.f32 %v1053_v1, %v329_v63  ;;  %v463_v10 = vadd.f32 %v1053_v1, %v330_v2  ;;  %v334_v11 = vmul.f32 %v1041_v0, %v201_v60  ;;  %844 = vst [vmem:[%s1086_s22 + $0x178] sm:$0xff] %v716_v4 }
  0x48   : > { %v464_v12 = vadd.f32 %v1053_v1, %v331_v5  ;;  %v465_v13 = vadd.f32 %v1053_v1, %v332_v6  ;;  %v466_v14 = vadd.f32 %v1053_v1, %v333_v7  ;;  %v335_v15 = vmul.f32 %v1041_v0, %v202_v3 }
  0x49   : > { %v589_v19 = vmul.f32 0.01, %v461_v8  ;;  %v590_v20 = vmul.f32 0.01, %v462_v9  ;;  %v591_v21 = vmul.f32 0.01, %v463_v10  ;;  %v467_v22 = vadd.f32 %v1053_v1, %v334_v11 }
  0x4a   : > { %v592_v23 = vmul.f32 0.01, %v464_v12  ;;  %v593_v24 = vmul.f32 0.01, %v465_v13  ;;  %v594_v25 = vmul.f32 0.01, %v466_v14  ;;  %v468_v26 = vadd.f32 %v1053_v1, %v335_v15 }
  0x4b   : > { %v717_v27 = vmax.f32 %v461_v8, %v589_v19  ;;  %v718_v28 = vmax.f32 %v462_v9, %v590_v20  ;;  %v719_v29 = vmax.f32 %v463_v10, %v591_v21  ;;  %v595_v30 = vmul.f32 0.01, %v467_v22  ;;  %v214_v9 = vld [vmem:[%s1048_s17 + $0x218] sm:$0xff]  ;;  %v215_v10 = vld [vmem:[%s1048_s17 + $0x220] sm:$0xff]  ;;  %v216_v11 = vld [vmem:[%s1048_s17 + $0x228] sm:$0xff] }
  0x4c   : > { %v720_v34 = vmax.f32 %v464_v12, %v592_v23  ;;  %v721_v35 = vmax.f32 %v465_v13, %v593_v24  ;;  %v722_v36 = vmax.f32 %v466_v14, %v594_v25  ;;  %v596_v37 = vmul.f32 0.01, %v468_v26  ;;  %v218_v21 = vld [vmem:[%s1048_s17 + $0x238] sm:$0xff] }
  0x4d   : > { %845 = vst [vmem:[%s1086_s22 + $0x180] sm:$0xff] %v717_v27  ;;  %846 = vst [vmem:[%s1086_s22 + $0x188] sm:$0xff] %v718_v28  ;;  %v723_v39 = vmax.f32 %v467_v22, %v595_v30  ;;  %v336_v40 = vmul.f32 %v1041_v0, %v203_v16  ;;  %v337_v41 = vmul.f32 %v1041_v0, %v204_v17  ;;  %v217_v16 = vld [vmem:[%s1048_s17 + $0x230] sm:$0xff] }
  0x4e   : > { %847 = vst [vmem:[%s1086_s22 + $0x190] sm:$0xff] %v719_v29  ;;  %v338_v42 = vmul.f32 %v1041_v0, %v205_v18  ;;  %848 = vst [vmem:[%s1086_s22 + $0x198] sm:$0xff] %v720_v34  ;;  %v724_v44 = vmax.f32 %v468_v26, %v596_v37  ;;  %v339_v45 = vmul.f32 %v1041_v0, %v206_v31  ;;  %v219_v34 = vld [vmem:[%s1048_s17 + $0x240] sm:$0xff] }
  0x4f   : > { %849 = vst [vmem:[%s1086_s22 + $0x1a0] sm:$0xff] %v721_v35  ;;  %850 = vst [vmem:[%s1086_s22 + $0x1a8] sm:$0xff] %v722_v36  ;;  %v340_v46 = vmul.f32 %v1041_v0, %v207_v32  ;;  %v341_v47 = vmul.f32 %v1041_v0, %v208_v33  ;;  %v469_v48 = vadd.f32 %v1053_v1, %v336_v40  ;;  %v220_v35 = vld [vmem:[%s1048_s17 + $0x248] sm:$0xff]  ;;  %v221_v36 = vld [vmem:[%s1048_s17 + $0x250] sm:$0xff] }
  0x50   : > { %851 = vst [vmem:[%s1086_s22 + $0x1b0] sm:$0xff] %v723_v39  ;;  %v470_v49 = vadd.f32 %v1053_v1, %v337_v41  ;;  %v471_v50 = vadd.f32 %v1053_v1, %v338_v42  ;;  %v342_v51 = vmul.f32 %v1041_v0, %v209_v38  ;;  %852 = vst [vmem:[%s1086_s22 + $0x1b8] sm:$0xff] %v724_v44 }
  0x51   : > { %v472_v52 = vadd.f32 %v1053_v1, %v339_v45  ;;  %v473_v53 = vadd.f32 %v1053_v1, %v340_v46  ;;  %v474_v54 = vadd.f32 %v1053_v1, %v341_v47  ;;  %v343_v55 = vmul.f32 %v1041_v0, %v210_v43 }
  0x52   : > { %v597_v59 = vmul.f32 0.01, %v469_v48  ;;  %v598_v60 = vmul.f32 0.01, %v470_v49  ;;  %v599_v61 = vmul.f32 0.01, %v471_v50  ;;  %v475_v62 = vadd.f32 %v1053_v1, %v342_v51 }
  0x53   : > { %v600_v63 = vmul.f32 0.01, %v472_v52  ;;  %v601_v2 = vmul.f32 0.01, %v473_v53  ;;  %v602_v3 = vmul.f32 0.01, %v474_v54  ;;  %v476_v4 = vadd.f32 %v1053_v1, %v343_v55 }
  0x54   : > { %v725_v5 = vmax.f32 %v469_v48, %v597_v59  ;;  %v726_v6 = vmax.f32 %v470_v49, %v598_v60  ;;  %v727_v7 = vmax.f32 %v471_v50, %v599_v61  ;;  %v603_v8 = vmul.f32 0.01, %v475_v62  ;;  %v222_v49 = vld [vmem:[%s1048_s17 + $0x258] sm:$0xff]  ;;  %v223_v50 = vld [vmem:[%s1048_s17 + $0x260] sm:$0xff]  ;;  %v224_v51 = vld [vmem:[%s1048_s17 + $0x268] sm:$0xff] }
  0x55   : > { %v728_v12 = vmax.f32 %v472_v52, %v600_v63  ;;  %v729_v13 = vmax.f32 %v473_v53, %v601_v2  ;;  %v730_v14 = vmax.f32 %v474_v54, %v602_v3  ;;  %v604_v15 = vmul.f32 0.01, %v476_v4  ;;  %v226_v61 = vld [vmem:[%s1048_s17 + $0x278] sm:$0xff] }
  0x56   : > { %853 = vst [vmem:[%s1086_s22 + $0x1c0] sm:$0xff] %v725_v5  ;;  %854 = vst [vmem:[%s1086_s22 + $0x1c8] sm:$0xff] %v726_v6  ;;  %v731_v17 = vmax.f32 %v475_v62, %v603_v8  ;;  %v344_v18 = vmul.f32 %v1041_v0, %v211_v56  ;;  %v345_v19 = vmul.f32 %v1041_v0, %v212_v57  ;;  %v225_v56 = vld [vmem:[%s1048_s17 + $0x270] sm:$0xff] }
  0x57   : > { %855 = vst [vmem:[%s1086_s22 + $0x1d0] sm:$0xff] %v727_v7  ;;  %v346_v20 = vmul.f32 %v1041_v0, %v213_v58  ;;  %856 = vst [vmem:[%s1086_s22 + $0x1d8] sm:$0xff] %v728_v12  ;;  %v732_v22 = vmax.f32 %v476_v4, %v604_v15  ;;  %v347_v23 = vmul.f32 %v1041_v0, %v214_v9  ;;  %v227_v12 = vld [vmem:[%s1048_s17 + $0x280] sm:$0xff] }
  0x58   : > { %857 = vst [vmem:[%s1086_s22 + $0x1e0] sm:$0xff] %v729_v13  ;;  %858 = vst [vmem:[%s1086_s22 + $0x1e8] sm:$0xff] %v730_v14  ;;  %v348_v24 = vmul.f32 %v1041_v0, %v215_v10  ;;  %v349_v25 = vmul.f32 %v1041_v0, %v216_v11  ;;  %v477_v26 = vadd.f32 %v1053_v1, %v344_v18  ;;  %v228_v13 = vld [vmem:[%s1048_s17 + $0x288] sm:$0xff]  ;;  %v229_v14 = vld [vmem:[%s1048_s17 + $0x290] sm:$0xff] }
  0x59   : > { %859 = vst [vmem:[%s1086_s22 + $0x1f0] sm:$0xff] %v731_v17  ;;  %v478_v27 = vadd.f32 %v1053_v1, %v345_v19  ;;  %v479_v28 = vadd.f32 %v1053_v1, %v346_v20  ;;  %v350_v29 = vmul.f32 %v1041_v0, %v217_v16  ;;  %860 = vst [vmem:[%s1086_s22 + $0x1f8] sm:$0xff] %v732_v22 }
  0x5a   : > { %v480_v30 = vadd.f32 %v1053_v1, %v347_v23  ;;  %v481_v31 = vadd.f32 %v1053_v1, %v348_v24  ;;  %v482_v32 = vadd.f32 %v1053_v1, %v349_v25  ;;  %v351_v33 = vmul.f32 %v1041_v0, %v218_v21 }
  0x5b   : > { %v605_v37 = vmul.f32 0.01, %v477_v26  ;;  %v606_v38 = vmul.f32 0.01, %v478_v27  ;;  %v607_v39 = vmul.f32 0.01, %v479_v28  ;;  %v483_v40 = vadd.f32 %v1053_v1, %v350_v29 }
  0x5c   : > { %v608_v41 = vmul.f32 0.01, %v480_v30  ;;  %v609_v42 = vmul.f32 0.01, %v481_v31  ;;  %v610_v43 = vmul.f32 0.01, %v482_v32  ;;  %v484_v44 = vadd.f32 %v1053_v1, %v351_v33 }
  0x5d   : > { %v733_v45 = vmax.f32 %v477_v26, %v605_v37  ;;  %v734_v46 = vmax.f32 %v478_v27, %v606_v38  ;;  %v735_v47 = vmax.f32 %v479_v28, %v607_v39  ;;  %v611_v48 = vmul.f32 0.01, %v483_v40  ;;  %v230_v27 = vld [vmem:[%s1048_s17 + $0x298] sm:$0xff]  ;;  %v231_v28 = vld [vmem:[%s1048_s17 + $0x2a0] sm:$0xff]  ;;  %v232_v29 = vld [vmem:[%s1048_s17 + $0x2a8] sm:$0xff] }
  0x5e   : > { %v736_v52 = vmax.f32 %v480_v30, %v608_v41  ;;  %v737_v53 = vmax.f32 %v481_v31, %v609_v42  ;;  %v738_v54 = vmax.f32 %v482_v32, %v610_v43  ;;  %v612_v55 = vmul.f32 0.01, %v484_v44  ;;  %v234_v39 = vld [vmem:[%s1048_s17 + $0x2b8] sm:$0xff] }
  0x5f   : > { %861 = vst [vmem:[%s1086_s22 + $0x200] sm:$0xff] %v733_v45  ;;  %862 = vst [vmem:[%s1086_s22 + $0x208] sm:$0xff] %v734_v46  ;;  %v739_v57 = vmax.f32 %v483_v40, %v611_v48  ;;  %v352_v58 = vmul.f32 %v1041_v0, %v219_v34  ;;  %v353_v59 = vmul.f32 %v1041_v0, %v220_v35  ;;  %v233_v34 = vld [vmem:[%s1048_s17 + $0x2b0] sm:$0xff] }
  0x60   : > { %863 = vst [vmem:[%s1086_s22 + $0x210] sm:$0xff] %v735_v47  ;;  %v354_v60 = vmul.f32 %v1041_v0, %v221_v36  ;;  %864 = vst [vmem:[%s1086_s22 + $0x218] sm:$0xff] %v736_v52  ;;  %v740_v62 = vmax.f32 %v484_v44, %v612_v55  ;;  %v355_v63 = vmul.f32 %v1041_v0, %v222_v49  ;;  %v235_v52 = vld [vmem:[%s1048_s17 + $0x2c0] sm:$0xff] }
  0x61   : > { %865 = vst [vmem:[%s1086_s22 + $0x220] sm:$0xff] %v737_v53  ;;  %866 = vst [vmem:[%s1086_s22 + $0x228] sm:$0xff] %v738_v54  ;;  %v356_v2 = vmul.f32 %v1041_v0, %v223_v50  ;;  %v357_v3 = vmul.f32 %v1041_v0, %v224_v51  ;;  %v485_v4 = vadd.f32 %v1053_v1, %v352_v58  ;;  %v236_v53 = vld [vmem:[%s1048_s17 + $0x2c8] sm:$0xff]  ;;  %v237_v54 = vld [vmem:[%s1048_s17 + $0x2d0] sm:$0xff] }
  0x62   : > { %867 = vst [vmem:[%s1086_s22 + $0x230] sm:$0xff] %v739_v57  ;;  %v486_v5 = vadd.f32 %v1053_v1, %v353_v59  ;;  %v487_v6 = vadd.f32 %v1053_v1, %v354_v60  ;;  %v358_v7 = vmul.f32 %v1041_v0, %v225_v56  ;;  %868 = vst [vmem:[%s1086_s22 + $0x238] sm:$0xff] %v740_v62 }
  0x63   : > { %v488_v8 = vadd.f32 %v1053_v1, %v355_v63  ;;  %v489_v9 = vadd.f32 %v1053_v1, %v356_v2  ;;  %v490_v10 = vadd.f32 %v1053_v1, %v357_v3  ;;  %v359_v11 = vmul.f32 %v1041_v0, %v226_v61 }
  0x64   : > { %v613_v15 = vmul.f32 0.01, %v485_v4  ;;  %v614_v16 = vmul.f32 0.01, %v486_v5  ;;  %v615_v17 = vmul.f32 0.01, %v487_v6  ;;  %v491_v18 = vadd.f32 %v1053_v1, %v358_v7 }
  0x65   : > { %v616_v19 = vmul.f32 0.01, %v488_v8  ;;  %v617_v20 = vmul.f32 0.01, %v489_v9  ;;  %v618_v21 = vmul.f32 0.01, %v490_v10  ;;  %v492_v22 = vadd.f32 %v1053_v1, %v359_v11 }
  0x66   : > { %v741_v23 = vmax.f32 %v485_v4, %v613_v15  ;;  %v742_v24 = vmax.f32 %v486_v5, %v614_v16  ;;  %v743_v25 = vmax.f32 %v487_v6, %v615_v17  ;;  %v619_v26 = vmul.f32 0.01, %v491_v18  ;;  %v238_v5 = vld [vmem:[%s1048_s17 + $0x2d8] sm:$0xff]  ;;  %v240_v6 = vld [vmem:[%s1048_s17 + $0x2e8] sm:$0xff]  ;;  %v241_v11 = vld [vmem:[%s1048_s17 + $0x2f0] sm:$0xff] }
  0x67   : > { %v744_v30 = vmax.f32 %v488_v8, %v616_v19  ;;  %v745_v31 = vmax.f32 %v489_v9, %v617_v20  ;;  %v746_v32 = vmax.f32 %v490_v10, %v618_v21  ;;  %v620_v33 = vmul.f32 0.01, %v492_v22  ;;  %v242_v17 = vld [vmem:[%s1048_s17 + $0x2f8] sm:$0xff] }
  0x68   : > { %869 = vst [vmem:[%s1086_s22 + $0x240] sm:$0xff] %v741_v23  ;;  %870 = vst [vmem:[%s1086_s22 + $0x248] sm:$0xff] %v742_v24  ;;  %v747_v35 = vmax.f32 %v491_v18, %v619_v26  ;;  %v360_v36 = vmul.f32 %v1041_v0, %v227_v12  ;;  %v361_v37 = vmul.f32 %v1041_v0, %v228_v13  ;;  %v1424_v13 = vld [vmem:[%s1588_s1] ss:$0 sm:$0xff] }
  0x69   : > { %871 = vst [vmem:[%s1086_s22 + $0x250] sm:$0xff] %v743_v25  ;;  %v362_v38 = vmul.f32 %v1041_v0, %v229_v14  ;;  %872 = vst [vmem:[%s1086_s22 + $0x258] sm:$0xff] %v744_v30  ;;  %v748_v40 = vmax.f32 %v492_v22, %v620_v33  ;;  %v363_v41 = vmul.f32 %v1041_v0, %v230_v27  ;;  %v243_v30 = vld [vmem:[%s1048_s17 + $0x300] sm:$0xff] }
  0x6a   : > { %873 = vst [vmem:[%s1086_s22 + $0x260] sm:$0xff] %v745_v31  ;;  %874 = vst [vmem:[%s1086_s22 + $0x268] sm:$0xff] %v746_v32  ;;  %v364_v42 = vmul.f32 %v1041_v0, %v231_v28  ;;  %v365_v43 = vmul.f32 %v1041_v0, %v232_v29  ;;  %v493_v44 = vadd.f32 %v1053_v1, %v360_v36  ;;  %v244_v31 = vld [vmem:[%s1048_s17 + $0x308] sm:$0xff]  ;;  %v245_v32 = vld [vmem:[%s1048_s17 + $0x310] sm:$0xff] }
  0x6b   : > { %875 = vst [vmem:[%s1086_s22 + $0x270] sm:$0xff] %v747_v35  ;;  %v494_v45 = vadd.f32 %v1053_v1, %v361_v37  ;;  %v495_v46 = vadd.f32 %v1053_v1, %v362_v38  ;;  %v366_v47 = vmul.f32 %v1041_v0, %v233_v34  ;;  %876 = vst [vmem:[%s1086_s22 + $0x278] sm:$0xff] %v748_v40 }
  0x6c   : > { %v496_v48 = vadd.f32 %v1053_v1, %v363_v41  ;;  %v497_v49 = vadd.f32 %v1053_v1, %v364_v42  ;;  %v498_v50 = vadd.f32 %v1053_v1, %v365_v43  ;;  %v367_v51 = vmul.f32 %v1041_v0, %v234_v39  ;;  %v1411_v0 = vld [vmem:[%s1588_s1 + $0x1] ss:$0 sm:$0xff] }
  0x6d   : > { %v621_v55 = vmul.f32 0.01, %v493_v44  ;;  %v622_v56 = vmul.f32 0.01, %v494_v45  ;;  %v623_v57 = vmul.f32 0.01, %v495_v46  ;;  %v499_v58 = vadd.f32 %v1053_v1, %v366_v47 }
  0x6e   : > { %v624_v59 = vmul.f32 0.01, %v496_v48  ;;  %v625_v60 = vmul.f32 0.01, %v497_v49  ;;  %v626_v61 = vmul.f32 0.01, %v498_v50  ;;  %v500_v62 = vadd.f32 %v1411_v0, %v367_v51 }
  0x6f   : > { %v749_v63 = vmax.f32 %v493_v44, %v621_v55  ;;  %v750_v2 = vmax.f32 %v494_v45, %v622_v56  ;;  %v751_v3 = vmax.f32 %v495_v46, %v623_v57  ;;  %v627_v4 = vmul.f32 0.01, %v499_v58  ;;  %v239_v1 = vld [vmem:[%s1048_s17 + $0x2e0] sm:$0xff]  ;;  %v246_v45 = vld [vmem:[%s1048_s17 + $0x318] sm:$0xff]  ;;  %v248_v47 = vld [vmem:[%s1048_s17 + $0x328] sm:$0xff] }
  0x70   : > { %v752_v7 = vmax.f32 %v496_v48, %v624_v59  ;;  %v753_v8 = vmax.f32 %v497_v49, %v625_v60  ;;  %v754_v9 = vmax.f32 %v498_v50, %v626_v61  ;;  %v628_v10 = vmul.f32 0.01, %v500_v62  ;;  %v247_v46 = vld [vmem:[%s1048_s17 + $0x320] sm:$0xff]  ;;  %v250_v57 = vld [vmem:[%s1048_s17 + $0x338] sm:$0xff] }
  0x71   : > { %877 = vst [vmem:[%s1086_s22 + $0x280] sm:$0xff] %v749_v63  ;;  %878 = vst [vmem:[%s1086_s22 + $0x288] sm:$0xff] %v750_v2  ;;  %v755_v12 = vmax.f32 %v499_v58, %v627_v4  ;;  %v368_v14 = vmul.f32 %v1424_v13, %v235_v52  ;;  %v369_v15 = vmul.f32 %v1424_v13, %v236_v53  ;;  %v249_v52 = vld [vmem:[%s1048_s17 + $0x330] sm:$0xff] }
  0x72   : > { %879 = vst [vmem:[%s1086_s22 + $0x290] sm:$0xff] %v751_v3  ;;  %v370_v16 = vmul.f32 %v1424_v13, %v237_v54  ;;  %880 = vst [vmem:[%s1086_s22 + $0x298] sm:$0xff] %v752_v7  ;;  %v756_v18 = vmax.f32 %v500_v62, %v628_v10  ;;  %v371_v19 = vmul.f32 %v1424_v13, %v238_v5  ;;  %v251_v7 = vld [vmem:[%s1048_s17 + $0x340] sm:$0xff] }
  0x73   : > { %881 = vst [vmem:[%s1086_s22 + $0x2a0] sm:$0xff] %v753_v8  ;;  %882 = vst [vmem:[%s1086_s22 + $0x2a8] sm:$0xff] %v754_v9  ;;  %v372_v20 = vmul.f32 %v1424_v13, %v239_v1  ;;  %v373_v21 = vmul.f32 %v1424_v13, %v240_v6  ;;  %v501_v22 = vadd.f32 %v1411_v0, %v368_v14  ;;  %v252_v8 = vld [vmem:[%s1048_s17 + $0x348] sm:$0xff]  ;;  %v253_v9 = vld [vmem:[%s1048_s17 + $0x350] sm:$0xff] }
  0x74   : > { %883 = vst [vmem:[%s1086_s22 + $0x2b0] sm:$0xff] %v755_v12  ;;  %v502_v23 = vadd.f32 %v1411_v0, %v369_v15  ;;  %v503_v24 = vadd.f32 %v1411_v0, %v370_v16  ;;  %v374_v25 = vmul.f32 %v1424_v13, %v241_v11  ;;  %884 = vst [vmem:[%s1086_s22 + $0x2b8] sm:$0xff] %v756_v18 }
  0x75   : > { %v504_v26 = vadd.f32 %v1411_v0, %v371_v19  ;;  %v505_v27 = vadd.f32 %v1411_v0, %v372_v20  ;;  %v506_v28 = vadd.f32 %v1411_v0, %v373_v21  ;;  %v375_v29 = vmul.f32 %v1424_v13, %v242_v17 }
  0x76   : > { %v629_v33 = vmul.f32 0.01, %v501_v22  ;;  %v630_v34 = vmul.f32 0.01, %v502_v23  ;;  %v631_v35 = vmul.f32 0.01, %v503_v24  ;;  %v507_v36 = vadd.f32 %v1411_v0, %v374_v25 }
  0x77   : > { %v632_v37 = vmul.f32 0.01, %v504_v26  ;;  %v633_v38 = vmul.f32 0.01, %v505_v27  ;;  %v634_v39 = vmul.f32 0.01, %v506_v28  ;;  %v508_v40 = vadd.f32 %v1411_v0, %v375_v29 }
  0x78   : > { %v757_v41 = vmax.f32 %v501_v22, %v629_v33  ;;  %v758_v42 = vmax.f32 %v502_v23, %v630_v34  ;;  %v759_v43 = vmax.f32 %v503_v24, %v631_v35  ;;  %v635_v44 = vmul.f32 0.01, %v507_v36  ;;  %v254_v23 = vld [vmem:[%s1048_s17 + $0x358] sm:$0xff]  ;;  %v255_v24 = vld [vmem:[%s1048_s17 + $0x360] sm:$0xff]  ;;  %v256_v25 = vld [vmem:[%s1048_s17 + $0x368] sm:$0xff] }
  0x79   : > { %v760_v48 = vmax.f32 %v504_v26, %v632_v37  ;;  %v761_v49 = vmax.f32 %v505_v27, %v633_v38  ;;  %v762_v50 = vmax.f32 %v506_v28, %v634_v39  ;;  %v636_v51 = vmul.f32 0.01, %v508_v40  ;;  %v258_v35 = vld [vmem:[%s1048_s17 + $0x378] sm:$0xff] }
  0x7a   : > { %885 = vst [vmem:[%s1086_s22 + $0x2c0] sm:$0xff] %v757_v41  ;;  %886 = vst [vmem:[%s1086_s22 + $0x2c8] sm:$0xff] %v758_v42  ;;  %v763_v53 = vmax.f32 %v507_v36, %v635_v44  ;;  %v376_v54 = vmul.f32 %v1424_v13, %v243_v30  ;;  %v377_v55 = vmul.f32 %v1424_v13, %v244_v31  ;;  %v257_v30 = vld [vmem:[%s1048_s17 + $0x370] sm:$0xff] }
  0x7b   : > { %887 = vst [vmem:[%s1086_s22 + $0x2d0] sm:$0xff] %v759_v43  ;;  %v378_v56 = vmul.f32 %v1424_v13, %v245_v32  ;;  %888 = vst [vmem:[%s1086_s22 + $0x2d8] sm:$0xff] %v760_v48  ;;  %v764_v58 = vmax.f32 %v508_v40, %v636_v51  ;;  %v379_v59 = vmul.f32 %v1424_v13, %v246_v45  ;;  %v259_v48 = vld [vmem:[%s1048_s17 + $0x380] sm:$0xff] }
  0x7c   : > { %889 = vst [vmem:[%s1086_s22 + $0x2e0] sm:$0xff] %v761_v49  ;;  %890 = vst [vmem:[%s1086_s22 + $0x2e8] sm:$0xff] %v762_v50  ;;  %v380_v60 = vmul.f32 %v1424_v13, %v247_v46  ;;  %v381_v61 = vmul.f32 %v1424_v13, %v248_v47  ;;  %v509_v62 = vadd.f32 %v1411_v0, %v376_v54  ;;  %v260_v49 = vld [vmem:[%s1048_s17 + $0x388] sm:$0xff]  ;;  %v261_v50 = vld [vmem:[%s1048_s17 + $0x390] sm:$0xff] }
  0x7d   : > { %891 = vst [vmem:[%s1086_s22 + $0x2f0] sm:$0xff] %v763_v53  ;;  %v510_v63 = vadd.f32 %v1411_v0, %v377_v55  ;;  %v511_v2 = vadd.f32 %v1411_v0, %v378_v56  ;;  %v382_v3 = vmul.f32 %v1424_v13, %v249_v52  ;;  %892 = vst [vmem:[%s1086_s22 + $0x2f8] sm:$0xff] %v764_v58 }
  0x7e   : > { %v512_v4 = vadd.f32 %v1411_v0, %v379_v59  ;;  %v513_v5 = vadd.f32 %v1411_v0, %v380_v60  ;;  %v514_v1 = vadd.f32 %v1411_v0, %v381_v61  ;;  %v383_v6 = vmul.f32 %v1424_v13, %v250_v57 }
  0x7f   : > { %v637_v10 = vmul.f32 0.01, %v509_v62  ;;  %v638_v11 = vmul.f32 0.01, %v510_v63  ;;  %v639_v12 = vmul.f32 0.01, %v511_v2  ;;  %v515_v14 = vadd.f32 %v1411_v0, %v382_v3 }
  0x80   : > { %v640_v15 = vmul.f32 0.01, %v512_v4  ;;  %v641_v16 = vmul.f32 0.01, %v513_v5  ;;  %v642_v17 = vmul.f32 0.01, %v514_v1  ;;  %v516_v18 = vadd.f32 %v1411_v0, %v383_v6 }
  0x81   : > { %v765_v19 = vmax.f32 %v509_v62, %v637_v10  ;;  %v766_v20 = vmax.f32 %v510_v63, %v638_v11  ;;  %v767_v21 = vmax.f32 %v511_v2, %v639_v12  ;;  %v643_v22 = vmul.f32 0.01, %v515_v14  ;;  %v262_v63 = vld [vmem:[%s1048_s17 + $0x398] sm:$0xff]  ;;  %v263_v2 = vld [vmem:[%s1048_s17 + $0x3a0] sm:$0xff]  ;;  %v264_v3 = vld [vmem:[%s1048_s17 + $0x3a8] sm:$0xff] }
  0x82   : > { %v768_v26 = vmax.f32 %v512_v4, %v640_v15  ;;  %v769_v27 = vmax.f32 %v513_v5, %v641_v16  ;;  %v770_v28 = vmax.f32 %v514_v1, %v642_v17  ;;  %v644_v29 = vmul.f32 0.01, %v516_v18  ;;  %v266_v12 = vld [vmem:[%s1048_s17 + $0x3b8] sm:$0xff] }
  0x83   : > { %893 = vst [vmem:[%s1086_s22 + $0x300] sm:$0xff] %v765_v19  ;;  %894 = vst [vmem:[%s1086_s22 + $0x308] sm:$0xff] %v766_v20  ;;  %v771_v31 = vmax.f32 %v515_v14, %v643_v22  ;;  %v384_v32 = vmul.f32 %v1424_v13, %v251_v7  ;;  %v385_v33 = vmul.f32 %v1424_v13, %v252_v8  ;;  %v265_v7 = vld [vmem:[%s1048_s17 + $0x3b0] sm:$0xff] }
  0x84   : > { %895 = vst [vmem:[%s1086_s22 + $0x310] sm:$0xff] %v767_v21  ;;  %v386_v34 = vmul.f32 %v1424_v13, %v253_v9  ;;  %896 = vst [vmem:[%s1086_s22 + $0x318] sm:$0xff] %v768_v26  ;;  %v772_v36 = vmax.f32 %v516_v18, %v644_v29  ;;  %v387_v37 = vmul.f32 %v1424_v13, %v254_v23  ;;  %v267_v26 = vld [vmem:[%s1048_s17 + $0x3c0] sm:$0xff] }
  0x85   : > { %897 = vst [vmem:[%s1086_s22 + $0x320] sm:$0xff] %v769_v27  ;;  %898 = vst [vmem:[%s1086_s22 + $0x328] sm:$0xff] %v770_v28  ;;  %v388_v38 = vmul.f32 %v1424_v13, %v255_v24  ;;  %v389_v39 = vmul.f32 %v1424_v13, %v256_v25  ;;  %v517_v40 = vadd.f32 %v1411_v0, %v384_v32  ;;  %v268_v27 = vld [vmem:[%s1048_s17 + $0x3c8] sm:$0xff]  ;;  %v269_v28 = vld [vmem:[%s1048_s17 + $0x3d0] sm:$0xff] }
  0x86   : > { %899 = vst [vmem:[%s1086_s22 + $0x330] sm:$0xff] %v771_v31  ;;  %v518_v41 = vadd.f32 %v1411_v0, %v385_v33  ;;  %v519_v42 = vadd.f32 %v1411_v0, %v386_v34  ;;  %v390_v43 = vmul.f32 %v1424_v13, %v257_v30  ;;  %900 = vst [vmem:[%s1086_s22 + $0x338] sm:$0xff] %v772_v36 }
  0x87   : > { %v520_v44 = vadd.f32 %v1411_v0, %v387_v37  ;;  %v521_v45 = vadd.f32 %v1411_v0, %v388_v38  ;;  %v522_v46 = vadd.f32 %v1411_v0, %v389_v39  ;;  %v391_v47 = vmul.f32 %v1424_v13, %v258_v35 }
  0x88   : > { %v645_v51 = vmul.f32 0.01, %v517_v40  ;;  %v646_v52 = vmul.f32 0.01, %v518_v41  ;;  %v647_v53 = vmul.f32 0.01, %v519_v42  ;;  %v523_v54 = vadd.f32 %v1411_v0, %v390_v43 }
  0x89   : > { %v648_v55 = vmul.f32 0.01, %v520_v44  ;;  %v649_v56 = vmul.f32 0.01, %v521_v45  ;;  %v650_v57 = vmul.f32 0.01, %v522_v46  ;;  %v524_v58 = vadd.f32 %v1411_v0, %v391_v47 }
  0x8a   : > { %v773_v59 = vmax.f32 %v517_v40, %v645_v51  ;;  %v774_v60 = vmax.f32 %v518_v41, %v646_v52  ;;  %v775_v61 = vmax.f32 %v519_v42, %v647_v53  ;;  %v651_v62 = vmul.f32 0.01, %v523_v54  ;;  %v270_v41 = vld [vmem:[%s1048_s17 + $0x3d8] sm:$0xff]  ;;  %v271_v42 = vld [vmem:[%s1048_s17 + $0x3e0] sm:$0xff]  ;;  %v272_v43 = vld [vmem:[%s1048_s17 + $0x3e8] sm:$0xff] }
  0x8b   : > { %v776_v4 = vmax.f32 %v520_v44, %v648_v55  ;;  %v777_v5 = vmax.f32 %v521_v45, %v649_v56  ;;  %v778_v1 = vmax.f32 %v522_v46, %v650_v57  ;;  %v652_v6 = vmul.f32 0.01, %v524_v58  ;;  %v274_v53 = vld [vmem:[%s1048_s17 + $0x3f8] sm:$0xff] }
  0x8c   : > { %901 = vst [vmem:[%s1086_s22 + $0x340] sm:$0xff] %v773_v59  ;;  %902 = vst [vmem:[%s1086_s22 + $0x348] sm:$0xff] %v774_v60  ;;  %v779_v8 = vmax.f32 %v523_v54, %v651_v62  ;;  %v392_v9 = vmul.f32 %v1424_v13, %v259_v48  ;;  %v393_v10 = vmul.f32 %v1424_v13, %v260_v49  ;;  %v273_v48 = vld [vmem:[%s1048_s17 + $0x3f0] sm:$0xff] }
  0x8d   : > { %903 = vst [vmem:[%s1086_s22 + $0x350] sm:$0xff] %v775_v61  ;;  %v394_v11 = vmul.f32 %v1424_v13, %v261_v50  ;;  %904 = vst [vmem:[%s1086_s22 + $0x358] sm:$0xff] %v776_v4  ;;  %v780_v14 = vmax.f32 %v524_v58, %v652_v6  ;;  %v395_v15 = vmul.f32 %v1424_v13, %v262_v63 }
  0x8e   : > { %905 = vst [vmem:[%s1086_s22 + $0x360] sm:$0xff] %v777_v5  ;;  %906 = vst [vmem:[%s1086_s22 + $0x368] sm:$0xff] %v778_v1  ;;  %v396_v16 = vmul.f32 %v1424_v13, %v263_v2  ;;  %v397_v17 = vmul.f32 %v1424_v13, %v264_v3  ;;  %v525_v18 = vadd.f32 %v1411_v0, %v392_v9 }
  0x8f   : > { %907 = vst [vmem:[%s1086_s22 + $0x370] sm:$0xff] %v779_v8  ;;  %v526_v19 = vadd.f32 %v1411_v0, %v393_v10  ;;  %v527_v20 = vadd.f32 %v1411_v0, %v394_v11  ;;  %v398_v21 = vmul.f32 %v1424_v13, %v265_v7  ;;  %908 = vst [vmem:[%s1086_s22 + $0x378] sm:$0xff] %v780_v14 }
  0x90   : > { %v528_v22 = vadd.f32 %v1411_v0, %v395_v15  ;;  %v529_v23 = vadd.f32 %v1411_v0, %v396_v16  ;;  %v530_v24 = vadd.f32 %v1411_v0, %v397_v17  ;;  %v399_v25 = vmul.f32 %v1424_v13, %v266_v12 }
  0x91   : > { %v653_v29 = vmul.f32 0.01, %v525_v18  ;;  %v654_v30 = vmul.f32 0.01, %v526_v19  ;;  %v655_v31 = vmul.f32 0.01, %v527_v20  ;;  %v531_v32 = vadd.f32 %v1411_v0, %v398_v21 }
  0x92   : > { %v656_v33 = vmul.f32 0.01, %v528_v22  ;;  %v657_v34 = vmul.f32 0.01, %v529_v23  ;;  %v658_v35 = vmul.f32 0.01, %v530_v24  ;;  %v532_v36 = vadd.f32 %v1411_v0, %v399_v25 }
  0x93   : > { %v781_v37 = vmax.f32 %v525_v18, %v653_v29  ;;  %v782_v38 = vmax.f32 %v526_v19, %v654_v30  ;;  %v783_v39 = vmax.f32 %v527_v20, %v655_v31  ;;  %v659_v40 = vmul.f32 0.01, %v531_v32 }
  0x94   : > { %v784_v44 = vmax.f32 %v528_v22, %v656_v33  ;;  %v785_v45 = vmax.f32 %v529_v23, %v657_v34  ;;  %v786_v46 = vmax.f32 %v530_v24, %v658_v35  ;;  %v660_v47 = vmul.f32 0.01, %v532_v36 }
  0x95   : > { %909 = vst [vmem:[%s1086_s22 + $0x380] sm:$0xff] %v781_v37  ;;  %910 = vst [vmem:[%s1086_s22 + $0x388] sm:$0xff] %v782_v38  ;;  %v787_v49 = vmax.f32 %v531_v32, %v659_v40  ;;  %v400_v50 = vmul.f32 %v1424_v13, %v267_v26  ;;  %v401_v51 = vmul.f32 %v1424_v13, %v268_v27 }
  0x96   : > { %911 = vst [vmem:[%s1086_s22 + $0x390] sm:$0xff] %v783_v39  ;;  %v402_v52 = vmul.f32 %v1424_v13, %v269_v28  ;;  %912 = vst [vmem:[%s1086_s22 + $0x398] sm:$0xff] %v784_v44  ;;  %v788_v54 = vmax.f32 %v532_v36, %v660_v47  ;;  %v403_v55 = vmul.f32 %v1424_v13, %v270_v41 }
  0x97   : > { %913 = vst [vmem:[%s1086_s22 + $0x3a0] sm:$0xff] %v785_v45  ;;  %914 = vst [vmem:[%s1086_s22 + $0x3a8] sm:$0xff] %v786_v46  ;;  %v404_v56 = vmul.f32 %v1424_v13, %v271_v42  ;;  %v405_v57 = vmul.f32 %v1424_v13, %v272_v43  ;;  %v533_v58 = vadd.f32 %v1411_v0, %v400_v50 }
  0x98   : > { %915 = vst [vmem:[%s1086_s22 + $0x3b0] sm:$0xff] %v787_v49  ;;  %v534_v59 = vadd.f32 %v1411_v0, %v401_v51  ;;  %v535_v60 = vadd.f32 %v1411_v0, %v402_v52  ;;  %v406_v61 = vmul.f32 %v1424_v13, %v273_v48  ;;  %916 = vst [vmem:[%s1086_s22 + $0x3b8] sm:$0xff] %v788_v54 }
  0x99   : > { %v536_v62 = vadd.f32 %v1411_v0, %v403_v55  ;;  %v537_v63 = vadd.f32 %v1411_v0, %v404_v56  ;;  %v538_v2 = vadd.f32 %v1411_v0, %v405_v57  ;;  %v407_v3 = vmul.f32 %v1424_v13, %v274_v53 }
  0x9a   : > { %v661_v4 = vmul.f32 0.01, %v533_v58  ;;  %v662_v5 = vmul.f32 0.01, %v534_v59  ;;  %v663_v1 = vmul.f32 0.01, %v535_v60  ;;  %v539_v6 = vadd.f32 %v1411_v0, %v406_v61 }
  0x9b   : > { %v664_v7 = vmul.f32 0.01, %v536_v62  ;;  %v665_v8 = vmul.f32 0.01, %v537_v63  ;;  %v666_v9 = vmul.f32 0.01, %v538_v2  ;;  %v540_v10 = vadd.f32 %v1411_v0, %v407_v3 }
  0x9c   : > { %v789_v11 = vmax.f32 %v533_v58, %v661_v4  ;;  %v790_v12 = vmax.f32 %v534_v59, %v662_v5  ;;  %v791_v13 = vmax.f32 %v535_v60, %v663_v1  ;;  %v667_v14 = vmul.f32 0.01, %v539_v6 }
  0x9d   : > { %v792_v15 = vmax.f32 %v536_v62, %v664_v7  ;;  %v793_v16 = vmax.f32 %v537_v63, %v665_v8  ;;  %v794_v17 = vmax.f32 %v538_v2, %v666_v9  ;;  %v668_v18 = vmul.f32 0.01, %v540_v10 }
  0x9e   : > { %917 = vst [vmem:[%s1086_s22 + $0x3c0] sm:$0xff] %v789_v11  ;;  %918 = vst [vmem:[%s1086_s22 + $0x3c8] sm:$0xff] %v790_v12  ;;  %v795_v19 = vmax.f32 %v539_v6, %v667_v14 }
  0x9f   : > { %919 = vst [vmem:[%s1086_s22 + $0x3d0] sm:$0xff] %v791_v13  ;;  %920 = vst [vmem:[%s1086_s22 + $0x3d8] sm:$0xff] %v792_v15  ;;  %v796_v20 = vmax.f32 %v540_v10, %v668_v18 }
  0xa0   : > { %921 = vst [vmem:[%s1086_s22 + $0x3e0] sm:$0xff] %v793_v16  ;;  %922 = vst [vmem:[%s1086_s22 + $0x3e8] sm:$0xff] %v794_v17 }
  0xa1   : > { %923 = vst [vmem:[%s1086_s22 + $0x3f0] sm:$0xff] %v795_v19  ;;  %924 = vst [vmem:[%s1086_s22 + $0x3f8] sm:$0xff] %v796_v20 }
  0xa2 PF: > { %s12_s9 = sadd.s32 1, %s1010_s9  }
  0xa3   : > { %p9_p4 = scmp.ge.s32.totalorder %s12_s9, 6  }
  0xa5   :  { %11 = sbr.rel (!%p9_p4) target bundleno = 1 (0x1), region = 58 }

</bundles_post_ra>
